<compile_context>
chip_gen: v5e
topology: v5e:2x2
jax: 0.10.0
libtpu: 0.0.40
codegen_flags: <defaults>
</compile_context>

<pallas_src>
import functools
import math

import jax
import jax.numpy as jnp
from jax import lax
from jax.experimental import pallas as pl
from jax.experimental.pallas import tpu as pltpu


def _rup(x, m):
    return -(-x // m) * m


# ---------------------------------------------------------------------------
# Fused kernel: one batch block per grid step, activations as (C, B*SEG) with
# each image owning a zero-halo segment on the lane axis.
# ---------------------------------------------------------------------------
def _head_kernel(x_ref, w1_ref, b1_ref, wc_ref, bc_ref, wsa_ref,
                 w2_ref, b2_ref, w3_ref, b3_ref, wf_ref, bf_ref,
                 o_ref, pad_ref, cols_ref, *, height, width, maxoff, seg):
    H, W = height, width
    hw = H * W
    B = x_ref.shape[0]
    cin = x_ref.shape[1]
    crows = pad_ref.shape[0]
    padw = pad_ref.shape[1]            # == B * seg
    L = padw - 2 * maxoff              # lane span covering every image interior
    f32 = jnp.float32

    # ----- zero the halo columns (nothing else ever writes them) ------------
    # Done every step (not gated on program_id==0): with
    # dimension_semantics=("parallel",) each TensorCore has its own scratch and
    # only one of them would ever execute step 0.  These are a handful of
    # aligned, unmasked stores, so the cost is negligible.
    pad_ref[:, 0:maxoff] = jnp.zeros((crows, maxoff), f32)
    for b in range(B):
        lo = b * seg + maxoff + hw
        hi = min((b + 1) * seg + maxoff, padw)
        pad_ref[:, lo:hi] = jnp.zeros((crows, hi - lo), f32)

    # Column-within-image of each destination lane (exact on interior lanes
    # because both seg and maxoff are multiples of W).
    xcol = lax.broadcasted_iota(jnp.int32, (1, L), 1) % W

    def border_mask(dx):
        return (xcol >= -dx) & (xcol < W - dx)

    def sigmoid(v):
        # exp (EUP) + approximate reciprocal (EUP): stays off the VPU slots.
        return pl.reciprocal(1.0 + jnp.exp(-v), approx=True)

    def silu(v):
        return v * sigmoid(v)

    def load_rows(v, c):
        """Write a (c, L) activation into the per-image interiors of pad_ref.

        Channel rows are zero-padded up to a multiple of 8 so every store is
        sublane aligned and rows c..cp (read by the next conv) are zero.  Gap
        lanes of `v` (between image interiors) are not stored, preserving the
        zero-halo invariant.  Returns the padded channel count cp."""
        cp = _rup(c, 8)
        if cp > c:
            v = jnp.concatenate([v, jnp.zeros((cp - c, L), f32)], axis=0)
        for b in range(B):
            s = b * seg + maxoff
            pad_ref[0:cp, s:s + hw] = v[:, b * seg:b * seg + hw]
        return cp

    def conv(w_ref, k, dil, pad, cp):
        """im2col (pad_ref rows [0,cp) -> cols_ref) + ONE bf16 MXU matmul.

        Every cols_ref store is (multiple-of-8 rows) x (full L lanes), i.e.
        unmasked and aligned.  Gap lanes of the result are don't-care."""
        for j in range(k):                      # dx-outer: one border mask per
            dx = j * dil - pad                  # distinct dx, reused k times.
            mask = None if dx == 0 else border_mask(dx)
            for i in range(k):
                dy = i * dil - pad
                off = dy * W + dx
                t = i * k + j                   # tap index in the weight layout
                win = pad_ref[0:cp, maxoff + off:maxoff + off + L]
                if mask is not None:
                    win = jnp.where(mask, win, 0.0)
                cols_ref[t * cp:(t + 1) * cp, :] = win
        cols = cols_ref[0:k * k * cp, :].astype(jnp.bfloat16)
        return jnp.dot(w_ref[...], cols, preferred_element_type=jnp.float32)

    # ----- stage 0: place the input images into pad_ref ---------------------
    cinp = _rup(cin, 8)
    for b in range(B):
        xb = x_ref[b]                                          # (cin, hw)
        if cinp > cin:
            xb = jnp.concatenate(
                [xb, jnp.zeros((cinp - cin, hw), f32)], axis=0)
        s = b * seg + maxoff
        pad_ref[0:cinp, s:s + hw] = xb

    # ----- conv1: CBS 3x3 (BN scale already folded into w1) -----------------
    y = silu(conv(w1_ref, 3, 1, 1, cinp) + b1_ref[...])        # (cin, L)

    # ----- context: 3x3, dilation 2, padding 2, bias, no activation ---------
    load_rows(y, cin)
    y = conv(wc_ref, 3, 2, 2, cinp) + bc_ref[...]               # (cin, L)

    # ----- spatial attention: mean/max over C -> 7x7 conv -> sigmoid -> mul --
    # Only 2 input channels: run the 7x7 conv as 49 broadcast-FMAs on the VPU
    # (scalar weights from SMEM) instead of a 1-row MXU matmul with misaligned
    # 2-row im2col stores.
    pooled = jnp.concatenate(
        [jnp.mean(y, axis=0, keepdims=True),
         jnp.max(y, axis=0, keepdims=True),
         jnp.zeros((6, L), f32)], axis=0)                       # pad to 8 rows
    for b in range(B):
        s = b * seg + maxoff
        pad_ref[0:8, s:s + hw] = pooled[:, b * seg:b * seg + hw]
    att = jnp.zeros((1, L), f32)
    for j in range(7):
        dx = j - 3
        mask = None if dx == 0 else border_mask(dx)
        for i in range(7):
            dy = i - 3
            off = dy * W + dx
            t = i * 7 + j
            win = pad_ref[0:2, maxoff + off:maxoff + off + L]   # (avg, max)
            if mask is not None:
                win = jnp.where(mask, win, 0.0)
            att = att + wsa_ref[2 * t] * win[0:1, :] \
                      + wsa_ref[2 * t + 1] * win[1:2, :]
    y = y * sigmoid(att)

    # ----- conv2: CBS 3x3, cin -> cin//2 -------------------------------------
    load_rows(y, cin)
    y = silu(conv(w2_ref, 3, 1, 1, cinp) + b2_ref[...])         # (cin//2, L)

    # ----- conv3: CBS 3x3, cin//2 -> cin//4 (tap stride padded to 8 rows) ----
    c2p = load_rows(y, y.shape[0])
    y = silu(conv(w3_ref, 3, 1, 1, c2p) + b3_ref[...])          # (cin//4, L)

    # ----- final 1x1 conv + bias (pure matmul, no spatial taps) --------------
    out = jnp.dot(wf_ref[...], y, preferred_element_type=jnp.float32) + bf_ref[...]
    for b in range(B):
        o_ref[b] = out[:, b * seg:b * seg + hw]


# ---------------------------------------------------------------------------
# Wrapper
# ---------------------------------------------------------------------------
def segmentation_head_forward(x_flat, q, *, height, width, batch_block=None):
    """x_flat: (N, Cin, H*W) f32 (NCHW with spatial flattened) -> (N, NC, H*W)."""
    n, cin, hw = x_flat.shape
    assert hw == height * width
    assert hw % 128 == 0, "kernel assumes a lane-dense (multiple-of-128) spatial extent"
    nc = q["wf"].shape[0]

    # Default: whole batch in one grid step (optimal on single-TC v5e/v6e).
    # On v7x pass batch_block = n // 2 so each TensorCore takes half the batch.
    bb = n if batch_block is None else batch_block
    assert n % bb == 0

    # Halo wide enough for the 7x7/pad-3 window, rounded so interiors start at
    # multiples of 128 (unmasked stores) and of W (lane % W == in-image column).
    unit = 128 * width // math.gcd(128, width)
    maxoff = _rup(3 * width + 3, unit)
    seg = hw + 2 * maxoff
    crows = _rup(cin, 8)
    krows = 9 * crows

    def const_spec(a):
        nd = a.ndim
        return pl.BlockSpec(a.shape, lambda b, _nd=nd: (0,) * _nd)

    in_specs = [
        pl.BlockSpec((bb, cin, hw), lambda b: (b, 0, 0)),
        const_spec(q["w1"]), const_spec(q["b1"]),
        const_spec(q["wc"]), const_spec(q["bc"]),
        pl.BlockSpec(memory_space=pltpu.MemorySpace.SMEM),   # 7x7 attention taps
        const_spec(q["w2"]), const_spec(q["b2"]),
        const_spec(q["w3"]), const_spec(q["b3"]),
        const_spec(q["wf"]), const_spec(q["bf"]),
    ]

    kern = functools.partial(_head_kernel, height=height, width=width,
                             maxoff=maxoff, seg=seg)
    return pl.pallas_call(
        kern,
        out_shape=jax.ShapeDtypeStruct((n, nc, hw), jnp.float32),
        grid=(n // bb,),
        in_specs=in_specs,
        out_specs=pl.BlockSpec((bb, nc, hw), lambda b: (b, 0, 0)),
        scratch_shapes=[
            pltpu.VMEM((crows, bb * seg), jnp.float32),              # padded rows
            pltpu.VMEM((krows, bb * seg - 2 * maxoff), jnp.float32),  # im2col cols
        ],
        compiler_params=pltpu.CompilerParams(
            dimension_semantics=("parallel",),
            vmem_limit_bytes=4 * 1024 * 1024,
        ),
    )(x_flat, q["w1"], q["b1"], q["wc"], q["bc"], q["wsa"],
      q["w2"], q["b2"], q["w3"], q["b3"], q["wf"], q["bf"])


# ---------------------------------------------------------------------------
# Parameter packing for the kernel: fold BN scales into the conv weights, pad
# each tap's input-channel slot to a multiple of 8 (aligned im2col stores),
# cast MXU weights to bf16.  Conv matrices use column = (i*K + j)*Cin + ci.
# ---------------------------------------------------------------------------
def _pad_taps(w, k, ci):
    co = w.shape[0]
    cip = _rup(ci, 8)
    if cip == ci:
        return w
    w = w.reshape(co, k * k, ci)
    w = jnp.pad(w, ((0, 0), (0, 0), (0, cip - ci)))
    return w.reshape(co, k * k * cip)


def pack_params(p, cin):
    c2 = cin // 2
    bf16 = jnp.bfloat16
    return {
        "w1": _pad_taps(p["w1"] * p["s1"], 3, cin).astype(bf16),
        "b1": p["b1"],
        "wc": _pad_taps(p["wc"], 3, cin).astype(bf16),
        "bc": p["bc"],
        "wsa": p["wsa"].reshape(-1),          # (98,) f32 scalars -> SMEM
        "w2": _pad_taps(p["w2"] * p["s2"], 3, cin).astype(bf16),
        "b2": p["b2"],
        "w3": _pad_taps(p["w3"] * p["s3"], 3, c2).astype(bf16),
        "b3": p["b3"],
        "wf": p["wf"],                        # final 1x1 stays f32
        "bf": p["bf"],
    }


# ---------------------------------------------------------------------------
# Deterministic synthetic parameter init (no checkpoint loading)
# ---------------------------------------------------------------------------
def init_params(key, cin, num_classes):
    ks = jax.random.split(key, 14)
    c2, c4 = cin // 2, cin // 4

    def wmat(k, ksz, ci, co):
        fan = float(ksz * ksz * ci)
        return jax.random.normal(k, (co, ksz * ksz * ci), jnp.float32) / jnp.sqrt(fan)

    def bn_affine(kg, kb, c):
        gamma = 1.0 + 0.1 * jax.random.normal(kg, (c, 1), jnp.float32)
        beta = 0.1 * jax.random.normal(kb, (c, 1), jnp.float32)
        # inference-mode BN with running_mean=0, running_var=1 (init values)
        return gamma / jnp.sqrt(1.0 + 1e-5), beta

    p = {}
    p["w1"] = wmat(ks[0], 3, cin, cin)
    p["s1"], p["b1"] = bn_affine(ks[1], ks[2], cin)
    p["wc"] = wmat(ks[3], 3, cin, cin)
    p["bc"] = 0.1 * jax.random.normal(ks[4], (cin, 1), jnp.float32)
    p["wsa"] = wmat(ks[5], 7, 2, 1)               # spatial attention, no bias
    p["w2"] = wmat(ks[6], 3, cin, c2)
    p["s2"], p["b2"] = bn_affine(ks[7], ks[8], c2)
    p["w3"] = wmat(ks[9], 3, c2, c4)
    p["s3"], p["b3"] = bn_affine(ks[10], ks[11], c4)
    p["wf"] = wmat(ks[12], 1, c4, num_classes)
    p["bf"] = 0.1 * jax.random.normal(ks[13], (num_classes, 1), jnp.float32)
    return p


# ---------------------------------------------------------------------------
# Pure-JAX reference (NHWC).  Mirrors the kernel's bf16 matmul precision (BN
# scales folded BEFORE the bf16 cast) so the comparison tolerance stays tight.
# ---------------------------------------------------------------------------
def _conv_ref(x_nhwc, w_mat, k, dil, pad, *, bf16=False):
    cout = w_mat.shape[0]
    ci = w_mat.shape[1] // (k * k)
    w_hwio = w_mat.T.reshape(k, k, ci, cout)
    lhs = x_nhwc
    prec = None
    if bf16:
        lhs = lhs.astype(jnp.bfloat16)
        w_hwio = w_hwio.astype(jnp.bfloat16)
    else:
        prec = lax.Precision.HIGHEST
    return lax.conv_general_dilated(
        lhs, w_hwio, window_strides=(1, 1),
        padding=[(pad, pad), (pad, pad)], rhs_dilation=(dil, dil),
        dimension_numbers=("NHWC", "HWIO", "NHWC"),
        preferred_element_type=jnp.float32, precision=prec)


def forward_ref(x_nhwc, p):
    def cbs(x, w, s, b, k, dil, pad):
        return jax.nn.silu(_conv_ref(x, w * s, k, dil, pad, bf16=True) + b[:, 0])

    y = cbs(x_nhwc, p["w1"], p["s1"], p["b1"], 3, 1, 1)
    y = _conv_ref(y, p["wc"], 3, 2, 2, bf16=True) + p["bc"][:, 0]
    avg = jnp.mean(y, axis=-1, keepdims=True)
    mx = jnp.max(y, axis=-1, keepdims=True)
    att = jax.nn.sigmoid(
        _conv_ref(jnp.concatenate([avg, mx], axis=-1), p["wsa"], 7, 1, 3))
    y = y * att
    y = cbs(y, p["w2"], p["s2"], p["b2"], 3, 1, 1)
    y = cbs(y, p["w3"], p["s3"], p["b3"], 3, 1, 1)
    return _conv_ref(y, p["wf"], 1, 1, 0) + p["bf"][:, 0]


# ---------------------------------------------------------------------------
if __name__ == "__main__":
    IN_CHANNELS, NUM_CLASSES = 8, 3
    N, H, W = 2, 16, 16

    key = jax.random.PRNGKey(0)
    kx, kp = jax.random.split(key)
    x_nchw = jax.random.normal(kx, (N, IN_CHANNELS, H, W), jnp.float32)  # torch NCHW
    params = init_params(kp, IN_CHANNELS, NUM_CLASSES)
    packed = pack_params(params, IN_CHANNELS)

    # Kernel layout = NCHW with the spatial dims flattened onto the lane axis.
    x_flat = x_nchw.reshape(N, IN_CHANNELS, H * W)
    out_flat = segmentation_head_forward(x_flat, packed, height=H, width=W)
    out_flat = jax.block_until_ready(out_flat)
    out_nchw = out_flat.reshape(N, NUM_CLASSES, H, W)
    assert out_nchw.shape == (N, NUM_CLASSES, H, W)

    ref_nhwc = forward_ref(jnp.transpose(x_nchw, (0, 2, 3, 1)), params)
    ref_nchw = jnp.transpose(ref_nhwc, (0, 3, 1, 2))

    # bf16 MXU inputs are mirrored in the reference; remaining divergence is the
    # EUP approximate reciprocal in sigmoid/SiLU plus accumulation order.
    err = float(jnp.max(jnp.abs(out_nchw - ref_nchw)))
    if not jnp.allclose(out_nchw, ref_nchw, atol=2e-2, rtol=2e-2):
        raise AssertionError(f"Pallas result mismatch vs reference, max abs err {err}")
    print("KERNEL_OK")
</pallas_src>

<mosaic_0001>
module attributes {stable_mosaic.version = 11 : i64} {
  func.func @_head_kernel(%arg0: i32, %arg1: memref<2x8x256xf32, #tpu.memory_space<vmem>>, %arg2: memref<8x72xbf16, #tpu.memory_space<vmem>>, %arg3: memref<8x1xf32, #tpu.memory_space<vmem>>, %arg4: memref<8x72xbf16, #tpu.memory_space<vmem>>, %arg5: memref<8x1xf32, #tpu.memory_space<vmem>>, %arg6: memref<98xf32, #tpu.memory_space<smem>>, %arg7: memref<4x72xbf16, #tpu.memory_space<vmem>>, %arg8: memref<4x1xf32, #tpu.memory_space<vmem>>, %arg9: memref<2x72xbf16, #tpu.memory_space<vmem>>, %arg10: memref<2x1xf32, #tpu.memory_space<vmem>>, %arg11: memref<3x2xf32, #tpu.memory_space<vmem>>, %arg12: memref<3x1xf32, #tpu.memory_space<vmem>>, %arg13: memref<2x3x256xf32, #tpu.memory_space<vmem>>, %arg14: memref<8x1024xf32, #tpu.memory_space<vmem>>, %arg15: memref<72x768xf32, #tpu.memory_space<vmem>>) attributes {dimension_semantics = [#tpu.dimension_semantics<parallel>], iteration_bounds = array<i64: 1>, scalar_prefetch = 0 : i64, scratch_operands = 2 : i64, tpu.core_type = #tpu.core_type<tc>, window_params = [{transform_indices = @transform_0, window_bounds = array<i64: 2, 8, 256>}, {pipeline_mode = #tpu.pipeline_mode<synchronous>, transform_indices = @transform_1, window_bounds = array<i64: 8, 72>}, {pipeline_mode = #tpu.pipeline_mode<synchronous>, transform_indices = @transform_2, window_bounds = array<i64: 8, 1>}, {pipeline_mode = #tpu.pipeline_mode<synchronous>, transform_indices = @transform_3, window_bounds = array<i64: 8, 72>}, {pipeline_mode = #tpu.pipeline_mode<synchronous>, transform_indices = @transform_4, window_bounds = array<i64: 8, 1>}, {transform_indices = @transform_5, window_bounds = array<i64: 98>}, {pipeline_mode = #tpu.pipeline_mode<synchronous>, transform_indices = @transform_6, window_bounds = array<i64: 4, 72>}, {pipeline_mode = #tpu.pipeline_mode<synchronous>, transform_indices = @transform_7, window_bounds = array<i64: 4, 1>}, {pipeline_mode = #tpu.pipeline_mode<synchronous>, transform_indices = @transform_8, window_bounds = array<i64: 2, 72>}, {pipeline_mode = #tpu.pipeline_mode<synchronous>, transform_indices = @transform_9, window_bounds = array<i64: 2, 1>}, {pipeline_mode = #tpu.pipeline_mode<synchronous>, transform_indices = @transform_10, window_bounds = array<i64: 3, 2>}, {pipeline_mode = #tpu.pipeline_mode<synchronous>, transform_indices = @transform_11, window_bounds = array<i64: 3, 1>}, {transform_indices = @transform_12, window_bounds = array<i64: 2, 3, 256>}]} {
    %cst = arith.constant 0.000000e+00 : f32
    %0 = vector.broadcast %cst : f32 to vector<8x128xf32>
    %c0 = arith.constant 0 : index
    %c0_0 = arith.constant 0 : index
    %1 = vector.load %arg14[%c0, %c0_0] : memref<8x1024xf32, #tpu.memory_space<vmem>>, vector<8x128xf32>
    tpu.vector_store %arg14[%c0, %c0_0], %0 {strides = array<i32>} : memref<8x1024xf32, #tpu.memory_space<vmem>>, vector<8x128xf32>,
    %cst_1 = arith.constant 0.000000e+00 : f32
    %2 = vector.broadcast %cst_1 : f32 to vector<8x256xf32>
    %c0_2 = arith.constant 0 : index
    %c384 = arith.constant 384 : index
    %3 = vector.load %arg14[%c0_2, %c384] : memref<8x1024xf32, #tpu.memory_space<vmem>>, vector<8x256xf32>
    tpu.vector_store %arg14[%c0_2, %c384], %2 {strides = array<i32>} : memref<8x1024xf32, #tpu.memory_space<vmem>>, vector<8x256xf32>,
    %cst_3 = arith.constant 0.000000e+00 : f32
    %4 = vector.broadcast %cst_3 : f32 to vector<8x128xf32>
    %c0_4 = arith.constant 0 : index
    %c896 = arith.constant 896 : index
    %5 = vector.load %arg14[%c0_4, %c896] : memref<8x1024xf32, #tpu.memory_space<vmem>>, vector<8x128xf32>
    tpu.vector_store %arg14[%c0_4, %c896], %4 {strides = array<i32>} : memref<8x1024xf32, #tpu.memory_space<vmem>>, vector<8x128xf32>,
    %6 = tpu.iota {dimensions = array<i32: 1>} : vector<1x768xi32>
    %c16_i32 = arith.constant 16 : i32
    %c0_i32 = arith.constant 0 : i32
    %7 = arith.cmpi eq, %c16_i32, %c0_i32 : i32
    %c1_i32 = arith.constant 1 : i32
    %8 = arith.select %7, %c1_i32, %c16_i32 : i32
    %9 = vector.broadcast %8 : i32 to vector<1x768xi32>
    %10 = arith.remsi %6, %9 : vector<1x768xi32>
    %c0_i32_5 = arith.constant 0 : i32
    %11 = vector.broadcast %c0_i32_5 : i32 to vector<1x768xi32>
    %12 = arith.cmpi ne, %10, %11 : vector<1x768xi32>
    %c0_i32_6 = arith.constant 0 : i32
    %13 = vector.broadcast %c0_i32_6 : i32 to vector<1x768xi32>
    %14 = arith.cmpi slt, %10, %13 : vector<1x768xi32>
    %c0_i32_7 = arith.constant 0 : i32
    %15 = arith.cmpi slt, %8, %c0_i32_7 : i32
    %16 = vector.broadcast %15 : i1 to vector<1x768xi1>
    %17 = vector.broadcast %16 : vector<1x768xi1> to vector<1x768xi1>
    %18 = arith.xori %14, %17 : vector<1x768xi1>
    %19 = arith.andi %18, %12 : vector<1x768xi1>
    %20 = vector.broadcast %8 : i32 to vector<1x768xi32>
    %21 = arith.addi %10, %20 : vector<1x768xi32>
    %22 = arith.select %19, %21, %10 : vector<1x768xi1>, vector<1x768xi32>
    %c0_8 = arith.constant 0 : index
    %c0_9 = arith.constant 0 : index
    %c0_10 = arith.constant 0 : index
    %23 = vector.load %arg1[%c0_8, %c0_9, %c0_10] : memref<2x8x256xf32, #tpu.memory_space<vmem>>, vector<1x8x256xf32>
    %24 = vector.shape_cast %23 : vector<1x8x256xf32> to vector<8x256xf32>
    %c0_11 = arith.constant 0 : index
    %c128 = arith.constant 128 : index
    %25 = vector.load %arg14[%c0_11, %c128] : memref<8x1024xf32, #tpu.memory_space<vmem>>, vector<8x256xf32>
    tpu.vector_store %arg14[%c0_11, %c128], %24 {strides = array<i32>} : memref<8x1024xf32, #tpu.memory_space<vmem>>, vector<8x256xf32>,
    %c1 = arith.constant 1 : index
    %c0_12 = arith.constant 0 : index
    %c0_13 = arith.constant 0 : index
    %26 = vector.load %arg1[%c1, %c0_12, %c0_13] : memref<2x8x256xf32, #tpu.memory_space<vmem>>, vector<1x8x256xf32>
    %27 = vector.shape_cast %26 : vector<1x8x256xf32> to vector<8x256xf32>
    %c0_14 = arith.constant 0 : index
    %c640 = arith.constant 640 : index
    %28 = vector.load %arg14[%c0_14, %c640] : memref<8x1024xf32, #tpu.memory_space<vmem>>, vector<8x256xf32>
    tpu.vector_store %arg14[%c0_14, %c640], %27 {strides = array<i32>} : memref<8x1024xf32, #tpu.memory_space<vmem>>, vector<8x256xf32>,
    %c1_i32_15 = arith.constant 1 : i32
    %29 = vector.broadcast %c1_i32_15 : i32 to vector<1x768xi32>
    %30 = arith.cmpi sge, %22, %29 : vector<1x768xi32>
    %c17_i32 = arith.constant 17 : i32
    %31 = vector.broadcast %c17_i32 : i32 to vector<1x768xi32>
    %32 = arith.cmpi slt, %22, %31 : vector<1x768xi32>
    %33 = arith.andi %30, %32 : vector<1x768xi1>
    %c0_16 = arith.constant 0 : index
    %c111 = arith.constant 111 : index
    %34 = vector.load %arg14[%c0_16, %c111] : memref<8x1024xf32, #tpu.memory_space<vmem>>, vector<8x768xf32>
    %cst_17 = arith.constant 0.000000e+00 : f32
    %35 = vector.shape_cast %33 : vector<1x768xi1> to vector<1x768xi1>
    %36 = vector.broadcast %35 : vector<1x768xi1> to vector<8x768xi1>
    %37 = vector.broadcast %cst_17 : f32 to vector<8x768xf32>
    %38 = arith.select %36, %34, %37 : vector<8x768xi1>, vector<8x768xf32>
    %c0_18 = arith.constant 0 : index
    %c0_19 = arith.constant 0 : index
    %39 = vector.load %arg15[%c0_18, %c0_19] : memref<72x768xf32, #tpu.memory_space<vmem>>, vector<8x768xf32>
    tpu.vector_store %arg15[%c0_18, %c0_19], %38 {strides = array<i32>} : memref<72x768xf32, #tpu.memory_space<vmem>>, vector<8x768xf32>,
    %c0_20 = arith.constant 0 : index
    %c127 = arith.constant 127 : index
    %40 = vector.load %arg14[%c0_20, %c127] : memref<8x1024xf32, #tpu.memory_space<vmem>>, vector<8x768xf32>
    %cst_21 = arith.constant 0.000000e+00 : f32
    %41 = vector.shape_cast %33 : vector<1x768xi1> to vector<1x768xi1>
    %42 = vector.broadcast %41 : vector<1x768xi1> to vector<8x768xi1>
    %43 = vector.broadcast %cst_21 : f32 to vector<8x768xf32>
    %44 = arith.select %42, %40, %43 : vector<8x768xi1>, vector<8x768xf32>
    %c24 = arith.constant 24 : index
    %c0_22 = arith.constant 0 : index
    %45 = vector.load %arg15[%c24, %c0_22] : memref<72x768xf32, #tpu.memory_space<vmem>>, vector<8x768xf32>
    tpu.vector_store %arg15[%c24, %c0_22], %44 {strides = array<i32>} : memref<72x768xf32, #tpu.memory_space<vmem>>, vector<8x768xf32>,
    %c0_23 = arith.constant 0 : index
    %c143 = arith.constant 143 : index
    %46 = vector.load %arg14[%c0_23, %c143] : memref<8x1024xf32, #tpu.memory_space<vmem>>, vector<8x768xf32>
    %cst_24 = arith.constant 0.000000e+00 : f32
    %47 = vector.shape_cast %33 : vector<1x768xi1> to vector<1x768xi1>
    %48 = vector.broadcast %47 : vector<1x768xi1> to vector<8x768xi1>
    %49 = vector.broadcast %cst_24 : f32 to vector<8x768xf32>
    %50 = arith.select %48, %46, %49 : vector<8x768xi1>, vector<8x768xf32>
    %c48 = arith.constant 48 : index
    %c0_25 = arith.constant 0 : index
    %51 = vector.load %arg15[%c48, %c0_25] : memref<72x768xf32, #tpu.memory_space<vmem>>, vector<8x768xf32>
    tpu.vector_store %arg15[%c48, %c0_25], %50 {strides = array<i32>} : memref<72x768xf32, #tpu.memory_space<vmem>>, vector<8x768xf32>,
    %c0_26 = arith.constant 0 : index
    %c112 = arith.constant 112 : index
    %52 = vector.load %arg14[%c0_26, %c112] : memref<8x1024xf32, #tpu.memory_space<vmem>>, vector<8x768xf32>
    %c8 = arith.constant 8 : index
    %c0_27 = arith.constant 0 : index
    %53 = vector.load %arg15[%c8, %c0_27] : memref<72x768xf32, #tpu.memory_space<vmem>>, vector<8x768xf32>
    tpu.vector_store %arg15[%c8, %c0_27], %52 {strides = array<i32>} : memref<72x768xf32, #tpu.memory_space<vmem>>, vector<8x768xf32>,
    %c0_28 = arith.constant 0 : index
    %c128_29 = arith.constant 128 : index
    %54 = vector.load %arg14[%c0_28, %c128_29] : memref<8x1024xf32, #tpu.memory_space<vmem>>, vector<8x768xf32>
    %c32 = arith.constant 32 : index
    %c0_30 = arith.constant 0 : index
    %55 = vector.load %arg15[%c32, %c0_30] : memref<72x768xf32, #tpu.memory_space<vmem>>, vector<8x768xf32>
    tpu.vector_store %arg15[%c32, %c0_30], %54 {strides = array<i32>} : memref<72x768xf32, #tpu.memory_space<vmem>>, vector<8x768xf32>,
    %c0_31 = arith.constant 0 : index
    %c144 = arith.constant 144 : index
    %56 = vector.load %arg14[%c0_31, %c144] : memref<8x1024xf32, #tpu.memory_space<vmem>>, vector<8x768xf32>
    %c56 = arith.constant 56 : index
    %c0_32 = arith.constant 0 : index
    %57 = vector.load %arg15[%c56, %c0_32] : memref<72x768xf32, #tpu.memory_space<vmem>>, vector<8x768xf32>
    tpu.vector_store %arg15[%c56, %c0_32], %56 {strides = array<i32>} : memref<72x768xf32, #tpu.memory_space<vmem>>, vector<8x768xf32>,
    %c-1_i32 = arith.constant -1 : i32
    %58 = vector.broadcast %c-1_i32 : i32 to vector<1x768xi32>
    %59 = arith.cmpi sge, %22, %58 : vector<1x768xi32>
    %c15_i32 = arith.constant 15 : i32
    %60 = vector.broadcast %c15_i32 : i32 to vector<1x768xi32>
    %61 = arith.cmpi slt, %22, %60 : vector<1x768xi32>
    %62 = arith.andi %59, %61 : vector<1x768xi1>
    %c0_33 = arith.constant 0 : index
    %c113 = arith.constant 113 : index
    %63 = vector.load %arg14[%c0_33, %c113] : memref<8x1024xf32, #tpu.memory_space<vmem>>, vector<8x768xf32>
    %cst_34 = arith.constant 0.000000e+00 : f32
    %64 = vector.shape_cast %62 : vector<1x768xi1> to vector<1x768xi1>
    %65 = vector.broadcast %64 : vector<1x768xi1> to vector<8x768xi1>
    %66 = vector.broadcast %cst_34 : f32 to vector<8x768xf32>
    %67 = arith.select %65, %63, %66 : vector<8x768xi1>, vector<8x768xf32>
    %c16 = arith.constant 16 : index
    %c0_35 = arith.constant 0 : index
    %68 = vector.load %arg15[%c16, %c0_35] : memref<72x768xf32, #tpu.memory_space<vmem>>, vector<8x768xf32>
    tpu.vector_store %arg15[%c16, %c0_35], %67 {strides = array<i32>} : memref<72x768xf32, #tpu.memory_space<vmem>>, vector<8x768xf32>,
    %c0_36 = arith.constant 0 : index
    %c129 = arith.constant 129 : index
    %69 = vector.load %arg14[%c0_36, %c129] : memref<8x1024xf32, #tpu.memory_space<vmem>>, vector<8x768xf32>
    %cst_37 = arith.constant 0.000000e+00 : f32
    %70 = vector.shape_cast %62 : vector<1x768xi1> to vector<1x768xi1>
    %71 = vector.broadcast %70 : vector<1x768xi1> to vector<8x768xi1>
    %72 = vector.broadcast %cst_37 : f32 to vector<8x768xf32>
    %73 = arith.select %71, %69, %72 : vector<8x768xi1>, vector<8x768xf32>
    %c40 = arith.constant 40 : index
    %c0_38 = arith.constant 0 : index
    %74 = vector.load %arg15[%c40, %c0_38] : memref<72x768xf32, #tpu.memory_space<vmem>>, vector<8x768xf32>
    tpu.vector_store %arg15[%c40, %c0_38], %73 {strides = array<i32>} : memref<72x768xf32, #tpu.memory_space<vmem>>, vector<8x768xf32>,
    %c0_39 = arith.constant 0 : index
    %c145 = arith.constant 145 : index
    %75 = vector.load %arg14[%c0_39, %c145] : memref<8x1024xf32, #tpu.memory_space<vmem>>, vector<8x768xf32>
    %cst_40 = arith.constant 0.000000e+00 : f32
    %76 = vector.shape_cast %62 : vector<1x768xi1> to vector<1x768xi1>
    %77 = vector.broadcast %76 : vector<1x768xi1> to vector<8x768xi1>
    %78 = vector.broadcast %cst_40 : f32 to vector<8x768xf32>
    %79 = arith.select %77, %75, %78 : vector<8x768xi1>, vector<8x768xf32>
    %c64 = arith.constant 64 : index
    %c0_41 = arith.constant 0 : index
    %80 = vector.load %arg15[%c64, %c0_41] : memref<72x768xf32, #tpu.memory_space<vmem>>, vector<8x768xf32>
    tpu.vector_store %arg15[%c64, %c0_41], %79 {strides = array<i32>} : memref<72x768xf32, #tpu.memory_space<vmem>>, vector<8x768xf32>,
    %c0_42 = arith.constant 0 : index
    %c0_43 = arith.constant 0 : index
    %81 = vector.load %arg15[%c0_42, %c0_43] : memref<72x768xf32, #tpu.memory_space<vmem>>, vector<72x768xf32>
    %82 = arith.truncf %81 : vector<72x768xf32> to vector<72x768xbf16>
    %c0_44 = arith.constant 0 : index
    %c0_45 = arith.constant 0 : index
    %83 = vector.load %arg2[%c0_44, %c0_45] : memref<8x72xbf16, #tpu.memory_space<vmem>>, vector<8x72xbf16>
    %cst_46 = arith.constant dense<0.000000e+00> : vector<8x768xf32>
    %84 = tpu.matmul %83, %82, %cst_46 {dimension_numbers = #tpu.dot_dimension_numbers<[1], [0], [0], [1], [0, 0, 1, 1], [], []>} : vector<8x72xbf16>, vector<72x768xbf16>, vector<8x768xf32> -> vector<8x768xf32>
    %c0_47 = arith.constant 0 : index
    %c0_48 = arith.constant 0 : index
    %85 = vector.load %arg3[%c0_47, %c0_48] : memref<8x1xf32, #tpu.memory_space<vmem>>, vector<8x1xf32>
    %86 = vector.broadcast %85 : vector<8x1xf32> to vector<8x768xf32>
    %87 = arith.addf %84, %86 : vector<8x768xf32>
    %cst_49 = arith.constant 0.000000e+00 : f32
    %88 = vector.broadcast %cst_49 : f32 to vector<8x768xf32>
    %89 = arith.subf %88, %87 : vector<8x768xf32>
    %90 = math.exp %89 : vector<8x768xf32>
    %cst_50 = arith.constant 1.000000e+00 : f32
    %91 = vector.broadcast %cst_50 : f32 to vector<8x768xf32>
    %92 = arith.addf %91, %90 : vector<8x768xf32>
    %93 = tpu.reciprocal %92 {approx = true} : vector<8x768xf32> -> vector<8x768xf32>
    %94 = arith.mulf %87, %93 : vector<8x768xf32>
    %95 = vector.extract_strided_slice %94 {offsets = [0, 0], sizes = [8, 256], strides = [1, 1]} : vector<8x768xf32> to vector<8x256xf32>
    %c0_51 = arith.constant 0 : index
    %c128_52 = arith.constant 128 : index
    %96 = vector.load %arg14[%c0_51, %c128_52] : memref<8x1024xf32, #tpu.memory_space<vmem>>, vector<8x256xf32>
    tpu.vector_store %arg14[%c0_51, %c128_52], %95 {strides = array<i32>} : memref<8x1024xf32, #tpu.memory_space<vmem>>, vector<8x256xf32>,
    %97 = vector.extract_strided_slice %94 {offsets = [0, 512], sizes = [8, 256], strides = [1, 1]} : vector<8x768xf32> to vector<8x256xf32>
    %c0_53 = arith.constant 0 : index
    %c640_54 = arith.constant 640 : index
    %98 = vector.load %arg14[%c0_53, %c640_54] : memref<8x1024xf32, #tpu.memory_space<vmem>>, vector<8x256xf32>
    tpu.vector_store %arg14[%c0_53, %c640_54], %97 {strides = array<i32>} : memref<8x1024xf32, #tpu.memory_space<vmem>>, vector<8x256xf32>,
    %c2_i32 = arith.constant 2 : i32
    %99 = vector.broadcast %c2_i32 : i32 to vector<1x768xi32>
    %100 = arith.cmpi sge, %22, %99 : vector<1x768xi32>
    %c18_i32 = arith.constant 18 : i32
    %101 = vector.broadcast %c18_i32 : i32 to vector<1x768xi32>
    %102 = arith.cmpi slt, %22, %101 : vector<1x768xi32>
    %103 = arith.andi %100, %102 : vector<1x768xi1>
    %c0_55 = arith.constant 0 : index
    %c94 = arith.constant 94 : index
    %104 = vector.load %arg14[%c0_55, %c94] : memref<8x1024xf32, #tpu.memory_space<vmem>>, vector<8x768xf32>
    %cst_56 = arith.constant 0.000000e+00 : f32
    %105 = vector.shape_cast %103 : vector<1x768xi1> to vector<1x768xi1>
    %106 = vector.broadcast %105 : vector<1x768xi1> to vector<8x768xi1>
    %107 = vector.broadcast %cst_56 : f32 to vector<8x768xf32>
    %108 = arith.select %106, %104, %107 : vector<8x768xi1>, vector<8x768xf32>
    %c0_57 = arith.constant 0 : index
    %c0_58 = arith.constant 0 : index
    %109 = vector.load %arg15[%c0_57, %c0_58] : memref<72x768xf32, #tpu.memory_space<vmem>>, vector<8x768xf32>
    tpu.vector_store %arg15[%c0_57, %c0_58], %108 {strides = array<i32>} : memref<72x768xf32, #tpu.memory_space<vmem>>, vector<8x768xf32>,
    %c0_59 = arith.constant 0 : index
    %c126 = arith.constant 126 : index
    %110 = vector.load %arg14[%c0_59, %c126] : memref<8x1024xf32, #tpu.memory_space<vmem>>, vector<8x768xf32>
    %cst_60 = arith.constant 0.000000e+00 : f32
    %111 = vector.shape_cast %103 : vector<1x768xi1> to vector<1x768xi1>
    %112 = vector.broadcast %111 : vector<1x768xi1> to vector<8x768xi1>
    %113 = vector.broadcast %cst_60 : f32 to vector<8x768xf32>
    %114 = arith.select %112, %110, %113 : vector<8x768xi1>, vector<8x768xf32>
    %c24_61 = arith.constant 24 : index
    %c0_62 = arith.constant 0 : index
    %115 = vector.load %arg15[%c24_61, %c0_62] : memref<72x768xf32, #tpu.memory_space<vmem>>, vector<8x768xf32>
    tpu.vector_store %arg15[%c24_61, %c0_62], %114 {strides = array<i32>} : memref<72x768xf32, #tpu.memory_space<vmem>>, vector<8x768xf32>,
    %c0_63 = arith.constant 0 : index
    %c158 = arith.constant 158 : index
    %116 = vector.load %arg14[%c0_63, %c158] : memref<8x1024xf32, #tpu.memory_space<vmem>>, vector<8x768xf32>
    %cst_64 = arith.constant 0.000000e+00 : f32
    %117 = vector.shape_cast %103 : vector<1x768xi1> to vector<1x768xi1>
    %118 = vector.broadcast %117 : vector<1x768xi1> to vector<8x768xi1>
    %119 = vector.broadcast %cst_64 : f32 to vector<8x768xf32>
    %120 = arith.select %118, %116, %119 : vector<8x768xi1>, vector<8x768xf32>
    %c48_65 = arith.constant 48 : index
    %c0_66 = arith.constant 0 : index
    %121 = vector.load %arg15[%c48_65, %c0_66] : memref<72x768xf32, #tpu.memory_space<vmem>>, vector<8x768xf32>
    tpu.vector_store %arg15[%c48_65, %c0_66], %120 {strides = array<i32>} : memref<72x768xf32, #tpu.memory_space<vmem>>, vector<8x768xf32>,
    %c0_67 = arith.constant 0 : index
    %c96 = arith.constant 96 : index
    %122 = vector.load %arg14[%c0_67, %c96] : memref<8x1024xf32, #tpu.memory_space<vmem>>, vector<8x768xf32>
    %c8_68 = arith.constant 8 : index
    %c0_69 = arith.constant 0 : index
    %123 = vector.load %arg15[%c8_68, %c0_69] : memref<72x768xf32, #tpu.memory_space<vmem>>, vector<8x768xf32>
    tpu.vector_store %arg15[%c8_68, %c0_69], %122 {strides = array<i32>} : memref<72x768xf32, #tpu.memory_space<vmem>>, vector<8x768xf32>,
    %c0_70 = arith.constant 0 : index
    %c128_71 = arith.constant 128 : index
    %124 = vector.load %arg14[%c0_70, %c128_71] : memref<8x1024xf32, #tpu.memory_space<vmem>>, vector<8x768xf32>
    %c32_72 = arith.constant 32 : index
    %c0_73 = arith.constant 0 : index
    %125 = vector.load %arg15[%c32_72, %c0_73] : memref<72x768xf32, #tpu.memory_space<vmem>>, vector<8x768xf32>
    tpu.vector_store %arg15[%c32_72, %c0_73], %124 {strides = array<i32>} : memref<72x768xf32, #tpu.memory_space<vmem>>, vector<8x768xf32>,
    %c0_74 = arith.constant 0 : index
    %c160 = arith.constant 160 : index
    %126 = vector.load %arg14[%c0_74, %c160] : memref<8x1024xf32, #tpu.memory_space<vmem>>, vector<8x768xf32>
    %c56_75 = arith.constant 56 : index
    %c0_76 = arith.constant 0 : index
    %127 = vector.load %arg15[%c56_75, %c0_76] : memref<72x768xf32, #tpu.memory_space<vmem>>, vector<8x768xf32>
    tpu.vector_store %arg15[%c56_75, %c0_76], %126 {strides = array<i32>} : memref<72x768xf32, #tpu.memory_space<vmem>>, vector<8x768xf32>,
    %c-2_i32 = arith.constant -2 : i32
    %128 = vector.broadcast %c-2_i32 : i32 to vector<1x768xi32>
    %129 = arith.cmpi sge, %22, %128 : vector<1x768xi32>
    %c14_i32 = arith.constant 14 : i32
    %130 = vector.broadcast %c14_i32 : i32 to vector<1x768xi32>
    %131 = arith.cmpi slt, %22, %130 : vector<1x768xi32>
    %132 = arith.andi %129, %131 : vector<1x768xi1>
    %c0_77 = arith.constant 0 : index
    %c98 = arith.constant 98 : index
    %133 = vector.load %arg14[%c0_77, %c98] : memref<8x1024xf32, #tpu.memory_space<vmem>>, vector<8x768xf32>
    %cst_78 = arith.constant 0.000000e+00 : f32
    %134 = vector.shape_cast %132 : vector<1x768xi1> to vector<1x768xi1>
    %135 = vector.broadcast %134 : vector<1x768xi1> to vector<8x768xi1>
    %136 = vector.broadcast %cst_78 : f32 to vector<8x768xf32>
    %137 = arith.select %135, %133, %136 : vector<8x768xi1>, vector<8x768xf32>
    %c16_79 = arith.constant 16 : index
    %c0_80 = arith.constant 0 : index
    %138 = vector.load %arg15[%c16_79, %c0_80] : memref<72x768xf32, #tpu.memory_space<vmem>>, vector<8x768xf32>
    tpu.vector_store %arg15[%c16_79, %c0_80], %137 {strides = array<i32>} : memref<72x768xf32, #tpu.memory_space<vmem>>, vector<8x768xf32>,
    %c0_81 = arith.constant 0 : index
    %c130 = arith.constant 130 : index
    %139 = vector.load %arg14[%c0_81, %c130] : memref<8x1024xf32, #tpu.memory_space<vmem>>, vector<8x768xf32>
    %cst_82 = arith.constant 0.000000e+00 : f32
    %140 = vector.shape_cast %132 : vector<1x768xi1> to vector<1x768xi1>
    %141 = vector.broadcast %140 : vector<1x768xi1> to vector<8x768xi1>
    %142 = vector.broadcast %cst_82 : f32 to vector<8x768xf32>
    %143 = arith.select %141, %139, %142 : vector<8x768xi1>, vector<8x768xf32>
    %c40_83 = arith.constant 40 : index
    %c0_84 = arith.constant 0 : index
    %144 = vector.load %arg15[%c40_83, %c0_84] : memref<72x768xf32, #tpu.memory_space<vmem>>, vector<8x768xf32>
    tpu.vector_store %arg15[%c40_83, %c0_84], %143 {strides = array<i32>} : memref<72x768xf32, #tpu.memory_space<vmem>>, vector<8x768xf32>,
    %c0_85 = arith.constant 0 : index
    %c162 = arith.constant 162 : index
    %145 = vector.load %arg14[%c0_85, %c162] : memref<8x1024xf32, #tpu.memory_space<vmem>>, vector<8x768xf32>
    %cst_86 = arith.constant 0.000000e+00 : f32
    %146 = vector.shape_cast %132 : vector<1x768xi1> to vector<1x768xi1>
    %147 = vector.broadcast %146 : vector<1x768xi1> to vector<8x768xi1>
    %148 = vector.broadcast %cst_86 : f32 to vector<8x768xf32>
    %149 = arith.select %147, %145, %148 : vector<8x768xi1>, vector<8x768xf32>
    %c64_87 = arith.constant 64 : index
    %c0_88 = arith.constant 0 : index
    %150 = vector.load %arg15[%c64_87, %c0_88] : memref<72x768xf32, #tpu.memory_space<vmem>>, vector<8x768xf32>
    tpu.vector_store %arg15[%c64_87, %c0_88], %149 {strides = array<i32>} : memref<72x768xf32, #tpu.memory_space<vmem>>, vector<8x768xf32>,
    %c0_89 = arith.constant 0 : index
    %c0_90 = arith.constant 0 : index
    %151 = vector.load %arg15[%c0_89, %c0_90] : memref<72x768xf32, #tpu.memory_space<vmem>>, vector<72x768xf32>
    %152 = arith.truncf %151 : vector<72x768xf32> to vector<72x768xbf16>
    %c0_91 = arith.constant 0 : index
    %c0_92 = arith.constant 0 : index
    %153 = vector.load %arg4[%c0_91, %c0_92] : memref<8x72xbf16, #tpu.memory_space<vmem>>, vector<8x72xbf16>
    %cst_93 = arith.constant dense<0.000000e+00> : vector<8x768xf32>
    %154 = tpu.matmul %153, %152, %cst_93 {dimension_numbers = #tpu.dot_dimension_numbers<[1], [0], [0], [1], [0, 0, 1, 1], [], []>} : vector<8x72xbf16>, vector<72x768xbf16>, vector<8x768xf32> -> vector<8x768xf32>
    %c0_94 = arith.constant 0 : index
    %c0_95 = arith.constant 0 : index
    %155 = vector.load %arg5[%c0_94, %c0_95] : memref<8x1xf32, #tpu.memory_space<vmem>>, vector<8x1xf32>
    %156 = vector.broadcast %155 : vector<8x1xf32> to vector<8x768xf32>
    %157 = arith.addf %154, %156 : vector<8x768xf32>
    %cst_96 = arith.constant dense<0.000000e+00> : vector<768xf32>
    %158 = vector.multi_reduction <add>, %157, %cst_96 [0] : vector<8x768xf32> to vector<768xf32>
    %159 = vector.shape_cast %158 : vector<768xf32> to vector<1x768xf32>
    %cst_97 = arith.constant 8.000000e+00 : f32
    %160 = vector.broadcast %cst_97 : f32 to vector<1x768xf32>
    %161 = arith.divf %159, %160 : vector<1x768xf32>
    %cst_98 = arith.constant dense<0xFF800000> : vector<768xf32>
    %162 = vector.multi_reduction <maximumf>, %157, %cst_98 [0] : vector<8x768xf32> to vector<768xf32>
    %163 = vector.shape_cast %162 : vector<768xf32> to vector<1x768xf32>
    %cst_99 = arith.constant 0.000000e+00 : f32
    %164 = vector.broadcast %cst_99 : f32 to vector<6x768xf32>
    %165 = tpu.concatenate %161, %163, %164 in 0 : vector<1x768xf32>, vector<1x768xf32>, vector<6x768xf32> -> vector<8x768xf32>
    %166 = vector.extract_strided_slice %165 {offsets = [0, 0], sizes = [8, 256], strides = [1, 1]} : vector<8x768xf32> to vector<8x256xf32>
    %c0_100 = arith.constant 0 : index
    %c128_101 = arith.constant 128 : index
    %167 = vector.load %arg14[%c0_100, %c128_101] : memref<8x1024xf32, #tpu.memory_space<vmem>>, vector<8x256xf32>
    tpu.vector_store %arg14[%c0_100, %c128_101], %166 {strides = array<i32>} : memref<8x1024xf32, #tpu.memory_space<vmem>>, vector<8x256xf32>,
    %168 = vector.extract_strided_slice %165 {offsets = [0, 512], sizes = [8, 256], strides = [1, 1]} : vector<8x768xf32> to vector<8x256xf32>
    %c0_102 = arith.constant 0 : index
    %c640_103 = arith.constant 640 : index
    %169 = vector.load %arg14[%c0_102, %c640_103] : memref<8x1024xf32, #tpu.memory_space<vmem>>, vector<8x256xf32>
    tpu.vector_store %arg14[%c0_102, %c640_103], %168 {strides = array<i32>} : memref<8x1024xf32, #tpu.memory_space<vmem>>, vector<8x256xf32>,
    %cst_104 = arith.constant 0.000000e+00 : f32
    %170 = vector.broadcast %cst_104 : f32 to vector<1x768xf32>
    %c3_i32 = arith.constant 3 : i32
    %171 = vector.broadcast %c3_i32 : i32 to vector<1x768xi32>
    %172 = arith.cmpi sge, %22, %171 : vector<1x768xi32>
    %c19_i32 = arith.constant 19 : i32
    %173 = vector.broadcast %c19_i32 : i32 to vector<1x768xi32>
    %174 = arith.cmpi slt, %22, %173 : vector<1x768xi32>
    %175 = arith.andi %172, %174 : vector<1x768xi1>
    %c0_105 = arith.constant 0 : index
    %c77 = arith.constant 77 : index
    %176 = vector.load %arg14[%c0_105, %c77] : memref<8x1024xf32, #tpu.memory_space<vmem>>, vector<2x768xf32>
    %cst_106 = arith.constant 0.000000e+00 : f32
    %177 = vector.shape_cast %175 : vector<1x768xi1> to vector<1x768xi1>
    %178 = vector.broadcast %177 : vector<1x768xi1> to vector<2x768xi1>
    %179 = vector.broadcast %cst_106 : f32 to vector<2x768xf32>
    %180 = arith.select %178, %176, %179 : vector<2x768xi1>, vector<2x768xf32>
    %c0_107 = arith.constant 0 : index
    %181 = memref.load %arg6[%c0_107] : memref<98xf32, #tpu.memory_space<smem>>
    %182 = vector.extract_strided_slice %180 {offsets = [0, 0], sizes = [1, 768], strides = [1, 1]} : vector<2x768xf32> to vector<1x768xf32>
    %183 = vector.broadcast %181 : f32 to vector<1x768xf32>
    %184 = arith.mulf %183, %182 : vector<1x768xf32>
    %185 = arith.addf %170, %184 : vector<1x768xf32>
    %c1_108 = arith.constant 1 : index
    %186 = memref.load %arg6[%c1_108] : memref<98xf32, #tpu.memory_space<smem>>
    %187 = vector.extract_strided_slice %180 {offsets = [1, 0], sizes = [1, 768], strides = [1, 1]} : vector<2x768xf32> to vector<1x768xf32>
    %188 = vector.broadcast %186 : f32 to vector<1x768xf32>
    %189 = arith.mulf %188, %187 : vector<1x768xf32>
    %190 = arith.addf %185, %189 : vector<1x768xf32>
    %c0_109 = arith.constant 0 : index
    %c93 = arith.constant 93 : index
    %191 = vector.load %arg14[%c0_109, %c93] : memref<8x1024xf32, #tpu.memory_space<vmem>>, vector<2x768xf32>
    %cst_110 = arith.constant 0.000000e+00 : f32
    %192 = vector.shape_cast %175 : vector<1x768xi1> to vector<1x768xi1>
    %193 = vector.broadcast %192 : vector<1x768xi1> to vector<2x768xi1>
    %194 = vector.broadcast %cst_110 : f32 to vector<2x768xf32>
    %195 = arith.select %193, %191, %194 : vector<2x768xi1>, vector<2x768xf32>
    %c14 = arith.constant 14 : index
    %196 = memref.load %arg6[%c14] : memref<98xf32, #tpu.memory_space<smem>>
    %197 = vector.extract_strided_slice %195 {offsets = [0, 0], sizes = [1, 768], strides = [1, 1]} : vector<2x768xf32> to vector<1x768xf32>
    %198 = vector.broadcast %196 : f32 to vector<1x768xf32>
    %199 = arith.mulf %198, %197 : vector<1x768xf32>
    %200 = arith.addf %190, %199 : vector<1x768xf32>
    %c15 = arith.constant 15 : index
    %201 = memref.load %arg6[%c15] : memref<98xf32, #tpu.memory_space<smem>>
    %202 = vector.extract_strided_slice %195 {offsets = [1, 0], sizes = [1, 768], strides = [1, 1]} : vector<2x768xf32> to vector<1x768xf32>
    %203 = vector.broadcast %201 : f32 to vector<1x768xf32>
    %204 = arith.mulf %203, %202 : vector<1x768xf32>
    %205 = arith.addf %200, %204 : vector<1x768xf32>
    %c0_111 = arith.constant 0 : index
    %c109 = arith.constant 109 : index
    %206 = vector.load %arg14[%c0_111, %c109] : memref<8x1024xf32, #tpu.memory_space<vmem>>, vector<2x768xf32>
    %cst_112 = arith.constant 0.000000e+00 : f32
    %207 = vector.shape_cast %175 : vector<1x768xi1> to vector<1x768xi1>
    %208 = vector.broadcast %207 : vector<1x768xi1> to vector<2x768xi1>
    %209 = vector.broadcast %cst_112 : f32 to vector<2x768xf32>
    %210 = arith.select %208, %206, %209 : vector<2x768xi1>, vector<2x768xf32>
    %c28 = arith.constant 28 : index
    %211 = memref.load %arg6[%c28] : memref<98xf32, #tpu.memory_space<smem>>
    %212 = vector.extract_strided_slice %210 {offsets = [0, 0], sizes = [1, 768], strides = [1, 1]} : vector<2x768xf32> to vector<1x768xf32>
    %213 = vector.broadcast %211 : f32 to vector<1x768xf32>
    %214 = arith.mulf %213, %212 : vector<1x768xf32>
    %215 = arith.addf %205, %214 : vector<1x768xf32>
    %c29 = arith.constant 29 : index
    %216 = memref.load %arg6[%c29] : memref<98xf32, #tpu.memory_space<smem>>
    %217 = vector.extract_strided_slice %210 {offsets = [1, 0], sizes = [1, 768], strides = [1, 1]} : vector<2x768xf32> to vector<1x768xf32>
    %218 = vector.broadcast %216 : f32 to vector<1x768xf32>
    %219 = arith.mulf %218, %217 : vector<1x768xf32>
    %220 = arith.addf %215, %219 : vector<1x768xf32>
    %c0_113 = arith.constant 0 : index
    %c125 = arith.constant 125 : index
    %221 = vector.load %arg14[%c0_113, %c125] : memref<8x1024xf32, #tpu.memory_space<vmem>>, vector<2x768xf32>
    %cst_114 = arith.constant 0.000000e+00 : f32
    %222 = vector.shape_cast %175 : vector<1x768xi1> to vector<1x768xi1>
    %223 = vector.broadcast %222 : vector<1x768xi1> to vector<2x768xi1>
    %224 = vector.broadcast %cst_114 : f32 to vector<2x768xf32>
    %225 = arith.select %223, %221, %224 : vector<2x768xi1>, vector<2x768xf32>
    %c42 = arith.constant 42 : index
    %226 = memref.load %arg6[%c42] : memref<98xf32, #tpu.memory_space<smem>>
    %227 = vector.extract_strided_slice %225 {offsets = [0, 0], sizes = [1, 768], strides = [1, 1]} : vector<2x768xf32> to vector<1x768xf32>
    %228 = vector.broadcast %226 : f32 to vector<1x768xf32>
    %229 = arith.mulf %228, %227 : vector<1x768xf32>
    %230 = arith.addf %220, %229 : vector<1x768xf32>
    %c43 = arith.constant 43 : index
    %231 = memref.load %arg6[%c43] : memref<98xf32, #tpu.memory_space<smem>>
    %232 = vector.extract_strided_slice %225 {offsets = [1, 0], sizes = [1, 768], strides = [1, 1]} : vector<2x768xf32> to vector<1x768xf32>
    %233 = vector.broadcast %231 : f32 to vector<1x768xf32>
    %234 = arith.mulf %233, %232 : vector<1x768xf32>
    %235 = arith.addf %230, %234 : vector<1x768xf32>
    %c0_115 = arith.constant 0 : index
    %c141 = arith.constant 141 : index
    %236 = vector.load %arg14[%c0_115, %c141] : memref<8x1024xf32, #tpu.memory_space<vmem>>, vector<2x768xf32>
    %cst_116 = arith.constant 0.000000e+00 : f32
    %237 = vector.shape_cast %175 : vector<1x768xi1> to vector<1x768xi1>
    %238 = vector.broadcast %237 : vector<1x768xi1> to vector<2x768xi1>
    %239 = vector.broadcast %cst_116 : f32 to vector<2x768xf32>
    %240 = arith.select %238, %236, %239 : vector<2x768xi1>, vector<2x768xf32>
    %c56_117 = arith.constant 56 : index
    %241 = memref.load %arg6[%c56_117] : memref<98xf32, #tpu.memory_space<smem>>
    %242 = vector.extract_strided_slice %240 {offsets = [0, 0], sizes = [1, 768], strides = [1, 1]} : vector<2x768xf32> to vector<1x768xf32>
    %243 = vector.broadcast %241 : f32 to vector<1x768xf32>
    %244 = arith.mulf %243, %242 : vector<1x768xf32>
    %245 = arith.addf %235, %244 : vector<1x768xf32>
    %c57 = arith.constant 57 : index
    %246 = memref.load %arg6[%c57] : memref<98xf32, #tpu.memory_space<smem>>
    %247 = vector.extract_strided_slice %240 {offsets = [1, 0], sizes = [1, 768], strides = [1, 1]} : vector<2x768xf32> to vector<1x768xf32>
    %248 = vector.broadcast %246 : f32 to vector<1x768xf32>
    %249 = arith.mulf %248, %247 : vector<1x768xf32>
    %250 = arith.addf %245, %249 : vector<1x768xf32>
    %c0_118 = arith.constant 0 : index
    %c157 = arith.constant 157 : index
    %251 = vector.load %arg14[%c0_118, %c157] : memref<8x1024xf32, #tpu.memory_space<vmem>>, vector<2x768xf32>
    %cst_119 = arith.constant 0.000000e+00 : f32
    %252 = vector.shape_cast %175 : vector<1x768xi1> to vector<1x768xi1>
    %253 = vector.broadcast %252 : vector<1x768xi1> to vector<2x768xi1>
    %254 = vector.broadcast %cst_119 : f32 to vector<2x768xf32>
    %255 = arith.select %253, %251, %254 : vector<2x768xi1>, vector<2x768xf32>
    %c70 = arith.constant 70 : index
    %256 = memref.load %arg6[%c70] : memref<98xf32, #tpu.memory_space<smem>>
    %257 = vector.extract_strided_slice %255 {offsets = [0, 0], sizes = [1, 768], strides = [1, 1]} : vector<2x768xf32> to vector<1x768xf32>
    %258 = vector.broadcast %256 : f32 to vector<1x768xf32>
    %259 = arith.mulf %258, %257 : vector<1x768xf32>
    %260 = arith.addf %250, %259 : vector<1x768xf32>
    %c71 = arith.constant 71 : index
    %261 = memref.load %arg6[%c71] : memref<98xf32, #tpu.memory_space<smem>>
    %262 = vector.extract_strided_slice %255 {offsets = [1, 0], sizes = [1, 768], strides = [1, 1]} : vector<2x768xf32> to vector<1x768xf32>
    %263 = vector.broadcast %261 : f32 to vector<1x768xf32>
    %264 = arith.mulf %263, %262 : vector<1x768xf32>
    %265 = arith.addf %260, %264 : vector<1x768xf32>
    %c0_120 = arith.constant 0 : index
    %c173 = arith.constant 173 : index
    %266 = vector.load %arg14[%c0_120, %c173] : memref<8x1024xf32, #tpu.memory_space<vmem>>, vector<2x768xf32>
    %cst_121 = arith.constant 0.000000e+00 : f32
    %267 = vector.shape_cast %175 : vector<1x768xi1> to vector<1x768xi1>
    %268 = vector.broadcast %267 : vector<1x768xi1> to vector<2x768xi1>
    %269 = vector.broadcast %cst_121 : f32 to vector<2x768xf32>
    %270 = arith.select %268, %266, %269 : vector<2x768xi1>, vector<2x768xf32>
    %c84 = arith.constant 84 : index
    %271 = memref.load %arg6[%c84] : memref<98xf32, #tpu.memory_space<smem>>
    %272 = vector.extract_strided_slice %270 {offsets = [0, 0], sizes = [1, 768], strides = [1, 1]} : vector<2x768xf32> to vector<1x768xf32>
    %273 = vector.broadcast %271 : f32 to vector<1x768xf32>
    %274 = arith.mulf %273, %272 : vector<1x768xf32>
    %275 = arith.addf %265, %274 : vector<1x768xf32>
    %c85 = arith.constant 85 : index
    %276 = memref.load %arg6[%c85] : memref<98xf32, #tpu.memory_space<smem>>
    %277 = vector.extract_strided_slice %270 {offsets = [1, 0], sizes = [1, 768], strides = [1, 1]} : vector<2x768xf32> to vector<1x768xf32>
    %278 = vector.broadcast %276 : f32 to vector<1x768xf32>
    %279 = arith.mulf %278, %277 : vector<1x768xf32>
    %280 = arith.addf %275, %279 : vector<1x768xf32>
    %c2_i32_122 = arith.constant 2 : i32
    %281 = vector.broadcast %c2_i32_122 : i32 to vector<1x768xi32>
    %282 = arith.cmpi sge, %22, %281 : vector<1x768xi32>
    %c18_i32_123 = arith.constant 18 : i32
    %283 = vector.broadcast %c18_i32_123 : i32 to vector<1x768xi32>
    %284 = arith.cmpi slt, %22, %283 : vector<1x768xi32>
    %285 = arith.andi %282, %284 : vector<1x768xi1>
    %c0_124 = arith.constant 0 : index
    %c78 = arith.constant 78 : index
    %286 = vector.load %arg14[%c0_124, %c78] : memref<8x1024xf32, #tpu.memory_space<vmem>>, vector<2x768xf32>
    %cst_125 = arith.constant 0.000000e+00 : f32
    %287 = vector.shape_cast %285 : vector<1x768xi1> to vector<1x768xi1>
    %288 = vector.broadcast %287 : vector<1x768xi1> to vector<2x768xi1>
    %289 = vector.broadcast %cst_125 : f32 to vector<2x768xf32>
    %290 = arith.select %288, %286, %289 : vector<2x768xi1>, vector<2x768xf32>
    %c2 = arith.constant 2 : index
    %291 = memref.load %arg6[%c2] : memref<98xf32, #tpu.memory_space<smem>>
    %292 = vector.extract_strided_slice %290 {offsets = [0, 0], sizes = [1, 768], strides = [1, 1]} : vector<2x768xf32> to vector<1x768xf32>
    %293 = vector.broadcast %291 : f32 to vector<1x768xf32>
    %294 = arith.mulf %293, %292 : vector<1x768xf32>
    %295 = arith.addf %280, %294 : vector<1x768xf32>
    %c3 = arith.constant 3 : index
    %296 = memref.load %arg6[%c3] : memref<98xf32, #tpu.memory_space<smem>>
    %297 = vector.extract_strided_slice %290 {offsets = [1, 0], sizes = [1, 768], strides = [1, 1]} : vector<2x768xf32> to vector<1x768xf32>
    %298 = vector.broadcast %296 : f32 to vector<1x768xf32>
    %299 = arith.mulf %298, %297 : vector<1x768xf32>
    %300 = arith.addf %295, %299 : vector<1x768xf32>
    %c0_126 = arith.constant 0 : index
    %c94_127 = arith.constant 94 : index
    %301 = vector.load %arg14[%c0_126, %c94_127] : memref<8x1024xf32, #tpu.memory_space<vmem>>, vector<2x768xf32>
    %cst_128 = arith.constant 0.000000e+00 : f32
    %302 = vector.shape_cast %285 : vector<1x768xi1> to vector<1x768xi1>
    %303 = vector.broadcast %302 : vector<1x768xi1> to vector<2x768xi1>
    %304 = vector.broadcast %cst_128 : f32 to vector<2x768xf32>
    %305 = arith.select %303, %301, %304 : vector<2x768xi1>, vector<2x768xf32>
    %c16_129 = arith.constant 16 : index
    %306 = memref.load %arg6[%c16_129] : memref<98xf32, #tpu.memory_space<smem>>
    %307 = vector.extract_strided_slice %305 {offsets = [0, 0], sizes = [1, 768], strides = [1, 1]} : vector<2x768xf32> to vector<1x768xf32>
    %308 = vector.broadcast %306 : f32 to vector<1x768xf32>
    %309 = arith.mulf %308, %307 : vector<1x768xf32>
    %310 = arith.addf %300, %309 : vector<1x768xf32>
    %c17 = arith.constant 17 : index
    %311 = memref.load %arg6[%c17] : memref<98xf32, #tpu.memory_space<smem>>
    %312 = vector.extract_strided_slice %305 {offsets = [1, 0], sizes = [1, 768], strides = [1, 1]} : vector<2x768xf32> to vector<1x768xf32>
    %313 = vector.broadcast %311 : f32 to vector<1x768xf32>
    %314 = arith.mulf %313, %312 : vector<1x768xf32>
    %315 = arith.addf %310, %314 : vector<1x768xf32>
    %c0_130 = arith.constant 0 : index
    %c110 = arith.constant 110 : index
    %316 = vector.load %arg14[%c0_130, %c110] : memref<8x1024xf32, #tpu.memory_space<vmem>>, vector<2x768xf32>
    %cst_131 = arith.constant 0.000000e+00 : f32
    %317 = vector.shape_cast %285 : vector<1x768xi1> to vector<1x768xi1>
    %318 = vector.broadcast %317 : vector<1x768xi1> to vector<2x768xi1>
    %319 = vector.broadcast %cst_131 : f32 to vector<2x768xf32>
    %320 = arith.select %318, %316, %319 : vector<2x768xi1>, vector<2x768xf32>
    %c30 = arith.constant 30 : index
    %321 = memref.load %arg6[%c30] : memref<98xf32, #tpu.memory_space<smem>>
    %322 = vector.extract_strided_slice %320 {offsets = [0, 0], sizes = [1, 768], strides = [1, 1]} : vector<2x768xf32> to vector<1x768xf32>
    %323 = vector.broadcast %321 : f32 to vector<1x768xf32>
    %324 = arith.mulf %323, %322 : vector<1x768xf32>
    %325 = arith.addf %315, %324 : vector<1x768xf32>
    %c31 = arith.constant 31 : index
    %326 = memref.load %arg6[%c31] : memref<98xf32, #tpu.memory_space<smem>>
    %327 = vector.extract_strided_slice %320 {offsets = [1, 0], sizes = [1, 768], strides = [1, 1]} : vector<2x768xf32> to vector<1x768xf32>
    %328 = vector.broadcast %326 : f32 to vector<1x768xf32>
    %329 = arith.mulf %328, %327 : vector<1x768xf32>
    %330 = arith.addf %325, %329 : vector<1x768xf32>
    %c0_132 = arith.constant 0 : index
    %c126_133 = arith.constant 126 : index
    %331 = vector.load %arg14[%c0_132, %c126_133] : memref<8x1024xf32, #tpu.memory_space<vmem>>, vector<2x768xf32>
    %cst_134 = arith.constant 0.000000e+00 : f32
    %332 = vector.shape_cast %285 : vector<1x768xi1> to vector<1x768xi1>
    %333 = vector.broadcast %332 : vector<1x768xi1> to vector<2x768xi1>
    %334 = vector.broadcast %cst_134 : f32 to vector<2x768xf32>
    %335 = arith.select %333, %331, %334 : vector<2x768xi1>, vector<2x768xf32>
    %c44 = arith.constant 44 : index
    %336 = memref.load %arg6[%c44] : memref<98xf32, #tpu.memory_space<smem>>
    %337 = vector.extract_strided_slice %335 {offsets = [0, 0], sizes = [1, 768], strides = [1, 1]} : vector<2x768xf32> to vector<1x768xf32>
    %338 = vector.broadcast %336 : f32 to vector<1x768xf32>
    %339 = arith.mulf %338, %337 : vector<1x768xf32>
    %340 = arith.addf %330, %339 : vector<1x768xf32>
    %c45 = arith.constant 45 : index
    %341 = memref.load %arg6[%c45] : memref<98xf32, #tpu.memory_space<smem>>
    %342 = vector.extract_strided_slice %335 {offsets = [1, 0], sizes = [1, 768], strides = [1, 1]} : vector<2x768xf32> to vector<1x768xf32>
    %343 = vector.broadcast %341 : f32 to vector<1x768xf32>
    %344 = arith.mulf %343, %342 : vector<1x768xf32>
    %345 = arith.addf %340, %344 : vector<1x768xf32>
    %c0_135 = arith.constant 0 : index
    %c142 = arith.constant 142 : index
    %346 = vector.load %arg14[%c0_135, %c142] : memref<8x1024xf32, #tpu.memory_space<vmem>>, vector<2x768xf32>
    %cst_136 = arith.constant 0.000000e+00 : f32
    %347 = vector.shape_cast %285 : vector<1x768xi1> to vector<1x768xi1>
    %348 = vector.broadcast %347 : vector<1x768xi1> to vector<2x768xi1>
    %349 = vector.broadcast %cst_136 : f32 to vector<2x768xf32>
    %350 = arith.select %348, %346, %349 : vector<2x768xi1>, vector<2x768xf32>
    %c58 = arith.constant 58 : index
    %351 = memref.load %arg6[%c58] : memref<98xf32, #tpu.memory_space<smem>>
    %352 = vector.extract_strided_slice %350 {offsets = [0, 0], sizes = [1, 768], strides = [1, 1]} : vector<2x768xf32> to vector<1x768xf32>
    %353 = vector.broadcast %351 : f32 to vector<1x768xf32>
    %354 = arith.mulf %353, %352 : vector<1x768xf32>
    %355 = arith.addf %345, %354 : vector<1x768xf32>
    %c59 = arith.constant 59 : index
    %356 = memref.load %arg6[%c59] : memref<98xf32, #tpu.memory_space<smem>>
    %357 = vector.extract_strided_slice %350 {offsets = [1, 0], sizes = [1, 768], strides = [1, 1]} : vector<2x768xf32> to vector<1x768xf32>
    %358 = vector.broadcast %356 : f32 to vector<1x768xf32>
    %359 = arith.mulf %358, %357 : vector<1x768xf32>
    %360 = arith.addf %355, %359 : vector<1x768xf32>
    %c0_137 = arith.constant 0 : index
    %c158_138 = arith.constant 158 : index
    %361 = vector.load %arg14[%c0_137, %c158_138] : memref<8x1024xf32, #tpu.memory_space<vmem>>, vector<2x768xf32>
    %cst_139 = arith.constant 0.000000e+00 : f32
    %362 = vector.shape_cast %285 : vector<1x768xi1> to vector<1x768xi1>
    %363 = vector.broadcast %362 : vector<1x768xi1> to vector<2x768xi1>
    %364 = vector.broadcast %cst_139 : f32 to vector<2x768xf32>
    %365 = arith.select %363, %361, %364 : vector<2x768xi1>, vector<2x768xf32>
    %c72 = arith.constant 72 : index
    %366 = memref.load %arg6[%c72] : memref<98xf32, #tpu.memory_space<smem>>
    %367 = vector.extract_strided_slice %365 {offsets = [0, 0], sizes = [1, 768], strides = [1, 1]} : vector<2x768xf32> to vector<1x768xf32>
    %368 = vector.broadcast %366 : f32 to vector<1x768xf32>
    %369 = arith.mulf %368, %367 : vector<1x768xf32>
    %370 = arith.addf %360, %369 : vector<1x768xf32>
    %c73 = arith.constant 73 : index
    %371 = memref.load %arg6[%c73] : memref<98xf32, #tpu.memory_space<smem>>
    %372 = vector.extract_strided_slice %365 {offsets = [1, 0], sizes = [1, 768], strides = [1, 1]} : vector<2x768xf32> to vector<1x768xf32>
    %373 = vector.broadcast %371 : f32 to vector<1x768xf32>
    %374 = arith.mulf %373, %372 : vector<1x768xf32>
    %375 = arith.addf %370, %374 : vector<1x768xf32>
    %c0_140 = arith.constant 0 : index
    %c174 = arith.constant 174 : index
    %376 = vector.load %arg14[%c0_140, %c174] : memref<8x1024xf32, #tpu.memory_space<vmem>>, vector<2x768xf32>
    %cst_141 = arith.constant 0.000000e+00 : f32
    %377 = vector.shape_cast %285 : vector<1x768xi1> to vector<1x768xi1>
    %378 = vector.broadcast %377 : vector<1x768xi1> to vector<2x768xi1>
    %379 = vector.broadcast %cst_141 : f32 to vector<2x768xf32>
    %380 = arith.select %378, %376, %379 : vector<2x768xi1>, vector<2x768xf32>
    %c86 = arith.constant 86 : index
    %381 = memref.load %arg6[%c86] : memref<98xf32, #tpu.memory_space<smem>>
    %382 = vector.extract_strided_slice %380 {offsets = [0, 0], sizes = [1, 768], strides = [1, 1]} : vector<2x768xf32> to vector<1x768xf32>
    %383 = vector.broadcast %381 : f32 to vector<1x768xf32>
    %384 = arith.mulf %383, %382 : vector<1x768xf32>
    %385 = arith.addf %375, %384 : vector<1x768xf32>
    %c87 = arith.constant 87 : index
    %386 = memref.load %arg6[%c87] : memref<98xf32, #tpu.memory_space<smem>>
    %387 = vector.extract_strided_slice %380 {offsets = [1, 0], sizes = [1, 768], strides = [1, 1]} : vector<2x768xf32> to vector<1x768xf32>
    %388 = vector.broadcast %386 : f32 to vector<1x768xf32>
    %389 = arith.mulf %388, %387 : vector<1x768xf32>
    %390 = arith.addf %385, %389 : vector<1x768xf32>
    %c1_i32_142 = arith.constant 1 : i32
    %391 = vector.broadcast %c1_i32_142 : i32 to vector<1x768xi32>
    %392 = arith.cmpi sge, %22, %391 : vector<1x768xi32>
    %c17_i32_143 = arith.constant 17 : i32
    %393 = vector.broadcast %c17_i32_143 : i32 to vector<1x768xi32>
    %394 = arith.cmpi slt, %22, %393 : vector<1x768xi32>
    %395 = arith.andi %392, %394 : vector<1x768xi1>
    %c0_144 = arith.constant 0 : index
    %c79 = arith.constant 79 : index
    %396 = vector.load %arg14[%c0_144, %c79] : memref<8x1024xf32, #tpu.memory_space<vmem>>, vector<2x768xf32>
    %cst_145 = arith.constant 0.000000e+00 : f32
    %397 = vector.shape_cast %395 : vector<1x768xi1> to vector<1x768xi1>
    %398 = vector.broadcast %397 : vector<1x768xi1> to vector<2x768xi1>
    %399 = vector.broadcast %cst_145 : f32 to vector<2x768xf32>
    %400 = arith.select %398, %396, %399 : vector<2x768xi1>, vector<2x768xf32>
    %c4 = arith.constant 4 : index
    %401 = memref.load %arg6[%c4] : memref<98xf32, #tpu.memory_space<smem>>
    %402 = vector.extract_strided_slice %400 {offsets = [0, 0], sizes = [1, 768], strides = [1, 1]} : vector<2x768xf32> to vector<1x768xf32>
    %403 = vector.broadcast %401 : f32 to vector<1x768xf32>
    %404 = arith.mulf %403, %402 : vector<1x768xf32>
    %405 = arith.addf %390, %404 : vector<1x768xf32>
    %c5 = arith.constant 5 : index
    %406 = memref.load %arg6[%c5] : memref<98xf32, #tpu.memory_space<smem>>
    %407 = vector.extract_strided_slice %400 {offsets = [1, 0], sizes = [1, 768], strides = [1, 1]} : vector<2x768xf32> to vector<1x768xf32>
    %408 = vector.broadcast %406 : f32 to vector<1x768xf32>
    %409 = arith.mulf %408, %407 : vector<1x768xf32>
    %410 = arith.addf %405, %409 : vector<1x768xf32>
    %c0_146 = arith.constant 0 : index
    %c95 = arith.constant 95 : index
    %411 = vector.load %arg14[%c0_146, %c95] : memref<8x1024xf32, #tpu.memory_space<vmem>>, vector<2x768xf32>
    %cst_147 = arith.constant 0.000000e+00 : f32
    %412 = vector.shape_cast %395 : vector<1x768xi1> to vector<1x768xi1>
    %413 = vector.broadcast %412 : vector<1x768xi1> to vector<2x768xi1>
    %414 = vector.broadcast %cst_147 : f32 to vector<2x768xf32>
    %415 = arith.select %413, %411, %414 : vector<2x768xi1>, vector<2x768xf32>
    %c18 = arith.constant 18 : index
    %416 = memref.load %arg6[%c18] : memref<98xf32, #tpu.memory_space<smem>>
    %417 = vector.extract_strided_slice %415 {offsets = [0, 0], sizes = [1, 768], strides = [1, 1]} : vector<2x768xf32> to vector<1x768xf32>
    %418 = vector.broadcast %416 : f32 to vector<1x768xf32>
    %419 = arith.mulf %418, %417 : vector<1x768xf32>
    %420 = arith.addf %410, %419 : vector<1x768xf32>
    %c19 = arith.constant 19 : index
    %421 = memref.load %arg6[%c19] : memref<98xf32, #tpu.memory_space<smem>>
    %422 = vector.extract_strided_slice %415 {offsets = [1, 0], sizes = [1, 768], strides = [1, 1]} : vector<2x768xf32> to vector<1x768xf32>
    %423 = vector.broadcast %421 : f32 to vector<1x768xf32>
    %424 = arith.mulf %423, %422 : vector<1x768xf32>
    %425 = arith.addf %420, %424 : vector<1x768xf32>
    %c0_148 = arith.constant 0 : index
    %c111_149 = arith.constant 111 : index
    %426 = vector.load %arg14[%c0_148, %c111_149] : memref<8x1024xf32, #tpu.memory_space<vmem>>, vector<2x768xf32>
    %cst_150 = arith.constant 0.000000e+00 : f32
    %427 = vector.shape_cast %395 : vector<1x768xi1> to vector<1x768xi1>
    %428 = vector.broadcast %427 : vector<1x768xi1> to vector<2x768xi1>
    %429 = vector.broadcast %cst_150 : f32 to vector<2x768xf32>
    %430 = arith.select %428, %426, %429 : vector<2x768xi1>, vector<2x768xf32>
    %c32_151 = arith.constant 32 : index
    %431 = memref.load %arg6[%c32_151] : memref<98xf32, #tpu.memory_space<smem>>
    %432 = vector.extract_strided_slice %430 {offsets = [0, 0], sizes = [1, 768], strides = [1, 1]} : vector<2x768xf32> to vector<1x768xf32>
    %433 = vector.broadcast %431 : f32 to vector<1x768xf32>
    %434 = arith.mulf %433, %432 : vector<1x768xf32>
    %435 = arith.addf %425, %434 : vector<1x768xf32>
    %c33 = arith.constant 33 : index
    %436 = memref.load %arg6[%c33] : memref<98xf32, #tpu.memory_space<smem>>
    %437 = vector.extract_strided_slice %430 {offsets = [1, 0], sizes = [1, 768], strides = [1, 1]} : vector<2x768xf32> to vector<1x768xf32>
    %438 = vector.broadcast %436 : f32 to vector<1x768xf32>
    %439 = arith.mulf %438, %437 : vector<1x768xf32>
    %440 = arith.addf %435, %439 : vector<1x768xf32>
    %c0_152 = arith.constant 0 : index
    %c127_153 = arith.constant 127 : index
    %441 = vector.load %arg14[%c0_152, %c127_153] : memref<8x1024xf32, #tpu.memory_space<vmem>>, vector<2x768xf32>
    %cst_154 = arith.constant 0.000000e+00 : f32
    %442 = vector.shape_cast %395 : vector<1x768xi1> to vector<1x768xi1>
    %443 = vector.broadcast %442 : vector<1x768xi1> to vector<2x768xi1>
    %444 = vector.broadcast %cst_154 : f32 to vector<2x768xf32>
    %445 = arith.select %443, %441, %444 : vector<2x768xi1>, vector<2x768xf32>
    %c46 = arith.constant 46 : index
    %446 = memref.load %arg6[%c46] : memref<98xf32, #tpu.memory_space<smem>>
    %447 = vector.extract_strided_slice %445 {offsets = [0, 0], sizes = [1, 768], strides = [1, 1]} : vector<2x768xf32> to vector<1x768xf32>
    %448 = vector.broadcast %446 : f32 to vector<1x768xf32>
    %449 = arith.mulf %448, %447 : vector<1x768xf32>
    %450 = arith.addf %440, %449 : vector<1x768xf32>
    %c47 = arith.constant 47 : index
    %451 = memref.load %arg6[%c47] : memref<98xf32, #tpu.memory_space<smem>>
    %452 = vector.extract_strided_slice %445 {offsets = [1, 0], sizes = [1, 768], strides = [1, 1]} : vector<2x768xf32> to vector<1x768xf32>
    %453 = vector.broadcast %451 : f32 to vector<1x768xf32>
    %454 = arith.mulf %453, %452 : vector<1x768xf32>
    %455 = arith.addf %450, %454 : vector<1x768xf32>
    %c0_155 = arith.constant 0 : index
    %c143_156 = arith.constant 143 : index
    %456 = vector.load %arg14[%c0_155, %c143_156] : memref<8x1024xf32, #tpu.memory_space<vmem>>, vector<2x768xf32>
    %cst_157 = arith.constant 0.000000e+00 : f32
    %457 = vector.shape_cast %395 : vector<1x768xi1> to vector<1x768xi1>
    %458 = vector.broadcast %457 : vector<1x768xi1> to vector<2x768xi1>
    %459 = vector.broadcast %cst_157 : f32 to vector<2x768xf32>
    %460 = arith.select %458, %456, %459 : vector<2x768xi1>, vector<2x768xf32>
    %c60 = arith.constant 60 : index
    %461 = memref.load %arg6[%c60] : memref<98xf32, #tpu.memory_space<smem>>
    %462 = vector.extract_strided_slice %460 {offsets = [0, 0], sizes = [1, 768], strides = [1, 1]} : vector<2x768xf32> to vector<1x768xf32>
    %463 = vector.broadcast %461 : f32 to vector<1x768xf32>
    %464 = arith.mulf %463, %462 : vector<1x768xf32>
    %465 = arith.addf %455, %464 : vector<1x768xf32>
    %c61 = arith.constant 61 : index
    %466 = memref.load %arg6[%c61] : memref<98xf32, #tpu.memory_space<smem>>
    %467 = vector.extract_strided_slice %460 {offsets = [1, 0], sizes = [1, 768], strides = [1, 1]} : vector<2x768xf32> to vector<1x768xf32>
    %468 = vector.broadcast %466 : f32 to vector<1x768xf32>
    %469 = arith.mulf %468, %467 : vector<1x768xf32>
    %470 = arith.addf %465, %469 : vector<1x768xf32>
    %c0_158 = arith.constant 0 : index
    %c159 = arith.constant 159 : index
    %471 = vector.load %arg14[%c0_158, %c159] : memref<8x1024xf32, #tpu.memory_space<vmem>>, vector<2x768xf32>
    %cst_159 = arith.constant 0.000000e+00 : f32
    %472 = vector.shape_cast %395 : vector<1x768xi1> to vector<1x768xi1>
    %473 = vector.broadcast %472 : vector<1x768xi1> to vector<2x768xi1>
    %474 = vector.broadcast %cst_159 : f32 to vector<2x768xf32>
    %475 = arith.select %473, %471, %474 : vector<2x768xi1>, vector<2x768xf32>
    %c74 = arith.constant 74 : index
    %476 = memref.load %arg6[%c74] : memref<98xf32, #tpu.memory_space<smem>>
    %477 = vector.extract_strided_slice %475 {offsets = [0, 0], sizes = [1, 768], strides = [1, 1]} : vector<2x768xf32> to vector<1x768xf32>
    %478 = vector.broadcast %476 : f32 to vector<1x768xf32>
    %479 = arith.mulf %478, %477 : vector<1x768xf32>
    %480 = arith.addf %470, %479 : vector<1x768xf32>
    %c75 = arith.constant 75 : index
    %481 = memref.load %arg6[%c75] : memref<98xf32, #tpu.memory_space<smem>>
    %482 = vector.extract_strided_slice %475 {offsets = [1, 0], sizes = [1, 768], strides = [1, 1]} : vector<2x768xf32> to vector<1x768xf32>
    %483 = vector.broadcast %481 : f32 to vector<1x768xf32>
    %484 = arith.mulf %483, %482 : vector<1x768xf32>
    %485 = arith.addf %480, %484 : vector<1x768xf32>
    %c0_160 = arith.constant 0 : index
    %c175 = arith.constant 175 : index
    %486 = vector.load %arg14[%c0_160, %c175] : memref<8x1024xf32, #tpu.memory_space<vmem>>, vector<2x768xf32>
    %cst_161 = arith.constant 0.000000e+00 : f32
    %487 = vector.shape_cast %395 : vector<1x768xi1> to vector<1x768xi1>
    %488 = vector.broadcast %487 : vector<1x768xi1> to vector<2x768xi1>
    %489 = vector.broadcast %cst_161 : f32 to vector<2x768xf32>
    %490 = arith.select %488, %486, %489 : vector<2x768xi1>, vector<2x768xf32>
    %c88 = arith.constant 88 : index
    %491 = memref.load %arg6[%c88] : memref<98xf32, #tpu.memory_space<smem>>
    %492 = vector.extract_strided_slice %490 {offsets = [0, 0], sizes = [1, 768], strides = [1, 1]} : vector<2x768xf32> to vector<1x768xf32>
    %493 = vector.broadcast %491 : f32 to vector<1x768xf32>
    %494 = arith.mulf %493, %492 : vector<1x768xf32>
    %495 = arith.addf %485, %494 : vector<1x768xf32>
    %c89 = arith.constant 89 : index
    %496 = memref.load %arg6[%c89] : memref<98xf32, #tpu.memory_space<smem>>
    %497 = vector.extract_strided_slice %490 {offsets = [1, 0], sizes = [1, 768], strides = [1, 1]} : vector<2x768xf32> to vector<1x768xf32>
    %498 = vector.broadcast %496 : f32 to vector<1x768xf32>
    %499 = arith.mulf %498, %497 : vector<1x768xf32>
    %500 = arith.addf %495, %499 : vector<1x768xf32>
    %c0_162 = arith.constant 0 : index
    %c80 = arith.constant 80 : index
    %501 = vector.load %arg14[%c0_162, %c80] : memref<8x1024xf32, #tpu.memory_space<vmem>>, vector<2x768xf32>
    %c6 = arith.constant 6 : index
    %502 = memref.load %arg6[%c6] : memref<98xf32, #tpu.memory_space<smem>>
    %503 = vector.extract_strided_slice %501 {offsets = [0, 0], sizes = [1, 768], strides = [1, 1]} : vector<2x768xf32> to vector<1x768xf32>
    %504 = vector.broadcast %502 : f32 to vector<1x768xf32>
    %505 = arith.mulf %504, %503 : vector<1x768xf32>
    %506 = arith.addf %500, %505 : vector<1x768xf32>
    %c7 = arith.constant 7 : index
    %507 = memref.load %arg6[%c7] : memref<98xf32, #tpu.memory_space<smem>>
    %508 = vector.extract_strided_slice %501 {offsets = [1, 0], sizes = [1, 768], strides = [1, 1]} : vector<2x768xf32> to vector<1x768xf32>
    %509 = vector.broadcast %507 : f32 to vector<1x768xf32>
    %510 = arith.mulf %509, %508 : vector<1x768xf32>
    %511 = arith.addf %506, %510 : vector<1x768xf32>
    %c0_163 = arith.constant 0 : index
    %c96_164 = arith.constant 96 : index
    %512 = vector.load %arg14[%c0_163, %c96_164] : memref<8x1024xf32, #tpu.memory_space<vmem>>, vector<2x768xf32>
    %c20 = arith.constant 20 : index
    %513 = memref.load %arg6[%c20] : memref<98xf32, #tpu.memory_space<smem>>
    %514 = vector.extract_strided_slice %512 {offsets = [0, 0], sizes = [1, 768], strides = [1, 1]} : vector<2x768xf32> to vector<1x768xf32>
    %515 = vector.broadcast %513 : f32 to vector<1x768xf32>
    %516 = arith.mulf %515, %514 : vector<1x768xf32>
    %517 = arith.addf %511, %516 : vector<1x768xf32>
    %c21 = arith.constant 21 : index
    %518 = memref.load %arg6[%c21] : memref<98xf32, #tpu.memory_space<smem>>
    %519 = vector.extract_strided_slice %512 {offsets = [1, 0], sizes = [1, 768], strides = [1, 1]} : vector<2x768xf32> to vector<1x768xf32>
    %520 = vector.broadcast %518 : f32 to vector<1x768xf32>
    %521 = arith.mulf %520, %519 : vector<1x768xf32>
    %522 = arith.addf %517, %521 : vector<1x768xf32>
    %c0_165 = arith.constant 0 : index
    %c112_166 = arith.constant 112 : index
    %523 = vector.load %arg14[%c0_165, %c112_166] : memref<8x1024xf32, #tpu.memory_space<vmem>>, vector<2x768xf32>
    %c34 = arith.constant 34 : index
    %524 = memref.load %arg6[%c34] : memref<98xf32, #tpu.memory_space<smem>>
    %525 = vector.extract_strided_slice %523 {offsets = [0, 0], sizes = [1, 768], strides = [1, 1]} : vector<2x768xf32> to vector<1x768xf32>
    %526 = vector.broadcast %524 : f32 to vector<1x768xf32>
    %527 = arith.mulf %526, %525 : vector<1x768xf32>
    %528 = arith.addf %522, %527 : vector<1x768xf32>
    %c35 = arith.constant 35 : index
    %529 = memref.load %arg6[%c35] : memref<98xf32, #tpu.memory_space<smem>>
    %530 = vector.extract_strided_slice %523 {offsets = [1, 0], sizes = [1, 768], strides = [1, 1]} : vector<2x768xf32> to vector<1x768xf32>
    %531 = vector.broadcast %529 : f32 to vector<1x768xf32>
    %532 = arith.mulf %531, %530 : vector<1x768xf32>
    %533 = arith.addf %528, %532 : vector<1x768xf32>
    %c0_167 = arith.constant 0 : index
    %c128_168 = arith.constant 128 : index
    %534 = vector.load %arg14[%c0_167, %c128_168] : memref<8x1024xf32, #tpu.memory_space<vmem>>, vector<2x768xf32>
    %c48_169 = arith.constant 48 : index
    %535 = memref.load %arg6[%c48_169] : memref<98xf32, #tpu.memory_space<smem>>
    %536 = vector.extract_strided_slice %534 {offsets = [0, 0], sizes = [1, 768], strides = [1, 1]} : vector<2x768xf32> to vector<1x768xf32>
    %537 = vector.broadcast %535 : f32 to vector<1x768xf32>
    %538 = arith.mulf %537, %536 : vector<1x768xf32>
    %539 = arith.addf %533, %538 : vector<1x768xf32>
    %c49 = arith.constant 49 : index
    %540 = memref.load %arg6[%c49] : memref<98xf32, #tpu.memory_space<smem>>
    %541 = vector.extract_strided_slice %534 {offsets = [1, 0], sizes = [1, 768], strides = [1, 1]} : vector<2x768xf32> to vector<1x768xf32>
    %542 = vector.broadcast %540 : f32 to vector<1x768xf32>
    %543 = arith.mulf %542, %541 : vector<1x768xf32>
    %544 = arith.addf %539, %543 : vector<1x768xf32>
    %c0_170 = arith.constant 0 : index
    %c144_171 = arith.constant 144 : index
    %545 = vector.load %arg14[%c0_170, %c144_171] : memref<8x1024xf32, #tpu.memory_space<vmem>>, vector<2x768xf32>
    %c62 = arith.constant 62 : index
    %546 = memref.load %arg6[%c62] : memref<98xf32, #tpu.memory_space<smem>>
    %547 = vector.extract_strided_slice %545 {offsets = [0, 0], sizes = [1, 768], strides = [1, 1]} : vector<2x768xf32> to vector<1x768xf32>
    %548 = vector.broadcast %546 : f32 to vector<1x768xf32>
    %549 = arith.mulf %548, %547 : vector<1x768xf32>
    %550 = arith.addf %544, %549 : vector<1x768xf32>
    %c63 = arith.constant 63 : index
    %551 = memref.load %arg6[%c63] : memref<98xf32, #tpu.memory_space<smem>>
    %552 = vector.extract_strided_slice %545 {offsets = [1, 0], sizes = [1, 768], strides = [1, 1]} : vector<2x768xf32> to vector<1x768xf32>
    %553 = vector.broadcast %551 : f32 to vector<1x768xf32>
    %554 = arith.mulf %553, %552 : vector<1x768xf32>
    %555 = arith.addf %550, %554 : vector<1x768xf32>
    %c0_172 = arith.constant 0 : index
    %c160_173 = arith.constant 160 : index
    %556 = vector.load %arg14[%c0_172, %c160_173] : memref<8x1024xf32, #tpu.memory_space<vmem>>, vector<2x768xf32>
    %c76 = arith.constant 76 : index
    %557 = memref.load %arg6[%c76] : memref<98xf32, #tpu.memory_space<smem>>
    %558 = vector.extract_strided_slice %556 {offsets = [0, 0], sizes = [1, 768], strides = [1, 1]} : vector<2x768xf32> to vector<1x768xf32>
    %559 = vector.broadcast %557 : f32 to vector<1x768xf32>
    %560 = arith.mulf %559, %558 : vector<1x768xf32>
    %561 = arith.addf %555, %560 : vector<1x768xf32>
    %c77_174 = arith.constant 77 : index
    %562 = memref.load %arg6[%c77_174] : memref<98xf32, #tpu.memory_space<smem>>
    %563 = vector.extract_strided_slice %556 {offsets = [1, 0], sizes = [1, 768], strides = [1, 1]} : vector<2x768xf32> to vector<1x768xf32>
    %564 = vector.broadcast %562 : f32 to vector<1x768xf32>
    %565 = arith.mulf %564, %563 : vector<1x768xf32>
    %566 = arith.addf %561, %565 : vector<1x768xf32>
    %c0_175 = arith.constant 0 : index
    %c176 = arith.constant 176 : index
    %567 = vector.load %arg14[%c0_175, %c176] : memref<8x1024xf32, #tpu.memory_space<vmem>>, vector<2x768xf32>
    %c90 = arith.constant 90 : index
    %568 = memref.load %arg6[%c90] : memref<98xf32, #tpu.memory_space<smem>>
    %569 = vector.extract_strided_slice %567 {offsets = [0, 0], sizes = [1, 768], strides = [1, 1]} : vector<2x768xf32> to vector<1x768xf32>
    %570 = vector.broadcast %568 : f32 to vector<1x768xf32>
    %571 = arith.mulf %570, %569 : vector<1x768xf32>
    %572 = arith.addf %566, %571 : vector<1x768xf32>
    %c91 = arith.constant 91 : index
    %573 = memref.load %arg6[%c91] : memref<98xf32, #tpu.memory_space<smem>>
    %574 = vector.extract_strided_slice %567 {offsets = [1, 0], sizes = [1, 768], strides = [1, 1]} : vector<2x768xf32> to vector<1x768xf32>
    %575 = vector.broadcast %573 : f32 to vector<1x768xf32>
    %576 = arith.mulf %575, %574 : vector<1x768xf32>
    %577 = arith.addf %572, %576 : vector<1x768xf32>
    %c-1_i32_176 = arith.constant -1 : i32
    %578 = vector.broadcast %c-1_i32_176 : i32 to vector<1x768xi32>
    %579 = arith.cmpi sge, %22, %578 : vector<1x768xi32>
    %c15_i32_177 = arith.constant 15 : i32
    %580 = vector.broadcast %c15_i32_177 : i32 to vector<1x768xi32>
    %581 = arith.cmpi slt, %22, %580 : vector<1x768xi32>
    %582 = arith.andi %579, %581 : vector<1x768xi1>
    %c0_178 = arith.constant 0 : index
    %c81 = arith.constant 81 : index
    %583 = vector.load %arg14[%c0_178, %c81] : memref<8x1024xf32, #tpu.memory_space<vmem>>, vector<2x768xf32>
    %cst_179 = arith.constant 0.000000e+00 : f32
    %584 = vector.shape_cast %582 : vector<1x768xi1> to vector<1x768xi1>
    %585 = vector.broadcast %584 : vector<1x768xi1> to vector<2x768xi1>
    %586 = vector.broadcast %cst_179 : f32 to vector<2x768xf32>
    %587 = arith.select %585, %583, %586 : vector<2x768xi1>, vector<2x768xf32>
    %c8_180 = arith.constant 8 : index
    %588 = memref.load %arg6[%c8_180] : memref<98xf32, #tpu.memory_space<smem>>
    %589 = vector.extract_strided_slice %587 {offsets = [0, 0], sizes = [1, 768], strides = [1, 1]} : vector<2x768xf32> to vector<1x768xf32>
    %590 = vector.broadcast %588 : f32 to vector<1x768xf32>
    %591 = arith.mulf %590, %589 : vector<1x768xf32>
    %592 = arith.addf %577, %591 : vector<1x768xf32>
    %c9 = arith.constant 9 : index
    %593 = memref.load %arg6[%c9] : memref<98xf32, #tpu.memory_space<smem>>
    %594 = vector.extract_strided_slice %587 {offsets = [1, 0], sizes = [1, 768], strides = [1, 1]} : vector<2x768xf32> to vector<1x768xf32>
    %595 = vector.broadcast %593 : f32 to vector<1x768xf32>
    %596 = arith.mulf %595, %594 : vector<1x768xf32>
    %597 = arith.addf %592, %596 : vector<1x768xf32>
    %c0_181 = arith.constant 0 : index
    %c97 = arith.constant 97 : index
    %598 = vector.load %arg14[%c0_181, %c97] : memref<8x1024xf32, #tpu.memory_space<vmem>>, vector<2x768xf32>
    %cst_182 = arith.constant 0.000000e+00 : f32
    %599 = vector.shape_cast %582 : vector<1x768xi1> to vector<1x768xi1>
    %600 = vector.broadcast %599 : vector<1x768xi1> to vector<2x768xi1>
    %601 = vector.broadcast %cst_182 : f32 to vector<2x768xf32>
    %602 = arith.select %600, %598, %601 : vector<2x768xi1>, vector<2x768xf32>
    %c22 = arith.constant 22 : index
    %603 = memref.load %arg6[%c22] : memref<98xf32, #tpu.memory_space<smem>>
    %604 = vector.extract_strided_slice %602 {offsets = [0, 0], sizes = [1, 768], strides = [1, 1]} : vector<2x768xf32> to vector<1x768xf32>
    %605 = vector.broadcast %603 : f32 to vector<1x768xf32>
    %606 = arith.mulf %605, %604 : vector<1x768xf32>
    %607 = arith.addf %597, %606 : vector<1x768xf32>
    %c23 = arith.constant 23 : index
    %608 = memref.load %arg6[%c23] : memref<98xf32, #tpu.memory_space<smem>>
    %609 = vector.extract_strided_slice %602 {offsets = [1, 0], sizes = [1, 768], strides = [1, 1]} : vector<2x768xf32> to vector<1x768xf32>
    %610 = vector.broadcast %608 : f32 to vector<1x768xf32>
    %611 = arith.mulf %610, %609 : vector<1x768xf32>
    %612 = arith.addf %607, %611 : vector<1x768xf32>
    %c0_183 = arith.constant 0 : index
    %c113_184 = arith.constant 113 : index
    %613 = vector.load %arg14[%c0_183, %c113_184] : memref<8x1024xf32, #tpu.memory_space<vmem>>, vector<2x768xf32>
    %cst_185 = arith.constant 0.000000e+00 : f32
    %614 = vector.shape_cast %582 : vector<1x768xi1> to vector<1x768xi1>
    %615 = vector.broadcast %614 : vector<1x768xi1> to vector<2x768xi1>
    %616 = vector.broadcast %cst_185 : f32 to vector<2x768xf32>
    %617 = arith.select %615, %613, %616 : vector<2x768xi1>, vector<2x768xf32>
    %c36 = arith.constant 36 : index
    %618 = memref.load %arg6[%c36] : memref<98xf32, #tpu.memory_space<smem>>
    %619 = vector.extract_strided_slice %617 {offsets = [0, 0], sizes = [1, 768], strides = [1, 1]} : vector<2x768xf32> to vector<1x768xf32>
    %620 = vector.broadcast %618 : f32 to vector<1x768xf32>
    %621 = arith.mulf %620, %619 : vector<1x768xf32>
    %622 = arith.addf %612, %621 : vector<1x768xf32>
    %c37 = arith.constant 37 : index
    %623 = memref.load %arg6[%c37] : memref<98xf32, #tpu.memory_space<smem>>
    %624 = vector.extract_strided_slice %617 {offsets = [1, 0], sizes = [1, 768], strides = [1, 1]} : vector<2x768xf32> to vector<1x768xf32>
    %625 = vector.broadcast %623 : f32 to vector<1x768xf32>
    %626 = arith.mulf %625, %624 : vector<1x768xf32>
    %627 = arith.addf %622, %626 : vector<1x768xf32>
    %c0_186 = arith.constant 0 : index
    %c129_187 = arith.constant 129 : index
    %628 = vector.load %arg14[%c0_186, %c129_187] : memref<8x1024xf32, #tpu.memory_space<vmem>>, vector<2x768xf32>
    %cst_188 = arith.constant 0.000000e+00 : f32
    %629 = vector.shape_cast %582 : vector<1x768xi1> to vector<1x768xi1>
    %630 = vector.broadcast %629 : vector<1x768xi1> to vector<2x768xi1>
    %631 = vector.broadcast %cst_188 : f32 to vector<2x768xf32>
    %632 = arith.select %630, %628, %631 : vector<2x768xi1>, vector<2x768xf32>
    %c50 = arith.constant 50 : index
    %633 = memref.load %arg6[%c50] : memref<98xf32, #tpu.memory_space<smem>>
    %634 = vector.extract_strided_slice %632 {offsets = [0, 0], sizes = [1, 768], strides = [1, 1]} : vector<2x768xf32> to vector<1x768xf32>
    %635 = vector.broadcast %633 : f32 to vector<1x768xf32>
    %636 = arith.mulf %635, %634 : vector<1x768xf32>
    %637 = arith.addf %627, %636 : vector<1x768xf32>
    %c51 = arith.constant 51 : index
    %638 = memref.load %arg6[%c51] : memref<98xf32, #tpu.memory_space<smem>>
    %639 = vector.extract_strided_slice %632 {offsets = [1, 0], sizes = [1, 768], strides = [1, 1]} : vector<2x768xf32> to vector<1x768xf32>
    %640 = vector.broadcast %638 : f32 to vector<1x768xf32>
    %641 = arith.mulf %640, %639 : vector<1x768xf32>
    %642 = arith.addf %637, %641 : vector<1x768xf32>
    %c0_189 = arith.constant 0 : index
    %c145_190 = arith.constant 145 : index
    %643 = vector.load %arg14[%c0_189, %c145_190] : memref<8x1024xf32, #tpu.memory_space<vmem>>, vector<2x768xf32>
    %cst_191 = arith.constant 0.000000e+00 : f32
    %644 = vector.shape_cast %582 : vector<1x768xi1> to vector<1x768xi1>
    %645 = vector.broadcast %644 : vector<1x768xi1> to vector<2x768xi1>
    %646 = vector.broadcast %cst_191 : f32 to vector<2x768xf32>
    %647 = arith.select %645, %643, %646 : vector<2x768xi1>, vector<2x768xf32>
    %c64_192 = arith.constant 64 : index
    %648 = memref.load %arg6[%c64_192] : memref<98xf32, #tpu.memory_space<smem>>
    %649 = vector.extract_strided_slice %647 {offsets = [0, 0], sizes = [1, 768], strides = [1, 1]} : vector<2x768xf32> to vector<1x768xf32>
    %650 = vector.broadcast %648 : f32 to vector<1x768xf32>
    %651 = arith.mulf %650, %649 : vector<1x768xf32>
    %652 = arith.addf %642, %651 : vector<1x768xf32>
    %c65 = arith.constant 65 : index
    %653 = memref.load %arg6[%c65] : memref<98xf32, #tpu.memory_space<smem>>
    %654 = vector.extract_strided_slice %647 {offsets = [1, 0], sizes = [1, 768], strides = [1, 1]} : vector<2x768xf32> to vector<1x768xf32>
    %655 = vector.broadcast %653 : f32 to vector<1x768xf32>
    %656 = arith.mulf %655, %654 : vector<1x768xf32>
    %657 = arith.addf %652, %656 : vector<1x768xf32>
    %c0_193 = arith.constant 0 : index
    %c161 = arith.constant 161 : index
    %658 = vector.load %arg14[%c0_193, %c161] : memref<8x1024xf32, #tpu.memory_space<vmem>>, vector<2x768xf32>
    %cst_194 = arith.constant 0.000000e+00 : f32
    %659 = vector.shape_cast %582 : vector<1x768xi1> to vector<1x768xi1>
    %660 = vector.broadcast %659 : vector<1x768xi1> to vector<2x768xi1>
    %661 = vector.broadcast %cst_194 : f32 to vector<2x768xf32>
    %662 = arith.select %660, %658, %661 : vector<2x768xi1>, vector<2x768xf32>
    %c78_195 = arith.constant 78 : index
    %663 = memref.load %arg6[%c78_195] : memref<98xf32, #tpu.memory_space<smem>>
    %664 = vector.extract_strided_slice %662 {offsets = [0, 0], sizes = [1, 768], strides = [1, 1]} : vector<2x768xf32> to vector<1x768xf32>
    %665 = vector.broadcast %663 : f32 to vector<1x768xf32>
    %666 = arith.mulf %665, %664 : vector<1x768xf32>
    %667 = arith.addf %657, %666 : vector<1x768xf32>
    %c79_196 = arith.constant 79 : index
    %668 = memref.load %arg6[%c79_196] : memref<98xf32, #tpu.memory_space<smem>>
    %669 = vector.extract_strided_slice %662 {offsets = [1, 0], sizes = [1, 768], strides = [1, 1]} : vector<2x768xf32> to vector<1x768xf32>
    %670 = vector.broadcast %668 : f32 to vector<1x768xf32>
    %671 = arith.mulf %670, %669 : vector<1x768xf32>
    %672 = arith.addf %667, %671 : vector<1x768xf32>
    %c0_197 = arith.constant 0 : index
    %c177 = arith.constant 177 : index
    %673 = vector.load %arg14[%c0_197, %c177] : memref<8x1024xf32, #tpu.memory_space<vmem>>, vector<2x768xf32>
    %cst_198 = arith.constant 0.000000e+00 : f32
    %674 = vector.shape_cast %582 : vector<1x768xi1> to vector<1x768xi1>
    %675 = vector.broadcast %674 : vector<1x768xi1> to vector<2x768xi1>
    %676 = vector.broadcast %cst_198 : f32 to vector<2x768xf32>
    %677 = arith.select %675, %673, %676 : vector<2x768xi1>, vector<2x768xf32>
    %c92 = arith.constant 92 : index
    %678 = memref.load %arg6[%c92] : memref<98xf32, #tpu.memory_space<smem>>
    %679 = vector.extract_strided_slice %677 {offsets = [0, 0], sizes = [1, 768], strides = [1, 1]} : vector<2x768xf32> to vector<1x768xf32>
    %680 = vector.broadcast %678 : f32 to vector<1x768xf32>
    %681 = arith.mulf %680, %679 : vector<1x768xf32>
    %682 = arith.addf %672, %681 : vector<1x768xf32>
    %c93_199 = arith.constant 93 : index
    %683 = memref.load %arg6[%c93_199] : memref<98xf32, #tpu.memory_space<smem>>
    %684 = vector.extract_strided_slice %677 {offsets = [1, 0], sizes = [1, 768], strides = [1, 1]} : vector<2x768xf32> to vector<1x768xf32>
    %685 = vector.broadcast %683 : f32 to vector<1x768xf32>
    %686 = arith.mulf %685, %684 : vector<1x768xf32>
    %687 = arith.addf %682, %686 : vector<1x768xf32>
    %c-2_i32_200 = arith.constant -2 : i32
    %688 = vector.broadcast %c-2_i32_200 : i32 to vector<1x768xi32>
    %689 = arith.cmpi sge, %22, %688 : vector<1x768xi32>
    %c14_i32_201 = arith.constant 14 : i32
    %690 = vector.broadcast %c14_i32_201 : i32 to vector<1x768xi32>
    %691 = arith.cmpi slt, %22, %690 : vector<1x768xi32>
    %692 = arith.andi %689, %691 : vector<1x768xi1>
    %c0_202 = arith.constant 0 : index
    %c82 = arith.constant 82 : index
    %693 = vector.load %arg14[%c0_202, %c82] : memref<8x1024xf32, #tpu.memory_space<vmem>>, vector<2x768xf32>
    %cst_203 = arith.constant 0.000000e+00 : f32
    %694 = vector.shape_cast %692 : vector<1x768xi1> to vector<1x768xi1>
    %695 = vector.broadcast %694 : vector<1x768xi1> to vector<2x768xi1>
    %696 = vector.broadcast %cst_203 : f32 to vector<2x768xf32>
    %697 = arith.select %695, %693, %696 : vector<2x768xi1>, vector<2x768xf32>
    %c10 = arith.constant 10 : index
    %698 = memref.load %arg6[%c10] : memref<98xf32, #tpu.memory_space<smem>>
    %699 = vector.extract_strided_slice %697 {offsets = [0, 0], sizes = [1, 768], strides = [1, 1]} : vector<2x768xf32> to vector<1x768xf32>
    %700 = vector.broadcast %698 : f32 to vector<1x768xf32>
    %701 = arith.mulf %700, %699 : vector<1x768xf32>
    %702 = arith.addf %687, %701 : vector<1x768xf32>
    %c11 = arith.constant 11 : index
    %703 = memref.load %arg6[%c11] : memref<98xf32, #tpu.memory_space<smem>>
    %704 = vector.extract_strided_slice %697 {offsets = [1, 0], sizes = [1, 768], strides = [1, 1]} : vector<2x768xf32> to vector<1x768xf32>
    %705 = vector.broadcast %703 : f32 to vector<1x768xf32>
    %706 = arith.mulf %705, %704 : vector<1x768xf32>
    %707 = arith.addf %702, %706 : vector<1x768xf32>
    %c0_204 = arith.constant 0 : index
    %c98_205 = arith.constant 98 : index
    %708 = vector.load %arg14[%c0_204, %c98_205] : memref<8x1024xf32, #tpu.memory_space<vmem>>, vector<2x768xf32>
    %cst_206 = arith.constant 0.000000e+00 : f32
    %709 = vector.shape_cast %692 : vector<1x768xi1> to vector<1x768xi1>
    %710 = vector.broadcast %709 : vector<1x768xi1> to vector<2x768xi1>
    %711 = vector.broadcast %cst_206 : f32 to vector<2x768xf32>
    %712 = arith.select %710, %708, %711 : vector<2x768xi1>, vector<2x768xf32>
    %c24_207 = arith.constant 24 : index
    %713 = memref.load %arg6[%c24_207] : memref<98xf32, #tpu.memory_space<smem>>
    %714 = vector.extract_strided_slice %712 {offsets = [0, 0], sizes = [1, 768], strides = [1, 1]} : vector<2x768xf32> to vector<1x768xf32>
    %715 = vector.broadcast %713 : f32 to vector<1x768xf32>
    %716 = arith.mulf %715, %714 : vector<1x768xf32>
    %717 = arith.addf %707, %716 : vector<1x768xf32>
    %c25 = arith.constant 25 : index
    %718 = memref.load %arg6[%c25] : memref<98xf32, #tpu.memory_space<smem>>
    %719 = vector.extract_strided_slice %712 {offsets = [1, 0], sizes = [1, 768], strides = [1, 1]} : vector<2x768xf32> to vector<1x768xf32>
    %720 = vector.broadcast %718 : f32 to vector<1x768xf32>
    %721 = arith.mulf %720, %719 : vector<1x768xf32>
    %722 = arith.addf %717, %721 : vector<1x768xf32>
    %c0_208 = arith.constant 0 : index
    %c114 = arith.constant 114 : index
    %723 = vector.load %arg14[%c0_208, %c114] : memref<8x1024xf32, #tpu.memory_space<vmem>>, vector<2x768xf32>
    %cst_209 = arith.constant 0.000000e+00 : f32
    %724 = vector.shape_cast %692 : vector<1x768xi1> to vector<1x768xi1>
    %725 = vector.broadcast %724 : vector<1x768xi1> to vector<2x768xi1>
    %726 = vector.broadcast %cst_209 : f32 to vector<2x768xf32>
    %727 = arith.select %725, %723, %726 : vector<2x768xi1>, vector<2x768xf32>
    %c38 = arith.constant 38 : index
    %728 = memref.load %arg6[%c38] : memref<98xf32, #tpu.memory_space<smem>>
    %729 = vector.extract_strided_slice %727 {offsets = [0, 0], sizes = [1, 768], strides = [1, 1]} : vector<2x768xf32> to vector<1x768xf32>
    %730 = vector.broadcast %728 : f32 to vector<1x768xf32>
    %731 = arith.mulf %730, %729 : vector<1x768xf32>
    %732 = arith.addf %722, %731 : vector<1x768xf32>
    %c39 = arith.constant 39 : index
    %733 = memref.load %arg6[%c39] : memref<98xf32, #tpu.memory_space<smem>>
    %734 = vector.extract_strided_slice %727 {offsets = [1, 0], sizes = [1, 768], strides = [1, 1]} : vector<2x768xf32> to vector<1x768xf32>
    %735 = vector.broadcast %733 : f32 to vector<1x768xf32>
    %736 = arith.mulf %735, %734 : vector<1x768xf32>
    %737 = arith.addf %732, %736 : vector<1x768xf32>
    %c0_210 = arith.constant 0 : index
    %c130_211 = arith.constant 130 : index
    %738 = vector.load %arg14[%c0_210, %c130_211] : memref<8x1024xf32, #tpu.memory_space<vmem>>, vector<2x768xf32>
    %cst_212 = arith.constant 0.000000e+00 : f32
    %739 = vector.shape_cast %692 : vector<1x768xi1> to vector<1x768xi1>
    %740 = vector.broadcast %739 : vector<1x768xi1> to vector<2x768xi1>
    %741 = vector.broadcast %cst_212 : f32 to vector<2x768xf32>
    %742 = arith.select %740, %738, %741 : vector<2x768xi1>, vector<2x768xf32>
    %c52 = arith.constant 52 : index
    %743 = memref.load %arg6[%c52] : memref<98xf32, #tpu.memory_space<smem>>
    %744 = vector.extract_strided_slice %742 {offsets = [0, 0], sizes = [1, 768], strides = [1, 1]} : vector<2x768xf32> to vector<1x768xf32>
    %745 = vector.broadcast %743 : f32 to vector<1x768xf32>
    %746 = arith.mulf %745, %744 : vector<1x768xf32>
    %747 = arith.addf %737, %746 : vector<1x768xf32>
    %c53 = arith.constant 53 : index
    %748 = memref.load %arg6[%c53] : memref<98xf32, #tpu.memory_space<smem>>
    %749 = vector.extract_strided_slice %742 {offsets = [1, 0], sizes = [1, 768], strides = [1, 1]} : vector<2x768xf32> to vector<1x768xf32>
    %750 = vector.broadcast %748 : f32 to vector<1x768xf32>
    %751 = arith.mulf %750, %749 : vector<1x768xf32>
    %752 = arith.addf %747, %751 : vector<1x768xf32>
    %c0_213 = arith.constant 0 : index
    %c146 = arith.constant 146 : index
    %753 = vector.load %arg14[%c0_213, %c146] : memref<8x1024xf32, #tpu.memory_space<vmem>>, vector<2x768xf32>
    %cst_214 = arith.constant 0.000000e+00 : f32
    %754 = vector.shape_cast %692 : vector<1x768xi1> to vector<1x768xi1>
    %755 = vector.broadcast %754 : vector<1x768xi1> to vector<2x768xi1>
    %756 = vector.broadcast %cst_214 : f32 to vector<2x768xf32>
    %757 = arith.select %755, %753, %756 : vector<2x768xi1>, vector<2x768xf32>
    %c66 = arith.constant 66 : index
    %758 = memref.load %arg6[%c66] : memref<98xf32, #tpu.memory_space<smem>>
    %759 = vector.extract_strided_slice %757 {offsets = [0, 0], sizes = [1, 768], strides = [1, 1]} : vector<2x768xf32> to vector<1x768xf32>
    %760 = vector.broadcast %758 : f32 to vector<1x768xf32>
    %761 = arith.mulf %760, %759 : vector<1x768xf32>
    %762 = arith.addf %752, %761 : vector<1x768xf32>
    %c67 = arith.constant 67 : index
    %763 = memref.load %arg6[%c67] : memref<98xf32, #tpu.memory_space<smem>>
    %764 = vector.extract_strided_slice %757 {offsets = [1, 0], sizes = [1, 768], strides = [1, 1]} : vector<2x768xf32> to vector<1x768xf32>
    %765 = vector.broadcast %763 : f32 to vector<1x768xf32>
    %766 = arith.mulf %765, %764 : vector<1x768xf32>
    %767 = arith.addf %762, %766 : vector<1x768xf32>
    %c0_215 = arith.constant 0 : index
    %c162_216 = arith.constant 162 : index
    %768 = vector.load %arg14[%c0_215, %c162_216] : memref<8x1024xf32, #tpu.memory_space<vmem>>, vector<2x768xf32>
    %cst_217 = arith.constant 0.000000e+00 : f32
    %769 = vector.shape_cast %692 : vector<1x768xi1> to vector<1x768xi1>
    %770 = vector.broadcast %769 : vector<1x768xi1> to vector<2x768xi1>
    %771 = vector.broadcast %cst_217 : f32 to vector<2x768xf32>
    %772 = arith.select %770, %768, %771 : vector<2x768xi1>, vector<2x768xf32>
    %c80_218 = arith.constant 80 : index
    %773 = memref.load %arg6[%c80_218] : memref<98xf32, #tpu.memory_space<smem>>
    %774 = vector.extract_strided_slice %772 {offsets = [0, 0], sizes = [1, 768], strides = [1, 1]} : vector<2x768xf32> to vector<1x768xf32>
    %775 = vector.broadcast %773 : f32 to vector<1x768xf32>
    %776 = arith.mulf %775, %774 : vector<1x768xf32>
    %777 = arith.addf %767, %776 : vector<1x768xf32>
    %c81_219 = arith.constant 81 : index
    %778 = memref.load %arg6[%c81_219] : memref<98xf32, #tpu.memory_space<smem>>
    %779 = vector.extract_strided_slice %772 {offsets = [1, 0], sizes = [1, 768], strides = [1, 1]} : vector<2x768xf32> to vector<1x768xf32>
    %780 = vector.broadcast %778 : f32 to vector<1x768xf32>
    %781 = arith.mulf %780, %779 : vector<1x768xf32>
    %782 = arith.addf %777, %781 : vector<1x768xf32>
    %c0_220 = arith.constant 0 : index
    %c178 = arith.constant 178 : index
    %783 = vector.load %arg14[%c0_220, %c178] : memref<8x1024xf32, #tpu.memory_space<vmem>>, vector<2x768xf32>
    %cst_221 = arith.constant 0.000000e+00 : f32
    %784 = vector.shape_cast %692 : vector<1x768xi1> to vector<1x768xi1>
    %785 = vector.broadcast %784 : vector<1x768xi1> to vector<2x768xi1>
    %786 = vector.broadcast %cst_221 : f32 to vector<2x768xf32>
    %787 = arith.select %785, %783, %786 : vector<2x768xi1>, vector<2x768xf32>
    %c94_222 = arith.constant 94 : index
    %788 = memref.load %arg6[%c94_222] : memref<98xf32, #tpu.memory_space<smem>>
    %789 = vector.extract_strided_slice %787 {offsets = [0, 0], sizes = [1, 768], strides = [1, 1]} : vector<2x768xf32> to vector<1x768xf32>
    %790 = vector.broadcast %788 : f32 to vector<1x768xf32>
    %791 = arith.mulf %790, %789 : vector<1x768xf32>
    %792 = arith.addf %782, %791 : vector<1x768xf32>
    %c95_223 = arith.constant 95 : index
    %793 = memref.load %arg6[%c95_223] : memref<98xf32, #tpu.memory_space<smem>>
    %794 = vector.extract_strided_slice %787 {offsets = [1, 0], sizes = [1, 768], strides = [1, 1]} : vector<2x768xf32> to vector<1x768xf32>
    %795 = vector.broadcast %793 : f32 to vector<1x768xf32>
    %796 = arith.mulf %795, %794 : vector<1x768xf32>
    %797 = arith.addf %792, %796 : vector<1x768xf32>
    %c-3_i32 = arith.constant -3 : i32
    %798 = vector.broadcast %c-3_i32 : i32 to vector<1x768xi32>
    %799 = arith.cmpi sge, %22, %798 : vector<1x768xi32>
    %c13_i32 = arith.constant 13 : i32
    %800 = vector.broadcast %c13_i32 : i32 to vector<1x768xi32>
    %801 = arith.cmpi slt, %22, %800 : vector<1x768xi32>
    %802 = arith.andi %799, %801 : vector<1x768xi1>
    %c0_224 = arith.constant 0 : index
    %c83 = arith.constant 83 : index
    %803 = vector.load %arg14[%c0_224, %c83] : memref<8x1024xf32, #tpu.memory_space<vmem>>, vector<2x768xf32>
    %cst_225 = arith.constant 0.000000e+00 : f32
    %804 = vector.shape_cast %802 : vector<1x768xi1> to vector<1x768xi1>
    %805 = vector.broadcast %804 : vector<1x768xi1> to vector<2x768xi1>
    %806 = vector.broadcast %cst_225 : f32 to vector<2x768xf32>
    %807 = arith.select %805, %803, %806 : vector<2x768xi1>, vector<2x768xf32>
    %c12 = arith.constant 12 : index
    %808 = memref.load %arg6[%c12] : memref<98xf32, #tpu.memory_space<smem>>
    %809 = vector.extract_strided_slice %807 {offsets = [0, 0], sizes = [1, 768], strides = [1, 1]} : vector<2x768xf32> to vector<1x768xf32>
    %810 = vector.broadcast %808 : f32 to vector<1x768xf32>
    %811 = arith.mulf %810, %809 : vector<1x768xf32>
    %812 = arith.addf %797, %811 : vector<1x768xf32>
    %c13 = arith.constant 13 : index
    %813 = memref.load %arg6[%c13] : memref<98xf32, #tpu.memory_space<smem>>
    %814 = vector.extract_strided_slice %807 {offsets = [1, 0], sizes = [1, 768], strides = [1, 1]} : vector<2x768xf32> to vector<1x768xf32>
    %815 = vector.broadcast %813 : f32 to vector<1x768xf32>
    %816 = arith.mulf %815, %814 : vector<1x768xf32>
    %817 = arith.addf %812, %816 : vector<1x768xf32>
    %c0_226 = arith.constant 0 : index
    %c99 = arith.constant 99 : index
    %818 = vector.load %arg14[%c0_226, %c99] : memref<8x1024xf32, #tpu.memory_space<vmem>>, vector<2x768xf32>
    %cst_227 = arith.constant 0.000000e+00 : f32
    %819 = vector.shape_cast %802 : vector<1x768xi1> to vector<1x768xi1>
    %820 = vector.broadcast %819 : vector<1x768xi1> to vector<2x768xi1>
    %821 = vector.broadcast %cst_227 : f32 to vector<2x768xf32>
    %822 = arith.select %820, %818, %821 : vector<2x768xi1>, vector<2x768xf32>
    %c26 = arith.constant 26 : index
    %823 = memref.load %arg6[%c26] : memref<98xf32, #tpu.memory_space<smem>>
    %824 = vector.extract_strided_slice %822 {offsets = [0, 0], sizes = [1, 768], strides = [1, 1]} : vector<2x768xf32> to vector<1x768xf32>
    %825 = vector.broadcast %823 : f32 to vector<1x768xf32>
    %826 = arith.mulf %825, %824 : vector<1x768xf32>
    %827 = arith.addf %817, %826 : vector<1x768xf32>
    %c27 = arith.constant 27 : index
    %828 = memref.load %arg6[%c27] : memref<98xf32, #tpu.memory_space<smem>>
    %829 = vector.extract_strided_slice %822 {offsets = [1, 0], sizes = [1, 768], strides = [1, 1]} : vector<2x768xf32> to vector<1x768xf32>
    %830 = vector.broadcast %828 : f32 to vector<1x768xf32>
    %831 = arith.mulf %830, %829 : vector<1x768xf32>
    %832 = arith.addf %827, %831 : vector<1x768xf32>
    %c0_228 = arith.constant 0 : index
    %c115 = arith.constant 115 : index
    %833 = vector.load %arg14[%c0_228, %c115] : memref<8x1024xf32, #tpu.memory_space<vmem>>, vector<2x768xf32>
    %cst_229 = arith.constant 0.000000e+00 : f32
    %834 = vector.shape_cast %802 : vector<1x768xi1> to vector<1x768xi1>
    %835 = vector.broadcast %834 : vector<1x768xi1> to vector<2x768xi1>
    %836 = vector.broadcast %cst_229 : f32 to vector<2x768xf32>
    %837 = arith.select %835, %833, %836 : vector<2x768xi1>, vector<2x768xf32>
    %c40_230 = arith.constant 40 : index
    %838 = memref.load %arg6[%c40_230] : memref<98xf32, #tpu.memory_space<smem>>
    %839 = vector.extract_strided_slice %837 {offsets = [0, 0], sizes = [1, 768], strides = [1, 1]} : vector<2x768xf32> to vector<1x768xf32>
    %840 = vector.broadcast %838 : f32 to vector<1x768xf32>
    %841 = arith.mulf %840, %839 : vector<1x768xf32>
    %842 = arith.addf %832, %841 : vector<1x768xf32>
    %c41 = arith.constant 41 : index
    %843 = memref.load %arg6[%c41] : memref<98xf32, #tpu.memory_space<smem>>
    %844 = vector.extract_strided_slice %837 {offsets = [1, 0], sizes = [1, 768], strides = [1, 1]} : vector<2x768xf32> to vector<1x768xf32>
    %845 = vector.broadcast %843 : f32 to vector<1x768xf32>
    %846 = arith.mulf %845, %844 : vector<1x768xf32>
    %847 = arith.addf %842, %846 : vector<1x768xf32>
    %c0_231 = arith.constant 0 : index
    %c131 = arith.constant 131 : index
    %848 = vector.load %arg14[%c0_231, %c131] : memref<8x1024xf32, #tpu.memory_space<vmem>>, vector<2x768xf32>
    %cst_232 = arith.constant 0.000000e+00 : f32
    %849 = vector.shape_cast %802 : vector<1x768xi1> to vector<1x768xi1>
    %850 = vector.broadcast %849 : vector<1x768xi1> to vector<2x768xi1>
    %851 = vector.broadcast %cst_232 : f32 to vector<2x768xf32>
    %852 = arith.select %850, %848, %851 : vector<2x768xi1>, vector<2x768xf32>
    %c54 = arith.constant 54 : index
    %853 = memref.load %arg6[%c54] : memref<98xf32, #tpu.memory_space<smem>>
    %854 = vector.extract_strided_slice %852 {offsets = [0, 0], sizes = [1, 768], strides = [1, 1]} : vector<2x768xf32> to vector<1x768xf32>
    %855 = vector.broadcast %853 : f32 to vector<1x768xf32>
    %856 = arith.mulf %855, %854 : vector<1x768xf32>
    %857 = arith.addf %847, %856 : vector<1x768xf32>
    %c55 = arith.constant 55 : index
    %858 = memref.load %arg6[%c55] : memref<98xf32, #tpu.memory_space<smem>>
    %859 = vector.extract_strided_slice %852 {offsets = [1, 0], sizes = [1, 768], strides = [1, 1]} : vector<2x768xf32> to vector<1x768xf32>
    %860 = vector.broadcast %858 : f32 to vector<1x768xf32>
    %861 = arith.mulf %860, %859 : vector<1x768xf32>
    %862 = arith.addf %857, %861 : vector<1x768xf32>
    %c0_233 = arith.constant 0 : index
    %c147 = arith.constant 147 : index
    %863 = vector.load %arg14[%c0_233, %c147] : memref<8x1024xf32, #tpu.memory_space<vmem>>, vector<2x768xf32>
    %cst_234 = arith.constant 0.000000e+00 : f32
    %864 = vector.shape_cast %802 : vector<1x768xi1> to vector<1x768xi1>
    %865 = vector.broadcast %864 : vector<1x768xi1> to vector<2x768xi1>
    %866 = vector.broadcast %cst_234 : f32 to vector<2x768xf32>
    %867 = arith.select %865, %863, %866 : vector<2x768xi1>, vector<2x768xf32>
    %c68 = arith.constant 68 : index
    %868 = memref.load %arg6[%c68] : memref<98xf32, #tpu.memory_space<smem>>
    %869 = vector.extract_strided_slice %867 {offsets = [0, 0], sizes = [1, 768], strides = [1, 1]} : vector<2x768xf32> to vector<1x768xf32>
    %870 = vector.broadcast %868 : f32 to vector<1x768xf32>
    %871 = arith.mulf %870, %869 : vector<1x768xf32>
    %872 = arith.addf %862, %871 : vector<1x768xf32>
    %c69 = arith.constant 69 : index
    %873 = memref.load %arg6[%c69] : memref<98xf32, #tpu.memory_space<smem>>
    %874 = vector.extract_strided_slice %867 {offsets = [1, 0], sizes = [1, 768], strides = [1, 1]} : vector<2x768xf32> to vector<1x768xf32>
    %875 = vector.broadcast %873 : f32 to vector<1x768xf32>
    %876 = arith.mulf %875, %874 : vector<1x768xf32>
    %877 = arith.addf %872, %876 : vector<1x768xf32>
    %c0_235 = arith.constant 0 : index
    %c163 = arith.constant 163 : index
    %878 = vector.load %arg14[%c0_235, %c163] : memref<8x1024xf32, #tpu.memory_space<vmem>>, vector<2x768xf32>
    %cst_236 = arith.constant 0.000000e+00 : f32
    %879 = vector.shape_cast %802 : vector<1x768xi1> to vector<1x768xi1>
    %880 = vector.broadcast %879 : vector<1x768xi1> to vector<2x768xi1>
    %881 = vector.broadcast %cst_236 : f32 to vector<2x768xf32>
    %882 = arith.select %880, %878, %881 : vector<2x768xi1>, vector<2x768xf32>
    %c82_237 = arith.constant 82 : index
    %883 = memref.load %arg6[%c82_237] : memref<98xf32, #tpu.memory_space<smem>>
    %884 = vector.extract_strided_slice %882 {offsets = [0, 0], sizes = [1, 768], strides = [1, 1]} : vector<2x768xf32> to vector<1x768xf32>
    %885 = vector.broadcast %883 : f32 to vector<1x768xf32>
    %886 = arith.mulf %885, %884 : vector<1x768xf32>
    %887 = arith.addf %877, %886 : vector<1x768xf32>
    %c83_238 = arith.constant 83 : index
    %888 = memref.load %arg6[%c83_238] : memref<98xf32, #tpu.memory_space<smem>>
    %889 = vector.extract_strided_slice %882 {offsets = [1, 0], sizes = [1, 768], strides = [1, 1]} : vector<2x768xf32> to vector<1x768xf32>
    %890 = vector.broadcast %888 : f32 to vector<1x768xf32>
    %891 = arith.mulf %890, %889 : vector<1x768xf32>
    %892 = arith.addf %887, %891 : vector<1x768xf32>
    %c0_239 = arith.constant 0 : index
    %c179 = arith.constant 179 : index
    %893 = vector.load %arg14[%c0_239, %c179] : memref<8x1024xf32, #tpu.memory_space<vmem>>, vector<2x768xf32>
    %cst_240 = arith.constant 0.000000e+00 : f32
    %894 = vector.shape_cast %802 : vector<1x768xi1> to vector<1x768xi1>
    %895 = vector.broadcast %894 : vector<1x768xi1> to vector<2x768xi1>
    %896 = vector.broadcast %cst_240 : f32 to vector<2x768xf32>
    %897 = arith.select %895, %893, %896 : vector<2x768xi1>, vector<2x768xf32>
    %c96_241 = arith.constant 96 : index
    %898 = memref.load %arg6[%c96_241] : memref<98xf32, #tpu.memory_space<smem>>
    %899 = vector.extract_strided_slice %897 {offsets = [0, 0], sizes = [1, 768], strides = [1, 1]} : vector<2x768xf32> to vector<1x768xf32>
    %900 = vector.broadcast %898 : f32 to vector<1x768xf32>
    %901 = arith.mulf %900, %899 : vector<1x768xf32>
    %902 = arith.addf %892, %901 : vector<1x768xf32>
    %c97_242 = arith.constant 97 : index
    %903 = memref.load %arg6[%c97_242] : memref<98xf32, #tpu.memory_space<smem>>
    %904 = vector.extract_strided_slice %897 {offsets = [1, 0], sizes = [1, 768], strides = [1, 1]} : vector<2x768xf32> to vector<1x768xf32>
    %905 = vector.broadcast %903 : f32 to vector<1x768xf32>
    %906 = arith.mulf %905, %904 : vector<1x768xf32>
    %907 = arith.addf %902, %906 : vector<1x768xf32>
    %cst_243 = arith.constant 0.000000e+00 : f32
    %908 = vector.broadcast %cst_243 : f32 to vector<1x768xf32>
    %909 = arith.subf %908, %907 : vector<1x768xf32>
    %910 = math.exp %909 : vector<1x768xf32>
    %cst_244 = arith.constant 1.000000e+00 : f32
    %911 = vector.broadcast %cst_244 : f32 to vector<1x768xf32>
    %912 = arith.addf %911, %910 : vector<1x768xf32>
    %913 = tpu.reciprocal %912 {approx = true} : vector<1x768xf32> -> vector<1x768xf32>
    %914 = vector.broadcast %913 : vector<1x768xf32> to vector<8x768xf32>
    %915 = arith.mulf %157, %914 : vector<8x768xf32>
    %916 = vector.extract_strided_slice %915 {offsets = [0, 0], sizes = [8, 256], strides = [1, 1]} : vector<8x768xf32> to vector<8x256xf32>
    %c0_245 = arith.constant 0 : index
    %c128_246 = arith.constant 128 : index
    %917 = vector.load %arg14[%c0_245, %c128_246] : memref<8x1024xf32, #tpu.memory_space<vmem>>, vector<8x256xf32>
    tpu.vector_store %arg14[%c0_245, %c128_246], %916 {strides = array<i32>} : memref<8x1024xf32, #tpu.memory_space<vmem>>, vector<8x256xf32>,
    %918 = vector.extract_strided_slice %915 {offsets = [0, 512], sizes = [8, 256], strides = [1, 1]} : vector<8x768xf32> to vector<8x256xf32>
    %c0_247 = arith.constant 0 : index
    %c640_248 = arith.constant 640 : index
    %919 = vector.load %arg14[%c0_247, %c640_248] : memref<8x1024xf32, #tpu.memory_space<vmem>>, vector<8x256xf32>
    tpu.vector_store %arg14[%c0_247, %c640_248], %918 {strides = array<i32>} : memref<8x1024xf32, #tpu.memory_space<vmem>>, vector<8x256xf32>,
    %c1_i32_249 = arith.constant 1 : i32
    %920 = vector.broadcast %c1_i32_249 : i32 to vector<1x768xi32>
    %921 = arith.cmpi sge, %22, %920 : vector<1x768xi32>
    %c17_i32_250 = arith.constant 17 : i32
    %922 = vector.broadcast %c17_i32_250 : i32 to vector<1x768xi32>
    %923 = arith.cmpi slt, %22, %922 : vector<1x768xi32>
    %924 = arith.andi %921, %923 : vector<1x768xi1>
    %c0_251 = arith.constant 0 : index
    %c111_252 = arith.constant 111 : index
    %925 = vector.load %arg14[%c0_251, %c111_252] : memref<8x1024xf32, #tpu.memory_space<vmem>>, vector<8x768xf32>
    %cst_253 = arith.constant 0.000000e+00 : f32
    %926 = vector.shape_cast %924 : vector<1x768xi1> to vector<1x768xi1>
    %927 = vector.broadcast %926 : vector<1x768xi1> to vector<8x768xi1>
    %928 = vector.broadcast %cst_253 : f32 to vector<8x768xf32>
    %929 = arith.select %927, %925, %928 : vector<8x768xi1>, vector<8x768xf32>
    %c0_254 = arith.constant 0 : index
    %c0_255 = arith.constant 0 : index
    %930 = vector.load %arg15[%c0_254, %c0_255] : memref<72x768xf32, #tpu.memory_space<vmem>>, vector<8x768xf32>
    tpu.vector_store %arg15[%c0_254, %c0_255], %929 {strides = array<i32>} : memref<72x768xf32, #tpu.memory_space<vmem>>, vector<8x768xf32>,
    %c0_256 = arith.constant 0 : index
    %c127_257 = arith.constant 127 : index
    %931 = vector.load %arg14[%c0_256, %c127_257] : memref<8x1024xf32, #tpu.memory_space<vmem>>, vector<8x768xf32>
    %cst_258 = arith.constant 0.000000e+00 : f32
    %932 = vector.shape_cast %924 : vector<1x768xi1> to vector<1x768xi1>
    %933 = vector.broadcast %932 : vector<1x768xi1> to vector<8x768xi1>
    %934 = vector.broadcast %cst_258 : f32 to vector<8x768xf32>
    %935 = arith.select %933, %931, %934 : vector<8x768xi1>, vector<8x768xf32>
    %c24_259 = arith.constant 24 : index
    %c0_260 = arith.constant 0 : index
    %936 = vector.load %arg15[%c24_259, %c0_260] : memref<72x768xf32, #tpu.memory_space<vmem>>, vector<8x768xf32>
    tpu.vector_store %arg15[%c24_259, %c0_260], %935 {strides = array<i32>} : memref<72x768xf32, #tpu.memory_space<vmem>>, vector<8x768xf32>,
    %c0_261 = arith.constant 0 : index
    %c143_262 = arith.constant 143 : index
    %937 = vector.load %arg14[%c0_261, %c143_262] : memref<8x1024xf32, #tpu.memory_space<vmem>>, vector<8x768xf32>
    %cst_263 = arith.constant 0.000000e+00 : f32
    %938 = vector.shape_cast %924 : vector<1x768xi1> to vector<1x768xi1>
    %939 = vector.broadcast %938 : vector<1x768xi1> to vector<8x768xi1>
    %940 = vector.broadcast %cst_263 : f32 to vector<8x768xf32>
    %941 = arith.select %939, %937, %940 : vector<8x768xi1>, vector<8x768xf32>
    %c48_264 = arith.constant 48 : index
    %c0_265 = arith.constant 0 : index
    %942 = vector.load %arg15[%c48_264, %c0_265] : memref<72x768xf32, #tpu.memory_space<vmem>>, vector<8x768xf32>
    tpu.vector_store %arg15[%c48_264, %c0_265], %941 {strides = array<i32>} : memref<72x768xf32, #tpu.memory_space<vmem>>, vector<8x768xf32>,
    %c0_266 = arith.constant 0 : index
    %c112_267 = arith.constant 112 : index
    %943 = vector.load %arg14[%c0_266, %c112_267] : memref<8x1024xf32, #tpu.memory_space<vmem>>, vector<8x768xf32>
    %c8_268 = arith.constant 8 : index
    %c0_269 = arith.constant 0 : index
    %944 = vector.load %arg15[%c8_268, %c0_269] : memref<72x768xf32, #tpu.memory_space<vmem>>, vector<8x768xf32>
    tpu.vector_store %arg15[%c8_268, %c0_269], %943 {strides = array<i32>} : memref<72x768xf32, #tpu.memory_space<vmem>>, vector<8x768xf32>,
    %c0_270 = arith.constant 0 : index
    %c128_271 = arith.constant 128 : index
    %945 = vector.load %arg14[%c0_270, %c128_271] : memref<8x1024xf32, #tpu.memory_space<vmem>>, vector<8x768xf32>
    %c32_272 = arith.constant 32 : index
    %c0_273 = arith.constant 0 : index
    %946 = vector.load %arg15[%c32_272, %c0_273] : memref<72x768xf32, #tpu.memory_space<vmem>>, vector<8x768xf32>
    tpu.vector_store %arg15[%c32_272, %c0_273], %945 {strides = array<i32>} : memref<72x768xf32, #tpu.memory_space<vmem>>, vector<8x768xf32>,
    %c0_274 = arith.constant 0 : index
    %c144_275 = arith.constant 144 : index
    %947 = vector.load %arg14[%c0_274, %c144_275] : memref<8x1024xf32, #tpu.memory_space<vmem>>, vector<8x768xf32>
    %c56_276 = arith.constant 56 : index
    %c0_277 = arith.constant 0 : index
    %948 = vector.load %arg15[%c56_276, %c0_277] : memref<72x768xf32, #tpu.memory_space<vmem>>, vector<8x768xf32>
    tpu.vector_store %arg15[%c56_276, %c0_277], %947 {strides = array<i32>} : memref<72x768xf32, #tpu.memory_space<vmem>>, vector<8x768xf32>,
    %c-1_i32_278 = arith.constant -1 : i32
    %949 = vector.broadcast %c-1_i32_278 : i32 to vector<1x768xi32>
    %950 = arith.cmpi sge, %22, %949 : vector<1x768xi32>
    %c15_i32_279 = arith.constant 15 : i32
    %951 = vector.broadcast %c15_i32_279 : i32 to vector<1x768xi32>
    %952 = arith.cmpi slt, %22, %951 : vector<1x768xi32>
    %953 = arith.andi %950, %952 : vector<1x768xi1>
    %c0_280 = arith.constant 0 : index
    %c113_281 = arith.constant 113 : index
    %954 = vector.load %arg14[%c0_280, %c113_281] : memref<8x1024xf32, #tpu.memory_space<vmem>>, vector<8x768xf32>
    %cst_282 = arith.constant 0.000000e+00 : f32
    %955 = vector.shape_cast %953 : vector<1x768xi1> to vector<1x768xi1>
    %956 = vector.broadcast %955 : vector<1x768xi1> to vector<8x768xi1>
    %957 = vector.broadcast %cst_282 : f32 to vector<8x768xf32>
    %958 = arith.select %956, %954, %957 : vector<8x768xi1>, vector<8x768xf32>
    %c16_283 = arith.constant 16 : index
    %c0_284 = arith.constant 0 : index
    %959 = vector.load %arg15[%c16_283, %c0_284] : memref<72x768xf32, #tpu.memory_space<vmem>>, vector<8x768xf32>
    tpu.vector_store %arg15[%c16_283, %c0_284], %958 {strides = array<i32>} : memref<72x768xf32, #tpu.memory_space<vmem>>, vector<8x768xf32>,
    %c0_285 = arith.constant 0 : index
    %c129_286 = arith.constant 129 : index
    %960 = vector.load %arg14[%c0_285, %c129_286] : memref<8x1024xf32, #tpu.memory_space<vmem>>, vector<8x768xf32>
    %cst_287 = arith.constant 0.000000e+00 : f32
    %961 = vector.shape_cast %953 : vector<1x768xi1> to vector<1x768xi1>
    %962 = vector.broadcast %961 : vector<1x768xi1> to vector<8x768xi1>
    %963 = vector.broadcast %cst_287 : f32 to vector<8x768xf32>
    %964 = arith.select %962, %960, %963 : vector<8x768xi1>, vector<8x768xf32>
    %c40_288 = arith.constant 40 : index
    %c0_289 = arith.constant 0 : index
    %965 = vector.load %arg15[%c40_288, %c0_289] : memref<72x768xf32, #tpu.memory_space<vmem>>, vector<8x768xf32>
    tpu.vector_store %arg15[%c40_288, %c0_289], %964 {strides = array<i32>} : memref<72x768xf32, #tpu.memory_space<vmem>>, vector<8x768xf32>,
    %c0_290 = arith.constant 0 : index
    %c145_291 = arith.constant 145 : index
    %966 = vector.load %arg14[%c0_290, %c145_291] : memref<8x1024xf32, #tpu.memory_space<vmem>>, vector<8x768xf32>
    %cst_292 = arith.constant 0.000000e+00 : f32
    %967 = vector.shape_cast %953 : vector<1x768xi1> to vector<1x768xi1>
    %968 = vector.broadcast %967 : vector<1x768xi1> to vector<8x768xi1>
    %969 = vector.broadcast %cst_292 : f32 to vector<8x768xf32>
    %970 = arith.select %968, %966, %969 : vector<8x768xi1>, vector<8x768xf32>
    %c64_293 = arith.constant 64 : index
    %c0_294 = arith.constant 0 : index
    %971 = vector.load %arg15[%c64_293, %c0_294] : memref<72x768xf32, #tpu.memory_space<vmem>>, vector<8x768xf32>
    tpu.vector_store %arg15[%c64_293, %c0_294], %970 {strides = array<i32>} : memref<72x768xf32, #tpu.memory_space<vmem>>, vector<8x768xf32>,
    %c0_295 = arith.constant 0 : index
    %c0_296 = arith.constant 0 : index
    %972 = vector.load %arg15[%c0_295, %c0_296] : memref<72x768xf32, #tpu.memory_space<vmem>>, vector<72x768xf32>
    %973 = arith.truncf %972 : vector<72x768xf32> to vector<72x768xbf16>
    %c0_297 = arith.constant 0 : index
    %c0_298 = arith.constant 0 : index
    %974 = vector.load %arg7[%c0_297, %c0_298] : memref<4x72xbf16, #tpu.memory_space<vmem>>, vector<4x72xbf16>
    %cst_299 = arith.constant dense<0.000000e+00> : vector<4x768xf32>
    %975 = tpu.matmul %974, %973, %cst_299 {dimension_numbers = #tpu.dot_dimension_numbers<[1], [0], [0], [1], [0, 0, 1, 1], [], []>} : vector<4x72xbf16>, vector<72x768xbf16>, vector<4x768xf32> -> vector<4x768xf32>
    %c0_300 = arith.constant 0 : index
    %c0_301 = arith.constant 0 : index
    %976 = vector.load %arg8[%c0_300, %c0_301] : memref<4x1xf32, #tpu.memory_space<vmem>>, vector<4x1xf32>
    %977 = vector.broadcast %976 : vector<4x1xf32> to vector<4x768xf32>
    %978 = arith.addf %975, %977 : vector<4x768xf32>
    %cst_302 = arith.constant 0.000000e+00 : f32
    %979 = vector.broadcast %cst_302 : f32 to vector<4x768xf32>
    %980 = arith.subf %979, %978 : vector<4x768xf32>
    %981 = math.exp %980 : vector<4x768xf32>
    %cst_303 = arith.constant 1.000000e+00 : f32
    %982 = vector.broadcast %cst_303 : f32 to vector<4x768xf32>
    %983 = arith.addf %982, %981 : vector<4x768xf32>
    %984 = tpu.reciprocal %983 {approx = true} : vector<4x768xf32> -> vector<4x768xf32>
    %985 = arith.mulf %978, %984 : vector<4x768xf32>
    %cst_304 = arith.constant 0.000000e+00 : f32
    %986 = vector.broadcast %cst_304 : f32 to vector<4x768xf32>
    %987 = tpu.concatenate %985, %986 in 0 : vector<4x768xf32>, vector<4x768xf32> -> vector<8x768xf32>
    %988 = vector.extract_strided_slice %987 {offsets = [0, 0], sizes = [8, 256], strides = [1, 1]} : vector<8x768xf32> to vector<8x256xf32>
    %c0_305 = arith.constant 0 : index
    %c128_306 = arith.constant 128 : index
    %989 = vector.load %arg14[%c0_305, %c128_306] : memref<8x1024xf32, #tpu.memory_space<vmem>>, vector<8x256xf32>
    tpu.vector_store %arg14[%c0_305, %c128_306], %988 {strides = array<i32>} : memref<8x1024xf32, #tpu.memory_space<vmem>>, vector<8x256xf32>,
    %990 = vector.extract_strided_slice %987 {offsets = [0, 512], sizes = [8, 256], strides = [1, 1]} : vector<8x768xf32> to vector<8x256xf32>
    %c0_307 = arith.constant 0 : index
    %c640_308 = arith.constant 640 : index
    %991 = vector.load %arg14[%c0_307, %c640_308] : memref<8x1024xf32, #tpu.memory_space<vmem>>, vector<8x256xf32>
    tpu.vector_store %arg14[%c0_307, %c640_308], %990 {strides = array<i32>} : memref<8x1024xf32, #tpu.memory_space<vmem>>, vector<8x256xf32>,
    %c1_i32_309 = arith.constant 1 : i32
    %992 = vector.broadcast %c1_i32_309 : i32 to vector<1x768xi32>
    %993 = arith.cmpi sge, %22, %992 : vector<1x768xi32>
    %c17_i32_310 = arith.constant 17 : i32
    %994 = vector.broadcast %c17_i32_310 : i32 to vector<1x768xi32>
    %995 = arith.cmpi slt, %22, %994 : vector<1x768xi32>
    %996 = arith.andi %993, %995 : vector<1x768xi1>
    %c0_311 = arith.constant 0 : index
    %c111_312 = arith.constant 111 : index
    %997 = vector.load %arg14[%c0_311, %c111_312] : memref<8x1024xf32, #tpu.memory_space<vmem>>, vector<8x768xf32>
    %cst_313 = arith.constant 0.000000e+00 : f32
    %998 = vector.shape_cast %996 : vector<1x768xi1> to vector<1x768xi1>
    %999 = vector.broadcast %998 : vector<1x768xi1> to vector<8x768xi1>
    %1000 = vector.broadcast %cst_313 : f32 to vector<8x768xf32>
    %1001 = arith.select %999, %997, %1000 : vector<8x768xi1>, vector<8x768xf32>
    %c0_314 = arith.constant 0 : index
    %c0_315 = arith.constant 0 : index
    %1002 = vector.load %arg15[%c0_314, %c0_315] : memref<72x768xf32, #tpu.memory_space<vmem>>, vector<8x768xf32>
    tpu.vector_store %arg15[%c0_314, %c0_315], %1001 {strides = array<i32>} : memref<72x768xf32, #tpu.memory_space<vmem>>, vector<8x768xf32>,
    %c0_316 = arith.constant 0 : index
    %c127_317 = arith.constant 127 : index
    %1003 = vector.load %arg14[%c0_316, %c127_317] : memref<8x1024xf32, #tpu.memory_space<vmem>>, vector<8x768xf32>
    %cst_318 = arith.constant 0.000000e+00 : f32
    %1004 = vector.shape_cast %996 : vector<1x768xi1> to vector<1x768xi1>
    %1005 = vector.broadcast %1004 : vector<1x768xi1> to vector<8x768xi1>
    %1006 = vector.broadcast %cst_318 : f32 to vector<8x768xf32>
    %1007 = arith.select %1005, %1003, %1006 : vector<8x768xi1>, vector<8x768xf32>
    %c24_319 = arith.constant 24 : index
    %c0_320 = arith.constant 0 : index
    %1008 = vector.load %arg15[%c24_319, %c0_320] : memref<72x768xf32, #tpu.memory_space<vmem>>, vector<8x768xf32>
    tpu.vector_store %arg15[%c24_319, %c0_320], %1007 {strides = array<i32>} : memref<72x768xf32, #tpu.memory_space<vmem>>, vector<8x768xf32>,
    %c0_321 = arith.constant 0 : index
    %c143_322 = arith.constant 143 : index
    %1009 = vector.load %arg14[%c0_321, %c143_322] : memref<8x1024xf32, #tpu.memory_space<vmem>>, vector<8x768xf32>
    %cst_323 = arith.constant 0.000000e+00 : f32
    %1010 = vector.shape_cast %996 : vector<1x768xi1> to vector<1x768xi1>
    %1011 = vector.broadcast %1010 : vector<1x768xi1> to vector<8x768xi1>
    %1012 = vector.broadcast %cst_323 : f32 to vector<8x768xf32>
    %1013 = arith.select %1011, %1009, %1012 : vector<8x768xi1>, vector<8x768xf32>
    %c48_324 = arith.constant 48 : index
    %c0_325 = arith.constant 0 : index
    %1014 = vector.load %arg15[%c48_324, %c0_325] : memref<72x768xf32, #tpu.memory_space<vmem>>, vector<8x768xf32>
    tpu.vector_store %arg15[%c48_324, %c0_325], %1013 {strides = array<i32>} : memref<72x768xf32, #tpu.memory_space<vmem>>, vector<8x768xf32>,
    %c0_326 = arith.constant 0 : index
    %c112_327 = arith.constant 112 : index
    %1015 = vector.load %arg14[%c0_326, %c112_327] : memref<8x1024xf32, #tpu.memory_space<vmem>>, vector<8x768xf32>
    %c8_328 = arith.constant 8 : index
    %c0_329 = arith.constant 0 : index
    %1016 = vector.load %arg15[%c8_328, %c0_329] : memref<72x768xf32, #tpu.memory_space<vmem>>, vector<8x768xf32>
    tpu.vector_store %arg15[%c8_328, %c0_329], %1015 {strides = array<i32>} : memref<72x768xf32, #tpu.memory_space<vmem>>, vector<8x768xf32>,
    %c0_330 = arith.constant 0 : index
    %c128_331 = arith.constant 128 : index
    %1017 = vector.load %arg14[%c0_330, %c128_331] : memref<8x1024xf32, #tpu.memory_space<vmem>>, vector<8x768xf32>
    %c32_332 = arith.constant 32 : index
    %c0_333 = arith.constant 0 : index
    %1018 = vector.load %arg15[%c32_332, %c0_333] : memref<72x768xf32, #tpu.memory_space<vmem>>, vector<8x768xf32>
    tpu.vector_store %arg15[%c32_332, %c0_333], %1017 {strides = array<i32>} : memref<72x768xf32, #tpu.memory_space<vmem>>, vector<8x768xf32>,
    %c0_334 = arith.constant 0 : index
    %c144_335 = arith.constant 144 : index
    %1019 = vector.load %arg14[%c0_334, %c144_335] : memref<8x1024xf32, #tpu.memory_space<vmem>>, vector<8x768xf32>
    %c56_336 = arith.constant 56 : index
    %c0_337 = arith.constant 0 : index
    %1020 = vector.load %arg15[%c56_336, %c0_337] : memref<72x768xf32, #tpu.memory_space<vmem>>, vector<8x768xf32>
    tpu.vector_store %arg15[%c56_336, %c0_337], %1019 {strides = array<i32>} : memref<72x768xf32, #tpu.memory_space<vmem>>, vector<8x768xf32>,
    %c-1_i32_338 = arith.constant -1 : i32
    %1021 = vector.broadcast %c-1_i32_338 : i32 to vector<1x768xi32>
    %1022 = arith.cmpi sge, %22, %1021 : vector<1x768xi32>
    %c15_i32_339 = arith.constant 15 : i32
    %1023 = vector.broadcast %c15_i32_339 : i32 to vector<1x768xi32>
    %1024 = arith.cmpi slt, %22, %1023 : vector<1x768xi32>
    %1025 = arith.andi %1022, %1024 : vector<1x768xi1>
    %c0_340 = arith.constant 0 : index
    %c113_341 = arith.constant 113 : index
    %1026 = vector.load %arg14[%c0_340, %c113_341] : memref<8x1024xf32, #tpu.memory_space<vmem>>, vector<8x768xf32>
    %cst_342 = arith.constant 0.000000e+00 : f32
    %1027 = vector.shape_cast %1025 : vector<1x768xi1> to vector<1x768xi1>
    %1028 = vector.broadcast %1027 : vector<1x768xi1> to vector<8x768xi1>
    %1029 = vector.broadcast %cst_342 : f32 to vector<8x768xf32>
    %1030 = arith.select %1028, %1026, %1029 : vector<8x768xi1>, vector<8x768xf32>
    %c16_343 = arith.constant 16 : index
    %c0_344 = arith.constant 0 : index
    %1031 = vector.load %arg15[%c16_343, %c0_344] : memref<72x768xf32, #tpu.memory_space<vmem>>, vector<8x768xf32>
    tpu.vector_store %arg15[%c16_343, %c0_344], %1030 {strides = array<i32>} : memref<72x768xf32, #tpu.memory_space<vmem>>, vector<8x768xf32>,
    %c0_345 = arith.constant 0 : index
    %c129_346 = arith.constant 129 : index
    %1032 = vector.load %arg14[%c0_345, %c129_346] : memref<8x1024xf32, #tpu.memory_space<vmem>>, vector<8x768xf32>
    %cst_347 = arith.constant 0.000000e+00 : f32
    %1033 = vector.shape_cast %1025 : vector<1x768xi1> to vector<1x768xi1>
    %1034 = vector.broadcast %1033 : vector<1x768xi1> to vector<8x768xi1>
    %1035 = vector.broadcast %cst_347 : f32 to vector<8x768xf32>
    %1036 = arith.select %1034, %1032, %1035 : vector<8x768xi1>, vector<8x768xf32>
    %c40_348 = arith.constant 40 : index
    %c0_349 = arith.constant 0 : index
    %1037 = vector.load %arg15[%c40_348, %c0_349] : memref<72x768xf32, #tpu.memory_space<vmem>>, vector<8x768xf32>
    tpu.vector_store %arg15[%c40_348, %c0_349], %1036 {strides = array<i32>} : memref<72x768xf32, #tpu.memory_space<vmem>>, vector<8x768xf32>,
    %c0_350 = arith.constant 0 : index
    %c145_351 = arith.constant 145 : index
    %1038 = vector.load %arg14[%c0_350, %c145_351] : memref<8x1024xf32, #tpu.memory_space<vmem>>, vector<8x768xf32>
    %cst_352 = arith.constant 0.000000e+00 : f32
    %1039 = vector.shape_cast %1025 : vector<1x768xi1> to vector<1x768xi1>
    %1040 = vector.broadcast %1039 : vector<1x768xi1> to vector<8x768xi1>
    %1041 = vector.broadcast %cst_352 : f32 to vector<8x768xf32>
    %1042 = arith.select %1040, %1038, %1041 : vector<8x768xi1>, vector<8x768xf32>
    %c64_353 = arith.constant 64 : index
    %c0_354 = arith.constant 0 : index
    %1043 = vector.load %arg15[%c64_353, %c0_354] : memref<72x768xf32, #tpu.memory_space<vmem>>, vector<8x768xf32>
    tpu.vector_store %arg15[%c64_353, %c0_354], %1042 {strides = array<i32>} : memref<72x768xf32, #tpu.memory_space<vmem>>, vector<8x768xf32>,
    %c0_355 = arith.constant 0 : index
    %c0_356 = arith.constant 0 : index
    %1044 = vector.load %arg15[%c0_355, %c0_356] : memref<72x768xf32, #tpu.memory_space<vmem>>, vector<72x768xf32>
    %1045 = arith.truncf %1044 : vector<72x768xf32> to vector<72x768xbf16>
    %c0_357 = arith.constant 0 : index
    %c0_358 = arith.constant 0 : index
    %1046 = vector.load %arg9[%c0_357, %c0_358] : memref<2x72xbf16, #tpu.memory_space<vmem>>, vector<2x72xbf16>
    %cst_359 = arith.constant dense<0.000000e+00> : vector<2x768xf32>
    %1047 = tpu.matmul %1046, %1045, %cst_359 {dimension_numbers = #tpu.dot_dimension_numbers<[1], [0], [0], [1], [0, 0, 1, 1], [], []>} : vector<2x72xbf16>, vector<72x768xbf16>, vector<2x768xf32> -> vector<2x768xf32>
    %c0_360 = arith.constant 0 : index
    %c0_361 = arith.constant 0 : index
    %1048 = vector.load %arg10[%c0_360, %c0_361] : memref<2x1xf32, #tpu.memory_space<vmem>>, vector<2x1xf32>
    %1049 = vector.broadcast %1048 : vector<2x1xf32> to vector<2x768xf32>
    %1050 = arith.addf %1047, %1049 : vector<2x768xf32>
    %cst_362 = arith.constant 0.000000e+00 : f32
    %1051 = vector.broadcast %cst_362 : f32 to vector<2x768xf32>
    %1052 = arith.subf %1051, %1050 : vector<2x768xf32>
    %1053 = math.exp %1052 : vector<2x768xf32>
    %cst_363 = arith.constant 1.000000e+00 : f32
    %1054 = vector.broadcast %cst_363 : f32 to vector<2x768xf32>
    %1055 = arith.addf %1054, %1053 : vector<2x768xf32>
    %1056 = tpu.reciprocal %1055 {approx = true} : vector<2x768xf32> -> vector<2x768xf32>
    %1057 = arith.mulf %1050, %1056 : vector<2x768xf32>
    %c0_364 = arith.constant 0 : index
    %c0_365 = arith.constant 0 : index
    %1058 = vector.load %arg11[%c0_364, %c0_365] : memref<3x2xf32, #tpu.memory_space<vmem>>, vector<3x2xf32>
    %cst_366 = arith.constant dense<0.000000e+00> : vector<3x768xf32>
    %1059 = tpu.matmul %1058, %1057, %cst_366 {dimension_numbers = #tpu.dot_dimension_numbers<[1], [0], [0], [1], [0, 0, 1, 1], [], []>} : vector<3x2xf32>, vector<2x768xf32>, vector<3x768xf32> -> vector<3x768xf32>
    %c0_367 = arith.constant 0 : index
    %c0_368 = arith.constant 0 : index
    %1060 = vector.load %arg12[%c0_367, %c0_368] : memref<3x1xf32, #tpu.memory_space<vmem>>, vector<3x1xf32>
    %1061 = vector.broadcast %1060 : vector<3x1xf32> to vector<3x768xf32>
    %1062 = arith.addf %1059, %1061 : vector<3x768xf32>
    %1063 = vector.extract_strided_slice %1062 {offsets = [0, 0], sizes = [3, 256], strides = [1, 1]} : vector<3x768xf32> to vector<3x256xf32>
    %c0_369 = arith.constant 0 : index
    %c0_370 = arith.constant 0 : index
    %c0_371 = arith.constant 0 : index
    %1064 = vector.load %arg13[%c0_369, %c0_370, %c0_371] : memref<2x3x256xf32, #tpu.memory_space<vmem>>, vector<1x3x256xf32>
    %1065 = vector.shape_cast %1064 : vector<1x3x256xf32> to vector<3x256xf32>
    %1066 = vector.shape_cast %1063 : vector<3x256xf32> to vector<1x3x256xf32>
    tpu.vector_store %arg13[%c0_369, %c0_370, %c0_371], %1066 {strides = array<i32>} : memref<2x3x256xf32, #tpu.memory_space<vmem>>, vector<1x3x256xf32>,
    %1067 = vector.extract_strided_slice %1062 {offsets = [0, 512], sizes = [3, 256], strides = [1, 1]} : vector<3x768xf32> to vector<3x256xf32>
    %c1_372 = arith.constant 1 : index
    %c0_373 = arith.constant 0 : index
    %c0_374 = arith.constant 0 : index
    %1068 = vector.load %arg13[%c1_372, %c0_373, %c0_374] : memref<2x3x256xf32, #tpu.memory_space<vmem>>, vector<1x3x256xf32>
    %1069 = vector.shape_cast %1068 : vector<1x3x256xf32> to vector<3x256xf32>
    %1070 = vector.shape_cast %1067 : vector<3x256xf32> to vector<1x3x256xf32>
    tpu.vector_store %arg13[%c1_372, %c0_373, %c0_374], %1070 {strides = array<i32>} : memref<2x3x256xf32, #tpu.memory_space<vmem>>, vector<1x3x256xf32>,
    return
  }
  func.func @transform_0(%arg0: i32) -> (i32, i32, i32) {
    %c0_i32 = arith.constant 0 : i32
    %c0_i32_0 = arith.constant 0 : i32
    %c0_i32_1 = arith.constant 0 : i32
    return %arg0, %c0_i32, %c0_i32_0 : i32, i32, i32
  }
  func.func @transform_1(%arg0: i32) -> (i32, i32) {
    %c0_i32 = arith.constant 0 : i32
    %c0_i32_0 = arith.constant 0 : i32
    %c0_i32_1 = arith.constant 0 : i32
    return %c0_i32, %c0_i32_0 : i32, i32
  }
  func.func @transform_2(%arg0: i32) -> (i32, i32) {
    %c0_i32 = arith.constant 0 : i32
    %c0_i32_0 = arith.constant 0 : i32
    %c0_i32_1 = arith.constant 0 : i32
    return %c0_i32, %c0_i32_0 : i32, i32
  }
  func.func @transform_3(%arg0: i32) -> (i32, i32) {
    %c0_i32 = arith.constant 0 : i32
    %c0_i32_0 = arith.constant 0 : i32
    %c0_i32_1 = arith.constant 0 : i32
    return %c0_i32, %c0_i32_0 : i32, i32
  }
  func.func @transform_4(%arg0: i32) -> (i32, i32) {
    %c0_i32 = arith.constant 0 : i32
    %c0_i32_0 = arith.constant 0 : i32
    %c0_i32_1 = arith.constant 0 : i32
    return %c0_i32, %c0_i32_0 : i32, i32
  }
  func.func @transform_5(%arg0: i32) -> i32 {
    %c0_i32 = arith.constant 0 : i32
    %c0_i32_0 = arith.constant 0 : i32
    return %c0_i32 : i32
  }
  func.func @transform_6(%arg0: i32) -> (i32, i32) {
    %c0_i32 = arith.constant 0 : i32
    %c0_i32_0 = arith.constant 0 : i32
    %c0_i32_1 = arith.constant 0 : i32
    return %c0_i32, %c0_i32_0 : i32, i32
  }
  func.func @transform_7(%arg0: i32) -> (i32, i32) {
    %c0_i32 = arith.constant 0 : i32
    %c0_i32_0 = arith.constant 0 : i32
    %c0_i32_1 = arith.constant 0 : i32
    return %c0_i32, %c0_i32_0 : i32, i32
  }
  func.func @transform_8(%arg0: i32) -> (i32, i32) {
    %c0_i32 = arith.constant 0 : i32
    %c0_i32_0 = arith.constant 0 : i32
    %c0_i32_1 = arith.constant 0 : i32
    return %c0_i32, %c0_i32_0 : i32, i32
  }
  func.func @transform_9(%arg0: i32) -> (i32, i32) {
    %c0_i32 = arith.constant 0 : i32
    %c0_i32_0 = arith.constant 0 : i32
    %c0_i32_1 = arith.constant 0 : i32
    return %c0_i32, %c0_i32_0 : i32, i32
  }
  func.func @transform_10(%arg0: i32) -> (i32, i32) {
    %c0_i32 = arith.constant 0 : i32
    %c0_i32_0 = arith.constant 0 : i32
    %c0_i32_1 = arith.constant 0 : i32
    return %c0_i32, %c0_i32_0 : i32, i32
  }
  func.func @transform_11(%arg0: i32) -> (i32, i32) {
    %c0_i32 = arith.constant 0 : i32
    %c0_i32_0 = arith.constant 0 : i32
    %c0_i32_1 = arith.constant 0 : i32
    return %c0_i32, %c0_i32_0 : i32, i32
  }
  func.func @transform_12(%arg0: i32) -> (i32, i32, i32) {
    %c0_i32 = arith.constant 0 : i32
    %c0_i32_0 = arith.constant 0 : i32
    %c0_i32_1 = arith.constant 0 : i32
    return %arg0, %c0_i32, %c0_i32_0 : i32, i32, i32
  }
}

</mosaic_0001>

<bundles_post_ra>
// kernel: tpu_custom_call.1
= control target key start
LH: loop header
LB: loop body
LE: loop exit
PB: predicated region body
PF: predicated region fallthrough
CT: control target
= control target key end

     0   :  { %17 = vsyncpa [#allocation5], 0  ;;  %s11098_s0 = inlined_call_operand.hbm [shape: f32[2,8,256], index: 0, kind: input, shape index: {}]   ;;  %s11099_s1 = inlined_call_operand.vmem [shape: bf16[8,72], index: 1, kind: input, shape index: {}]   ;;  %s11100_s2 = inlined_call_operand.vmem [shape: f32[8,1], index: 2, kind: input, shape index: {}]   ;;  %s11101_s3 = inlined_call_operand.vmem [shape: bf16[8,72], index: 3, kind: input, shape index: {}]   ;;  %s11102_s4 = inlined_call_operand.vmem [shape: f32[8,1], index: 4, kind: input, shape index: {}]   ;;  %s11103_s5 = inlined_call_operand.vmem [shape: f32[98], index: 5, kind: input, shape index: {}]   ;;  %s11104_s6 = inlined_call_operand.vmem [shape: bf16[4,72], index: 6, kind: input, shape index: {}]   ;;  %s11105_s7 = inlined_call_operand.vmem [shape: f32[4,1], index: 7, kind: input, shape index: {}]   ;;  %s11106_s8 = inlined_call_operand.vmem [shape: bf16[2,72], index: 8, kind: input, shape index: {}]   ;;  %s11107_s9 = inlined_call_operand.vmem [shape: f32[2,1], index: 9, kind: input, shape index: {}]   ;;  %s11108_s10 = inlined_call_operand.vmem [shape: f32[3,2], index: 10, kind: input, shape index: {}]   ;;  %s11109_s11 = inlined_call_operand.vmem [shape: f32[3,1], index: 11, kind: input, shape index: {}]   ;;  %s11110_s12 = inlined_call_operand.vmem [shape: f32[2,3,256], index: 12, kind: output, shape index: {}]  }
   0x1   :  { %s23_s23 = sshll.u32 %s11098_s0, 4  ;;  %s24_s23 = int_to_ptr.hbm [resolvable:$true] %s23_s23 }
   0x2   :  { %18 = vsyncpa [#allocation6], 0  ;;  %s6949_s24 = smov [#allocation4]   ;;  %s45_s28 = sshll.u32 %s11103_s5, 4  ;;  %s46_s28 = int_to_ptr.vmem [resolvable:$true] %s45_s28 }
   0x3   :  { %s25_s25 = sshll.u32 %s6949_s24, 4  ;;  %s6950_s29 = smov 256   ;;  %s26_s25 = int_to_ptr.vmem [resolvable:$true] %s25_s25 }
   0x4   :  { %s6951_s30 = smov 16   ;;  %s6952_s13 = smov [#allocation7]  }
   0x5   :  { %31 = dma.hbm_to_vmem [thread:$0]  %s24_s23, 512, %s26_s25, [#allocation5], %s6950_s29, %s6950_s29, %s6951_s30  }
   0x6   :  { %48 = dma.vmem_to_smem %s46_s28, 16, %s6952_s13, [#allocation6]  }
   0x7   :  { %6945 = dma.done.wait [#allocation5], 512  }
   0x8   :  { %6946 = vsyncadd [#allocation5], 4294966784 }
   0x9   :  { %6947 = dma.done.wait [#allocation6], 16  }
   0xa   :  { %6948 = vsyncadd [#allocation6], 4294967280 }
   0xb   :  { %69 = sfence }
   0xc   :  { %v7076_v0 = vld [vmem:[#allocation4 + $0x10] sm:$0xff]  ;;  %v7078_v1 = vld [vmem:[#allocation4 + $0x18] sm:$0xff]  ;;  %v7080_v2 = vld [vmem:[#allocation4 + $0x8] sm:$0xff]  ;;  %v6953_v4 = vmov 0.0   ;;  %s11245_s0 = smov 17   ;;  %s11150_s5 = smov 1   ;;  %v75_v23 = vlaneseq }
   0xd   :  { %v6146_v3 = vpack.i.bf16 %v7078_v1, %v7076_v0  ;;  %73 = vst [vmem:[#allocation2 + $0x38] sm:$0xff] %v6953_v4  ;;  %v6156_v5 = vpack.i.bf16 0.0, %v7080_v2  ;;  %v7086_v6 = vld [vmem:[#allocation4] sm:$0xff]  ;;  %v6176_v8 = vpack.i.bf16 0.0, %v7078_v1  ;;  %v6171_v9 = vpack.i.bf16 %v7076_v0, %v6953_v4  ;;  %s11148_s14 = smov 113   ;;  %s6957_s15 = smov 112  }
   0xe   :  { %71 = vst [vmem:[#allocation2 + $0x28] sm:$0xff] %v6953_v4  ;;  %v6136_v7 = vpack.i.bf16 %v7086_v6, %v6953_v4  ;;  %v6166_v10 = vpack.i.bf16 %v7080_v2, %v7086_v6  ;;  %s11237_s16 = smov 15   ;;  %s11164_s17 = smov 127   ;;  %v7146_v24 = vand.u32 127, %v75_v23  ;;  %vm11117_vm0 = vcmask 908288   ;;  %v704_v39 = vld [vmem:[%s11100_s2] sm:$0xff] }
   0xf   :  { %6147 = vrot.lane.b32.xlu1 %v6146_v3, %s11245_s0  ;;  %6157 = vrot.lane.b32.xlu2 %v6156_v5, %s11150_s5  ;;  %72 = vst [vmem:[#allocation2] sm:$0xff] %v6953_v4  ;;  %s11134_s18 = smov 111   ;;  %v6961_v38 = vmov 0   ;;  %vm11119_vm2 = vcmask 1043456   ;;  %vm11120_vm3 = vcmask 924672   ;;  %vm11118_vm5 = vcmask 916480  }
  0x10   :  { %74 = vst [vmem:[#allocation2 + $0x20] sm:$0xff] %v6953_v4  ;;  %6137 = vrot.lane.b32.xlu0 %v6136_v7, %s11245_s0  ;;  %v81_v28 = vadd.s32 640, %v7146_v24  ;;  %6257 = vset.pattern.permute.xlu2 %v6961_v38  ;;  %vm11122_vm6 = vcmask 1039360   ;;  %vm11123_vm7 = vmmov 1   ;;  %v11321_v53 = vmov 0  ;;  %s6963_s2 = smov 51  }
  0x11   :  { %6256 = vset.pattern.permute.xlu0 %v6961_v38  ;;  %6813 = vset.pattern.permute.xlu1 %v6961_v38  ;;  %vm11115_vm9 = vcmask 121856   ;;  %v11324_v62 = vmov 0  ;;  %vm11193_vm11 = vcmask 7168   ;;  %vm11113_vm12 = vcmask 138240   ;;  %s6964_s23 = smov 3   ;;  %s6966_s25 = smov 35  }
  0x12   :  { %v7155_v29 = vand.u32 15, %v81_v28  ;;  %vm11114_vm13 = vcmask 130048   ;;  %v80_v23 = vadd.s32 512, %v7146_v24  ;;  %v7261_v38 = vand.u32 15, %v7146_v24  ;;  %s11140_s26 = smov 18   ;;  %s6968_s27 = smov 83  }
  0x13   :  { %vm11116_vm15 = vcmask 588800   ;;  %s6969_s28 = smov 19   ;;  %s11138_s29 = smov 114  }
  0x14   :  { %vm11111_vm1 = vcmp.lt.s32.totalorder %v7155_v29, 15  ;;  %vm11112_vm4 = vcmp.ge.s32.totalorder %v7155_v29, 1  ;;  %v7188_v49 = vld [vmem:[#allocation2 + $0x38] sm:$0x3]  ;;  %11330 = vst [vmem:[#allocation13_spill] sm:$0xff] %v7261_v38  ;;  %s11144_s13 = smov 50  }
  0x15   :  { %v7190_v50 = vld [vmem:[#allocation2 + $0x28] sm:$0x3]  ;;  %vm7199_vm8 = vmpackc.low %vm11123_vm7, %vm11112_vm4  ;;  %s6972_s19 = smov 115   ;;  %s11136_s20 = smov 33  }
  0x16   :  { %v11322_v53 = vsel %vm7199_vm8, 4294967295, %v11321_v53  ;;  %v7211_v59 = vpack.i.bf16 %v7188_v49, %v7190_v50  ;;  %vm7220_vm10 = vmpackc.low %vm11111_vm1, %vm11123_vm7  ;;  %s6974_s21 = smov 2   ;;  %s5816_s22 = sld [smem:[#allocation7 + $0x6]] }
  0x17   :  { %6162 = vrot.lane.b32.xlu2 %v6146_v3, %s11150_s5  ;;  %6152 = vrot.lane.b32.xlu1 %v6136_v7, %s11150_s5  ;;  %11323 = vst [vmem:[#allocation10_spill] sm:$0xff] %v11322_v53  ;;  %v11325_v62 = vsel %vm7220_vm10, 4294967295, %v11324_v62  ;;  %vm7248_vm14 = vmpackc.low %vm11112_vm4, %vm11111_vm1  ;;  %s11142_s24 = smov 81  }
  0x18   :  { %6142 = vrot.lane.b32.xlu0 %v6156_v5, %s11245_s0  ;;  %11326 = vst [vmem:[#allocation11_spill] sm:$0xff] %v11325_v62 }
  0x1f   :  { %6177 = vrot.lane.b32.xlu2 %v6176_v8, %s11148_s14  ;;  %6172 = vrot.lane.b32.xlu1 %v6171_v9, %s11148_s14 }
  0x20   :  { %6167 = vrot.lane.b32.xlu0 %v6166_v10, %s11148_s14 }
  0x27   :  { %6192 = vrot.lane.b32.xlu2 %v6146_v3, %s6951_s30  ;;  %6187 = vrot.lane.b32.xlu1 %v6156_v5, %s6951_s30 }
  0x28   :  { %6182 = vrot.lane.b32.xlu0 %v6136_v7, %s6951_s30 }
  0x2f   :  { %6207 = vrot.lane.b32.xlu2 %v6176_v8, %s6957_s15  ;;  %6202 = vrot.lane.b32.xlu1 %v6171_v9, %s6957_s15 }
  0x30   :  { %6197 = vrot.lane.b32.xlu0 %v6166_v10, %s6957_s15 }
  0x37   :  { %6222 = vrot.lane.b32.xlu2 %v6146_v3, %s11237_s16  ;;  %6217 = vrot.lane.b32.xlu1 %v6156_v5, %s11237_s16 }
  0x38   :  { %6212 = vrot.lane.b32.xlu0 %v6136_v7, %s11237_s16 }
  0x3f   :  { %6237 = vrot.lane.b32.xlu2 %v6176_v8, %s11164_s17  ;;  %6232 = vrot.lane.b32.xlu1 %v6171_v9, %s11164_s17 }
  0x40   :  { %6227 = vrot.lane.b32.xlu0 %v6166_v10, %s11164_s17 }
  0x47   :  { %6252 = vrot.lane.b32.xlu2 %v6176_v8, %s11134_s18  ;;  %6247 = vrot.lane.b32.xlu1 %v6171_v9, %s11134_s18 }
  0x48   :  { %6242 = vrot.lane.b32.xlu0 %v6166_v10, %s11134_s18  ;;  %v77_v10 = vadd.s32 128, %v7146_v24  ;;  %s6977_s18 = smov 98  }
  0x4f   :  { %6269 = vrot.lane.b32.xlu1 %v7211_v59, %s6969_s28 }
  0x50   :  { %707 = vperm.xlu0 %6256, %v704_v39   ;;  %v7263_v39 = vand.u32 15, %v77_v10 }
  0x52   :  { %vm11125_vm4 = vcmp.lt.s32.totalorder %v7263_v39, 15 }
  0x58   :  { %6259 = vrot.lane.b32.xlu0 %v7211_v59, %s6963_s2 }
  0x60   :  { %6274 = vrot.lane.b32.xlu0 %v7211_v59, %s6964_s23 }
  0x69   :  { %v7122_v11 = vpop.permute.xlu2 %6157 }
  0x71   :  { %v7124_v12 = vpop.permute.xlu2 %6162 }
  0x72   :  { %v6165_v55 = vunpack.i.h.bf16 %v7124_v12  ;;  %v6164_v60 = vunpack.i.l.bf16 %v7124_v12 }
  0x74   :  { %v280_v3 = vsel %vm11193_vm11, %v6164_v60, %v6165_v55 }
  0x79   :  { %v7126_v13 = vpop.permute.xlu2 %6177 }
  0x7a   :  { %v6180_v35 = vunpack.i.h.bf16 %v7126_v13  ;;  %v6179_v40 = vunpack.i.l.bf16 %v7126_v13 }
  0x7c   :  { %v333_v47 = vsel %vm11120_vm3, %v6179_v40, %v6180_v35 }
  0x81   :  { %v7128_v14 = vpop.permute.xlu1 %6147  ;;  %v7130_v15 = vpop.permute.xlu2 %6192 }
  0x82   :  { %v7132_v16 = vpop.permute.xlu0 %6137  ;;  %v6150_v63 = vunpack.i.h.bf16 %v7128_v14  ;;  %v6195_v5 = vunpack.i.h.bf16 %v7130_v15  ;;  %v6194_v7 = vunpack.i.l.bf16 %v7130_v15 }
  0x89   :  { %v7134_v17 = vpop.permute.xlu2 %6207  ;;  %v7136_v18 = vpop.permute.xlu1 %6152 }
  0x8a   :  { %v7138_v19 = vpop.permute.xlu0 %6142  ;;  %v6210_v36 = vunpack.i.h.bf16 %v7134_v17  ;;  %v6209_v42 = vunpack.i.l.bf16 %v7134_v17 }
  0x8c   :  { %v445_v48 = vsel %vm11118_vm5, %v6209_v42, %v6210_v36 }
  0x8d   :  { %v5926_v56 = vpack.c.bf16 %v445_v48, %v333_v47 }
  0x91   :  { %v7140_v20 = vpop.permute.xlu2 %6222  ;;  %v7142_v21 = vpop.permute.xlu1 %6172 }
  0x92   :  { %v7144_v22 = vpop.permute.xlu0 %6167  ;;  %v6225_v57 = vunpack.i.h.bf16 %v7140_v20  ;;  %v6224_v58 = vunpack.i.l.bf16 %v7140_v20  ;;  %v6175_v24 = vunpack.i.h.bf16 %v7142_v21  ;;  %v6174_v48 = vunpack.i.l.bf16 %v7142_v21 }
  0x93   :  { %v6139_v20 = vunpack.i.l.bf16 %v7132_v16 }
  0x94   :  { %v522_v8 = vsel %vm11115_vm9, %v6224_v58, %v6225_v57  ;;  %v7285_v57 = vld [vmem:[%s11099_s1] sm:$0xf]  ;;  %vm11121_vm9 = vcmp.ge.s32.totalorder %v7263_v39, 1  ;;  %s6965_s1 = smov 99  }
  0x95   :  { %v5932_v35 = vpack.c.bf16 %v280_v3, %v522_v8 }
  0x99   :  { %v7148_v25 = vpop.permute.xlu2 %6237  ;;  %v7150_v26 = vpop.permute.xlu1 %6187 }
  0x9a   :  { %v7152_v27 = vpop.permute.xlu0 %6182  ;;  %v6240_v43 = vunpack.i.h.bf16 %v7148_v25  ;;  %v6239_v44 = vunpack.i.l.bf16 %v7148_v25  ;;  %v6189_v12 = vunpack.i.l.bf16 %v7150_v26 }
  0x9c   :  { %v575_v54 = vsel %vm11122_vm6, %v6239_v44, %v6240_v43  ;;  %v1348_v43 = vld [vmem:[%s11102_s4] sm:$0xff]  ;;  %s6975_s4 = smov 34  }
  0x9d   :  { %v5929_v61 = vpack.c.bf16 %v575_v54, %v7078_v1  ;;  %v6149_v1 = vunpack.i.l.bf16 %v7128_v14  ;;  %1351 = vperm.xlu2 %6257, %v1348_v43   ;;  %v6170_v54 = vunpack.i.h.bf16 %v7144_v22  ;;  %v7497_v14 = vstv %s5816_s22  ;;  %s5819_s22 = sld [smem:[#allocation7 + $0x15]] }
  0x9f   :  { %v227_v36 = vsel %vm11113_vm12, %v6149_v1, %v6150_v63 }
  0xa1   :  { %v7157_v30 = vpop.permute.xlu2 %6252  ;;  %v7159_v31 = vpop.permute.xlu1 %6202 }
  0xa2   :  { %v6255_v32 = vunpack.i.h.bf16 %v7157_v30  ;;  %v6254_v33 = vunpack.i.l.bf16 %v7157_v30  ;;  %v7163_v34 = vpop.permute.xlu0 %6197  ;;  %v6205_v55 = vunpack.i.h.bf16 %v7159_v31 }
  0xa3   :  { %v6200_v21 = vunpack.i.h.bf16 %v7163_v34  ;;  %v6199_v8 = vunpack.i.l.bf16 %v7163_v34 }
  0xa4   :  { %v628_v37 = vsel %vm11117_vm0, %v6254_v33, %v6255_v32  ;;  %v11327_v32 = vmov 0 }
  0xa5   :  { %v640_v41 = vsel %vm11111_vm1, %v628_v37, 0.0  ;;  %v11328_v32 = vsel %vm7248_vm14, 4294967295, %v11327_v32  ;;  %v386_v37 = vsel %vm11114_vm13, %v6194_v7, %v6195_v5  ;;  %vm11128_vm1 = vcmp.lt.s32.totalorder %v7261_v38, 15  ;;  %6264 = vrot.lane.b32.xlu2 %v7211_v59, %s6966_s25 }
  0xa6   :  { %v702_v45 = vpack.c.bf16 %v640_v41, %v640_v41  ;;  %11329 = vst [vmem:[#allocation12_spill] sm:$0xff] %v11328_v32  ;;  %v7265_v41 = vand.u32 15, %v80_v23  ;;  %v5935_v47 = vpack.c.bf16 %v386_v37, %v227_v36  ;;  %v6204_v36 = vunpack.i.l.bf16 %v7159_v31 }
  0xa7   :  { %vm11129_vm13 = vcmp.ge.s32.totalorder %v7261_v38, 1 }
  0xa8   :  { %v725_v46 = vsel %vm11119_vm2, %v702_v45, 0  ;;  %v7272_v45 = vld [vmem:[#allocation2 + $0x20] sm:$0x3]  ;;  %vm11127_vm12 = vcmp.lt.s32.totalorder %v7265_v41, 15 }
  0xa9   :  { %769 = vmatpush.bf16.msra.mxu3 %v725_v46  ;;  %v7192_v51 = vpop.permute.xlu1 %6217  ;;  %v7274_v46 = vld [vmem:[#allocation2] sm:$0x3] }
  0xaa   :  { %v7194_v52 = vpop.permute.xlu0 %6212  ;;  %v7293_v5 = vpack.i.bf16 %v7272_v45, %v7274_v46  ;;  %v6220_v13 = vunpack.i.h.bf16 %v7192_v51 }
  0xac   :  { %6284 = vrot.lane.b32.xlu0 %v7293_v5, %s6965_s1  ;;  %6279 = vrot.lane.b32.xlu1 %v7293_v5, %s6972_s19 }
  0xad   :  { %5927 = vmatpush.bf16.msk.msra.mxu3 %vm7199_vm8, %v5926_v56  ;;  %6289 = vrot.lane.b32.xlu2 %v7293_v5, %s6968_s27 }
  0xb1   :  { %5930 = vmatpush.bf16.msk.msra.mxu3 %vm7220_vm10, %v5929_v61  ;;  %v7238_v9 = vpop.permute.xlu1 %6232 }
  0xb2   :  { %v7242_v28 = vpop.permute.xlu0 %6227 }
  0xb4   :  { %6304 = vrot.lane.b32.xlu0 %v7211_v59, %s11140_s26  ;;  %6299 = vrot.lane.b32.xlu1 %v7211_v59, %s6975_s4  ;;  %s11146_s26 = smov 48  }
  0xb5   :  { %5933 = vmatpush.bf16.msk.msra.mxu3 %vm7248_vm14, %v5932_v35  ;;  %v6169_v35 = vunpack.i.l.bf16 %v7144_v22  ;;  %6294 = vrot.lane.b32.xlu2 %v7211_v59, %s11144_s13  ;;  %s11243_s13 = smov 49  }
  0xb9   :  { %5936 = vmatpush.bf16.msk.msra.mxu3 %vm7199_vm8, %v5935_v47  ;;  %v6248_v56 = vpop.permute.xlu1 %6247 }
  0xba   :  { %v6250_v61 = vunpack.i.h.bf16 %v6248_v56  ;;  %v6249_v63 = vunpack.i.l.bf16 %v6248_v56  ;;  %v6243_v3 = vpop.permute.xlu0 %6242 }
  0xbb   :  { %v6245_v10 = vunpack.i.h.bf16 %v6243_v3  ;;  %v6244_v23 = vunpack.i.l.bf16 %v6243_v3  ;;  %v6235_v3 = vunpack.i.h.bf16 %v7238_v9 }
  0xbc   :  { %5770 = vmatmul.msk.bf16.vlgmr.msra.gmra.mxu3 %vm11116_vm15, %v7285_v57  ;;  %v627_v37 = vsel %vm11117_vm0, %v6250_v61, %v6254_v33  ;;  %vm11126_vm15 = vcmp.ge.s32.totalorder %v7265_v41, 1  ;;  %v440_v61 = vsel %vm11118_vm5, %v6199_v8, %v6200_v21  ;;  %v6229_v8 = vunpack.i.l.bf16 %v7242_v28  ;;  %6314 = vrot.lane.b32.xlu0 %v7293_v5, %s11138_s29  ;;  %s5817_s29 = sld [smem:[#allocation7 + $0x7]] }
  0xbd   :  { %v623_v43 = vsel %vm11117_vm0, %v6244_v23, %v6245_v10  ;;  %v624_v47 = vsel %vm11117_vm0, %v6245_v10, %v6249_v63  ;;  %v639_v34 = vsel %vm11127_vm12, %v627_v37, 0.0  ;;  %v444_v63 = vsel %vm11118_vm5, %v6205_v55, %v6209_v42  ;;  %vm7333_vm0 = vmpackc.low %vm11123_vm7, %vm11129_vm13  ;;  %6309 = vrot.lane.b32.xlu2 %v7211_v59, %s6974_s21 }
  0xbe   :  { %v635_v22 = vsel %vm11128_vm1, %v623_v43, 0.0  ;;  %v636_v31 = vsel %vm11125_vm4, %v624_v47, 0.0  ;;  %v701_v30 = vpack.c.bf16 %v639_v34, %v639_v34  ;;  %v6234_v10 = vunpack.i.l.bf16 %v7238_v9 }
  0xbf   :  { %v699_v33 = vpack.c.bf16 %v635_v22, %v635_v22  ;;  %v700_v56 = vpack.c.bf16 %v636_v31, %v636_v31  ;;  %v441_v37 = vsel %vm11118_vm5, %v6200_v21, %v6204_v36  ;;  %v6230_v43 = vunpack.i.h.bf16 %v7242_v28  ;;  %vm7346_vm5 = vmpackc.low %vm11123_vm7, %vm11126_vm15 }
  0xc0   :  { %v722_v23 = vsel %vm11119_vm2, %v701_v30, 0  ;;  %v11331_v55 = vmov 0  ;;  %v6160_v9 = vunpack.i.h.bf16 %v7122_v11  ;;  %v328_v21 = vsel %vm11120_vm3, %v6169_v35, %v6170_v54  ;;  %vm7421_vm15 = vmpackc.low %vm11129_vm13, %vm11128_vm1 }
  0xc1   :  { %v716_v17 = vsel %vm11119_vm2, %v699_v33, 0  ;;  %v719_v42 = vsel %vm11119_vm2, %v700_v56, 0  ;;  %756 = vmatpush.bf16.msra.mxu2 %v722_v23  ;;  %v11332_v55 = vsel %vm7333_vm0, 4294967295, %v11331_v55  ;;  %v329_v28 = vsel %vm11120_vm3, %v6170_v54, %v6174_v48  ;;  %vm7353_vm2 = vmpackc.low %vm11123_vm7, %vm11121_vm9 }
  0xc2   :  { %11333 = vst [vmem:[#allocation14_spill] sm:$0xff] %v11332_v55  ;;  %730 = vmatpush.bf16.msra.mxu0 %v716_v17  ;;  %743 = vmatpush.bf16.msra.mxu1 %v719_v42  ;;  %v332_v36 = vsel %vm11120_vm3, %v6175_v24, %v6179_v40  ;;  %v11334_v47 = vmov 0  ;;  %v5890_v34 = vpack.c.bf16 %v440_v61, %v328_v21  ;;  %v11337_v22 = vmov 0  ;;  %vm7370_vm3 = vmpackc.low %vm11128_vm1, %vm11123_vm7 }
  0xc3   :  { %v11335_v47 = vsel %vm7346_vm5, 4294967295, %v11334_v47  ;;  %v11338_v22 = vsel %vm7353_vm2, 4294967295, %v11337_v22  ;;  %v5914_v48 = vpack.c.bf16 %v444_v63, %v332_v36  ;;  %v6219_v40 = vunpack.i.l.bf16 %v7192_v51  ;;  %vm7385_vm9 = vmpackc.low %vm11127_vm12, %vm11123_vm7 }
  0xc4   :  { %11336 = vst [vmem:[#allocation15_spill] sm:$0xff] %v11335_v47  ;;  %v5902_v24 = vpack.c.bf16 %v441_v37, %v329_v28  ;;  %v574_v54 = vsel %vm11122_vm6, %v6235_v3, %v6239_v44  ;;  %v6215_v35 = vunpack.i.h.bf16 %v7194_v52  ;;  %v6214_v31 = vunpack.i.l.bf16 %v7194_v52  ;;  %6334 = vrot.lane.b32.xlu0 %v7211_v59, %s11136_s20  ;;  %s6978_s20 = smov 82  }
  0xc5   :  { %11339 = vst [vmem:[#allocation16_spill] sm:$0xff] %v11338_v22  ;;  %5915 = vmatpush.bf16.msk.msra.mxu2 %vm7346_vm5, %v5914_v48  ;;  %v570_v30 = vsel %vm11122_vm6, %v6229_v8, %v6230_v43  ;;  %v11340_v33 = vmov 0  ;;  %v571_v25 = vsel %vm11122_vm6, %v6230_v43, %v6234_v10  ;;  %v6159_v44 = vunpack.i.l.bf16 %v7122_v11  ;;  %vm7397_vm6 = vmpackc.low %vm11125_vm4, %vm11123_vm7  ;;  %6319 = vrot.lane.b32.xlu2 %v7293_v5, %s6977_s18 }
  0xc6   :  { %v11341_v33 = vsel %vm7370_vm3, 4294967295, %v11340_v33  ;;  %v6155_v51 = vunpack.i.h.bf16 %v7136_v18  ;;  %v6154_v52 = vunpack.i.l.bf16 %v7136_v18  ;;  %5891 = vmatpush.bf16.msk.msra.mxu0 %vm7333_vm0, %v5890_v34  ;;  %5903 = vmatpush.bf16.msk.msra.mxu1 %vm7353_vm2, %v5902_v24  ;;  %v11343_v56 = vmov 0 }
  0xc7   :  { %11342 = vst [vmem:[#allocation17_spill] sm:$0xff] %v11341_v33  ;;  %v11344_v56 = vsel %vm7385_vm9, 4294967295, %v11343_v56  ;;  %v279_v11 = vsel %vm11193_vm11, %v6160_v9, %v6164_v60  ;;  %v6140_v61 = vunpack.i.h.bf16 %v7132_v16  ;;  %v6190_v18 = vunpack.i.h.bf16 %v7150_v26  ;;  %6324 = vrot.lane.b32.xlu1 %v7293_v5, %s6978_s20 }
  0xc8   :  { %11345 = vst [vmem:[#allocation18_spill] sm:$0xff] %v11344_v56  ;;  %v11346_v63 = vmov 0  ;;  %v5917_v3 = vpack.c.bf16 %v574_v54, %v7076_v0  ;;  %v5893_v60 = vpack.c.bf16 %v570_v30, %v7086_v6  ;;  %v5905_v10 = vpack.c.bf16 %v571_v25, %v7080_v2 }
  0xc9   :  { %v11347_v63 = vsel %vm7397_vm6, 4294967295, %v11346_v63  ;;  %vm11349_vm7 = vcmask 121856   ;;  %v6185_v0 = vunpack.i.h.bf16 %v7152_v27  ;;  %v6184_v37 = vunpack.i.l.bf16 %v7152_v27 }
  0xca   :  { %11348 = vst [vmem:[#allocation19_spill] sm:$0xff] %v11347_v63  ;;  %v521_v23 = vsel %vm11349_vm7, %v6220_v13, %v6224_v58  ;;  %5918 = vmatpush.bf16.msk.msra.mxu2 %vm7385_vm9, %v5917_v3  ;;  %vm11350_vm4 = vmmov %vm11349_vm7  ;;  %v11351_v6 = vmov 0  ;;  %v6145_v26 = vunpack.i.h.bf16 %v7138_v19  ;;  %v6144_v27 = vunpack.i.l.bf16 %v7138_v19  ;;  %5894 = vmatpush.bf16.msk.msra.mxu0 %vm7370_vm3, %v5893_v60  ;;  %v7541_v3 = vpop.permute.xlu0 %707 }
  0xcb   :  { %v517_v43 = vsel %vm11350_vm4, %v6214_v31, %v6215_v35  ;;  %v11352_v6 = vsel %vm7421_vm15, 4294967295, %v11351_v6  ;;  %vm11354_vm12 = vmmov %vm11350_vm4  ;;  %5906 = vmatpush.bf16.msk.msra.mxu1 %vm7397_vm6, %v5905_v10  ;;  %v275_v58 = vsel %vm11193_vm11, %v6154_v52, %v6155_v51  ;;  %vm11355_vm4 = vcmp.lt.s32.totalorder %v7265_v41, 15 }
  0xcc   :  { %11353 = vst [vmem:[#allocation20_spill] sm:$0xff] %v11352_v6  ;;  %v518_v2 = vsel %vm11354_vm12, %v6215_v35, %v6219_v40  ;;  %vm11356_vm7 = vcmp.ge.s32.totalorder %v7265_v41, 1  ;;  %v11357_v8 = vmov 0  ;;  %v276_v16 = vsel %vm11193_vm11, %v6155_v51, %v6159_v44  ;;  %6359 = vrot.lane.b32.xlu0 %v7293_v5, %s11142_s24  ;;  %s5824_s24 = sld [smem:[#allocation7 + $0x3e]] }
  0xcd   :  { %vm7440_vm12 = vmpackc.low %vm11356_vm7, %vm11355_vm4  ;;  %vm11360_vm1 = vcmp.lt.s32.totalorder %v7263_v39, 15  ;;  %vm11361_vm13 = vcmp.ge.s32.totalorder %v7263_v39, 1  ;;  %v11362_v19 = vmov 0  ;;  %v5920_v17 = vpack.c.bf16 %v279_v11, %v521_v23  ;;  %6339 = vrot.lane.b32.xlu2 %v7211_v59, %s11245_s0 }
  0xce   :  { %v11358_v8 = vsel %vm7440_vm12, 4294967295, %v11357_v8  ;;  %vm7449_vm3 = vmpackc.low %vm11361_vm13, %vm11360_vm1  ;;  %v5896_v42 = vpack.c.bf16 %v275_v58, %v517_v43  ;;  %v5908_v9 = vpack.c.bf16 %v276_v16, %v518_v2  ;;  %vm11365_vm6 = vcmask 130048  }
  0xcf   :  { %11359 = vst [vmem:[#allocation21_spill] sm:$0xff] %v11358_v8  ;;  %v11363_v19 = vsel %vm7449_vm3, 4294967295, %v11362_v19  ;;  %v385_v21 = vsel %vm11365_vm6, %v6190_v18, %v6194_v7  ;;  %5921 = vmatpush.bf16.msk.msra.mxu2 %vm7440_vm12, %v5920_v17  ;;  %vm11366_vm4 = vmmov %vm11365_vm6  ;;  %vm11368_vm1 = vcmask 138240   ;;  %6329 = vrot.lane.b32.xlu1 %v7211_v59, %s11243_s13  ;;  %v7510_v24 = vstv %s5817_s29  ;;  %s5818_s29 = sld [smem:[#allocation7 + $0x14]] }
  0xd0   :  { %11364 = vst [vmem:[#allocation22_spill] sm:$0xff] %v11363_v19  ;;  %v381_v28 = vsel %vm11366_vm4, %v6184_v37, %v6185_v0  ;;  %vm11367_vm7 = vmmov %vm11366_vm4  ;;  %5897 = vmatpush.bf16.msk.msra.mxu0 %vm7421_vm15, %v5896_v42  ;;  %5909 = vmatpush.bf16.msk.msra.mxu1 %vm7449_vm3, %v5908_v9  ;;  %v222_v34 = vsel %vm11368_vm1, %v6139_v20, %v6140_v61  ;;  %vm11371_vm4 = vcmask 588800   ;;  %v7535_v11 = vstv %s5819_s22  ;;  %s11152_s22 = smov 97  }
  0xd1   :  { %v382_v36 = vsel %vm11367_vm7, %v6185_v0, %v6189_v12  ;;  %vm11369_vm13 = vmmov %vm11368_vm1  ;;  %v5899_v13 = vpack.c.bf16 %v381_v28, %v222_v34  ;;  %v2770_v54 = vmul.f32 %v7510_v24, %v7190_v50  ;;  %v2773_v25 = vmul.f32 %v7510_v24, %v7188_v49 }
  0xd2   :  { %v226_v15 = vsel %vm11369_vm13, %v6145_v26, %v6149_v1  ;;  %vm11370_vm6 = vmmov %vm11368_vm1  ;;  %v2731_v1 = vmul.f32 %v7497_v14, %v7190_v50  ;;  %v7517_v35 = vstv %s5824_s24  ;;  %s6981_s24 = smov 32   ;;  %v2855_v12 = vmul.f32 %v7535_v11, %v7188_v49  ;;  %v7551_v23 = vpop.permute.xlu0 %6259 }
  0xd3   :  { %v223_v7 = vsel %vm11370_vm6, %v6140_v61, %v6144_v27  ;;  %v5923_v48 = vpack.c.bf16 %v385_v21, %v226_v15  ;;  %vm11372_vm7 = vmmov %vm11371_vm4  ;;  %v2782_v31 = vrot.slane %v2770_v54, 1  ;;  %v3012_v30 = vmul.f32 %v7517_v35, %v7274_v46 }
  0xd4   :  { %v5911_v40 = vpack.c.bf16 %v382_v36, %v223_v7  ;;  %5900 = vmatpush.bf16.msk.msra.mxu0 %vm7333_vm0, %v5899_v13  ;;  %vm11373_vm1 = vmmov %vm11371_vm4  ;;  %2743 = vrot.lane.b32.xlu0 %v2731_v1, %s11146_s26  ;;  %v2785_v44 = vrot.slane %v2773_v25, 1  ;;  %v2852_v61 = vmul.f32 %v7535_v11, %v7190_v50  ;;  %v3015_v60 = vmul.f32 %v7517_v35, %v7272_v45 }
  0xd5   :  { %5924 = vmatpush.bf16.msk.msra.mxu2 %vm7346_vm5, %v5923_v48  ;;  %6349 = vrot.lane.b32.xlu2 %v7293_v5, %s11148_s14  ;;  %v7528_v51 = vstv %s5818_s29  ;;  %s5825_s29 = sld [smem:[#allocation7 + $0x3f]]  ;;  %v2867_v10 = vrot.slane %v2855_v12, 1  ;;  %vm11196_vm13 = vcmask 769024   ;;  %vm11197_vm6 = vcmp.lt.s32.totalorder %v7261_v38, 14 }
  0xd6   :  { %5912 = vmatpush.bf16.msk.msra.mxu1 %vm7353_vm2, %v5911_v40  ;;  %v2817_v52 = vmul.f32 %v7528_v51, %v7188_v49  ;;  %v2864_v18 = vrot.slane %v2852_v61, 1  ;;  %s5820_s14 = sld [smem:[#allocation7 + $0x22]]  ;;  %vm11419_vm11 = vcmask 1043456   ;;  %vm11232_vm15 = vcmask 261120  }
  0xd7   :  { %5767 = vmatmul.msk.bf16.vlgmr.msra.gmra.mxu0 %vm11372_vm7, %v7285_v57  ;;  %6344 = vrot.lane.b32.xlu1 %v7211_v59, %s11150_s5  ;;  %v2814_v59 = vmul.f32 %v7528_v51, %v7190_v50  ;;  %s5827_s5 = sld [smem:[#allocation7 + $0x4d]]  ;;  %vm11204_vm7 = vcmp.ge.s32.totalorder %v7261_v38, 2  ;;  %vm11424_vm12 = vcmp.ge.s32.totalorder %v7261_v38, 2  ;;  %vm11229_vm5 = vcmp.lt.s32.totalorder %v7263_v39, 14 }
  0xd8   :  { %5769 = vmatmul.msk.bf16.vlgmr.msra.gmra.mxu2 %vm11371_vm4, %v7285_v57  ;;  %vm11203_vm4 = vcmask 785408   ;;  %vm11425_vm2 = vcmask 769024  }
  0xd9   :  { %5768 = vmatmul.msk.bf16.vlgmr.msra.gmra.mxu1 %vm11373_vm1, %v7285_v57  ;;  %v2734_v57 = vmul.f32 %v7497_v14, %v7188_v49  ;;  %vm11202_vm1 = vcmask 801792  }
  0xda   :  { %v7568_v27 = vpop.permute.xlu0 %6274 }
  0xdb   :  { %v7553_v0 = vstv %s5825_s29  ;;  %s5829_s29 = sld [smem:[#allocation7 + $0x5b]] }
  0xdc   :  { %2749 = vrot.lane.b32.xlu0 %v2734_v57, %s11146_s26  ;;  %v3050_v37 = vmul.f32 %v7553_v0, %v7274_v46  ;;  %v7559_v2 = vstv %s5820_s14  ;;  %s5821_s14 = sld [smem:[#allocation7 + $0x23]]  ;;  %v3053_v16 = vmul.f32 %v7553_v0, %v7272_v45 }
  0xdd   :  { %3026 = vrot.lane.b32.xlu2 %v3012_v30, %s6957_s15  ;;  %v7570_v58 = vstv %s5827_s5  ;;  %v2899_v21 = vmul.f32 %v7559_v2, %v7188_v49  ;;  %s11156_s5 = smov 80  }
  0xde   :  { %v3062_v20 = vrot.slane %v3050_v37, 1  ;;  %11374 = vst [vmem:[#allocation23_spill] sm:$0xff] %v7570_v58  ;;  %v3135_v17 = vmul.f32 %v7570_v58, %v7272_v45  ;;  %v3065_v42 = vrot.slane %v3053_v16, 1 }
  0xdf   :  { %6354 = vrot.lane.b32.xlu1 %v7293_v5, %s11152_s22  ;;  %v2896_v5 = vmul.f32 %v7559_v2, %v7190_v50  ;;  %s6983_s22 = smov 96  }
  0xe0   :  { %v3147_v9 = vrot.slane %v3135_v17, 1 }
  0xe2   :  { %v7585_v34 = vstv %s5821_s14  ;;  %s11239_s14 = smov 31  }
  0xe3   :  { %v2934_v15 = vmul.f32 %v7585_v34, %v7190_v50  ;;  %v2937_v57 = vmul.f32 %v7585_v34, %v7188_v49 }
  0xe4   :  { %2788 = vrot.lane.b32.xlu0 %v2782_v31, %s11146_s26  ;;  %v6368_v31 = vpack.i.bf16 %v7190_v50, %v7188_v49  ;;  %v6378_v49 = vpack.i.bf16 %v7274_v46, %v7272_v45 }
  0xe5   :  { %3032 = vrot.lane.b32.xlu2 %v3015_v60, %s6957_s15  ;;  %v2946_v40 = vrot.slane %v2934_v15, 1  ;;  %v2949_v30 = vrot.slane %v2937_v57, 1 }
  0xec   :  { %2794 = vrot.lane.b32.xlu0 %v2785_v44, %s11146_s26  ;;  %s5826_s26 = sld [smem:[#allocation7 + $0x4c]] }
  0xed   :  { %3070 = vrot.lane.b32.xlu2 %v3062_v20, %s6957_s15 }
  0xf2   :  { %v7557_v43 = vstv %s5826_s26  ;;  %s5828_s26 = sld [smem:[#allocation7 + $0x5a]] }
  0xf3   :  { %v3097_v26 = vmul.f32 %v7557_v43, %v7272_v45  ;;  %v3094_v48 = vmul.f32 %v7557_v43, %v7274_v46 }
  0xf4   :  { %2826 = vrot.lane.b32.xlu0 %v2814_v59, %s6981_s24  ;;  %v7611_v59 = vstv %s5829_s29  ;;  %s11235_s29 = smov 30  }
  0xf5   :  { %3114 = vrot.lane.b32.xlu1 %v3097_v26, %s6983_s22  ;;  %3076 = vrot.lane.b32.xlu2 %v3065_v42, %s6957_s15  ;;  %11378 = vst [vmem:[#allocation27_spill] sm:$0xff] %v7611_v59 }
  0xf7   :  { %v7583_v36 = vpop.permute.xlu2 %1351 }
  0xf8   :  { %v7589_v7 = vstv %s5828_s26  ;;  %s11241_s26 = smov 47  }
  0xf9   :  { %11375 = vst [vmem:[#allocation24_spill] sm:$0xff] %v7589_v7  ;;  %v3179_v13 = vmul.f32 %v7589_v7, %v7272_v45 }
  0xfc   :  { %2832 = vrot.lane.b32.xlu0 %v2817_v52, %s6981_s24  ;;  %v3218_v52 = vmul.f32 %v7611_v59, %v7272_v45 }
  0xfd   :  { %3158 = vrot.lane.b32.xlu1 %v3147_v9, %s6983_s22  ;;  %3108 = vrot.lane.b32.xlu2 %v3094_v48, %s6983_s22 }
  0xfe   :  { %v3230_v50 = vrot.slane %v3218_v52, 1 }
  0xff   :  { %v7602_v54 = vpop.permute.xlu2 %6264 }
 0x104   :  { %2870 = vrot.lane.b32.xlu0 %v2864_v18, %s6981_s24 }
 0x105   :  { %3196 = vrot.lane.b32.xlu1 %v3179_v13, %s11156_s5  ;;  %6369 = vrot.lane.b32.xlu2 %v6368_v31, %s11239_s14  ;;  %s11465_s14 = smov 113  }
 0x107   :  { %v7617_v61 = vpop.permute.xlu2 %6289 }
 0x108   :  { %11379 = vst [vmem:[#allocation28_spill] sm:$0xff] %v7617_v61 }
 0x10c   :  { %2876 = vrot.lane.b32.xlu0 %v2867_v10, %s6981_s24 }
 0x10d   :  { %6364 = vrot.lane.b32.xlu1 %v6368_v31, %s11241_s26  ;;  %6374 = vrot.lane.b32.xlu2 %v6368_v31, %s11237_s16  ;;  %s11464_s16 = smov 1   ;;  %s11466_s26 = smov 97  }
 0x10f   :  { %v7625_v10 = vpop.permute.xlu2 %6294 }
 0x110   :  { %11381 = vst [vmem:[#allocation30_spill] sm:$0xff] %v7625_v10 }
 0x114   :  { %2908 = vrot.lane.b32.xlu0 %v2896_v5, %s6951_s30 }
 0x115   :  { %6379 = vrot.lane.b32.xlu1 %v6378_v49, %s11164_s17  ;;  %s11224_s17 = smov 94  }
 0x117   :  { %v7632_v13 = vpop.permute.xlu2 %6309 }
 0x118   :  { %11383 = vst [vmem:[#allocation32_spill] sm:$0xff] %v7632_v13 }
 0x11c   :  { %2914 = vrot.lane.b32.xlu0 %v2899_v21, %s6951_s30 }
 0x11e   :  { %v7581_v28 = vpop.permute.xlu0 %6284 }
 0x124   :  { %2952 = vrot.lane.b32.xlu0 %v2946_v40, %s6951_s30 }
 0x126   :  { %v7598_v1 = vpop.permute.xlu0 %6304 }
 0x127   :  { %11376 = vst [vmem:[#allocation25_spill] sm:$0xff] %v7598_v1 }
 0x12c   :  { %2958 = vrot.lane.b32.xlu0 %v2949_v30, %s6951_s30 }
 0x12e   :  { %v7609_v44 = vpop.permute.xlu0 %6314 }
 0x12f   :  { %11377 = vst [vmem:[#allocation26_spill] sm:$0xff] %v7609_v44 }
 0x134   :  { %3241 = vrot.lane.b32.xlu0 %v3230_v50, %s11156_s5  ;;  %s11226_s5 = smov 126  }
 0x136   :  { %v7622_v12 = vpop.permute.xlu0 %6334 }
 0x137   :  { %11380 = vst [vmem:[#allocation29_spill] sm:$0xff] %v7622_v12 }
 0x13e   :  { %v7629_v5 = vpop.permute.xlu0 %6359 }
 0x13f   :  { %v775_v25 = vpop.f32.mrf.mxu3  ;;  %11382 = vst [vmem:[#allocation31_spill] sm:$0xff] %v7629_v5 }
 0x140   :  { %v776_v60 = vadd.f32 %v775_v25, %v7541_v3 }
 0x142   :  { %v782_v26 = vsub.f32 0.0, %v776_v60 }
 0x144   :  { %v789_v42 = vmul.f32 1.442695, %v782_v26 }
 0x146   :  { %v7634_v25 = vpop.permute.xlu0 %2743 }
 0x147   :  { %v777_v18 = vpop.f32.mrf.mxu3  ;;  %11384 = vst [vmem:[#allocation33_spill] sm:$0xff] %v7634_v25 }
 0x154   :  { %v736_v37 = vpop.f32.mrf.mxu0 }
 0x155   :  { %v737_v45 = vadd.f32 %v736_v37, %v7541_v3 }
 0x156   :  { %v749_v20 = vpop.f32.mrf.mxu1 }
 0x157   :  { %v750_v46 = vadd.f32 %v749_v20, %v7541_v3  ;;  %v779_v16 = vsub.f32 0.0, %v737_v45 }
 0x159   :  { %v780_v17 = vsub.f32 0.0, %v750_v46  ;;  %v783_v9 = vmul.f32 1.442695, %v779_v16  ;;  %v7636_v16 = vpop.permute.xlu2 %6319 }
 0x15a   :  { %11385 = vst [vmem:[#allocation34_spill] sm:$0xff] %v7636_v16 }
 0x15b   :  { %v785_v21 = vmul.f32 1.442695, %v780_v17  ;;  %v762_v15 = vpop.f32.mrf.mxu2  ;;  %6814 = vpow2.f32 %v783_v9  ;;  %v7638_v9 = vpop.permute.xlu1 %6269 }
 0x15c   :  { %v763_v48 = vadd.f32 %v762_v15, %v7541_v3  ;;  %v738_v31 = vpop.f32.mrf.mxu0  ;;  %11386 = vst [vmem:[#allocation35_spill] sm:$0xff] %v7638_v9 }
 0x15d   :  { %6816 = vpow2.f32 %v785_v21  ;;  %v7640_v21 = vpop.permute.xlu0 %2749 }
 0x15e   :  { %v781_v40 = vsub.f32 0.0, %v763_v48  ;;  %v751_v57 = vpop.f32.mrf.mxu1  ;;  %6818 = vpow2.f32 %v789_v42  ;;  %11387 = vst [vmem:[#allocation36_spill] sm:$0xff] %v7640_v21 }
 0x160   :  { %v787_v30 = vmul.f32 1.442695, %v781_v40 }
 0x161   :  { %v6815_v52 = vpop.eup %6814 }
 0x162   :  { %6820 = vpow2.f32 %v787_v30  ;;  %v791_v18 = vadd.f32 1.0, %v6815_v52 }
 0x163   :  { %v764_v49 = vpop.f32.mrf.mxu2  ;;  %v6817_v50 = vpop.eup %6816 }
 0x164   :  { %v6819_v37 = vpop.eup %6818  ;;  %v792_v20 = vadd.f32 1.0, %v6817_v50  ;;  %6822 = vrcp.f32 %v791_v18  ;;  %v7652_v50 = vpop.permute.xlu2 %6339 }
 0x165   :  { %v794_v26 = vadd.f32 1.0, %v6819_v37  ;;  %11388 = vst [vmem:[#allocation37_spill] sm:$0xff] %v7652_v50  ;;  %v7660_v37 = vpop.permute.xlu0 %2788 }
 0x166   :  { %6824 = vrcp.f32 %v792_v20  ;;  %11390 = vst [vmem:[#allocation39_spill] sm:$0xff] %v7660_v37 }
 0x168   :  { %v6821_v3 = vpop.eup %6820 }
 0x169   :  { %v793_v17 = vadd.f32 1.0, %v6821_v3 }
 0x16a   :  { %v6823_v42 = vpop.eup %6822 }
 0x16b   :  { %6826 = vrcp.f32 %v793_v17  ;;  %v7642_v40 = vmul.f32 %v6823_v42, %v737_v45 }
 0x16c   :  { %6828 = vrcp.f32 %v794_v26  ;;  %v6825_v15 = vpop.eup %6824  ;;  %v7667_v3 = vpop.permute.xlu2 %6349 }
 0x16d   :  { %v7644_v57 = vmul.f32 %v6825_v15, %v750_v46  ;;  %v6383_v31 = vpack.i.bf16 %v7642_v40, %v6953_v4  ;;  %v7658_v46 = vpop.permute.xlu1 %6279  ;;  %11391 = vst [vmem:[#allocation40_spill] sm:$0xff] %v7667_v3 }
 0x16e   :  { %11389 = vst [vmem:[#allocation38_spill] sm:$0xff] %v7658_v46 }
 0x16f   :  { %v6398_v30 = vpack.i.bf16 0.0, %v7644_v57  ;;  %6384 = vrot.lane.b32.xlu1 %v6383_v31, %s6975_s4 }
 0x171   :  { %v6827_v52 = vpop.eup %6826  ;;  %6399 = vrot.lane.b32.xlu0 %v6398_v30, %s6974_s21  ;;  %6389 = vrot.lane.b32.xlu2 %v6398_v30, %s6975_s4 }
 0x172   :  { %v6829_v49 = vpop.eup %6828  ;;  %v7654_v18 = vmul.f32 %v6827_v52, %v763_v48  ;;  %v7673_v48 = vpop.permute.xlu0 %2794 }
 0x173   :  { %v7656_v45 = vmul.f32 %v6829_v49, %v776_v60  ;;  %v6403_v60 = vpack.i.bf16 %v7644_v57, %v7642_v40  ;;  %11393 = vst [vmem:[#allocation42_spill] sm:$0xff] %v7673_v48 }
 0x174   :  { %v7678_v17 = vpop.permute.xlu2 %3026  ;;  %v6453_v15 = vpack.i.bf16 %v7654_v18, %v6953_v4 }
 0x175   :  { %v6443_v20 = vpack.i.bf16 %v7656_v45, %v7654_v18  ;;  %v7669_v26 = vpop.permute.xlu1 %6299  ;;  %11394 = vst [vmem:[#allocation43_spill] sm:$0xff] %v7678_v17  ;;  %v6458_v42 = vpack.i.bf16 0.0, %v7656_v45 }
 0x176   :  { %11392 = vst [vmem:[#allocation41_spill] sm:$0xff] %v7669_v26 }
 0x177   :  { %6444 = vrot.lane.b32.xlu1 %v6443_v20, %s6975_s4 }
 0x179   :  { %6414 = vrot.lane.b32.xlu0 %v6398_v30, %s6981_s24  ;;  %6394 = vrot.lane.b32.xlu2 %v6383_v31, %s6974_s21 }
 0x17a   :  { %v7688_v49 = vpop.permute.xlu0 %2826 }
 0x17b   :  { %11396 = vst [vmem:[#allocation45_spill] sm:$0xff] %v7688_v49 }
 0x17d   :  { %v7684_v52 = vpop.permute.xlu1 %6324 }
 0x17e   :  { %11395 = vst [vmem:[#allocation44_spill] sm:$0xff] %v7684_v52 }
 0x17f   :  { %6449 = vrot.lane.b32.xlu1 %v6443_v20, %s6974_s21 }
 0x181   :  { %6429 = vrot.lane.b32.xlu0 %v6398_v30, %s11235_s29  ;;  %6404 = vrot.lane.b32.xlu2 %v6403_v60, %s6977_s18  ;;  %v7690_v30 = vpop.permute.xlu2 %3032 }
 0x182   :  { %11397 = vst [vmem:[#allocation46_spill] sm:$0xff] %v7690_v30  ;;  %v7697_v4 = vpop.permute.xlu0 %2832 }
 0x183   :  { %11399 = vst [vmem:[#allocation48_spill] sm:$0xff] %v7697_v4 }
 0x185   :  { %v7695_v19 = vpop.permute.xlu1 %6329 }
 0x186   :  { %11398 = vst [vmem:[#allocation47_spill] sm:$0xff] %v7695_v19 }
 0x187   :  { %6459 = vrot.lane.b32.xlu1 %v6458_v42, %s6977_s18 }
 0x189   :  { %6454 = vrot.lane.b32.xlu0 %v6453_v15, %s6977_s18  ;;  %6409 = vrot.lane.b32.xlu2 %v6383_v31, %s6981_s24  ;;  %v7702_v6 = vpop.permute.xlu2 %3070 }
 0x18a   :  { %11400 = vst [vmem:[#allocation49_spill] sm:$0xff] %v7702_v6  ;;  %v7706_v33 = vpop.permute.xlu0 %2870 }
 0x18b   :  { %11402 = vst [vmem:[#allocation51_spill] sm:$0xff] %v7706_v33 }
 0x18d   :  { %v7704_v63 = vpop.permute.xlu1 %6344 }
 0x18e   :  { %11401 = vst [vmem:[#allocation50_spill] sm:$0xff] %v7704_v63 }
 0x18f   :  { %6464 = vrot.lane.b32.xlu1 %v6443_v20, %s6981_s24 }
 0x191   :  { %6469 = vrot.lane.b32.xlu0 %v6453_v15, %s6983_s22  ;;  %6419 = vrot.lane.b32.xlu2 %v6403_v60, %s6983_s22  ;;  %v7711_v8 = vpop.permute.xlu2 %3076 }
 0x192   :  { %11403 = vst [vmem:[#allocation52_spill] sm:$0xff] %v7711_v8  ;;  %v7715_v47 = vpop.permute.xlu0 %2876 }
 0x193   :  { %11405 = vst [vmem:[#allocation54_spill] sm:$0xff] %v7715_v47 }
 0x195   :  { %v7713_v56 = vpop.permute.xlu1 %6354 }
 0x196   :  { %11404 = vst [vmem:[#allocation53_spill] sm:$0xff] %v7713_v56 }
 0x197   :  { %6474 = vrot.lane.b32.xlu1 %v6458_v42, %s6983_s22 }
 0x199   :  { %6484 = vrot.lane.b32.xlu0 %v6453_v15, %s11226_s5  ;;  %6424 = vrot.lane.b32.xlu2 %v6383_v31, %s11235_s29  ;;  %v7719_v31 = vpop.permute.xlu2 %3108 }
 0x19a   :  { %11406 = vst [vmem:[#allocation55_spill] sm:$0xff] %v7719_v31  ;;  %v7724_v22 = vpop.permute.xlu0 %2908 }
 0x19b   :  { %11408 = vst [vmem:[#allocation57_spill] sm:$0xff] %v7724_v22 }
 0x19f   :  { %6479 = vrot.lane.b32.xlu1 %v6443_v20, %s11235_s29  ;;  %v7722_v20 = vpop.permute.xlu1 %3114  ;;  %s11463_s29 = smov 33  }
 0x1a0   :  { %11407 = vst [vmem:[#allocation56_spill] sm:$0xff] %v7722_v20 }
 0x1a1   :  { %6494 = vrot.lane.b32.xlu0 %v6453_v15, %s11224_s17  ;;  %6434 = vrot.lane.b32.xlu2 %v6403_v60, %s11226_s5  ;;  %v7726_v15 = vpop.permute.xlu2 %6369 }
 0x1a2   :  { %11409 = vst [vmem:[#allocation58_spill] sm:$0xff] %v7726_v15  ;;  %v7730_v32 = vpop.permute.xlu0 %2914 }
 0x1a3   :  { %11411 = vst [vmem:[#allocation60_spill] sm:$0xff] %v7730_v32 }
 0x1a7   :  { %6489 = vrot.lane.b32.xlu1 %v6458_v42, %s11226_s5  ;;  %v7728_v55 = vpop.permute.xlu1 %3158  ;;  %s11462_s5 = smov 114  }
 0x1a8   :  { %11410 = vst [vmem:[#allocation59_spill] sm:$0xff] %v7728_v55 }
 0x1a9   :  { %6439 = vrot.lane.b32.xlu2 %v6403_v60, %s11224_s17  ;;  %v7732_v62 = vpop.permute.xlu2 %6374 }
 0x1aa   :  { %11412 = vst [vmem:[#allocation61_spill] sm:$0xff] %v7732_v62  ;;  %v7736_v6 = vpop.permute.xlu0 %2952 }
 0x1ab   :  { %11414 = vst [vmem:[#allocation63_spill] sm:$0xff] %v7736_v6 }
 0x1af   :  { %6499 = vrot.lane.b32.xlu1 %v6458_v42, %s11224_s17  ;;  %v7734_v53 = vpop.permute.xlu1 %3196  ;;  %s11461_s17 = smov 18  }
 0x1b0   :  { %11413 = vst [vmem:[#allocation62_spill] sm:$0xff] %v7734_v53 }
 0x1b2   :  { %v7742_v42 = vpop.permute.xlu0 %2958 }
 0x1b3   :  { %11416 = vst [vmem:[#allocation65_spill] sm:$0xff] %v7742_v42 }
 0x1b7   :  { %v7740_v31 = vpop.permute.xlu1 %6364 }
 0x1b8   :  { %11415 = vst [vmem:[#allocation64_spill] sm:$0xff] %v7740_v31 }
 0x1ba   :  { %v7748_v8 = vpop.permute.xlu0 %3241 }
 0x1bb   :  { %11418 = vst [vmem:[#allocation67_spill] sm:$0xff] %v7748_v8 }
 0x1bf   :  { %v7746_v20 = vpop.permute.xlu1 %6379 }
 0x1c0   :  { %11417 = vst [vmem:[#allocation66_spill] sm:$0xff] %v7746_v20 }
 0x1cb   :  { %v7738_v60 = vpop.permute.xlu2 %6389 }
 0x1d3   :  { %v7744_v17 = vpop.permute.xlu2 %6394 }
 0x1db   :  { %v7750_v55 = vpop.permute.xlu2 %6404 }
 0x1dc   :  { %v6407_v19 = vunpack.i.h.bf16 %v7750_v55  ;;  %v6406_v7 = vunpack.i.l.bf16 %v7750_v55 }
 0x1de   :  { %v972_v55 = vsel %vm11202_vm1, %v6406_v7, %v6407_v19  ;;  %v6397_v7 = vunpack.i.h.bf16 %v7744_v17  ;;  %vm11423_vm1 = vcmp.lt.s32.totalorder %v7261_v38, 14 }
 0x1df   :  { %vm5943_vm9 = vmpackc.low %vm11424_vm12, %vm11423_vm1  ;;  %vm11230_vm12 = vcmp.ge.s32.totalorder %v7263_v39, 2 }
 0x1e1   :  { %v7752_v22 = vpop.permute.xlu1 %6384 }
 0x1e3   :  { %v7754_v30 = vpop.permute.xlu0 %6399  ;;  %v7756_v53 = vpop.permute.xlu2 %6409 }
 0x1e9   :  { %v7758_v6 = vpop.permute.xlu1 %6444 }
 0x1eb   :  { %v7760_v62 = vpop.permute.xlu0 %6414  ;;  %v7762_v31 = vpop.permute.xlu2 %6419 }
 0x1ec   :  { %v6422_v48 = vunpack.i.h.bf16 %v7762_v31  ;;  %v6421_v21 = vunpack.i.l.bf16 %v7762_v31 }
 0x1f1   :  { %v7764_v15 = vpop.permute.xlu1 %6449 }
 0x1f3   :  { %v7766_v33 = vpop.permute.xlu0 %6429  ;;  %v7768_v20 = vpop.permute.xlu2 %6424 }
 0x1f4   :  { %v6426_v59 = vunpack.i.l.bf16 %v7768_v20 }
 0x1f9   :  { %v7770_v8 = vpop.permute.xlu1 %6459 }
 0x1fb   :  { %v7772_v42 = vpop.permute.xlu0 %6454  ;;  %v7774_v49 = vpop.permute.xlu2 %6434 }
 0x1fc   :  { %v6436_v26 = vunpack.i.l.bf16 %v7774_v49 }
 0x201   :  { %v7776_v32 = vpop.permute.xlu1 %6464 }
 0x203   :  { %v7778_v37 = vpop.permute.xlu0 %6469  ;;  %v6440_v25 = vpop.permute.xlu2 %6439 }
 0x204   :  { %v6442_v47 = vunpack.i.h.bf16 %v6440_v25  ;;  %v6441_v4 = vunpack.i.l.bf16 %v6440_v25  ;;  %v6437_v25 = vunpack.i.h.bf16 %v7774_v49 }
 0x206   :  { %v1267_v56 = vsel %vm11196_vm13, %v6441_v4, %v6442_v47  ;;  %v1084_v4 = vsel %vm11203_vm4, %v6421_v21, %v6422_v48  ;;  %vm11207_vm13 = vcmask 1031168  }
 0x207   :  { %v1279_v63 = vsel %vm11197_vm6, %v1267_v56, 0.0  ;;  %vm11420_vm6 = vmmov 1   ;;  %v5938_v49 = vpack.c.bf16 %v1084_v4, %v972_v55  ;;  %v1214_v21 = vsel %vm11207_vm13, %v6436_v26, %v6437_v25 }
 0x208   :  { %v1343_v52 = vpack.c.bf16 %v1279_v63, %v1279_v63  ;;  %vm7801_vm3 = vmpackc.low %vm11420_vm6, %vm11204_vm7  ;;  %v6387_v4 = vunpack.i.h.bf16 %v7752_v22  ;;  %v5941_v55 = vpack.c.bf16 %v1214_v21, %v7642_v40  ;;  %vm11320_vm7 = vcmask 15360  }
 0x209   :  { %v7792_v58 = vpop.permute.xlu1 %6474  ;;  %vm5940_vm4 = vmpackc.low %vm11423_vm1, %vm11420_vm6  ;;  %v6411_v26 = vunpack.i.l.bf16 %v7756_v53  ;;  %vm11231_vm13 = vcmask 277504   ;;  %v6416_v63 = vunpack.i.l.bf16 %v7760_v62 }
 0x20a   :  { %v1358_v31 = vsel %vm11419_vm11, %v1343_v52, 0  ;;  %v6427_v52 = vunpack.i.h.bf16 %v7768_v20  ;;  %vm11228_vm11 = vcmask 244736   ;;  %v6412_v20 = vunpack.i.h.bf16 %v7756_v53  ;;  %vm7853_vm1 = vmpackc.low %vm11420_vm6, %vm11230_vm12 }
 0x20b   :  { %v7795_v56 = vpop.permute.xlu0 %6484  ;;  %1372 = vmatpush.bf16.msrb.mxu0 %v1358_v31  ;;  %v6396_v31 = vunpack.i.l.bf16 %v7744_v17 }
 0x20c   :  { %v1161_v46 = vsel %vm11228_vm11, %v6426_v59, %v6427_v52  ;;  %v1025_v21 = vsel %vm11232_vm15, %v6411_v26, %v6412_v20 }
 0x20d   :  { %v919_v9 = vsel %vm11320_vm7, %v6396_v31, %v6397_v7 }
 0x20e   :  { %v5944_v53 = vpack.c.bf16 %v919_v9, %v1161_v46  ;;  %v6486_v9 = vunpack.i.l.bf16 %v7795_v56 }
 0x20f   :  { %5939 = vmatpush.bf16.msk.msrb.mxu0 %vm7801_vm3, %v5938_v49  ;;  %v6386_v49 = vunpack.i.l.bf16 %v7752_v22  ;;  %v6471_v22 = vunpack.i.l.bf16 %v7778_v37 }
 0x211   :  { %v7820_v3 = vpop.permute.xlu1 %6479  ;;  %v866_v59 = vsel %vm11231_vm13, %v6386_v49, %v6387_v4 }
 0x212   :  { %v5947_v38 = vpack.c.bf16 %v1025_v21, %v866_v59 }
 0x213   :  { %v6495_v17 = vpop.permute.xlu0 %6494  ;;  %5942 = vmatpush.bf16.msk.msrb.mxu0 %vm5940_vm4, %v5941_v55  ;;  %v6456_v55 = vunpack.i.l.bf16 %v7772_v42  ;;  %vm11426_vm4 = vcmask 1043456  }
 0x214   :  { %v6496_v50 = vunpack.i.l.bf16 %v6495_v17 }
 0x216   :  { %v1268_v40 = vsel %vm11425_vm2, %v6442_v47, %v6496_v50  ;;  %vm11427_vm2 = vcmask 785408   ;;  %v7847_v50 = vld [vmem:[%s11101_s3] sm:$0xf]  ;;  %s11460_s3 = smov 50  }
 0x217   :  { %5945 = vmatpush.bf16.msk.msrb.mxu0 %vm5943_vm9, %v5944_v53  ;;  %v1280_v31 = vsel %vm11229_vm5, %v1268_v40, 0.0  ;;  %v1085_v47 = vsel %vm11427_vm2, %v6422_v48, %v6471_v22  ;;  %vm11428_vm9 = vcmask 801792   ;;  %v6431_v48 = vunpack.i.l.bf16 %v7766_v33  ;;  %vm5952_vm2 = vmpackc.low %vm11229_vm5, %vm11420_vm6 }
 0x218   :  { %v1344_v16 = vpack.c.bf16 %v1280_v31, %v1280_v31  ;;  %v973_v26 = vsel %vm11428_vm9, %v6407_v19, %v6456_v55  ;;  %v6401_v19 = vunpack.i.l.bf16 %v7754_v30  ;;  %v6391_v22 = vunpack.i.l.bf16 %v7738_v60 }
 0x219   :  { %v7839_v5 = vpop.permute.xlu1 %6489  ;;  %v5950_v49 = vpack.c.bf16 %v1085_v47, %v973_v26  ;;  %v1162_v59 = vsel %vm11228_vm11, %v6427_v52, %v6431_v48  ;;  %vm11233_vm9 = vcmp.lt.s32.totalorder %v7265_v41, 14  ;;  %v6476_v55 = vunpack.i.l.bf16 %v7792_v58 }
 0x21a   :  { %v1361_v46 = vsel %vm11426_vm4, %v1344_v16, 0  ;;  %vm11431_vm4 = vcmask 588800   ;;  %vm11433_vm11 = vcmask 769024   ;;  %v6472_v26 = vunpack.i.h.bf16 %v7778_v37 }
 0x21b   :  { %1385 = vmatpush.bf16.msrb.mxu1 %v1361_v46  ;;  %5948 = vmatpush.bf16.msk.msrb.mxu0 %vm7801_vm3, %v5947_v38  ;;  %vm11432_vm3 = vcmask 1031168   ;;  %v1026_v46 = vsel %vm11232_vm15, %v6412_v20, %v6416_v63  ;;  %v6462_v63 = vunpack.i.h.bf16 %v7770_v8  ;;  %v6491_v37 = vunpack.i.l.bf16 %v7839_v5 }
 0x21c   :  { %v1215_v38 = vsel %vm11432_vm3, %v6437_v25, %v6486_v9  ;;  %v6497_v25 = vunpack.i.h.bf16 %v6495_v17  ;;  %v920_v9 = vsel %vm11320_vm7, %v6397_v7, %v6401_v19  ;;  %vm5955_vm3 = vmpackc.low %vm11230_vm12, %vm11229_vm5  ;;  %vm11436_vm5 = vcmask 1043456  }
 0x21d   :  { %v5953_v53 = vpack.c.bf16 %v1215_v38, %v7644_v57  ;;  %v867_v57 = vsel %vm11231_vm13, %v6387_v4, %v6391_v22  ;;  %v5956_v52 = vpack.c.bf16 %v920_v9, %v1162_v59  ;;  %v6457_v38 = vunpack.i.h.bf16 %v7772_v42  ;;  %vm11437_vm12 = vmmov %vm11436_vm5 }
 0x21e   :  { %5771 = vmatmul.msk.bf16.vlgmr.msrb.gmra.mxu0 %vm11431_vm4, %v7847_v50  ;;  %vm11234_vm4 = vcmp.lt.s32.totalorder %v7155_v29, 14  ;;  %v6461_v4 = vunpack.i.l.bf16 %v7770_v8  ;;  %vm812_vm13 = vcmp.ge.s32.totalorder %v7155_v29, 2  ;;  %v6492_v42 = vunpack.i.h.bf16 %v7839_v5 }
 0x21f   :  { %5951 = vmatpush.bf16.msk.msrb.mxu1 %vm7853_vm1, %v5950_v49  ;;  %v6477_v49 = vunpack.i.h.bf16 %v7792_v58  ;;  %v6487_v8 = vunpack.i.h.bf16 %v7795_v56  ;;  %v6481_v16 = vunpack.i.l.bf16 %v7820_v3 }
 0x221   :  { %v6500_v40 = vpop.permute.xlu1 %6499 }
 0x222   :  { %v6502_v21 = vunpack.i.h.bf16 %v6500_v40  ;;  %v6501_v31 = vunpack.i.l.bf16 %v6500_v40 }
 0x223   :  { %5954 = vmatpush.bf16.msk.msrb.mxu1 %vm5952_vm2, %v5953_v53  ;;  %vm11434_vm2 = vmmov %vm11433_vm11  ;;  %v5959_v53 = vpack.c.bf16 %v1026_v46, %v867_v57  ;;  %v6482_v57 = vunpack.i.h.bf16 %v7820_v3  ;;  %v6432_v46 = vunpack.i.h.bf16 %v7766_v33  ;;  %v6452_v3 = vunpack.i.h.bf16 %v7764_v15 }
 0x224   :  { %v1271_v17 = vsel %vm11433_vm11, %v6497_v25, %v6501_v31  ;;  %v1272_v47 = vsel %vm11434_vm2, %v6501_v31, %v6502_v21  ;;  %vm811_vm11 = vcmp.ge.s32.totalorder %v7265_v41, 2  ;;  %vm11435_vm2 = vcmask 785408  }
 0x225   :  { %v1283_v7 = vsel %vm11233_vm9, %v1271_v17, 0.0  ;;  %v1284_v48 = vsel %vm11234_vm4, %v1272_v47, 0.0  ;;  %v1088_v58 = vsel %vm11435_vm2, %v6472_v26, %v6476_v55  ;;  %v6451_v17 = vunpack.i.l.bf16 %v7764_v15 }
 0x226   :  { %v1345_v20 = vpack.c.bf16 %v1283_v7, %v1283_v7  ;;  %v1346_v19 = vpack.c.bf16 %v1284_v48, %v1284_v48  ;;  %v6402_v26 = vunpack.i.h.bf16 %v7754_v30  ;;  %v6466_v33 = vunpack.i.l.bf16 %v7776_v32 }
 0x227   :  { %5957 = vmatpush.bf16.msk.msrb.mxu1 %vm5955_vm3, %v5956_v52  ;;  %vm11438_vm3 = vmmov %vm11435_vm2  ;;  %vm11439_vm2 = vcmask 801792   ;;  %v6467_v48 = vunpack.i.h.bf16 %v7776_v32  ;;  %v6417_v15 = vunpack.i.h.bf16 %v7760_v62  ;;  %v924_v32 = vsel %vm11320_vm7, %v6451_v17, %v6452_v3 }
 0x228   :  { %v1364_v22 = vsel %vm11436_vm5, %v1345_v20, 0  ;;  %v1367_v40 = vsel %vm11437_vm12, %v1346_v19, 0  ;;  %v1089_v59 = vsel %vm11438_vm3, %v6476_v55, %v6477_v49  ;;  %v976_v25 = vsel %vm11439_vm2, %v6457_v38, %v6461_v4  ;;  %vm7907_vm5 = vmpackc.low %vm11420_vm6, %vm811_vm11 }
 0x229   :  { %1398 = vmatpush.bf16.msrb.mxu2 %v1364_v22  ;;  %1411 = vmatpush.bf16.msrb.mxu3 %v1367_v40  ;;  %v5962_v31 = vpack.c.bf16 %v1088_v58, %v976_v25  ;;  %vm11442_vm12 = vmmov %vm11439_vm2  ;;  %vm11446_vm2 = vcmask 588800   ;;  %v6392_v62 = vunpack.i.h.bf16 %v7738_v60  ;;  %v6990_v60 = vmov 8.0  }
 0x22a   :  { %v977_v5 = vsel %vm11442_vm12, %v6461_v4, %v6462_v63  ;;  %vm7915_vm3 = vmpackc.low %vm11420_vm6, %vm812_vm13  ;;  %v923_v4 = vsel %vm11320_vm7, %v6402_v26, %v6451_v17  ;;  %6830 = vrcp.f32 %v6990_v60 }
 0x22b   :  { %5960 = vmatpush.bf16.msk.msrb.mxu1 %vm7853_vm1, %v5959_v53  ;;  %v5974_v55 = vpack.c.bf16 %v1089_v59, %v977_v5  ;;  %vm11445_vm1 = vcmask 1031168  }
 0x22c   :  { %v1218_v9 = vsel %vm11445_vm1, %v6487_v8, %v6491_v37  ;;  %vm11447_vm12 = vmmov %vm11445_vm1 }
 0x22d   :  { %5963 = vmatpush.bf16.msk.msrb.mxu2 %vm7907_vm5, %v5962_v31  ;;  %v1219_v52 = vsel %vm11447_vm12, %v6491_v37, %v6492_v42  ;;  %5975 = vmatpush.bf16.msk.msrb.mxu3 %vm7915_vm3, %v5974_v55  ;;  %vm5964_vm1 = vmpackc.low %vm11233_vm9, %vm11420_vm6  ;;  %v5965_v47 = vpack.c.bf16 %v1218_v9, %v7654_v18  ;;  %vm11448_vm12 = vcmask 244736   ;;  %v6446_v18 = vunpack.i.l.bf16 %v7758_v6 }
 0x22e   :  { %5772 = vmatmul.msk.bf16.vlgmr.msrb.gmra.mxu1 %vm11446_vm2, %v7847_v50  ;;  %vm5976_vm2 = vmpackc.low %vm11234_vm4, %vm11420_vm6  ;;  %v5977_v49 = vpack.c.bf16 %v1219_v52, %v7656_v45  ;;  %v1165_v7 = vsel %vm11448_vm12, %v6432_v46, %v6481_v16  ;;  %v6447_v45 = vunpack.i.h.bf16 %v7758_v6 }
 0x22f   :  { %vm11449_vm15 = vmmov %vm11448_vm12  ;;  %v5968_v30 = vpack.c.bf16 %v923_v4, %v1165_v7  ;;  %vm11452_vm12 = vcmask 277504  }
 0x230   :  { %v1166_v38 = vsel %vm11449_vm15, %v6481_v16, %v6482_v57  ;;  %vm5967_vm6 = vmpackc.low %vm811_vm11, %vm11233_vm9  ;;  %v870_v53 = vsel %vm11452_vm12, %v6392_v62, %v6446_v18  ;;  %v6831_v22 = vpop.eup %6830 }
 0x231   :  { %5966 = vmatpush.bf16.msk.msrb.mxu2 %vm5964_vm1, %v5965_v47  ;;  %5978 = vmatpush.bf16.msk.msrb.mxu3 %vm5976_vm2, %v5977_v49  ;;  %vm5979_vm15 = vmpackc.low %vm812_vm13, %vm11234_vm4  ;;  %v5980_v20 = vpack.c.bf16 %v924_v32, %v1166_v38  ;;  %vm11450_vm1 = vcmask 261120   ;;  %vm11454_vm4 = vcmask 588800   ;;  %v1446_v40 = vmul.f32 8.0, %v6831_v22 }
 0x232   :  { %v1029_v19 = vsel %vm11450_vm1, %v6417_v15, %v6466_v33  ;;  %vm11451_vm2 = vmmov %vm11450_vm1  ;;  %vm1495_vm1 = vcmp.ge.s32.totalorder %v7263_v39, 3 }
 0x233   :  { %v1030_v63 = vsel %vm11451_vm2, %v6466_v33, %v6467_v48  ;;  %v5971_v6 = vpack.c.bf16 %v1029_v19, %v870_v53  ;;  %vm11453_vm9 = vmmov %vm11452_vm12  ;;  %v1447_v59 = vsub.f32 1.0, %v1446_v40  ;;  %vm1595_vm2 = vcmask 285696  }
 0x234   :  { %v871_v58 = vsel %vm11453_vm9, %v6446_v18, %v6447_v45  ;;  %vm1450_vm9 = vweird.f32 %v6831_v22  ;;  %vm1652_vm12 = vcmask 154624  }
 0x235   :  { %5969 = vmatpush.bf16.msk.msrb.mxu2 %vm5967_vm6, %v5968_v30  ;;  %5981 = vmatpush.bf16.msk.msrb.mxu3 %vm5979_vm15, %v5980_v20  ;;  %v5983_v37 = vpack.c.bf16 %v1030_v63, %v871_v58  ;;  %vm11455_vm6 = vmmov %vm11454_vm4  ;;  %v1448_v21 = vmul.f32 %v6831_v22, %v1447_v59 }
 0x237   :  { %v1449_v55 = vadd.f32 %v6831_v22, %v1448_v21 }
 0x239   :  { %5972 = vmatpush.bf16.msk.msrb.mxu2 %vm7907_vm5, %v5971_v6  ;;  %5984 = vmatpush.bf16.msk.msrb.mxu3 %vm7915_vm3, %v5983_v37  ;;  %v7977_v17 = vsel %vm1450_vm9, %v6831_v22, %v1449_v55  ;;  %vm11308_vm5 = vcmask 1041408   ;;  %vm1538_vm3 = vcmask 416768   ;;  %vm1496_vm9 = vcmp.ge.s32.totalorder %v7265_v41, 3 }
 0x23c   :  { %5773 = vmatmul.msk.bf16.vlgmr.msrb.gmra.mxu2 %vm11454_vm4, %v7847_v50  ;;  %5774 = vmatmul.msk.bf16.vlgmr.msrb.gmra.mxu3 %vm11455_vm6, %v7847_v50  ;;  %vm1480_vm4 = vcmask 1040384   ;;  %vm1497_vm6 = vcmp.ge.s32.totalorder %v7155_v29, 3 }
 0x29b   :  { %v1378_v42 = vpop.f32.mrf.mxu0 }
 0x29c   :  { %v7972_v8 = vadd.f32 %v1378_v42, %v7583_v36 }
 0x29e   :  { %11456 = vst [vmem:[#allocation68_spill] sm:$0xff] %v7972_v8  ;;  %v1421_v25 = vrot.slane %v7972_v8, 4 }
 0x2a0   :  { %v1422_v31 = vadd.f32 %v1421_v25, %v7972_v8  ;;  %v1457_v5 = vmax.f32 %v7972_v8, %v1421_v25 }
 0x2a2   :  { %v1423_v56 = vrot.slane %v1422_v31, 2  ;;  %v1458_v16 = vrot.slane %v1457_v5, 2 }
 0x2a3   :  { %v1380_v50 = vpop.f32.mrf.mxu0 }
 0x2a4   :  { %v1424_v9 = vadd.f32 %v1423_v56, %v1422_v31  ;;  %v1459_v57 = vmax.f32 %v1457_v5, %v1458_v16 }
 0x2a6   :  { %v1425_v52 = vrot.slane %v1424_v9, 1  ;;  %v1460_v46 = vrot.slane %v1459_v57, 1 }
 0x2a8   :  { %v1426_v3 = vadd.f32 %v1425_v52, %v1424_v9  ;;  %v1461_v26 = vmax.f32 %v1459_v57, %v1460_v46 }
 0x2aa   :  { %v1452_v47 = vmul.f32 %v7977_v17, %v1426_v3 }
 0x2ab   :  { %v1391_v33 = vpop.f32.mrf.mxu1 }
 0x2ac   :  { %v1481_v49 = vsel %vm1480_vm4, %v1452_v47, %v1461_v26  ;;  %v7982_v7 = vadd.f32 %v1391_v33, %v7583_v36 }
 0x2ad   :  { %v1486_v48 = vsel %vm11308_vm5, %v1481_v49, 0.0 }
 0x2ae   :  { %11457 = vst [vmem:[#allocation69_spill] sm:$0xff] %v7982_v7  ;;  %v1427_v38 = vrot.slane %v7982_v7, 4 }
 0x2af   :  { %1490 = vst [vmem:[#allocation2 + $0x18] sm:$0xff] %v1486_v48 }
 0x2b0   :  { %v1428_v15 = vadd.f32 %v1427_v38, %v7982_v7  ;;  %v1463_v18 = vmax.f32 %v7982_v7, %v1427_v38 }
 0x2b2   :  { %v1429_v4 = vrot.slane %v1428_v15, 2  ;;  %v1464_v45 = vrot.slane %v1463_v18, 2 }
 0x2b3   :  { %v1393_v30 = vpop.f32.mrf.mxu1 }
 0x2b4   :  { %v1430_v32 = vadd.f32 %v1429_v4, %v1428_v15  ;;  %v1465_v62 = vmax.f32 %v1463_v18, %v1464_v45 }
 0x2b6   :  { %v7988_v20 = vld [vmem:[#allocation2 + $0x18] sm:$0x3]  ;;  %v1431_v19 = vrot.slane %v1430_v32, 1  ;;  %v1466_v63 = vrot.slane %v1465_v62, 1 }
 0x2b7   :  { %1585 = vrot.lane.b32.xlu0 %v7988_v20, %s6966_s25  ;;  %1528 = vrot.lane.b32.xlu1 %v7988_v20, %s6963_s2 }
 0x2b8   :  { %v1432_v53 = vadd.f32 %v1431_v19, %v1430_v32  ;;  %v1467_v58 = vmax.f32 %v1465_v62, %v1466_v63 }
 0x2ba   :  { %v1453_v6 = vmul.f32 %v7977_v17, %v1432_v53 }
 0x2bc   :  { %v1482_v37 = vsel %vm1480_vm4, %v1453_v6, %v1467_v58 }
 0x2bd   :  { %v1487_v60 = vsel %vm11308_vm5, %v1482_v37, 0.0  ;;  %v8031_v37 = vld [vmem:[#allocation2 + $0x18] sm:$0x3] }
 0x2be   :  { %1491 = vst [vmem:[#allocation2 + $0x8] sm:$0xff] %v1487_v60 }
 0x2bf   :  { %v1404_v22 = vpop.f32.mrf.mxu2  ;;  %v1417_v42 = vpop.f32.mrf.mxu3 }
 0x2c0   :  { %v7998_v40 = vadd.f32 %v1404_v22, %v7583_v36  ;;  %v8001_v59 = vadd.f32 %v1417_v42, %v7583_v36  ;;  %v3010_v22 = vmul.f32 %v7517_v35, %v8031_v37  ;;  %v2732_v42 = vmul.f32 %v7497_v14, %v7988_v20 }
 0x2c2   :  { %11458 = vst [vmem:[#allocation70_spill] sm:$0xff] %v7998_v40  ;;  %v1433_v25 = vrot.slane %v7998_v40, 4  ;;  %v1439_v21 = vrot.slane %v8001_v59, 4 }
 0x2c3   :  { %11459 = vst [vmem:[#allocation71_spill] sm:$0xff] %v8001_v59 }
 0x2c4   :  { %v1434_v5 = vadd.f32 %v1433_v25, %v7998_v40  ;;  %v1469_v56 = vmax.f32 %v7998_v40, %v1433_v25  ;;  %v1440_v16 = vadd.f32 %v1439_v21, %v8001_v59  ;;  %v1475_v55 = vmax.f32 %v8001_v59, %v1439_v21 }
 0x2c5   :  { %v8005_v31 = vld [vmem:[#allocation2 + $0x8] sm:$0x3] }
 0x2c6   :  { %1530 = vrot.lane.b32.xlu2 %v8005_v31, %s6963_s2  ;;  %1644 = vrot.lane.b32.xlu0 %v8005_v31, %s6969_s28  ;;  %v1435_v36 = vrot.slane %v1434_v5, 2  ;;  %v1470_v50 = vrot.slane %v1469_v56, 2  ;;  %v1441_v9 = vrot.slane %v1440_v16, 2  ;;  %v1476_v57 = vrot.slane %v1475_v55, 2  ;;  %v8017_v18 = vld [vmem:[#allocation2 + $0x8] sm:$0x3] }
 0x2c7   :  { %1587 = vrot.lane.b32.xlu1 %v8005_v31, %s6966_s25  ;;  %v1406_v52 = vpop.f32.mrf.mxu2  ;;  %v1419_v47 = vpop.f32.mrf.mxu3 }
 0x2c8   :  { %v1436_v46 = vadd.f32 %v1435_v36, %v1434_v5  ;;  %v1471_v3 = vmax.f32 %v1469_v56, %v1470_v50  ;;  %v1442_v26 = vadd.f32 %v1441_v9, %v1440_v16  ;;  %v1477_v33 = vmax.f32 %v1475_v55, %v1476_v57 }
 0x2c9   :  { %v2733_v56 = vmul.f32 %v7497_v14, %v8005_v31  ;;  %v3092_v16 = vmul.f32 %v7557_v43, %v8031_v37  ;;  %v2815_v55 = vmul.f32 %v7528_v51, %v7988_v20  ;;  %v3048_v9 = vmul.f32 %v7553_v0, %v8031_v37 }
 0x2ca   :  { %v1437_v49 = vrot.slane %v1436_v46, 1  ;;  %v1472_v48 = vrot.slane %v1471_v3, 1  ;;  %v1443_v38 = vrot.slane %v1442_v26, 1  ;;  %v1478_v15 = vrot.slane %v1477_v33, 1 }
 0x2cb   :  { %v2816_v52 = vmul.f32 %v7528_v51, %v8005_v31 }
 0x2cc   :  { %v1438_v4 = vadd.f32 %v1437_v49, %v1436_v46  ;;  %v1444_v45 = vadd.f32 %v1443_v38, %v1442_v26  ;;  %v1473_v32 = vmax.f32 %v1471_v3, %v1472_v48  ;;  %v1479_v19 = vmax.f32 %v1477_v33, %v1478_v15 }
 0x2cd   :  { %v3060_v46 = vrot.slane %v3048_v9, 1  ;;  %v2897_v3 = vmul.f32 %v7559_v2, %v7988_v20  ;;  %v2898_v49 = vmul.f32 %v7559_v2, %v8005_v31  ;;  %v3011_v38 = vmul.f32 %v7517_v35, %v8017_v18 }
 0x2ce   :  { %1642 = vrot.lane.b32.xlu2 %v7988_v20, %s6969_s28  ;;  %1768 = vrot.lane.b32.xlu0 %v8017_v18, %s6972_s19  ;;  %v1454_v30 = vmul.f32 %v7977_v17, %v1438_v4  ;;  %v1455_v62 = vmul.f32 %v7977_v17, %v1444_v45  ;;  %v2772_v45 = vmul.f32 %v7510_v24, %v8005_v31 }
 0x2cf   :  { %1699 = vrot.lane.b32.xlu1 %v7988_v20, %s6964_s23  ;;  %v2936_v9 = vmul.f32 %v7585_v34, %v8005_v31 }
 0x2d0   :  { %v1483_v63 = vsel %vm1480_vm4, %v1454_v30, %v1473_v32  ;;  %v1484_v6 = vsel %vm1480_vm4, %v1455_v62, %v1479_v19  ;;  %v2784_v32 = vrot.slane %v2772_v45, 1  ;;  %v3093_v19 = vmul.f32 %v7557_v43, %v8017_v18 }
 0x2d1   :  { %v1488_v53 = vsel %vm11308_vm5, %v1483_v63, 0.0  ;;  %v1489_v58 = vsel %vm11308_vm5, %v1484_v6, 0.0  ;;  %v2854_v6 = vmul.f32 %v7535_v11, %v8005_v31  ;;  %vm1778_vm4 = vcmask 941056  }
 0x2d2   :  { %1492 = vst [vmem:[#allocation2 + $0x10] sm:$0xff] %v1488_v53  ;;  %vm1835_vm5 = vcmask 809984  }
 0x2d3   :  { %1493 = vst [vmem:[#allocation2 + $0x30] sm:$0xff] %v1489_v58 }
 0x2d6   :  { %1701 = vrot.lane.b32.xlu2 %v8005_v31, %s6964_s23  ;;  %1880 = vrot.lane.b32.xlu0 %v8031_v37, %s6968_s27 }
 0x2d7   :  { %1823 = vrot.lane.b32.xlu1 %v8031_v37, %s6965_s1 }
 0x2d9   :  { %v8149_v48 = vld [vmem:[#allocation2 + $0x10] sm:$0x3] }
 0x2da   :  { %v8165_v62 = vld [vmem:[#allocation2 + $0x30] sm:$0x3] }
 0x2db   :  { %v2736_v1 = vmul.f32 %v7497_v14, %v8165_v62 }
 0x2de   :  { %1766 = vrot.lane.b32.xlu2 %v8031_v37, %s6972_s19  ;;  %1939 = vrot.lane.b32.xlu0 %v7988_v20, %s11460_s3 }
 0x2df   :  { %1882 = vrot.lane.b32.xlu1 %v8017_v18, %s6968_s27 }
 0x2e6   :  { %1825 = vrot.lane.b32.xlu2 %v8017_v18, %s6965_s1  ;;  %1998 = vrot.lane.b32.xlu0 %v8005_v31, %s6975_s4 }
 0x2e7   :  { %1941 = vrot.lane.b32.xlu1 %v8005_v31, %s11460_s3 }
 0x2ee   :  { %1996 = vrot.lane.b32.xlu2 %v7988_v20, %s6975_s4  ;;  %2109 = vrot.lane.b32.xlu0 %v7988_v20, %s6974_s21 }
 0x2ef   :  { %2052 = vrot.lane.b32.xlu1 %v7988_v20, %s11461_s17 }
 0x2f6   :  { %2054 = vrot.lane.b32.xlu2 %v8005_v31, %s11461_s17  ;;  %2220 = vrot.lane.b32.xlu0 %v8031_v37, %s6977_s18 }
 0x2f7   :  { %2111 = vrot.lane.b32.xlu1 %v8005_v31, %s6974_s21 }
 0x2fe   :  { %2165 = vrot.lane.b32.xlu2 %v8017_v18, %s11462_s5  ;;  %2278 = vrot.lane.b32.xlu0 %v8017_v18, %s6978_s20 }
 0x2ff   :  { %2163 = vrot.lane.b32.xlu1 %v8031_v37, %s11462_s5 }
 0x306   :  { %2276 = vrot.lane.b32.xlu2 %v8031_v37, %s6978_s20  ;;  %2337 = vrot.lane.b32.xlu0 %v8005_v31, %s11243_s13 }
 0x307   :  { %2222 = vrot.lane.b32.xlu1 %v8017_v18, %s6977_s18 }
 0x30e   :  { %2335 = vrot.lane.b32.xlu2 %v7988_v20, %s11243_s13  ;;  %2449 = vrot.lane.b32.xlu0 %v7988_v20, %s11245_s0  ;;  %s11467_s13 = smov 81  }
 0x30f   :  { %2392 = vrot.lane.b32.xlu1 %v7988_v20, %s11463_s29 }
 0x316   :  { %2394 = vrot.lane.b32.xlu2 %v8005_v31, %s11463_s29  ;;  %2507 = vrot.lane.b32.xlu0 %v8005_v31, %s11464_s16 }
 0x317   :  { %2451 = vrot.lane.b32.xlu1 %v8005_v31, %s11245_s0  ;;  %s11468_s0 = smov 48  }
 0x31e   :  { %2505 = vrot.lane.b32.xlu2 %v7988_v20, %s11464_s16  ;;  %2559 = vrot.lane.b32.xlu0 %v8031_v37, %s11465_s14 }
 0x31f   :  { %2561 = vrot.lane.b32.xlu1 %v8017_v18, %s11465_s14 }
 0x320   :  { %v8093_v17 = vpop.permute.xlu2 %1530 }
 0x326   :  { %2615 = vrot.lane.b32.xlu2 %v8031_v37, %s11466_s26  ;;  %2617 = vrot.lane.b32.xlu0 %v8017_v18, %s11466_s26 }
 0x327   :  { %2672 = vrot.lane.b32.xlu1 %v8031_v37, %s11467_s13 }
 0x328   :  { %v8101_v60 = vpop.permute.xlu2 %1642 }
 0x329   :  { %v8111_v25 = vpop.permute.xlu0 %1585  ;;  %v8115_v5 = vpop.permute.xlu1 %1528 }
 0x32e   :  { %2674 = vrot.lane.b32.xlu2 %v8017_v18, %s11467_s13  ;;  %3022 = vrot.lane.b32.xlu0 %v3010_v22, %s6957_s15  ;;  %v2771_v22 = vmul.f32 %v7510_v24, %v7988_v20 }
 0x32f   :  { %2745 = vrot.lane.b32.xlu1 %v2732_v42, %s11468_s0  ;;  %v2866_v42 = vrot.slane %v2854_v6, 1  ;;  %v8211_v6 = vld [vmem:[#allocation2 + $0x10] sm:$0x3] }
 0x330   :  { %v8113_v21 = vpop.permute.xlu2 %1701  ;;  %v3051_v61 = vmul.f32 %v7553_v0, %v8211_v6 }
 0x336   :  { %2747 = vrot.lane.b32.xlu2 %v2733_v56, %s11468_s0  ;;  %3104 = vrot.lane.b32.xlu0 %v3092_v16, %s6983_s22  ;;  %v2783_v56 = vrot.slane %v2771_v22, 1 }
 0x337   :  { %2828 = vrot.lane.b32.xlu1 %v2815_v55, %s6981_s24 }
 0x338   :  { %v8126_v36 = vpop.permute.xlu2 %1766  ;;  %v8128_v50 = vpop.permute.xlu0 %1644 }
 0x339   :  { %v8132_v57 = vpop.permute.xlu1 %1587 }
 0x33e   :  { %2830 = vrot.lane.b32.xlu2 %v2816_v52, %s6981_s24  ;;  %3066 = vrot.lane.b32.xlu0 %v3060_v46, %s6957_s15  ;;  %v2853_v46 = vmul.f32 %v7535_v11, %v7988_v20 }
 0x33f   :  { %2910 = vrot.lane.b32.xlu1 %v2897_v3, %s6951_s30  ;;  %v2948_v3 = vrot.slane %v2936_v9, 1 }
 0x340   :  { %v8141_v47 = vpop.permute.xlu2 %1825  ;;  %v8143_v26 = vpop.permute.xlu0 %1768 }
 0x341   :  { %v8145_v33 = vpop.permute.xlu1 %1699 }
 0x346   :  { %2912 = vrot.lane.b32.xlu2 %v2898_v49, %s6951_s30  ;;  %1534 = vrot.lane.b32.xlu0 %v8149_v48, %s6963_s2  ;;  %v8197_v49 = vld [vmem:[#allocation2 + $0x30] sm:$0x3] }
 0x347   :  { %3024 = vrot.lane.b32.xlu1 %v3011_v38, %s6957_s15  ;;  %v2865_v38 = vrot.slane %v2853_v46, 1 }
 0x348   :  { %v8157_v15 = vpop.permute.xlu2 %1996  ;;  %v8159_v4 = vpop.permute.xlu0 %1880 }
 0x349   :  { %11469 = vst [vmem:[#allocation72_spill] sm:$0xff] %v8157_v15  ;;  %v8163_v30 = vpop.permute.xlu1 %1823  ;;  %v11531_v15 = vld [vmem:[#allocation38_spill] sm:$0xff] }
 0x34a   :  { %11470 = vst [vmem:[#allocation73_spill] sm:$0xff] %v8159_v4  ;;  %v2819_v4 = vmul.f32 %v7528_v51, %v8165_v62 }
 0x34e   :  { %2792 = vrot.lane.b32.xlu2 %v2784_v32, %s11468_s0  ;;  %1593 = vrot.lane.b32.xlu0 %v8165_v62, %s6966_s25 }
 0x34f   :  { %3106 = vrot.lane.b32.xlu1 %v3093_v19, %s6983_s22  ;;  %v2935_v19 = vmul.f32 %v7585_v34, %v7988_v20  ;;  %v3049_v20 = vmul.f32 %v7553_v0, %v8017_v18 }
 0x350   :  { %v8173_v63 = vpop.permute.xlu2 %2054  ;;  %v8175_v53 = vpop.permute.xlu0 %1939 }
 0x351   :  { %11471 = vst [vmem:[#allocation74_spill] sm:$0xff] %v8173_v63  ;;  %v8179_v58 = vpop.permute.xlu1 %1882  ;;  %v2947_v22 = vrot.slane %v2935_v19, 1  ;;  %v3061_v46 = vrot.slane %v3049_v20, 1 }
 0x352   :  { %11472 = vst [vmem:[#allocation75_spill] sm:$0xff] %v8175_v53  ;;  %v8508_v53 = vmul.f32 %v7557_v43, %v8211_v6 }
 0x353   :  { %11473 = vst [vmem:[#allocation76_spill] sm:$0xff] %v8179_v58 }
 0x356   :  { %2874 = vrot.lane.b32.xlu2 %v2866_v42, %s6981_s24  ;;  %1705 = vrot.lane.b32.xlu0 %v8149_v48, %s6964_s23 }
 0x357   :  { %2790 = vrot.lane.b32.xlu1 %v2783_v56, %s11468_s0 }
 0x358   :  { %v8187_v16 = vpop.permute.xlu2 %2165  ;;  %v8189_v55 = vpop.permute.xlu0 %1998 }
 0x359   :  { %11474 = vst [vmem:[#allocation77_spill] sm:$0xff] %v8187_v16  ;;  %v8193_v52 = vpop.permute.xlu1 %1941  ;;  %v11535_v16 = vld [vmem:[#allocation23_spill] sm:$0xff] }
 0x35a   :  { %11475 = vst [vmem:[#allocation78_spill] sm:$0xff] %v8189_v55  ;;  %v3096_v55 = vmul.f32 %v7557_v43, %v8197_v49  ;;  %v8448_v44 = vmul.f32 %v11535_v16, %v8017_v18  ;;  %v8496_v10 = vmul.f32 %v11535_v16, %v8197_v49 }
 0x35b   :  { %11476 = vst [vmem:[#allocation79_spill] sm:$0xff] %v8193_v52  ;;  %v11548_v52 = vld [vmem:[#allocation13_spill] sm:$0xff] }
 0x35c   :  { %vm1494_vm15 = vcmp.ge.s32.totalorder %v11548_v52, 3 }
 0x35e   :  { %2956 = vrot.lane.b32.xlu2 %v2948_v3, %s6951_s30  ;;  %1774 = vrot.lane.b32.xlu0 %v8197_v49, %s6972_s19 }
 0x35f   :  { %2872 = vrot.lane.b32.xlu1 %v2865_v38, %s6981_s24 }
 0x360   :  { %v8203_v45 = vpop.permute.xlu2 %2276  ;;  %v8205_v32 = vpop.permute.xlu0 %2109 }
 0x361   :  { %11477 = vst [vmem:[#allocation80_spill] sm:$0xff] %v8203_v45  ;;  %v8207_v31 = vpop.permute.xlu1 %2052 }
 0x362   :  { %11478 = vst [vmem:[#allocation81_spill] sm:$0xff] %v8205_v32 }
 0x363   :  { %11479 = vst [vmem:[#allocation82_spill] sm:$0xff] %v8207_v31 }
 0x366   :  { %1591 = vrot.lane.b32.xlu2 %v8149_v48, %s6966_s25  ;;  %1886 = vrot.lane.b32.xlu0 %v8211_v6, %s6968_s27  ;;  %s11515_s25 = smov 31  }
 0x367   :  { %2954 = vrot.lane.b32.xlu1 %v2947_v22, %s6951_s30 }
 0x368   :  { %v8218_v42 = vpop.permute.xlu2 %2335  ;;  %v8220_v56 = vpop.permute.xlu0 %2220 }
 0x369   :  { %11480 = vst [vmem:[#allocation83_spill] sm:$0xff] %v8218_v42  ;;  %v8222_v9 = vpop.permute.xlu1 %2111 }
 0x36a   :  { %11481 = vst [vmem:[#allocation84_spill] sm:$0xff] %v8220_v56 }
 0x36b   :  { %11482 = vst [vmem:[#allocation85_spill] sm:$0xff] %v8222_v9  ;;  %v11528_v9 = vld [vmem:[#allocation35_spill] sm:$0xff] }
 0x36e   :  { %1650 = vrot.lane.b32.xlu2 %v8165_v62, %s6969_s28  ;;  %1947 = vrot.lane.b32.xlu0 %v8165_v62, %s11460_s3 }
 0x36f   :  { %3068 = vrot.lane.b32.xlu1 %v3061_v46, %s6957_s15 }
 0x370   :  { %v8231_v3 = vpop.permute.xlu2 %2394  ;;  %v8233_v38 = vpop.permute.xlu0 %2278 }
 0x371   :  { %11483 = vst [vmem:[#allocation86_spill] sm:$0xff] %v8231_v3  ;;  %v8235_v19 = vpop.permute.xlu1 %2163 }
 0x372   :  { %11484 = vst [vmem:[#allocation87_spill] sm:$0xff] %v8233_v38  ;;  %v3013_v38 = vmul.f32 %v7517_v35, %v8211_v6 }
 0x373   :  { %11485 = vst [vmem:[#allocation88_spill] sm:$0xff] %v8235_v19 }
 0x376   :  { %1772 = vrot.lane.b32.xlu2 %v8211_v6, %s6972_s19  ;;  %2058 = vrot.lane.b32.xlu0 %v8149_v48, %s11461_s17  ;;  %s8502_s19 = sld [smem:[#allocation7]] }
 0x377   :  { %1536 = vrot.lane.b32.xlu1 %v8165_v62, %s6963_s2  ;;  %s11501_s2 = smov 17  }
 0x378   :  { %v8243_v22 = vpop.permute.xlu2 %2505  ;;  %v8245_v20 = vpop.permute.xlu0 %2337 }
 0x379   :  { %11486 = vst [vmem:[#allocation89_spill] sm:$0xff] %v8243_v22  ;;  %v8247_v46 = vpop.permute.xlu1 %2222 }
 0x37a   :  { %11487 = vst [vmem:[#allocation90_spill] sm:$0xff] %v8245_v20 }
 0x37b   :  { %11488 = vst [vmem:[#allocation91_spill] sm:$0xff] %v8247_v46 }
 0x37e   :  { %1831 = vrot.lane.b32.xlu2 %v8197_v49, %s6965_s1  ;;  %2117 = vrot.lane.b32.xlu0 %v8165_v62, %s6974_s21 }
 0x37f   :  { %1648 = vrot.lane.b32.xlu1 %v8149_v48, %s6969_s28  ;;  %s8442_s28 = sld [smem:[#allocation7 + $0x1]] }
 0x380   :  { %v8255_v7 = vpop.permute.xlu2 %2615  ;;  %v8257_v8 = vpop.permute.xlu0 %2449 }
 0x381   :  { %11489 = vst [vmem:[#allocation92_spill] sm:$0xff] %v8255_v7  ;;  %v8259_v40 = vpop.permute.xlu1 %2392 }
 0x382   :  { %11490 = vst [vmem:[#allocation93_spill] sm:$0xff] %v8257_v8 }
 0x383   :  { %11491 = vst [vmem:[#allocation94_spill] sm:$0xff] %v8259_v40 }
 0x385   :  { %v8531_v43 = vstv %s8442_s28  ;;  %s8760_s28 = sld [smem:[#allocation7 + $0x39]] }
 0x386   :  { %1945 = vrot.lane.b32.xlu2 %v8149_v48, %s11460_s3  ;;  %2226 = vrot.lane.b32.xlu0 %v8211_v6, %s6977_s18  ;;  %s8638_s3 = sld [smem:[#allocation7 + $0x2a]] }
 0x387   :  { %1707 = vrot.lane.b32.xlu1 %v8165_v62, %s6964_s23  ;;  %s11508_s23 = smov 49  }
 0x388   :  { %v8267_v59 = vpop.permute.xlu2 %2674  ;;  %v8269_v22 = vpop.permute.xlu0 %2507 }
 0x389   :  { %11492 = vst [vmem:[#allocation95_spill] sm:$0xff] %v8267_v59  ;;  %v8271_v3 = vpop.permute.xlu1 %2451 }
 0x38a   :  { %11493 = vst [vmem:[#allocation96_spill] sm:$0xff] %v8269_v22 }
 0x38b   :  { %11494 = vst [vmem:[#allocation97_spill] sm:$0xff] %v8271_v3 }
 0x38e   :  { %2004 = vrot.lane.b32.xlu2 %v8165_v62, %s6975_s4  ;;  %2284 = vrot.lane.b32.xlu0 %v8197_v49, %s6978_s20 }
 0x38f   :  { %1829 = vrot.lane.b32.xlu1 %v8211_v6, %s6965_s1  ;;  %s11512_s1 = smov 47  }
 0x390   :  { %v8279_v7 = vpop.permute.xlu2 %2747  ;;  %v8281_v8 = vpop.permute.xlu0 %2559 }
 0x391   :  { %11495 = vst [vmem:[#allocation98_spill] sm:$0xff] %v8279_v7  ;;  %v8283_v40 = vpop.permute.xlu1 %2561 }
 0x392   :  { %11496 = vst [vmem:[#allocation99_spill] sm:$0xff] %v8281_v8 }
 0x393   :  { %11497 = vst [vmem:[#allocation100_spill] sm:$0xff] %v8283_v40 }
 0x396   :  { %2115 = vrot.lane.b32.xlu2 %v8149_v48, %s6974_s21  ;;  %2398 = vrot.lane.b32.xlu0 %v8149_v48, %s11463_s29  ;;  %s8543_s21 = sld [smem:[#allocation7 + $0xf]] }
 0x397   :  { %1888 = vrot.lane.b32.xlu1 %v8197_v49, %s6968_s27  ;;  %s11519_s27 = smov 127  }
 0x398   :  { %v8291_v59 = vpop.permute.xlu2 %2830  ;;  %v8293_v22 = vpop.permute.xlu0 %2617 }
 0x399   :  { %11498 = vst [vmem:[#allocation101_spill] sm:$0xff] %v8291_v59  ;;  %v8295_v3 = vpop.permute.xlu1 %2672 }
 0x39a   :  { %11499 = vst [vmem:[#allocation102_spill] sm:$0xff] %v8293_v22 }
 0x39b   :  { %11500 = vst [vmem:[#allocation103_spill] sm:$0xff] %v8295_v3 }
 0x39e   :  { %2171 = vrot.lane.b32.xlu2 %v8197_v49, %s11462_s5  ;;  %2457 = vrot.lane.b32.xlu0 %v8165_v62, %s11501_s2 }
 0x39f   :  { %2002 = vrot.lane.b32.xlu1 %v8149_v48, %s6975_s4  ;;  %s8554_s4 = sld [smem:[#allocation7 + $0x1d]] }
 0x3a0   :  { %v8303_v7 = vpop.permute.xlu2 %2912  ;;  %v8305_v8 = vpop.permute.xlu0 %3022 }
 0x3a1   :  { %11502 = vst [vmem:[#allocation104_spill] sm:$0xff] %v8303_v7  ;;  %v8307_v40 = vpop.permute.xlu1 %2745 }
 0x3a2   :  { %11503 = vst [vmem:[#allocation105_spill] sm:$0xff] %v8305_v8 }
 0x3a3   :  { %11504 = vst [vmem:[#allocation106_spill] sm:$0xff] %v8307_v40 }
 0x3a6   :  { %2282 = vrot.lane.b32.xlu2 %v8211_v6, %s6978_s20  ;;  %2565 = vrot.lane.b32.xlu0 %v8211_v6, %s11465_s14  ;;  %s8528_s20 = sld [smem:[#allocation7 + $0xe]] }
 0x3a7   :  { %2060 = vrot.lane.b32.xlu1 %v8165_v62, %s11461_s17  ;;  %s8645_s17 = sld [smem:[#allocation7 + $0x2b]] }
 0x3a8   :  { %v8315_v59 = vpop.permute.xlu2 %2792  ;;  %v8317_v3 = vpop.permute.xlu0 %3104 }
 0x3a9   :  { %11505 = vst [vmem:[#allocation107_spill] sm:$0xff] %v8315_v59  ;;  %v8319_v22 = vpop.permute.xlu1 %2828 }
 0x3aa   :  { %11506 = vst [vmem:[#allocation108_spill] sm:$0xff] %v8317_v3 }
 0x3ab   :  { %11507 = vst [vmem:[#allocation109_spill] sm:$0xff] %v8319_v22 }
 0x3ae   :  { %2343 = vrot.lane.b32.xlu2 %v8165_v62, %s11508_s23  ;;  %2623 = vrot.lane.b32.xlu0 %v8197_v49, %s11466_s26 }
 0x3af   :  { %2169 = vrot.lane.b32.xlu1 %v8211_v6, %s11462_s5  ;;  %s8749_s5 = sld [smem:[#allocation7 + $0x46]] }
 0x3b0   :  { %v8327_v8 = vpop.permute.xlu2 %2874  ;;  %v8329_v7 = vpop.permute.xlu0 %3066 }
 0x3b1   :  { %11509 = vst [vmem:[#allocation110_spill] sm:$0xff] %v8327_v8  ;;  %v8331_v40 = vpop.permute.xlu1 %2910 }
 0x3b2   :  { %11510 = vst [vmem:[#allocation111_spill] sm:$0xff] %v8329_v7 }
 0x3b3   :  { %11511 = vst [vmem:[#allocation112_spill] sm:$0xff] %v8331_v40 }
 0x3b6   :  { %2455 = vrot.lane.b32.xlu2 %v8149_v48, %s11501_s2  ;;  %3265 = vrot.lane.b32.xlu0 %v8165_v62, %s11512_s1 }
 0x3b7   :  { %2228 = vrot.lane.b32.xlu1 %v8197_v49, %s6977_s18  ;;  %s11517_s18 = smov 15  }
 0x3b8   :  { %v8339_v3 = vpop.permute.xlu2 %2956  ;;  %v8341_v22 = vpop.permute.xlu0 %1534 }
 0x3b9   :  { %11513 = vst [vmem:[#allocation113_spill] sm:$0xff] %v8339_v3  ;;  %v8343_v59 = vpop.permute.xlu1 %3024 }
 0x3ba   :  { %11514 = vst [vmem:[#allocation114_spill] sm:$0xff] %v8343_v59 }
 0x3be   :  { %2513 = vrot.lane.b32.xlu2 %v8165_v62, %s11464_s16  ;;  %3320 = vrot.lane.b32.xlu0 %v8149_v48, %s11515_s25 }
 0x3bf   :  { %2341 = vrot.lane.b32.xlu1 %v8149_v48, %s11508_s23  ;;  %s8753_s23 = sld [smem:[#allocation7 + $0x47]] }
 0x3c0   :  { %v8351_v7 = vpop.permute.xlu2 %1591  ;;  %v8353_v40 = vpop.permute.xlu0 %1593 }
 0x3c1   :  { %v8355_v8 = vpop.permute.xlu1 %3106 }
 0x3c2   :  { %11516 = vst [vmem:[#allocation115_spill] sm:$0xff] %v8355_v8 }
 0x3c6   :  { %2621 = vrot.lane.b32.xlu2 %v8211_v6, %s11466_s26  ;;  %3377 = vrot.lane.b32.xlu0 %v8149_v48, %s11517_s18  ;;  %s8574_s26 = sld [smem:[#allocation7 + $0x1c]] }
 0x3c7   :  { %2400 = vrot.lane.b32.xlu1 %v8165_v62, %s11463_s29  ;;  %s8623_s29 = sld [smem:[#allocation7 + $0x38]] }
 0x3c8   :  { %v8363_v59 = vpop.permute.xlu2 %1650  ;;  %v8365_v3 = vpop.permute.xlu0 %1705 }
 0x3c9   :  { %v8367_v20 = vpop.permute.xlu1 %2790 }
 0x3ca   :  { %11518 = vst [vmem:[#allocation116_spill] sm:$0xff] %v8367_v20 }
 0x3ce   :  { %2680 = vrot.lane.b32.xlu2 %v8197_v49, %s11467_s13  ;;  %3433 = vrot.lane.b32.xlu0 %v8197_v49, %s11519_s27 }
 0x3cf   :  { %2511 = vrot.lane.b32.xlu1 %v8149_v48, %s11464_s16 }
 0x3d0   :  { %v8375_v8 = vpop.permute.xlu2 %1772  ;;  %v8377_v42 = vpop.permute.xlu0 %1774 }
 0x3d1   :  { %v8379_v45 = vpop.permute.xlu1 %2872 }
 0x3d2   :  { %11520 = vst [vmem:[#allocation117_spill] sm:$0xff] %v8379_v45  ;;  %v11540_v45 = vld [vmem:[#allocation24_spill] sm:$0xff] }
 0x3d3   :  { %v8474_v13 = vmul.f32 %v11540_v45, %v8031_v37  ;;  %v8485_v58 = vmul.f32 %v11540_v45, %v8017_v18 }
 0x3d5   :  { %11544 = vst [vmem:[#allocation24_spill] sm:$0xff] %v8474_v13 }
 0x3d6   :  { %3263 = vrot.lane.b32.xlu2 %v8149_v48, %s11512_s1  ;;  %3028 = vrot.lane.b32.xlu0 %v3013_v38, %s6957_s15  ;;  %v3178_v38 = vmul.f32 %v11540_v45, %v8197_v49  ;;  %11547 = vst [vmem:[#allocation126_spill] sm:$0xff] %v8485_v58  ;;  %v8537_v58 = vmul.f32 %v7559_v2, %v8149_v48 }
 0x3d7   :  { %2567 = vrot.lane.b32.xlu1 %v8197_v49, %s11465_s14 }
 0x3d8   :  { %v8388_v20 = vpop.permute.xlu2 %1831  ;;  %v8390_v56 = vpop.permute.xlu0 %1886 }
 0x3d9   :  { %11521 = vst [vmem:[#allocation118_spill] sm:$0xff] %v8388_v20  ;;  %v8392_v46 = vpop.permute.xlu1 %2954 }
 0x3da   :  { %11522 = vst [vmem:[#allocation119_spill] sm:$0xff] %v8390_v56 }
 0x3db   :  { %11523 = vst [vmem:[#allocation120_spill] sm:$0xff] %v8392_v46 }
 0x3de   :  { %3431 = vrot.lane.b32.xlu2 %v8211_v6, %s11519_s27  ;;  %3112 = vrot.lane.b32.xlu0 %v3096_v55, %s6983_s22  ;;  %v11533_v55 = vld [vmem:[#allocation27_spill] sm:$0xff] }
 0x3df   :  { %2678 = vrot.lane.b32.xlu1 %v8211_v6, %s11467_s13  ;;  %v8440_v31 = vmul.f32 %v11533_v55, %v8031_v37  ;;  %v8456_v19 = vmul.f32 %v11533_v55, %v8017_v18  ;;  %s11543_s13 = smov 80   ;;  %v8500_v18 = vmul.f32 %v7497_v14, %v8149_v48  ;;  %v8518_v14 = vmul.f32 %v7528_v51, %v8149_v48 }
 0x3e0   :  { %v8421_v32 = vpop.permute.xlu2 %1945  ;;  %v8423_v63 = vpop.permute.xlu0 %1947  ;;  %v8541_v51 = vmul.f32 %v11535_v16, %v8211_v6 }
 0x3e1   :  { %11524 = vst [vmem:[#allocation121_spill] sm:$0xff] %v8421_v32  ;;  %v8429_v46 = vpop.permute.xlu1 %3068  ;;  %v8600_v32 = vmul.f32 %v7585_v34, %v8149_v48 }
 0x3e2   :  { %11525 = vst [vmem:[#allocation122_spill] sm:$0xff] %v8423_v63  ;;  %v8452_v63 = vmul.f32 %v11535_v16, %v8031_v37  ;;  %v11549_v37 = vunpack.i.l.bf16 %v7551_v23  ;;  %v8560_v16 = vmul.f32 %v7517_v35, %v8197_v49 }
 0x3e3   :  { %11529 = vst [vmem:[#allocation35_spill] sm:$0xff] %v8429_v46  ;;  %v2901_v46 = vmul.f32 %v7559_v2, %v8165_v62 }
 0x3e4   :  { %11534 = vst [vmem:[#allocation38_spill] sm:$0xff] %v8440_v31  ;;  %v1539_v12 = vsel %vm1538_vm3, %v11549_v37, %v8115_v5  ;;  %v8512_v37 = vmul.f32 %v7510_v24, %v8165_v62  ;;  %v8564_v31 = vmul.f32 %v11540_v45, %v8211_v6 }
 0x3e5   :  { %11536 = vst [vmem:[#allocation27_spill] sm:$0xff] %v8452_v63  ;;  %v1547_v63 = vsel %vm1494_vm15, %v1539_v12, 0.0  ;;  %v8552_v12 = vmul.f32 %v7510_v24, %v8149_v48 }
 0x3e6   :  { %11537 = vst [vmem:[#allocation123_spill] sm:$0xff] %v8456_v19  ;;  %2753 = vrot.lane.b32.xlu2 %v2736_v1, %s11468_s0  ;;  %3194 = vrot.lane.b32.xlu0 %v3178_v38, %s11543_s13  ;;  %v3063_v38 = vrot.slane %v3051_v61, 1  ;;  %v8522_v19 = vmul.f32 %v7535_v11, %v8165_v62  ;;  %v8526_v61 = vmul.f32 %v7585_v34, %v8165_v62 }
 0x3e7   :  { %3322 = vrot.lane.b32.xlu1 %v8165_v62, %s11515_s25  ;;  %11550 = vst [vmem:[#allocation13_spill] sm:$0xff] %v8541_v51  ;;  %v1563_v24 = vmul.f32 %v8531_v43, %v1547_v63  ;;  %v1597_v34 = vsel %vm1595_vm2, %v8111_v25, %v8132_v57  ;;  %v8630_v51 = vstv %s8528_s20  ;;  %s8800_s20 = sld [smem:[#allocation7 + $0x54]] }
 0x3e8   :  { %v8478_v56 = vpop.permute.xlu2 %2004  ;;  %v8480_v1 = vpop.permute.xlu0 %2058  ;;  %11551 = vst [vmem:[#allocation127_spill] sm:$0xff] %v8552_v12 }
 0x3e9   :  { %11545 = vst [vmem:[#allocation124_spill] sm:$0xff] %v8478_v56  ;;  %v1537_v13 = vpop.permute.xlu1 %1536  ;;  %v3146_v56 = vrot.slane %v8496_v10, 1  ;;  %v8568_v10 = vmul.f32 %v11533_v55, %v8197_v49  ;;  %v1571_v12 = vrot.slane %v1563_v24, 1  ;;  %v11561_v24 = vunpack.i.h.bf16 %v7551_v23 }
 0x3ea   :  { %11546 = vst [vmem:[#allocation125_spill] sm:$0xff] %v8480_v1  ;;  %v1540_v1 = vsel %vm1538_vm3, %v8115_v5, %v8093_v17  ;;  %v8591_v5 = vmul.f32 %v11533_v55, %v8211_v6 }
 0x3eb   :  { %11552 = vst [vmem:[#allocation128_spill] sm:$0xff] %v8564_v31  ;;  %v1548_v35 = vsel %vm1495_vm1, %v1540_v1, 0.0  ;;  %v1542_v1 = vsel %vm1538_vm3, %v8341_v22, %v1537_v13  ;;  %v8612_v13 = vmul.f32 %v7553_v0, %v8197_v49  ;;  %v1541_v49 = vsel %vm1538_vm3, %v11561_v24, %v8341_v22 }
 0x3ec   :  { %11553 = vst [vmem:[#allocation129_spill] sm:$0xff] %v8568_v10  ;;  %v1550_v0 = vsel %vm1497_vm6, %v1542_v1, 0.0  ;;  %v1605_v1 = vsel %vm1495_vm1, %v1597_v34, 0.0  ;;  %v8658_v34 = vstv %s8574_s26  ;;  %v1654_v24 = vsel %vm1652_vm12, %v8101_v60, %v8128_v50  ;;  %s8908_s26 = sld [smem:[#allocation7 + $0x2]] }
 0x3ed   :  { %11557 = vst [vmem:[#allocation133_spill] sm:$0xff] %v8591_v5  ;;  %vm1709_vm3 = vcmask 23552   ;;  %v1662_v50 = vsel %vm1495_vm1, %v1654_v24, 0.0 }
 0x3ee   :  { %2836 = vrot.lane.b32.xlu2 %v2819_v4, %s6981_s24  ;;  %3072 = vrot.lane.b32.xlu0 %v3063_v38, %s6957_s15  ;;  %v8587_v38 = vmul.f32 %v7535_v11, %v8149_v48  ;;  %11558 = vst [vmem:[#allocation134_spill] sm:$0xff] %v8600_v32  ;;  %v11559_v11 = vunpack.i.l.bf16 %v7602_v54  ;;  %v11560_v48 = vunpack.i.l.bf16 %v11528_v9  ;;  %v11564_v32 = vunpack.i.h.bf16 %v7602_v54 }
 0x3ef   :  { %3379 = vrot.lane.b32.xlu1 %v8165_v62, %s11517_s18  ;;  %v1564_v62 = vmul.f32 %v8531_v43, %v1548_v35 }
 0x3f0   :  { %v8580_v4 = vpop.permute.xlu2 %2115  ;;  %v8582_v2 = vpop.permute.xlu0 %2117  ;;  %11556 = vst [vmem:[#allocation132_spill] sm:$0xff] %v8587_v38  ;;  %v1566_v38 = vmul.f32 %v8531_v43, %v1550_v0 }
 0x3f1   :  { %11554 = vst [vmem:[#allocation130_spill] sm:$0xff] %v8580_v4  ;;  %v8595_v17 = vpop.permute.xlu1 %1648  ;;  %v1596_v4 = vsel %vm1595_vm2, %v11559_v11, %v8111_v25  ;;  %v1653_v11 = vsel %vm1652_vm12, %v11560_v48, %v8101_v60  ;;  %v8633_v25 = vstv %s8543_s21  ;;  %v8641_v48 = vstv %s8554_s4  ;;  %s8808_s21 = sld [smem:[#allocation7 + $0x55]] }
 0x3f2   :  { %11555 = vst [vmem:[#allocation131_spill] sm:$0xff] %v8582_v2  ;;  %v8607_v2 = vstv %s8502_s19  ;;  %v1604_v57 = vsel %vm1494_vm15, %v1596_v4, 0.0  ;;  %v1572_v4 = vrot.slane %v1564_v62, 1  ;;  %v1549_v62 = vsel %vm1496_vm9, %v1541_v49, 0.0  ;;  %s11569_s19 = smov 111   ;;  %s8900_s4 = sld [smem:[#allocation7 + $0x10]] }
 0x3f3   :  { %v1553_v10 = vmul.f32 %v8607_v2, %v1547_v63  ;;  %v1661_v63 = vsel %vm1494_vm15, %v1653_v11, 0.0  ;;  %v1610_v31 = vmul.f32 %v8630_v51, %v1604_v57  ;;  %v1620_v20 = vmul.f32 %v8633_v25, %v1604_v57 }
 0x3f4   :  { %v1574_v49 = vrot.slane %v1566_v38, 1  ;;  %v1598_v60 = vsel %vm1595_vm2, %v11564_v32, %v8351_v7  ;;  %v8701_v38 = vstv %s8645_s17  ;;  %s9012_s17 = sld [smem:[#allocation7 + $0x1f]] }
 0x3f5   :  { %v1579_v5 = vadd.f32 %v1571_v12, %v1553_v10  ;;  %v1554_v12 = vmul.f32 %v8607_v2, %v1548_v35  ;;  %v1621_v10 = vmul.f32 %v8633_v25, %v1605_v1  ;;  %v1606_v32 = vsel %vm1496_vm9, %v1598_v60, 0.0 }
 0x3f6   :  { %2918 = vrot.lane.b32.xlu2 %v2901_v46, %s6951_s30  ;;  %3156 = vrot.lane.b32.xlu0 %v3146_v56, %s6983_s22  ;;  %v1611_v56 = vmul.f32 %v8630_v51, %v1605_v1  ;;  %v1599_v1 = vsel %vm1595_vm2, %v8351_v7, %v8353_v40  ;;  %v1628_v46 = vrot.slane %v1620_v20, 1  ;;  %v1667_v40 = vmul.f32 %v8658_v34, %v1661_v63 }
 0x3f7   :  { %2751 = vrot.lane.b32.xlu1 %v8500_v18, %s11468_s0  ;;  %v8677_v18 = vmul.f32 %v8641_v48, %v1661_v63  ;;  %v1580_v35 = vadd.f32 %v1572_v4, %v1554_v12  ;;  %v1614_v57 = vadd.f32 %v1610_v31, %v1579_v5  ;;  %v1629_v31 = vrot.slane %v1621_v10, 1 }
 0x3f8   :  { %v8664_v23 = vpop.permute.xlu2 %2171  ;;  %v8666_v22 = vpop.permute.xlu0 %2226  ;;  %v1556_v5 = vmul.f32 %v8607_v2, %v1550_v0  ;;  %v8698_v20 = vstv %s8638_s3  ;;  %v11565_v63 = vrot.slane %v8448_v44, 1  ;;  %v1668_v12 = vmul.f32 %v8658_v34, %v1662_v50  ;;  %s8944_s3 = sld [smem:[#allocation7 + $0x3]] }
 0x3f9   :  { %11562 = vst [vmem:[#allocation135_spill] sm:$0xff] %v8664_v23  ;;  %v8674_v11 = vpop.permute.xlu1 %1707  ;;  %v1565_v23 = vmul.f32 %v8531_v43, %v1549_v62  ;;  %v1615_v4 = vadd.f32 %v1611_v56, %v1580_v35  ;;  %v1607_v43 = vsel %vm1497_vm6, %v1599_v1, 0.0  ;;  %v1685_v54 = vrot.slane %v8677_v18, 1 }
 0x3fa   :  { %11563 = vst [vmem:[#allocation136_spill] sm:$0xff] %v8666_v22  ;;  %v8686_v22 = vstv %s8623_s29  ;;  %v1636_v7 = vadd.f32 %v1628_v46, %v1614_v57  ;;  %v1582_v0 = vadd.f32 %v1574_v49, %v1556_v5  ;;  %v1678_v56 = vmul.f32 %v8641_v48, %v1662_v50  ;;  %s8933_s29 = sld [smem:[#allocation7 + $0x11]] }
 0x3fb   :  { %v11566_v10 = vunpack.i.l.bf16 %v7568_v27  ;;  %v1573_v24 = vrot.slane %v1565_v23, 1  ;;  %v1637_v18 = vadd.f32 %v1629_v31, %v1615_v4  ;;  %v1613_v35 = vmul.f32 %v8630_v51, %v1607_v43 }
 0x3fc   :  { %v1623_v44 = vmul.f32 %v8633_v25, %v1607_v43  ;;  %v1656_v57 = vsel %vm1652_vm12, %v8595_v17, %v8363_v59  ;;  %v1555_v23 = vmul.f32 %v8607_v2, %v1549_v62  ;;  %v1612_v60 = vmul.f32 %v8630_v51, %v1606_v32  ;;  %v6880_v43 = vld [vmem:[#allocation2 + $0x20] sm:$0x3] }
 0x3fd   :  { %v11567_v50 = vunpack.i.h.bf16 %v11528_v9  ;;  %v1711_v31 = vsel %vm1709_vm3, %v8145_v33, %v8113_v21  ;;  %v1617_v5 = vadd.f32 %v1613_v35, %v1582_v0  ;;  %v1686_v2 = vrot.slane %v1678_v56, 1 }
 0x3fe   :  { %3110 = vrot.lane.b32.xlu2 %v8508_v53, %s6983_s22  ;;  %3150 = vrot.lane.b32.xlu0 %v11565_v63, %s6983_s22  ;;  %v1710_v53 = vsel %vm1709_vm3, %v11566_v10, %v8145_v33  ;;  %v8744_v63 = vld [vmem:[#allocation2] sm:$0x3]  ;;  %v1671_v9 = vadd.f32 %v1667_v40, %v1636_v7  ;;  %v1672_v62 = vadd.f32 %v1668_v12, %v1637_v18  ;;  %v1631_v33 = vrot.slane %v1623_v44, 1 }
 0x3ff   :  { %2834 = vrot.lane.b32.xlu1 %v8518_v14, %s6981_s24  ;;  %v1622_v14 = vmul.f32 %v8633_v25, %v1606_v32  ;;  %v1655_v4 = vsel %vm1652_vm12, %v11567_v50, %v8595_v17  ;;  %v1718_v59 = vsel %vm1494_vm15, %v1710_v53, 0.0  ;;  %v8747_v51 = vpack.i.bf16 %v8744_v63, %v6880_v43 }
 0x400   :  { %v8721_v46 = vpop.permute.xlu2 %2282  ;;  %v8728_v1 = vpop.permute.xlu0 %2284  ;;  %v1581_v25 = vadd.f32 %v1573_v24, %v1555_v23  ;;  %v1664_v17 = vsel %vm1497_vm6, %v1656_v57, 0.0  ;;  %v1779_v21 = vsel %vm1778_vm4, %v8126_v36, %v8143_v26  ;;  %v1663_v32 = vsel %vm1496_vm9, %v1655_v4, 0.0 }
 0x401   :  { %v8730_v49 = vpop.permute.xlu1 %1829  ;;  %v1719_v40 = vsel %vm1495_vm1, %v1711_v31, 0.0  ;;  %v1724_v7 = vmul.f32 %v8698_v20, %v1718_v59  ;;  %v1630_v56 = vrot.slane %v1622_v14, 1  ;;  %v11568_v12 = vrot.slane %v8512_v37, 1 }
 0x402   :  { %v1616_v0 = vadd.f32 %v1612_v60, %v1581_v25  ;;  %v1639_v10 = vadd.f32 %v1631_v33, %v1617_v5  ;;  %v1670_v36 = vmul.f32 %v8658_v34, %v1664_v17  ;;  %v1680_v53 = vmul.f32 %v8641_v48, %v1664_v17 }
 0x403   :  { %v1713_v24 = vsel %vm1709_vm3, %v8365_v3, %v8674_v11  ;;  %v1693_v18 = vadd.f32 %v1685_v54, %v1671_v9  ;;  %v1734_v35 = vmul.f32 %v8701_v38, %v1718_v59  ;;  %v1669_v44 = vmul.f32 %v8658_v34, %v1663_v32 }
 0x404   :  { %v1679_v37 = vmul.f32 %v8641_v48, %v1663_v32  ;;  %v11570_v23 = vunpack.i.l.bf16 %v7581_v28  ;;  %v1694_v60 = vadd.f32 %v1686_v2, %v1672_v62  ;;  %v1725_v14 = vmul.f32 %v8698_v20, %v1719_v40 }
 0x405   :  { %v1735_v54 = vmul.f32 %v8701_v38, %v1719_v40  ;;  %v11571_v48 = vunpack.i.l.bf16 %v11531_v15  ;;  %v1787_v4 = vsel %vm1494_vm15, %v1779_v21, 0.0  ;;  %v1638_v31 = vadd.f32 %v1630_v56, %v1616_v0 }
 0x406   :  { %2798 = vrot.lane.b32.xlu2 %v11568_v12, %s11468_s0  ;;  %6504 = vrot.lane.b32.xlu0 %v8747_v51, %s11569_s19  ;;  %v1837_v11 = vsel %vm1835_vm5, %v8141_v47, %v11570_v23  ;;  %v1721_v59 = vsel %vm1497_vm6, %v1713_v24, 0.0  ;;  %v1728_v5 = vadd.f32 %v1724_v7, %v1693_v18  ;;  %v1674_v43 = vadd.f32 %v1670_v36, %v1639_v10 }
 0x407   :  { %2916 = vrot.lane.b32.xlu1 %v8537_v58, %s6951_s30  ;;  %v1780_v58 = vsel %vm1778_vm4, %v8143_v26, %v11571_v48  ;;  %v1688_v2 = vrot.slane %v1680_v53, 1  ;;  %v3176_v9 = vmul.f32 %v8744_v63, %v11540_v45  ;;  %v1742_v25 = vrot.slane %v1734_v35, 1 }
 0x408   :  { %v8780_v57 = vpop.permute.xlu2 %2343  ;;  %v8788_v50 = vpop.permute.xlu0 %2398  ;;  %v11572_v26 = vunpack.i.h.bf16 %v7568_v27  ;;  %v1673_v62 = vadd.f32 %v1669_v44, %v1638_v31  ;;  %v1687_v21 = vrot.slane %v1679_v37, 1  ;;  %v1729_v33 = vadd.f32 %v1725_v14, %v1694_v60 }
 0x409   :  { %v8790_v34 = vpop.permute.xlu1 %1888  ;;  %v1743_v32 = vrot.slane %v1735_v54, 1  ;;  %v1727_v40 = vmul.f32 %v8698_v20, %v1721_v59  ;;  %v1737_v7 = vmul.f32 %v8701_v38, %v1721_v59  ;;  %v8813_v0 = vstv %s8749_s5  ;;  %s6991_s5 = smov 95  }
 0x40a   :  { %v1712_v17 = vsel %vm1709_vm3, %v11572_v26, %v8365_v3  ;;  %v8816_v56 = vstv %s8753_s23  ;;  %v1802_v45 = vstv %s8760_s28  ;;  %v11573_v27 = vrot.slane %v8522_v19, 1  ;;  %s9042_s23 = sld [smem:[#allocation7 + $0x3b]] }
 0x40b   :  { %v3064_v3 = vrot.slane %v8612_v13, 1  ;;  %v1845_v12 = vsel %vm1495_vm1, %v1837_v11, 0.0  ;;  %v1788_v10 = vsel %vm1495_vm1, %v1780_v58, 0.0  ;;  %v1720_v36 = vsel %vm1496_vm9, %v1712_v17, 0.0  ;;  %s9052_s28 = sld [smem:[#allocation7 + $0x2c]] }
 0x40c   :  { %v1696_v53 = vadd.f32 %v1688_v2, %v1674_v43  ;;  %v1793_v24 = vmul.f32 %v8686_v22, %v1787_v4  ;;  %v1750_v18 = vadd.f32 %v1742_v25, %v1728_v5  ;;  %v1836_v19 = vsel %vm1835_vm5, %v8163_v30, %v8141_v47 }
 0x40d   :  { %v1695_v35 = vadd.f32 %v1687_v21, %v1673_v62  ;;  %v1751_v37 = vadd.f32 %v1743_v32, %v1729_v33  ;;  %v11574_v23 = vunpack.i.h.bf16 %v11531_v15  ;;  %v1745_v14 = vrot.slane %v1737_v7, 1 }
 0x40e   :  { %2880 = vrot.lane.b32.xlu2 %v11573_v27, %s6981_s24  ;;  %3190 = vrot.lane.b32.xlu0 %v3176_v9, %s11543_s13  ;;  %v1731_v60 = vadd.f32 %v1727_v40, %v1696_v53  ;;  %v1803_v48 = vmul.f32 %v1802_v45, %v1787_v4  ;;  %v1804_v47 = vmul.f32 %v1802_v45, %v1788_v10  ;;  %v1844_v15 = vsel %vm1494_vm15, %v1836_v19, 0.0  ;;  %v11577_v53 = vld [vmem:[#allocation128_spill] sm:$0xff] }
 0x40f   :  { %3030 = vrot.lane.b32.xlu1 %v8560_v16, %s6957_s15  ;;  %v1782_v11 = vsel %vm1778_vm4, %v8377_v42, %v11574_v23  ;;  %v1726_v30 = vmul.f32 %v8698_v20, %v1720_v36  ;;  %v1736_v58 = vmul.f32 %v8701_v38, %v1720_v36  ;;  %v1794_v31 = vmul.f32 %v8686_v22, %v1788_v10  ;;  %v11576_v36 = vld [vmem:[#allocation118_spill] sm:$0xff] }
 0x410   :  { %v8836_v44 = vpop.permute.xlu2 %2455  ;;  %v8842_v54 = vpop.permute.xlu0 %2457  ;;  %vm1892_vm2 = vcmask 678912   ;;  %v8852_v59 = vstv %s8800_s20  ;;  %v1797_v5 = vadd.f32 %v1793_v24, %v1750_v18  ;;  %vm1949_vm12 = vcmask 408576   ;;  %s9071_s20 = sld [smem:[#allocation7 + $0x2d]] }
 0x411   :  { %v8846_v16 = vpop.permute.xlu1 %2002  ;;  %v1781_v4 = vsel %vm1778_vm4, %v8375_v8, %v8377_v42  ;;  %v1790_v20 = vsel %vm1497_vm6, %v1782_v11, 0.0  ;;  %v1730_v38 = vadd.f32 %v1726_v30, %v1695_v35  ;;  %v8860_v43 = vmul.f32 %v8816_v56, %v1845_v12  ;;  %v11579_v11 = vld [vmem:[#allocation76_spill] sm:$0xff] }
 0x412   :  { %v1798_v2 = vadd.f32 %v1794_v31, %v1751_v37  ;;  %v8863_v9 = vstv %s8808_s21  ;;  %v1753_v25 = vadd.f32 %v1745_v14, %v1731_v60  ;;  %v1811_v26 = vrot.slane %v1803_v48, 1  ;;  %s9082_s21 = sld [smem:[#allocation7 + $0x4]] }
 0x413   :  { %v1812_v17 = vrot.slane %v1804_v47, 1  ;;  %v1860_v62 = vmul.f32 %v8816_v56, %v1844_v15  ;;  %v1744_v21 = vrot.slane %v1736_v58, 1  ;;  %v11575_v33 = vrot.slane %v8526_v61, 1 }
 0x414   :  { %v1789_v8 = vsel %vm1496_vm9, %v1781_v4, 0.0  ;;  %v1796_v42 = vmul.f32 %v8686_v22, %v1790_v20  ;;  %v1806_v32 = vmul.f32 %v1802_v45, %v1790_v20  ;;  %v3215_v40 = vmul.f32 %v8744_v63, %v11533_v55 }
 0x415   :  { %v1819_v7 = vadd.f32 %v1811_v26, %v1797_v5  ;;  %v1850_v27 = vmul.f32 %v8813_v0, %v1844_v15  ;;  %v1752_v10 = vadd.f32 %v1744_v21, %v1730_v38  ;;  %v1838_v61 = vsel %vm1835_vm5, %v8730_v49, %v11576_v36  ;;  %v11580_v49 = vld [vmem:[#allocation73_spill] sm:$0xff]  ;;  %v11581_v15 = vld [vmem:[#allocation28_spill] sm:$0xff]  ;;  %v11584_v21 = vld [vmem:[#allocation119_spill] sm:$0xff] }
 0x416   :  { %2962 = vrot.lane.b32.xlu2 %v11575_v33, %s6951_s30  ;;  %3487 = vrot.lane.b32.xlu0 %v8211_v6, %s11569_s19  ;;  %v1851_v18 = vmul.f32 %v8813_v0, %v1845_v12  ;;  %v1820_v19 = vadd.f32 %v1812_v17, %v1798_v2  ;;  %v11578_v6 = vunpack.i.h.bf16 %v7581_v28  ;;  %v1800_v35 = vadd.f32 %v1796_v42, %v1753_v25 }
 0x417   :  { %3192 = vrot.lane.b32.xlu1 %v11577_v53, %s11543_s13  ;;  %v1869_v23 = vrot.slane %v8860_v43, 1  ;;  %v1893_v60 = vsel %vm1892_vm2, %v11580_v49, %v11579_v11  ;;  %v1795_v14 = vmul.f32 %v8686_v22, %v1789_v8  ;;  %v1805_v48 = vmul.f32 %v1802_v45, %v1789_v8  ;;  %v11585_v8 = vld [vmem:[#allocation13_spill] sm:$0xff] }
 0x418   :  { %v8882_v24 = vpop.permute.xlu2 %2513  ;;  %v1839_v55 = vsel %vm1835_vm5, %v11576_v36, %v11578_v6  ;;  %v8889_v37 = vpop.permute.xlu0 %2565  ;;  %v1868_v12 = vrot.slane %v1860_v62, 1  ;;  %v1814_v30 = vrot.slane %v1806_v32, 1  ;;  %v1846_v28 = vsel %vm1496_vm9, %v1838_v61, 0.0  ;;  %v11587_v32 = vld [vmem:[#allocation75_spill] sm:$0xff] }
 0x419   :  { %v8896_v47 = vpop.permute.xlu1 %2060  ;;  %v3227_v58 = vrot.slane %v3215_v40, 1  ;;  %v1854_v31 = vadd.f32 %v1850_v27, %v1819_v7  ;;  %v11582_v5 = vunpack.i.l.bf16 %v11581_v15  ;;  %v1847_v22 = vsel %vm1497_vm6, %v1839_v55, 0.0  ;;  %v11588_v40 = vld [vmem:[#allocation30_spill] sm:$0xff]  ;;  %v11590_v6 = vld [vmem:[#allocation127_spill] sm:$0xff] }
 0x41a   :  { %v1799_v45 = vadd.f32 %v1795_v14, %v1752_v10  ;;  %v1855_v20 = vadd.f32 %v1851_v18, %v1820_v19  ;;  %v1901_v38 = vsel %vm1494_vm15, %v1893_v60, 0.0  ;;  %v1822_v43 = vadd.f32 %v1814_v30, %v1800_v35 }
 0x41b   :  { %v1894_v4 = vsel %vm1892_vm2, %v11579_v11, %v11582_v5  ;;  %v11583_v2 = vunpack.i.h.bf16 %v11581_v15  ;;  %v1813_v26 = vrot.slane %v1805_v48, 1  ;;  %v1852_v17 = vmul.f32 %v8813_v0, %v1846_v28 }
 0x41c   :  { %v1862_v62 = vmul.f32 %v8816_v56, %v1846_v28  ;;  %v1895_v33 = vsel %vm1892_vm2, %v11584_v21, %v8790_v34  ;;  %v11586_v42 = vrot.slane %v11585_v8, 1  ;;  %v11589_v7 = vunpack.i.l.bf16 %v11588_v40 }
 0x41d   :  { %v1896_v25 = vsel %vm1892_vm2, %v8790_v34, %v11583_v2  ;;  %v1902_v10 = vsel %vm1495_vm1, %v1894_v4, 0.0  ;;  %v1853_v36 = vmul.f32 %v8813_v0, %v1847_v22  ;;  %v1863_v61 = vmul.f32 %v8816_v56, %v1847_v22  ;;  %v11594_v2 = vld [vmem:[#allocation41_spill] sm:$0xff] }
 0x41e   :  { %3154 = vrot.lane.b32.xlu2 %v11586_v42, %s6983_s22  ;;  %v1950_v27 = vsel %vm1949_vm12, %v11589_v7, %v11587_v32  ;;  %3235 = vrot.lane.b32.xlu0 %v3227_v58, %s11543_s13  ;;  %v1907_v34 = vmul.f32 %v8852_v59, %v1901_v38  ;;  %v1917_v53 = vmul.f32 %v8863_v9, %v1901_v38  ;;  %v1904_v19 = vsel %vm1497_vm6, %v1896_v25, 0.0  ;;  %v11601_v7 = vld [vmem:[#allocation122_spill] sm:$0xff] }
 0x41f   :  { %v1821_v18 = vadd.f32 %v1813_v26, %v1799_v45  ;;  %v11591_v55 = vrot.slane %v11590_v6, 1  ;;  %v1876_v0 = vadd.f32 %v1868_v12, %v1854_v31  ;;  %v1877_v56 = vadd.f32 %v1869_v23, %v1855_v20  ;;  %v11592_v12 = vld [vmem:[#allocation79_spill] sm:$0xff] }
 0x420   :  { %v8942_v35 = vpop.permute.xlu2 %2621  ;;  %v1857_v11 = vadd.f32 %v1853_v36, %v1822_v43  ;;  %v1903_v49 = vsel %vm1496_vm9, %v1895_v33, 0.0  ;;  %v8948_v60 = vpop.permute.xlu0 %2623  ;;  %v1908_v14 = vmul.f32 %v8852_v59, %v1902_v10  ;;  %v1918_v48 = vmul.f32 %v8863_v9, %v1902_v10  ;;  %v11593_v43 = vld [vmem:[#allocation72_spill] sm:$0xff]  ;;  %v11602_v10 = vld [vmem:[#allocation121_spill] sm:$0xff] }
 0x421   :  { %2796 = vrot.lane.b32.xlu1 %v11591_v55, %s11468_s0  ;;  %v1856_v30 = vadd.f32 %v1852_v17, %v1821_v18  ;;  %v1870_v28 = vrot.slane %v1862_v62, 1  ;;  %v8952_v58 = vpop.permute.xlu1 %2169  ;;  %v1951_v23 = vsel %vm1949_vm12, %v11587_v32, %v11592_v12  ;;  %v1871_v31 = vrot.slane %v1863_v61, 1  ;;  %s8976_s0 = sld [smem:[#allocation7 + $0x1e]] }
 0x422   :  { %v1910_v15 = vmul.f32 %v8852_v59, %v1904_v19  ;;  %v1920_v5 = vmul.f32 %v8863_v9, %v1904_v19  ;;  %v1911_v4 = vadd.f32 %v1907_v34, %v1876_v0  ;;  %v1925_v22 = vrot.slane %v1917_v53, 1  ;;  %v11603_v34 = vld [vmem:[#allocation38_spill] sm:$0xff] }
 0x423   :  { %v1909_v45 = vmul.f32 %v8852_v59, %v1903_v49  ;;  %v1919_v20 = vmul.f32 %v8863_v9, %v1903_v49  ;;  %v8962_v38 = vstv %s8900_s4  ;;  %v11595_v25 = vunpack.i.l.bf16 %v11594_v2  ;;  %v11599_v9 = vld [vmem:[#allocation129_spill] sm:$0xff]  ;;  %s6992_s4 = smov 46  }
 0x424   :  { %vm11596_vm5 = vcmask 277504   ;;  %v1963_v17 = vstv %s8908_s26  ;;  %v1879_v62 = vadd.f32 %v1871_v31, %v1857_v11  ;;  %vm11597_vm15 = vcmp.ge.s32.totalorder %v11548_v52, 2  ;;  %s9172_s26 = sld [smem:[#allocation7 + $0x48]] }
 0x425   :  { %v2006_v26 = vsel %vm11596_vm5, %v11595_v25, %v11593_v43  ;;  %v1958_v21 = vsel %vm11597_vm15, %v1950_v27, 0.0  ;;  %v1912_v33 = vadd.f32 %v1908_v14, %v1877_v56  ;;  %vm11598_vm1 = vcmp.ge.s32.totalorder %v7263_v39, 2  ;;  %v11606_v56 = vld [vmem:[#allocation132_spill] sm:$0xff]  ;;  %vm11609_vm6 = vmmov %vm11596_vm5 }
 0x426   :  { %v1959_v8 = vsel %vm11598_vm1, %v1951_v23, 0.0  ;;  %v1878_v59 = vadd.f32 %v1870_v28, %v1856_v30  ;;  %v11600_v42 = vrot.slane %v11599_v9, 1  ;;  %v1926_v32 = vrot.slane %v1918_v48, 1  ;;  %v11608_v30 = vld [vmem:[#allocation78_spill] sm:$0xff]  ;;  %vm11611_vm4 = vmmov %vm11597_vm15 }
 0x427   :  { %v1953_v36 = vsel %vm1949_vm12, %v11602_v10, %v11601_v7  ;;  %v1914_v61 = vadd.f32 %v1910_v15, %v1879_v62  ;;  %v1928_v27 = vrot.slane %v1920_v5, 1  ;;  %v11604_v53 = vrot.slane %v11603_v34, 1  ;;  %vm11612_vm3 = vmmov %vm11598_vm1 }
 0x428   :  { %3239 = vrot.lane.b32.xlu2 %v11600_v42, %s11543_s13  ;;  %v1933_v18 = vadd.f32 %v1925_v22, %v1911_v4  ;;  %v11605_v19 = vunpack.i.h.bf16 %v11588_v40  ;;  %v1913_v55 = vadd.f32 %v1909_v45, %v1878_v59  ;;  %v1927_v0 = vrot.slane %v1919_v20, 1  ;;  %v8991_v49 = vpop.permute.xlu2 %2680  ;;  %v8998_v23 = vpop.permute.xlu0 %3265  ;;  %vm11614_vm2 = vmmov %vm11596_vm5 }
 0x429   :  { %3231 = vrot.lane.b32.xlu0 %v11604_v53, %s11543_s13  ;;  %v11607_v11 = vrot.slane %v11606_v56, 1  ;;  %v2029_v14 = vstv %s8933_s29  ;;  %v1973_v48 = vstv %s8944_s3  ;;  %v2007_v28 = vsel %vm11609_vm6, %v11593_v43, %v11608_v30  ;;  %11610 = vst [vmem:[#allocation118_spill] sm:$0xff] %v8998_v23  ;;  %v9002_v5 = vpop.permute.xlu1 %2228  ;;  %v11622_v30 = vld [vmem:[#allocation82_spill] sm:$0xff]  ;;  %vm11628_vm5 = vmmov %vm11611_vm4  ;;  %s9178_s29 = sld [smem:[#allocation7 + $0x49]]  ;;  %v11673_v23 = vld [vmem:[#allocation44_spill] sm:$0xff] }
 0x42a   :  { %v1952_v6 = vsel %vm1949_vm12, %v11605_v19, %v11602_v10  ;;  %v1965_v12 = vmul.f32 %v1963_v17, %v1959_v8  ;;  %v1964_v40 = vmul.f32 %v1963_v17, %v1958_v21  ;;  %v1975_v31 = vmul.f32 %v1973_v48, %v1959_v8  ;;  %vm11616_vm12 = vmmov %vm11614_vm2  ;;  %s9222_s3 = sld [smem:[#allocation7 + $0x57]] }
 0x42b   :  { %2878 = vrot.lane.b32.xlu1 %v11607_v11, %s6981_s24  ;;  %vm2062_vm9 = vcmask 146432   ;;  %v1961_v15 = vsel %vm812_vm13, %v1953_v36, 0.0  ;;  %v2014_v4 = vsel %vm11611_vm4, %v2006_v26, 0.0  ;;  %v1934_v22 = vadd.f32 %v1926_v32, %v1912_v33  ;;  %s9008_s24 = sld [smem:[#allocation7 + $0x3a]]  ;;  %v11613_v26 = vld [vmem:[#allocation124_spill] sm:$0xff]  ;;  %vm11639_vm6 = vmmov %vm11611_vm4 }
 0x42c   :  { %v1960_v45 = vsel %vm811_vm11, %v1952_v6, 0.0  ;;  %v1936_v20 = vadd.f32 %v1928_v27, %v1914_v61  ;;  %v1974_v43 = vmul.f32 %v1973_v48, %v1958_v21  ;;  %v1968_v25 = vadd.f32 %v1964_v40, %v1933_v18  ;;  %v11617_v61 = vld [vmem:[#allocation133_spill] sm:$0xff]  ;;  %v9030_v6 = vld [vmem:[#allocation2 + $0x10] sm:$0x3]  ;;  %vm11648_vm4 = vmmov %vm11598_vm1 }
 0x42d   :  { %v2015_v62 = vsel %vm11612_vm3, %v2007_v28, 0.0  ;;  %v1935_v8 = vadd.f32 %v1927_v0, %v1913_v55  ;;  %v1969_v59 = vadd.f32 %v1965_v12, %v1934_v22  ;;  %v1967_v9 = vmul.f32 %v1963_v17, %v1961_v15  ;;  %v11619_v0 = vld [vmem:[#allocation134_spill] sm:$0xff]  ;;  %v11623_v28 = vld [vmem:[#allocation25_spill] sm:$0xff]  ;;  %vm11650_vm3 = vmmov %vm11628_vm5 }
 0x42e   :  { %v1977_v42 = vmul.f32 %v1973_v48, %v1961_v15  ;;  %v2009_v33 = vsel %vm11614_vm2, %v8846_v16, %v11613_v26  ;;  %v1983_v32 = vrot.slane %v1975_v31, 1  ;;  %v1966_v7 = vmul.f32 %v1963_v17, %v1960_v45 }
 0x42f   :  { %v1976_v21 = vmul.f32 %v1973_v48, %v1960_v45  ;;  %v11615_v10 = vunpack.i.h.bf16 %v11594_v2  ;;  %v11618_v27 = vrot.slane %v11617_v61, 1  ;;  %v2020_v34 = vmul.f32 %v8962_v38, %v2014_v4 }
 0x430   :  { %v9025_v53 = vmul.f32 %v2029_v14, %v2014_v4  ;;  %v9028_v18 = vstv %s8976_s0  ;;  %v1971_v19 = vadd.f32 %v1967_v9, %v1936_v20  ;;  %v1982_v2 = vrot.slane %v1974_v43, 1  ;;  %v9040_v11 = vpop.permute.xlu2 %3263  ;;  %v9050_v4 = vpop.permute.xlu0 %3320  ;;  %v11626_v20 = vld [vmem:[#allocation74_spill] sm:$0xff]  ;;  %s9235_s0 = sld [smem:[#allocation7 + $0x56]] }
 0x431   :  { %v2008_v36 = vsel %vm11616_vm12, %v11615_v10, %v8846_v16  ;;  %3237 = vrot.lane.b32.xlu2 %v11618_v27, %s11543_s13  ;;  %3543 = vrot.lane.b32.xlu0 %v9030_v6, %s6991_s5  ;;  %v2021_v16 = vmul.f32 %v8962_v38, %v2015_v62  ;;  %v1970_v17 = vadd.f32 %v1966_v7, %v1935_v8  ;;  %v2017_v55 = vsel %vm812_vm13, %v2009_v33, 0.0  ;;  %v9057_v8 = vpop.permute.xlu1 %2341  ;;  %v11627_v33 = vld [vmem:[#allocation125_spill] sm:$0xff] }
 0x432   :  { %v11620_v56 = vrot.slane %v11619_v0, 1  ;;  %11621 = vst [vmem:[#allocation128_spill] sm:$0xff] %v9040_v11  ;;  %v2031_v48 = vmul.f32 %v2029_v14, %v2015_v62  ;;  %v11624_v12 = vunpack.i.l.bf16 %v11623_v28  ;;  %v1985_v31 = vrot.slane %v1977_v42, 1 }
 0x433   :  { %v2016_v15 = vsel %vm811_vm11, %v2008_v36, 0.0  ;;  %11625 = vst [vmem:[#allocation76_spill] sm:$0xff] %v9050_v4  ;;  %v1990_v22 = vadd.f32 %v1982_v2, %v1968_v25  ;;  %v1991_v45 = vadd.f32 %v1983_v32, %v1969_v59  ;;  %v2064_v43 = vsel %vm2062_vm9, %v11622_v30, %v11626_v20 }
 0x434   :  { %2960 = vrot.lane.b32.xlu1 %v11620_v56, %s6951_s30  ;;  %v2063_v40 = vsel %vm2062_vm9, %v11624_v12, %v11622_v30  ;;  %v1984_v62 = vrot.slane %v1976_v21, 1  ;;  %v1993_v9 = vadd.f32 %v1985_v31, %v1971_v19  ;;  %v2023_v42 = vmul.f32 %v8962_v38, %v2017_v55  ;;  %v11631_v12 = vld [vmem:[#allocation23_spill] sm:$0xff] }
 0x435   :  { %v2033_v26 = vmul.f32 %v2029_v14, %v2017_v55  ;;  %v2066_v25 = vsel %vm2062_vm9, %v11627_v33, %v8896_v47  ;;  %v2071_v59 = vsel %vm11628_vm5, %v2063_v40, 0.0  ;;  %v2022_v7 = vmul.f32 %v8962_v38, %v2016_v15  ;;  %v9075_v55 = vld [vmem:[#allocation2 + $0x30] sm:$0x3] }
 0x436   :  { %v1992_v32 = vadd.f32 %v1984_v62, %v1970_v17  ;;  %v2032_v10 = vmul.f32 %v2029_v14, %v2016_v15  ;;  %v2038_v36 = vrot.slane %v9025_v53, 1  ;;  %vm2175_vm15 = vcmask 932864   ;;  %v11634_v62 = vld [vmem:[#allocation32_spill] sm:$0xff] }
 0x437   :  { %v9068_v21 = vstv %s9008_s24  ;;  %v2086_v61 = vstv %s9012_s17  ;;  %v2039_v27 = vrot.slane %v2031_v48, 1  ;;  %v2025_v19 = vadd.f32 %v2021_v16, %v1991_v45  ;;  %s11668_s24 = smov 30   ;;  %s9296_s17 = sld [smem:[#allocation7 + $0x13]] }
 0x438   :  { %v2024_v2 = vadd.f32 %v2020_v34, %v1990_v22  ;;  %v2074_v47 = vsel %vm812_vm13, %v2066_v25, 0.0  ;;  %v2072_v38 = vsel %vm11598_vm1, %v2064_v43, 0.0  ;;  %v2077_v14 = vmul.f32 %v9028_v18, %v2071_v59  ;;  %v9084_v34 = vld [vmem:[#allocation2 + $0x18] sm:$0x3]  ;;  %v9095_v30 = vpop.permute.xlu2 %3431 }
 0x439   :  { %3489 = vrot.lane.b32.xlu2 %v9075_v55, %s11569_s19  ;;  %v2027_v53 = vadd.f32 %v2023_v42, %v1993_v9  ;;  %v2041_v16 = vrot.slane %v2033_v26, 1  ;;  %3371 = vrot.lane.b32.xlu0 %v9084_v34, %s11517_s18  ;;  %v11629_v17 = vunpack.i.h.bf16 %v11623_v28  ;;  %v2026_v56 = vadd.f32 %v2022_v7, %v1992_v32  ;;  %11630 = vst [vmem:[#allocation73_spill] sm:$0xff] %v9095_v30  ;;  %v9103_v28 = vpop.permute.xlu0 %3377  ;;  %v11633_v43 = vld [vmem:[#allocation81_spill] sm:$0xff]  ;;  %v9112_v26 = vpop.permute.xlu1 %2400  ;;  %v11649_v30 = vld [vmem:[#allocation135_spill] sm:$0xff] }
 0x43a   :  { %v2040_v48 = vrot.slane %v2032_v10, 1  ;;  %v3132_v40 = vmul.f32 %v8744_v63, %v11631_v12  ;;  %v9100_v31 = vstv %s9042_s23  ;;  %v2087_v15 = vmul.f32 %v2086_v61, %v2071_v59  ;;  %11632 = vst [vmem:[#allocation28_spill] sm:$0xff] %v9103_v28  ;;  %v11636_v7 = vld [vmem:[#allocation85_spill] sm:$0xff]  ;;  %s9318_s23 = sld [smem:[#allocation7 + $0x2f]] }
 0x43b   :  { %v2065_v0 = vsel %vm2062_vm9, %v11629_v17, %v11627_v33  ;;  %v2080_v22 = vmul.f32 %v9028_v18, %v2074_v47  ;;  %v2090_v45 = vmul.f32 %v2086_v61, %v2074_v47  ;;  %v9106_v20 = vstv %s9052_s28  ;;  %vm11644_vm9 = vmmov %vm11598_vm1  ;;  %s9324_s28 = sld [smem:[#allocation7 + $0x20]] }
 0x43c   :  { %3074 = vrot.lane.b32.xlu1 %v3064_v3, %s6957_s15  ;;  %v11635_v9 = vunpack.i.l.bf16 %v11634_v62  ;;  %v2046_v3 = vadd.f32 %v2038_v36, %v2024_v2  ;;  %v2047_v42 = vadd.f32 %v2039_v27, %v2025_v19  ;;  %v2078_v63 = vmul.f32 %v9028_v18, %v2072_v38  ;;  %v11637_v36 = vld [vmem:[#allocation131_spill] sm:$0xff]  ;;  %v11638_v27 = vld [vmem:[#allocation130_spill] sm:$0xff] }
 0x43d   :  { %v2088_v33 = vmul.f32 %v2086_v61, %v2072_v38  ;;  %v2073_v25 = vsel %vm811_vm11, %v2065_v0, 0.0  ;;  %v2049_v59 = vadd.f32 %v2041_v16, %v2027_v53  ;;  %v2120_v10 = vsel %vm11320_vm7, %v11633_v43, %v11636_v7  ;;  %v11640_v16 = vld [vmem:[#allocation126_spill] sm:$0xff] }
 0x43e   :  { %v2119_v13 = vsel %vm11320_vm7, %v11635_v9, %v11633_v43  ;;  %v2081_v32 = vadd.f32 %v2077_v14, %v2046_v3  ;;  %v2048_v47 = vadd.f32 %v2040_v48, %v2026_v56  ;;  %v3144_v17 = vrot.slane %v3132_v40, 1  ;;  %v11641_v43 = vld [vmem:[#allocation26_spill] sm:$0xff]  ;;  %v11643_v48 = vld [vmem:[#allocation77_spill] sm:$0xff] }
 0x43f   :  { %v2095_v12 = vrot.slane %v2087_v15, 1  ;;  %v2122_v19 = vsel %vm11320_vm7, %v11638_v27, %v11637_v36  ;;  %v2084_v2 = vadd.f32 %v2080_v22, %v2049_v59  ;;  %v2098_v9 = vrot.slane %v2090_v45, 1  ;;  %v9138_v45 = vld [vmem:[#allocation2 + $0x10] sm:$0x3] }
 0x440   :  { %v2142_v38 = vstv %s9071_s20  ;;  %v2127_v0 = vsel %vm11639_vm6, %v2119_v13, 0.0  ;;  %v2079_v53 = vmul.f32 %v9028_v18, %v2073_v25  ;;  %v2089_v14 = vmul.f32 %v2086_v61, %v2073_v25  ;;  %v9149_v25 = vpop.permute.xlu2 %2753  ;;  %s9355_s20 = sld [smem:[#allocation7 + $0x21]] }
 0x441   :  { %3188 = vrot.lane.b32.xlu2 %v11640_v16, %s11543_s13  ;;  %v11642_v56 = vunpack.i.l.bf16 %v11641_v43  ;;  %v2082_v15 = vadd.f32 %v2078_v63, %v2047_v42  ;;  %v9134_v3 = vstv %s9082_s21  ;;  %v2128_v22 = vsel %vm11644_vm9, %v2120_v10, 0.0  ;;  %3659 = vrot.lane.b32.xlu0 %v9138_v45, %s6992_s4  ;;  %v9152_v16 = vpop.permute.xlu0 %3433  ;;  %vm11667_vm9 = vmmov %vm11650_vm3  ;;  %s6993_s21 = smov 79  }
 0x442   :  { %v2096_v18 = vrot.slane %v2088_v33, 1  ;;  %v11645_v61 = vunpack.i.h.bf16 %v11634_v62  ;;  %v2130_v42 = vsel %vm812_vm13, %v2122_v19, 0.0  ;;  %v2083_v63 = vadd.f32 %v2079_v53, %v2048_v47  ;;  %11646 = vst [vmem:[#allocation119_spill] sm:$0xff] %v9152_v16  ;;  %v9158_v47 = vpop.permute.xlu1 %2511 }
 0x443   :  { %v2177_v40 = vsel %vm2175_vm15, %v11643_v48, %v11642_v56  ;;  %v2133_v59 = vmul.f32 %v9106_v20, %v2127_v0  ;;  %v2143_v7 = vmul.f32 %v2142_v38, %v2127_v0  ;;  %v2103_v10 = vadd.f32 %v2095_v12, %v2081_v32  ;;  %v6886_v32 = vld [vmem:[#allocation2 + $0x38] sm:$0x3]  ;;  %v6887_v12 = vld [vmem:[#allocation2 + $0x28] sm:$0x3] }
 0x444   :  { %v2121_v13 = vsel %vm11320_vm7, %v11645_v61, %v11638_v27  ;;  %3152 = vrot.lane.b32.xlu1 %v3144_v17, %s6983_s22  ;;  %v2106_v36 = vadd.f32 %v2098_v9, %v2084_v2  ;;  %v2134_v33 = vmul.f32 %v9106_v20, %v2128_v22  ;;  %v2144_v62 = vmul.f32 %v2142_v38, %v2128_v22  ;;  %v11647_v27 = vld [vmem:[#allocation88_spill] sm:$0xff] }
 0x445   :  { %v2176_v56 = vsel %vm2175_vm15, %v11647_v27, %v11643_v48  ;;  %v2097_v19 = vrot.slane %v2089_v14, 1  ;;  %v2129_v17 = vsel %vm811_vm11, %v2121_v13, 0.0  ;;  %v2136_v53 = vmul.f32 %v9106_v20, %v2130_v42 }
 0x446   :  { %v2146_v0 = vmul.f32 %v2142_v38, %v2130_v42  ;;  %v9163_v2 = vpack.i.bf16 %v6887_v12, %v6886_v32  ;;  %v2185_v9 = vsel %vm11648_vm4, %v2177_v40, 0.0  ;;  %v2104_v22 = vadd.f32 %v2096_v18, %v2082_v15 }
 0x447   :  { %v2105_v61 = vadd.f32 %v2097_v19, %v2083_v63  ;;  %v2178_v14 = vsel %vm2175_vm15, %v8952_v58, %v11649_v30  ;;  %v2137_v48 = vadd.f32 %v2133_v59, %v2103_v10  ;;  %v2184_v13 = vsel %vm11650_vm3, %v2176_v56, 0.0  ;;  %v9181_v58 = vld [vmem:[#allocation2 + $0x8] sm:$0x3] }
 0x448   :  { %v11651_v42 = vunpack.i.h.bf16 %v11641_v43  ;;  %v2140_v32 = vadd.f32 %v2136_v53, %v2106_v36  ;;  %v2151_v12 = vrot.slane %v2143_v7, 1  ;;  %vm2288_vm2 = vcmask 670720   ;;  %v11652_v10 = vld [vmem:[#allocation27_spill] sm:$0xff] }
 0x449   :  { %v2135_v40 = vmul.f32 %v9106_v20, %v2129_v17  ;;  %v2145_v15 = vmul.f32 %v2142_v38, %v2129_v17  ;;  %3259 = vrot.lane.b32.xlu2 %v9181_v58, %s11512_s1  ;;  %v2138_v18 = vadd.f32 %v2134_v33, %v2104_v22  ;;  %v2152_v63 = vrot.slane %v2144_v62, 1  ;;  %6519 = vrot.lane.b32.xlu0 %v9163_v2, %s6992_s4  ;;  %v9196_v33 = vpop.permute.xlu2 %2836  ;;  %v11654_v17 = vld [vmem:[#allocation34_spill] sm:$0xff]  ;;  %v9203_v22 = vpop.permute.xlu0 %3028 }
 0x44a   :  { %v2179_v27 = vsel %vm2175_vm15, %v11649_v30, %v11651_v42  ;;  %v2154_v59 = vrot.slane %v2146_v0, 1  ;;  %v2186_v43 = vsel %vm811_vm11, %v2178_v14, 0.0  ;;  %v2191_v30 = vmul.f32 %v9068_v21, %v2185_v9  ;;  %11657 = vst [vmem:[#allocation13_spill] sm:$0xff] %v9203_v22  ;;  %v11715_v22 = vld [vmem:[#allocation97_spill] sm:$0xff] }
 0x44b   :  { %v2190_v7 = vmul.f32 %v9068_v21, %v2184_v13  ;;  %v2187_v20 = vsel %vm812_vm13, %v2179_v27, 0.0  ;;  %v2139_v38 = vadd.f32 %v2135_v40, %v2105_v61  ;;  %v11653_v36 = vrot.slane %v11652_v10, 1  ;;  %v11658_v27 = vld [vmem:[#allocation136_spill] sm:$0xff] }
 0x44c   :  { %v2159_v62 = vadd.f32 %v2151_v12, %v2137_v48  ;;  %v2200_v56 = vmul.f32 %v9100_v31, %v2184_v13  ;;  %v2162_v19 = vadd.f32 %v2154_v59, %v2140_v32  ;;  %v11655_v53 = vunpack.i.h.bf16 %v11654_v17  ;;  %v9210_v48 = vpop.permute.xlu1 %2567  ;;  %v11661_v10 = vld [vmem:[#allocation84_spill] sm:$0xff] }
 0x44d   :  { %3148 = vrot.lane.b32.xlu1 %v11653_v36, %s6983_s22  ;;  %vm11656_vm12 = vcmask 801792   ;;  %v2153_v14 = vrot.slane %v2145_v15, 1  ;;  %v2192_v61 = vmul.f32 %v9068_v21, %v2186_v43  ;;  %v2202_v42 = vmul.f32 %v9100_v31, %v2186_v43  ;;  %s9215_s22 = sld [smem:[#allocation7 + $0x5]]  ;;  %v11660_v43 = vld [vmem:[#allocation91_spill] sm:$0xff] }
 0x44e   :  { %v2235_v0 = vsel %vm11656_vm12, %v9002_v5, %v11655_v53  ;;  %vm11659_vm5 = vmmov %vm11656_vm12  ;;  %v2201_v13 = vmul.f32 %v9100_v31, %v2185_v9  ;;  %v2160_v32 = vadd.f32 %v2152_v63, %v2138_v18  ;;  %v2193_v12 = vmul.f32 %v9068_v21, %v2187_v20 }
 0x44f   :  { %v2234_v40 = vsel %vm11659_vm5, %v11658_v27, %v9002_v5  ;;  %v2203_v59 = vmul.f32 %v9100_v31, %v2187_v20  ;;  %vm2345_vm15 = vcmask 400384   ;;  %v2194_v15 = vadd.f32 %v2190_v7, %v2159_v62  ;;  %vm11662_vm1 = vmmov %vm11659_vm5 }
 0x450   :  { %v2232_v36 = vsel %vm11662_vm1, %v11661_v10, %v11660_v43  ;;  %v2161_v5 = vadd.f32 %v2153_v14, %v2139_v38  ;;  %v2243_v53 = vsel %vm812_vm13, %v2235_v0, 0.0  ;;  %v2208_v9 = vrot.slane %v2200_v56, 1  ;;  %vm11664_vm6 = vmmov %vm11662_vm1  ;;  %v11665_v38 = vld [vmem:[#allocation123_spill] sm:$0xff] }
 0x451   :  { %v11663_v18 = vunpack.i.l.bf16 %v11654_v17  ;;  %v2197_v31 = vadd.f32 %v2193_v12, %v2162_v19  ;;  %v2242_v63 = vsel %vm811_vm11, %v2234_v40, 0.0  ;;  %v2245_v7 = vstv %s9172_s26  ;;  %v9239_v19 = vld [vmem:[#allocation2 + $0x30] sm:$0x3]  ;;  %v9247_v10 = vpop.permute.xlu2 %2918  ;;  %s11700_s26 = smov 126  }
 0x452   :  { %v2255_v20 = vstv %s9178_s29  ;;  %v2196_v62 = vadd.f32 %v2192_v61, %v2161_v5  ;;  %v2210_v27 = vrot.slane %v2202_v42, 1  ;;  %v11666_v14 = vrot.slane %v11665_v38, 1  ;;  %3718 = vrot.lane.b32.xlu0 %v9239_v19, %s11668_s24  ;;  %11669 = vst [vmem:[#allocation75_spill] sm:$0xff] %v9247_v10  ;;  %v11671_v5 = vld [vmem:[#allocation80_spill] sm:$0xff]  ;;  %s9454_s29 = sld [smem:[#allocation7 + $0x3d]] }
 0x453   :  { %v2233_v21 = vsel %vm11664_vm6, %v11660_v43, %v11663_v18  ;;  %v2240_v56 = vsel %vm11667_vm9, %v2232_v36, 0.0  ;;  %v2211_v17 = vrot.slane %v2203_v59, 1  ;;  %v2249_v0 = vmul.f32 %v2245_v7, %v2243_v53  ;;  %v11670_v59 = vld [vmem:[#allocation87_spill] sm:$0xff] }
 0x454   :  { %3233 = vrot.lane.b32.xlu2 %v11666_v14, %s11543_s13  ;;  %v2259_v43 = vmul.f32 %v2255_v20, %v2243_v53  ;;  %v2209_v40 = vrot.slane %v2201_v13, 1  ;;  %v2241_v61 = vsel %vm11648_vm4, %v2233_v21, 0.0  ;;  %v2248_v42 = vmul.f32 %v2245_v7, %v2242_v63  ;;  %v9252_v13 = vpop.permute.xlu0 %3112 }
 0x455   :  { %v2258_v12 = vmul.f32 %v2255_v20, %v2242_v63  ;;  %3257 = vrot.lane.b32.xlu1 %v9084_v34, %s11512_s1  ;;  %v2195_v36 = vadd.f32 %v2191_v30, %v2160_v32  ;;  %v2289_v53 = vsel %vm2288_vm2, %v11671_v5, %v11670_v59  ;;  %v2216_v18 = vadd.f32 %v2208_v9, %v2194_v15  ;;  %v9254_v63 = vpop.permute.xlu1 %2678  ;;  %s9290_s1 = sld [smem:[#allocation7 + $0x12]] }
 0x456   :  { %v2219_v38 = vadd.f32 %v2211_v17, %v2197_v31  ;;  %11672 = vst [vmem:[#allocation30_spill] sm:$0xff] %v9252_v13  ;;  %v2246_v14 = vmul.f32 %v2245_v7, %v2240_v56  ;;  %v2256_v21 = vmul.f32 %v2255_v20, %v2240_v56  ;;  %v2218_v16 = vadd.f32 %v2210_v27, %v2196_v62 }
 0x457   :  { %v2247_v28 = vmul.f32 %v2245_v7, %v2241_v61  ;;  %v11674_v4 = vunpack.i.h.bf16 %v11673_v23  ;;  %v2267_v5 = vrot.slane %v2259_v43, 1  ;;  %v2257_v11 = vmul.f32 %v2255_v20, %v2241_v61 }
 0x458   :  { %v2253_v32 = vadd.f32 %v2249_v0, %v2219_v38  ;;  %v2291_v15 = vsel %vm2288_vm2, %v8721_v46, %v8728_v1  ;;  %v2252_v9 = vadd.f32 %v2248_v42, %v2218_v16  ;;  %v2266_v31 = vrot.slane %v2258_v12, 1  ;;  %v11676_v46 = vld [vmem:[#allocation83_spill] sm:$0xff]  ;;  %v11680_v38 = vld [vmem:[#allocation24_spill] sm:$0xff] }
 0x459   :  { %v2292_v30 = vsel %vm2288_vm2, %v8728_v1, %v11674_v4  ;;  %v9264_v56 = vstv %s9215_s22  ;;  %v2312_v62 = vstv %s9222_s3  ;;  %v11675_v7 = vunpack.i.l.bf16 %v11673_v23  ;;  %v11677_v1 = vld [vmem:[#allocation47_spill] sm:$0xff]  ;;  %s6994_s22 = smov 110   ;;  %s9484_s3 = sld [smem:[#allocation7 + $0x4a]] }
 0x45a   :  { %v2297_v4 = vsel %vm11650_vm3, %v2289_v53, 0.0  ;;  %v2217_v17 = vadd.f32 %v2209_v40, %v2195_v36  ;;  %v2250_v0 = vadd.f32 %v2246_v14, %v2216_v18  ;;  %v2264_v20 = vrot.slane %v2256_v21, 1  ;;  %v9294_v14 = vpop.permute.xlu2 %3110 }
 0x45b   :  { %v2290_v27 = vsel %vm2288_vm2, %v11670_v59, %v11675_v7  ;;  %v2300_v43 = vsel %vm812_vm13, %v2292_v30, 0.0  ;;  %v11678_v16 = vunpack.i.l.bf16 %v11677_v1  ;;  %v2302_v61 = vstv %s9235_s0  ;;  %v9284_v59 = vld [vmem:[#allocation2 + $0x18] sm:$0x3]  ;;  %vm11679_vm13 = vmmov %vm11648_vm4  ;;  %11681 = vst [vmem:[#allocation127_spill] sm:$0xff] %v9294_v14  ;;  %s9490_s0 = sld [smem:[#allocation7 + $0x4b]] }
 0x45c   :  { %6509 = vrot.lane.b32.xlu2 %v8747_v51, %s6991_s5  ;;  %v2299_v42 = vsel %vm811_vm11, %v2291_v15, 0.0  ;;  %v2275_v12 = vadd.f32 %v2267_v5, %v2253_v32  ;;  %3481 = vrot.lane.b32.xlu0 %v9284_v59, %s11569_s19  ;;  %v2298_v40 = vsel %vm11679_vm13, %v2290_v27, 0.0  ;;  %v2251_v36 = vadd.f32 %v2247_v28, %v2217_v17  ;;  %v9301_v15 = vpop.permute.xlu0 %3194 }
 0x45d   :  { %v2346_v23 = vsel %vm2345_vm15, %v11678_v16, %v11676_v46  ;;  %v2265_v53 = vrot.slane %v2257_v11, 1  ;;  %v2274_v18 = vadd.f32 %v2266_v31, %v2252_v9  ;;  %3186 = vrot.lane.b32.xlu1 %v11680_v38, %s11543_s13  ;;  %v2313_v21 = vmul.f32 %v2312_v62, %v2297_v4  ;;  %11682 = vst [vmem:[#allocation79_spill] sm:$0xff] %v9301_v15  ;;  %v9307_v27 = vpop.permute.xlu1 %3322  ;;  %s9314_s13 = sld [smem:[#allocation7 + $0x2e]] }
 0x45e   :  { %v2306_v30 = vmul.f32 %v2302_v61, %v2300_v43  ;;  %v2316_v32 = vmul.f32 %v2312_v62, %v2300_v43  ;;  %v2349_v5 = vsel %vm2345_vm15, %v9057_v8, %v8780_v57  ;;  %v2272_v11 = vadd.f32 %v2264_v20, %v2250_v0  ;;  %11684 = vst [vmem:[#allocation72_spill] sm:$0xff] %v9307_v27  ;;  %v11686_v43 = vld [vmem:[#allocation90_spill] sm:$0xff] }
 0x45f   :  { %v2305_v28 = vmul.f32 %v2302_v61, %v2299_v42  ;;  %v2315_v7 = vmul.f32 %v2312_v62, %v2299_v42  ;;  %v11683_v9 = vunpack.i.h.bf16 %v11677_v1  ;;  %vm11685_vm11 = vcmp.ge.s32.totalorder %v11548_v52, 1 }
 0x460   :  { %v2354_v17 = vsel %vm11685_vm11, %v2346_v23, 0.0  ;;  %v2347_v16 = vsel %vm2345_vm15, %v11676_v46, %v11686_v43  ;;  %vm2402_vm2 = vcmask 269312   ;;  %v2310_v57 = vadd.f32 %v2306_v30, %v2275_v12  ;;  %vm11705_vm4 = vmmov %vm11685_vm11 }
 0x461   :  { %v2348_v31 = vsel %vm2345_vm15, %v11683_v9, %v9057_v8  ;;  %v2303_v38 = vmul.f32 %v2302_v61, %v2297_v4  ;;  %v2273_v0 = vadd.f32 %v2265_v53, %v2251_v36  ;;  %v2309_v20 = vadd.f32 %v2305_v28, %v2274_v18  ;;  %v9333_v53 = vld [vmem:[#allocation2 + $0x8] sm:$0x3] }
 0x462   :  { %vm11687_vm12 = vcmp.ge.s32.totalorder %v7155_v29, 1  ;;  %v2304_v8 = vmul.f32 %v2302_v61, %v2298_v40  ;;  %v2314_v42 = vmul.f32 %v2312_v62, %v2298_v40  ;;  %v2324_v9 = vrot.slane %v2316_v32, 1 }
 0x463   :  { %v2357_v1 = vsel %vm11687_vm12, %v2349_v5, 0.0  ;;  %vm11688_vm5 = vcmp.ge.s32.totalorder %v7265_v41, 1  ;;  %v2321_v27 = vrot.slane %v2313_v21, 1  ;;  %vm11689_vm15 = vcmp.ge.s32.totalorder %v7263_v39, 1  ;;  %v9341_v5 = vpop.permute.xlu2 %2798  ;;  %vm11692_vm1 = vmmov %vm11687_vm12 }
 0x464   :  { %v2356_v23 = vsel %vm11688_vm5, %v2348_v31, 0.0  ;;  %v2355_v46 = vsel %vm11689_vm15, %v2347_v16, 0.0  ;;  %v2307_v4 = vadd.f32 %v2303_v38, %v2272_v11  ;;  %v2323_v12 = vrot.slane %v2315_v7, 1  ;;  %3316 = vrot.lane.b32.xlu2 %v9181_v58, %s11515_s25  ;;  %3539 = vrot.lane.b32.xlu0 %v9333_v53, %s6991_s5  ;;  %v11690_v11 = vld [vmem:[#allocation50_spill] sm:$0xff]  ;;  %v9347_v43 = vpop.permute.xlu0 %3072  ;;  %vm11699_vm6 = vmmov %vm11688_vm5 }
 0x465   :  { %v2332_v62 = vadd.f32 %v2324_v9, %v2310_v57  ;;  %v2363_v61 = vmul.f32 %v9134_v3, %v2357_v1  ;;  %v2373_v40 = vmul.f32 %v9264_v56, %v2357_v1  ;;  %v2406_v36 = vsel %vm2402_vm2, %v8788_v50, %v9112_v26  ;;  %3545 = vrot.lane.b32.xlu1 %v9075_v55, %s6991_s5  ;;  %vm11708_vm13 = vmmov %vm11689_vm15 }
 0x466   :  { %v2308_v18 = vadd.f32 %v2304_v8, %v2273_v0  ;;  %v2331_v21 = vadd.f32 %v2323_v12, %v2309_v20  ;;  %v2362_v30 = vmul.f32 %v9134_v3, %v2356_v23  ;;  %v2372_v32 = vmul.f32 %v9264_v56, %v2356_v23  ;;  %11691 = vst [vmem:[#allocation41_spill] sm:$0xff] %v9347_v43  ;;  %v9351_v0 = vpop.permute.xlu1 %3379  ;;  %v11694_v12 = vld [vmem:[#allocation29_spill] sm:$0xff]  ;;  %vm11714_vm5 = vmmov %vm11692_vm1 }
 0x467   :  { %v6346_v28 = vunpack.i.l.bf16 %v11690_v11  ;;  %v2360_v26 = vmul.f32 %v9134_v3, %v2354_v17  ;;  %v2416_v7 = vstv %s9290_s1  ;;  %v2426_v31 = vstv %s9296_s17  ;;  %11693 = vst [vmem:[#allocation129_spill] sm:$0xff] %v9351_v0  ;;  %s9525_s1 = sld [smem:[#allocation7 + $0x58]] }
 0x468   :  { %v2322_v16 = vrot.slane %v2314_v42, 1  ;;  %v2329_v57 = vadd.f32 %v2321_v27, %v2307_v4  ;;  %v2414_v38 = vsel %vm11692_vm1, %v2406_v36, 0.0  ;;  %v2370_v20 = vmul.f32 %v9264_v56, %v2354_v17  ;;  %vm11717_vm1 = vmmov %vm11699_vm6  ;;  %s9531_s17 = sld [smem:[#allocation7 + $0x59]] }
 0x469   :  { %v2371_v1 = vmul.f32 %v9264_v56, %v2355_v46  ;;  %v2367_v8 = vadd.f32 %v2363_v61, %v2332_v62  ;;  %v2381_v9 = vrot.slane %v2373_v40, 1  ;;  %v11695_v15 = vunpack.i.h.bf16 %v11694_v12  ;;  %v11696_v61 = vld [vmem:[#allocation94_spill] sm:$0xff] }
 0x46a   :  { %v2330_v23 = vadd.f32 %v2322_v16, %v2308_v18  ;;  %v2366_v42 = vadd.f32 %v2362_v30, %v2331_v21  ;;  %v2380_v4 = vrot.slane %v2372_v32, 1  ;;  %v9362_v36 = vstv %s9314_s13  ;;  %v11701_v32 = vld [vmem:[#allocation93_spill] sm:$0xff]  ;;  %s6995_s13 = smov 14  }
 0x46b   :  { %v2405_v27 = vsel %vm2402_vm2, %v11695_v15, %v8788_v50  ;;  %v9365_v14 = vstv %s9318_s23  ;;  %v2420_v0 = vmul.f32 %v2416_v7, %v2414_v38  ;;  %v2430_v17 = vmul.f32 %v2426_v31, %v2414_v38  ;;  %v11698_v15 = vld [vmem:[#allocation86_spill] sm:$0xff]  ;;  %s6996_s23 = smov 78  }
 0x46c   :  { %v2361_v56 = vmul.f32 %v9134_v3, %v2355_v46  ;;  %v9369_v13 = vstv %s9324_s28  ;;  %v2364_v62 = vadd.f32 %v2360_v26, %v2329_v57  ;;  %v11697_v40 = vunpack.i.l.bf16 %v11694_v12  ;;  %6514 = vrot.lane.b32.xlu2 %v8747_v51, %s6993_s21  ;;  %3829 = vrot.lane.b32.xlu0 %v9075_v55, %s11700_s26  ;;  %v11702_v26 = vld [vmem:[#allocation37_spill] sm:$0xff]  ;;  %s5822_s28 = sld [smem:[#allocation7 + $0x30]] }
 0x46d   :  { %v2378_v50 = vrot.slane %v2370_v20, 1  ;;  %v2404_v21 = vsel %vm2402_vm2, %v11696_v61, %v11698_v15  ;;  %v2413_v3 = vsel %vm11699_vm6, %v2405_v27, 0.0  ;;  %v2389_v46 = vadd.f32 %v2381_v9, %v2367_v8  ;;  %3314 = vrot.lane.b32.xlu1 %v9084_v34, %s11515_s25  ;;  %v9390_v20 = vpop.permute.xlu2 %2880  ;;  %v9397_v27 = vpop.permute.xlu0 %3156  ;;  %s9423_s25 = sld [smem:[#allocation7 + $0x3c]] }
 0x46e   :  { %v2403_v18 = vsel %vm2402_vm2, %v11697_v40, %v11696_v61  ;;  %v2379_v30 = vrot.slane %v2371_v1, 1  ;;  %v11703_v16 = vunpack.i.l.bf16 %v11702_v26  ;;  %vm11704_vm9 = vcmask 138240   ;;  %11707 = vst [vmem:[#allocation122_spill] sm:$0xff] %v9397_v27  ;;  %v11709_v40 = vld [vmem:[#allocation89_spill] sm:$0xff]  ;;  %vm11711_vm2 = vmmov %vm11705_vm4 }
 0x46f   :  { %v2365_v51 = vadd.f32 %v2361_v56, %v2330_v23  ;;  %v2388_v38 = vadd.f32 %v2380_v4, %v2366_v42  ;;  %v2411_v8 = vsel %vm11705_vm4, %v2403_v18, 0.0  ;;  %vm11706_vm3 = vmmov %vm11704_vm9  ;;  %v2424_v9 = vadd.f32 %v2420_v0, %v2389_v46  ;;  %v9401_v56 = vpop.permute.xlu1 %2751 }
 0x470   :  { %v2459_v57 = vsel %vm11704_vm9, %v11703_v16, %v11701_v32  ;;  %v2462_v1 = vsel %vm11706_vm3, %v8836_v44, %v8842_v54  ;;  %v2438_v12 = vrot.slane %v2430_v17, 1  ;;  %v2386_v61 = vadd.f32 %v2378_v50, %v2364_v62  ;;  %vm11713_vm12 = vmmov %vm11706_vm3 }
 0x471   :  { %v2412_v23 = vsel %vm11708_vm13, %v2404_v21, 0.0  ;;  %v2419_v42 = vmul.f32 %v2416_v7, %v2413_v3  ;;  %v2429_v4 = vmul.f32 %v2426_v31, %v2413_v3  ;;  %vm11710_vm11 = vcmask 7168   ;;  %vm11716_vm15 = vmmov %vm11706_vm3 }
 0x472   :  { %v9405_v15 = vsel %vm11710_vm11, %v6346_v28, %v11709_v40  ;;  %v2482_v18 = vstv %s9355_s20  ;;  %v2467_v54 = vsel %vm11711_vm2, %v2459_v57, 0.0  ;;  %v11712_v0 = vunpack.i.h.bf16 %v11702_v26  ;;  %vm11719_vm6 = vmmov %vm11710_vm11  ;;  %s5823_s20 = sld [smem:[#allocation7 + $0x31]] }
 0x473   :  { %v2387_v62 = vadd.f32 %v2379_v30, %v2365_v51  ;;  %v2417_v50 = vmul.f32 %v2416_v7, %v2411_v8  ;;  %v2470_v21 = vsel %vm11714_vm5, %v2462_v1, 0.0  ;;  %v2423_v3 = vadd.f32 %v2419_v42, %v2388_v38  ;;  %vm11720_vm9 = vmmov %vm11719_vm6 }
 0x474   :  { %v2461_v17 = vsel %vm11713_vm12, %v11712_v0, %v8836_v44  ;;  %v2418_v46 = vmul.f32 %v2416_v7, %v2412_v23  ;;  %v2427_v16 = vmul.f32 %v2426_v31, %v2411_v8  ;;  %v2428_v27 = vmul.f32 %v2426_v31, %v2412_v23  ;;  %3600 = vrot.lane.b32.xlu2 %v9030_v6, %s6993_s21  ;;  %vm11721_vm4 = vmmov %vm11708_vm13  ;;  %v11724_v0 = vld [vmem:[#allocation96_spill] sm:$0xff] }
 0x475   :  { %v2446_v28 = vadd.f32 %v2438_v12, %v2424_v9  ;;  %v2421_v43 = vadd.f32 %v2417_v50, %v2386_v61  ;;  %v2460_v57 = vsel %vm11716_vm15, %v11701_v32, %v11715_v22  ;;  %v2437_v10 = vrot.slane %v2429_v4, 1  ;;  %3827 = vrot.lane.b32.xlu0 %v9030_v6, %s11700_s26  ;;  %3602 = vrot.lane.b32.xlu1 %v9075_v55, %s6993_s21  ;;  %v9438_v1 = vpop.permute.xlu2 %2962  ;;  %vm11722_vm3 = vmmov %vm11717_vm1  ;;  %v6892_v50 = vld [vmem:[#allocation2 + $0x20] sm:$0x3] }
 0x476   :  { %v2469_v26 = vsel %vm11717_vm1, %v2461_v17, 0.0  ;;  %v2476_v44 = vmul.f32 %v9369_v13, %v2470_v21  ;;  %v2486_v7 = vmul.f32 %v2482_v18, %v2470_v21  ;;  %v11718_v31 = vunpack.i.h.bf16 %v11690_v11  ;;  %vm11723_vm13 = vmmov %vm11714_vm5 }
 0x477   :  { %v2518_v22 = vsel %vm11720_vm9, %v9158_v47, %v8882_v24  ;;  %v2473_v32 = vmul.f32 %v9369_v13, %v2467_v54  ;;  %v2483_v51 = vmul.f32 %v2482_v18, %v2467_v54  ;;  %v2422_v38 = vadd.f32 %v2418_v46, %v2387_v62  ;;  %v9442_v24 = vpop.permute.xlu0 %3150  ;;  %v9449_v4 = vpop.permute.xlu1 %2834  ;;  %vm11725_vm11 = vmmov %vm11719_vm6 }
 0x478   :  { %v2517_v30 = vsel %vm11719_vm6, %v11718_v31, %v9158_v47  ;;  %v2445_v8 = vadd.f32 %v2437_v10, %v2423_v3  ;;  %v2435_v11 = vrot.slane %v2427_v16, 1  ;;  %v2468_v9 = vsel %vm11721_vm4, %v2460_v57, 0.0  ;;  %vm11732_vm15 = vmmov %vm11721_vm4 }
 0x479   :  { %v2485_v12 = vmul.f32 %v2482_v18, %v2469_v26  ;;  %v2480_v61 = vadd.f32 %v2476_v44, %v2446_v28  ;;  %v2436_v47 = vrot.slane %v2428_v27, 1  ;;  %v2475_v23 = vmul.f32 %v9369_v13, %v2469_v26  ;;  %v6893_v27 = vld [vmem:[#allocation2] sm:$0x3]  ;;  %vm11733_vm6 = vmmov %vm11723_vm13 }
 0x47a   :  { %v2525_v42 = vsel %vm11722_vm3, %v2517_v30, 0.0  ;;  %v2526_v10 = vsel %vm11723_vm13, %v2518_v22, 0.0  ;;  %v2443_v54 = vadd.f32 %v2435_v11, %v2421_v43  ;;  %v2516_v17 = vsel %vm11725_vm11, %v11709_v40, %v11724_v0  ;;  %v11727_v30 = vld [vmem:[#allocation40_spill] sm:$0xff] }
 0x47b   :  { %v2494_v62 = vrot.slane %v2486_v7, 1  ;;  %v9456_v21 = vpack.i.bf16 %v6893_v27, %v6892_v50  ;;  %v2444_v3 = vadd.f32 %v2436_v47, %v2422_v38  ;;  %v2474_v46 = vmul.f32 %v9369_v13, %v2468_v9 }
 0x47c   :  { %v2484_v16 = vmul.f32 %v2482_v18, %v2468_v9  ;;  %v2479_v28 = vadd.f32 %v2475_v23, %v2445_v8  ;;  %v2493_v57 = vrot.slane %v2485_v12, 1  ;;  %v2531_v43 = vmul.f32 %v9362_v36, %v2525_v42  ;;  %3427 = vrot.lane.b32.xlu2 %v9333_v53, %s11519_s27  ;;  %v11730_v18 = vld [vmem:[#allocation53_spill] sm:$0xff] }
 0x47d   :  { %v2502_v26 = vadd.f32 %v2494_v62, %v2480_v61  ;;  %v2532_v44 = vmul.f32 %v9362_v36, %v2526_v10  ;;  %v2541_v40 = vmul.f32 %v9365_v14, %v2525_v42  ;;  %v2542_v7 = vmul.f32 %v9365_v14, %v2526_v10  ;;  %6539 = vrot.lane.b32.xlu0 %v9456_v21, %s6994_s22 }
 0x47e   :  { %vm11726_vm2 = vcmask 924672   ;;  %v11728_v22 = vunpack.i.h.bf16 %v11727_v30  ;;  %v6357_v38 = vunpack.i.h.bf16 %v11730_v18  ;;  %v6356_v8 = vunpack.i.l.bf16 %v11730_v18  ;;  %3373 = vrot.lane.b32.xlu1 %v9181_v58, %s11517_s18 }
 0x47f   :  { %v2573_v31 = vsel %vm11726_vm2, %v8889_v37, %v9210_v48  ;;  %vm11729_vm12 = vmmov %vm11726_vm2  ;;  %v2477_v11 = vadd.f32 %v2473_v32, %v2443_v54  ;;  %v9475_v9 = vstv %s9423_s25  ;;  %vm11731_vm5 = vcmp.ge.s32.totalorder %v11548_v52, 1  ;;  %v9488_v32 = vpop.permute.xlu2 %3154  ;;  %v9496_v42 = vpop.permute.xlu0 %6504  ;;  %s9695_s25 = sld [smem:[#allocation7 + $0x9]] }
 0x480   :  { %v2574_v13 = vsel %vm11729_vm12, %v9210_v48, %v11728_v22  ;;  %v2523_v37 = vsel %vm11731_vm5, %v9405_v15, 0.0  ;;  %v2491_v12 = vrot.slane %v2483_v51, 1  ;;  %v2524_v48 = vsel %vm11732_vm15, %v2516_v17, 0.0  ;;  %v9498_v62 = vpop.permute.xlu1 %2916  ;;  %vm11736_vm9 = vmmov %vm11726_vm2 }
 0x481   :  { %v2501_v61 = vadd.f32 %v2493_v57, %v2479_v28  ;;  %v2478_v47 = vadd.f32 %v2474_v46, %v2444_v3  ;;  %v2492_v23 = vrot.slane %v2484_v16, 1  ;;  %v2581_v15 = vsel %vm11717_vm1, %v2573_v31, 0.0  ;;  %v11734_v46 = vld [vmem:[#allocation100_spill] sm:$0xff]  ;;  %v11735_v16 = vld [vmem:[#allocation99_spill] sm:$0xff]  ;;  %vm11738_vm3 = vmmov %vm11726_vm2 }
 0x482   :  { %v2582_v51 = vsel %vm11733_vm6, %v2574_v13, 0.0  ;;  %v2536_v54 = vadd.f32 %v2532_v44, %v2502_v26  ;;  %v2549_v0 = vrot.slane %v2541_v40, 1  ;;  %v2550_v17 = vrot.slane %v2542_v7, 1  ;;  %vm11739_vm13 = vmmov %vm11731_vm5 }
 0x483   :  { %v2535_v10 = vadd.f32 %v2531_v43, %v2501_v61  ;;  %v2529_v50 = vmul.f32 %v9362_v36, %v2523_v37  ;;  %v2499_v27 = vadd.f32 %v2491_v12, %v2477_v11  ;;  %v2594_v3 = vstv %s9454_s29  ;;  %vm11740_vm2 = vmmov %vm11732_vm15  ;;  %s9701_s29 = sld [smem:[#allocation7 + $0x8]] }
 0x484   :  { %v2571_v28 = vsel %vm11736_vm9, %v11735_v16, %v11734_v46  ;;  %v2587_v57 = vmul.f32 %v9475_v9, %v2581_v15  ;;  %v2588_v31 = vmul.f32 %v9475_v9, %v2582_v51  ;;  %v2597_v22 = vmul.f32 %v2594_v3, %v2581_v15  ;;  %3716 = vrot.lane.b32.xlu2 %v9138_v45, %s11668_s24  ;;  %vm11741_vm12 = vmmov %vm11717_vm1 }
 0x485   :  { %v2598_v13 = vmul.f32 %v2594_v3, %v2582_v51  ;;  %v2539_v26 = vmul.f32 %v9365_v14, %v2523_v37  ;;  %v2530_v43 = vmul.f32 %v9362_v36, %v2524_v48  ;;  %v2540_v44 = vmul.f32 %v9365_v14, %v2524_v48  ;;  %3883 = vrot.lane.b32.xlu0 %v9030_v6, %s6994_s22  ;;  %vm11742_vm5 = vmmov %vm11733_vm6 }
 0x486   :  { %vm2627_vm4 = vcmask 793600   ;;  %v2500_v40 = vadd.f32 %v2492_v23, %v2478_v47  ;;  %v11737_v7 = vunpack.i.l.bf16 %v11727_v30  ;;  %v2557_v12 = vadd.f32 %v2549_v0, %v2535_v10  ;;  %3661 = vrot.lane.b32.xlu1 %v9239_v19, %s6992_s4  ;;  %vm11745_vm15 = vmmov %vm11739_vm13 }
 0x487   :  { %v2558_v61 = vadd.f32 %v2550_v17, %v2536_v54  ;;  %v2533_v15 = vadd.f32 %v2529_v50, %v2499_v27  ;;  %v2579_v36 = vsel %vm11739_vm13, %v2571_v28, 0.0  ;;  %v2630_v14 = vsel %vm2627_vm4, %v8942_v35, %v8948_v60  ;;  %v9529_v51 = vpop.permute.xlu2 %3239  ;;  %vm11748_vm1 = vmmov %vm11740_vm2 }
 0x488   :  { %v2572_v11 = vsel %vm11738_vm3, %v11734_v46, %v11737_v7  ;;  %v2631_v30 = vsel %vm2627_vm4, %v8948_v60, %v6357_v38  ;;  %v2591_v37 = vadd.f32 %v2587_v57, %v2557_v12  ;;  %v2605_v47 = vrot.slane %v2597_v22, 1  ;;  %v9535_v38 = vpop.permute.xlu0 %3190  ;;  %v9541_v17 = vpop.permute.xlu1 %3030  ;;  %v11743_v57 = vld [vmem:[#allocation102_spill] sm:$0xff]  ;;  %vm11749_vm6 = vmmov %vm11741_vm12 }
 0x489   :  { %v2592_v48 = vadd.f32 %v2588_v31, %v2558_v61  ;;  %v2606_v23 = vrot.slane %v2598_v13, 1  ;;  %v2547_v10 = vrot.slane %v2539_v26, 1  ;;  %vm2684_vm11 = vcmask 662528   ;;  %v11744_v31 = vld [vmem:[#allocation92_spill] sm:$0xff]  ;;  %vm11750_vm9 = vmmov %vm11742_vm5 }
 0x48a   :  { %v2641_v35 = vstv %s9484_s3  ;;  %v2651_v60 = vstv %s9490_s0  ;;  %v2534_v6 = vadd.f32 %v2530_v43, %v2500_v40  ;;  %v2580_v54 = vsel %vm11740_vm2, %v2572_v11, 0.0  ;;  %s9729_s3 = sld [smem:[#allocation7 + $0x17]] }
 0x48b   :  { %v2638_v0 = vsel %vm11741_vm12, %v2630_v14, 0.0  ;;  %v2555_v50 = vadd.f32 %v2547_v10, %v2533_v15  ;;  %v2585_v27 = vmul.f32 %v9475_v9, %v2579_v36  ;;  %v2595_v46 = vmul.f32 %v2594_v3, %v2579_v36  ;;  %s9740_s0 = sld [smem:[#allocation7 + $0x16]] }
 0x48c   :  { %v2639_v16 = vsel %vm11742_vm5, %v2631_v30, 0.0  ;;  %v2548_v28 = vrot.slane %v2540_v44, 1  ;;  %v2628_v22 = vsel %vm2627_vm4, %v11744_v31, %v11743_v57  ;;  %v2613_v13 = vadd.f32 %v2605_v47, %v2591_v37  ;;  %6524 = vrot.lane.b32.xlu2 %v9163_v2, %s11668_s24 }
 0x48d   :  { %v2614_v26 = vadd.f32 %v2606_v23, %v2592_v48  ;;  %v2586_v43 = vmul.f32 %v9475_v9, %v2580_v54  ;;  %v2596_v40 = vmul.f32 %v2594_v3, %v2580_v54  ;;  %v2629_v7 = vsel %vm2627_vm4, %v11743_v57, %v6356_v8  ;;  %3710 = vrot.lane.b32.xlu0 %v9084_v34, %s11668_s24  ;;  %v11746_v8 = vld [vmem:[#allocation31_spill] sm:$0xff]  ;;  %vm11753_vm4 = vmmov %vm11739_vm13 }
 0x48e   :  { %v2644_v11 = vmul.f32 %v2641_v35, %v2638_v0  ;;  %v2645_v12 = vmul.f32 %v2641_v35, %v2639_v16  ;;  %v2654_v61 = vmul.f32 %v2651_v60, %v2638_v0  ;;  %v2655_v44 = vmul.f32 %v2651_v60, %v2639_v16  ;;  %3425 = vrot.lane.b32.xlu1 %v9284_v59, %s11519_s27  ;;  %vm11754_vm13 = vmmov %vm11748_vm1 }
 0x48f   :  { %v2687_v15 = vsel %vm2684_vm11, %v9254_v63, %v8991_v49  ;;  %v2556_v9 = vadd.f32 %v2548_v28, %v2534_v6  ;;  %v2589_v3 = vadd.f32 %v2585_v27, %v2555_v50  ;;  %v2603_v36 = vrot.slane %v2595_v46, 1  ;;  %v9569_v63 = vpop.permute.xlu2 %3237 }
 0x490   :  { %v2636_v18 = vsel %vm11745_vm15, %v2628_v22, 0.0  ;;  %v11747_v14 = vunpack.i.h.bf16 %v11746_v8  ;;  %v2649_v37 = vadd.f32 %v2645_v12, %v2614_v26  ;;  %v2648_v48 = vadd.f32 %v2644_v11, %v2613_v13  ;;  %v9577_v6 = vpop.permute.xlu0 %3487  ;;  %v9579_v27 = vpop.permute.xlu1 %3192 }
 0x491   :  { %v2698_v47 = vstv %s9525_s1  ;;  %v2708_v23 = vstv %s9531_s17  ;;  %v2637_v10 = vsel %vm11748_vm1, %v2629_v7, 0.0  ;;  %v2695_v34 = vsel %vm11749_vm6, %v2687_v15, 0.0  ;;  %v11751_v15 = vld [vmem:[#allocation95_spill] sm:$0xff]  ;;  %s9787_s1 = sld [smem:[#allocation7 + $0x25]]  ;;  %s11826_s17 = smov 94  }
 0x492   :  { %v2688_v30 = vsel %vm2684_vm11, %v8991_v49, %v11747_v14  ;;  %v2642_v54 = vmul.f32 %v2641_v35, %v2636_v18  ;;  %v2652_v0 = vmul.f32 %v2651_v60, %v2636_v18  ;;  %v2662_v49 = vrot.slane %v2654_v61, 1  ;;  %v11752_v18 = vld [vmem:[#allocation103_spill] sm:$0xff] }
 0x493   :  { %v2663_v50 = vrot.slane %v2655_v44, 1  ;;  %v2590_v46 = vadd.f32 %v2586_v43, %v2556_v9  ;;  %v2604_v16 = vrot.slane %v2596_v40, 1  ;;  %v2611_v28 = vadd.f32 %v2603_v36, %v2589_v3 }
 0x494   :  { %v2696_v57 = vsel %vm11750_vm9, %v2688_v30, 0.0  ;;  %v2670_v31 = vadd.f32 %v2662_v49, %v2648_v48  ;;  %v2701_v22 = vmul.f32 %v2698_v47, %v2695_v34  ;;  %v2711_v13 = vmul.f32 %v2708_v23, %v2695_v34  ;;  %3774 = vrot.lane.b32.xlu2 %v9239_v19, %s6995_s13  ;;  %v11755_v49 = vld [vmem:[#allocation36_spill] sm:$0xff] }
 0x495   :  { %v2671_v26 = vadd.f32 %v2663_v50, %v2649_v37  ;;  %v6361_v7 = vunpack.i.l.bf16 %v11746_v8  ;;  %v2643_v11 = vmul.f32 %v2641_v35, %v2637_v10  ;;  %v2653_v12 = vmul.f32 %v2651_v60, %v2637_v10  ;;  %3998 = vrot.lane.b32.xlu0 %v9075_v55, %s6996_s23 }
 0x496   :  { %v2685_v61 = vsel %vm2684_vm11, %v11752_v18, %v11751_v15  ;;  %v2646_v44 = vadd.f32 %v2642_v54, %v2611_v28  ;;  %v2660_v14 = vrot.slane %v2652_v0, 1  ;;  %v2702_v43 = vmul.f32 %v2698_v47, %v2696_v57  ;;  %3483 = vrot.lane.b32.xlu1 %v9333_v53, %s11569_s19 }
 0x497   :  { %v2712_v40 = vmul.f32 %v2708_v23, %v2696_v57  ;;  %v2612_v9 = vadd.f32 %v2604_v16, %v2590_v46  ;;  %v2686_v35 = vsel %vm2684_vm11, %v11751_v15, %v6361_v7  ;;  %v2705_v60 = vadd.f32 %v2701_v22, %v2670_v31  ;;  %v9595_v8 = vpop.permute.xlu2 %3489 }
 0x498   :  { %v2719_v3 = vrot.slane %v2711_v13, 1  ;;  %v2706_v36 = vadd.f32 %v2702_v43, %v2671_v26  ;;  %v2661_v37 = vrot.slane %v2653_v12, 1  ;;  %v2693_v48 = vsel %vm11753_vm4, %v2685_v61, 0.0  ;;  %v9599_v10 = vpop.permute.xlu0 %3235  ;;  %v2797_v54 = vpop.permute.xlu1 %2796  ;;  %v11756_v13 = vld [vmem:[#allocation42_spill] sm:$0xff] }
 0x499   :  { %v2647_v30 = vadd.f32 %v2643_v11, %v2612_v9  ;;  %v2668_v34 = vadd.f32 %v2660_v14, %v2646_v44  ;;  %vm2755_vm3 = vcmask 392192   ;;  %v2720_v55 = vrot.slane %v2712_v40, 1 }
 0x49a   :  { %v2694_v0 = vsel %vm11754_vm13, %v2686_v35, 0.0  ;;  %v2758_v50 = vsel %vm2755_vm3, %v11755_v49, %v9401_v56  ;;  %v2759_v46 = vsel %vm2755_vm3, %v9401_v56, %v9149_v25  ;;  %v2699_v16 = vmul.f32 %v2698_v47, %v2693_v48  ;;  %v11765_v49 = vld [vmem:[#allocation116_spill] sm:$0xff] }
 0x49b   :  { %v2709_v28 = vmul.f32 %v2708_v23, %v2693_v48  ;;  %v2727_v57 = vadd.f32 %v2719_v3, %v2705_v60  ;;  %v2728_v31 = vadd.f32 %v2720_v55, %v2706_v36  ;;  %v2669_v22 = vadd.f32 %v2661_v37, %v2647_v30  ;;  %v11760_v3 = vld [vmem:[#allocation54_spill] sm:$0xff] }
 0x49c   :  { %v2802_v26 = vsel %vm2755_vm3, %v11756_v13, %v2797_v54  ;;  %v2803_v7 = vsel %vm2755_vm3, %v2797_v54, %v9341_v5  ;;  %v2710_v11 = vmul.f32 %v2708_v23, %v2694_v0  ;;  %v2703_v12 = vadd.f32 %v2699_v16, %v2668_v34  ;;  %3537 = vrot.lane.b32.xlu2 %v9284_v59, %s6991_s5  ;;  %v11763_v55 = vld [vmem:[#allocation106_spill] sm:$0xff]  ;;  %v11764_v54 = vld [vmem:[#allocation33_spill] sm:$0xff]  ;;  %s6997_s5 = smov 45  }
 0x49d   :  { %v2766_v15 = vadd.f32 %v2758_v50, %v2727_v57  ;;  %v2767_v18 = vadd.f32 %v2759_v46, %v2728_v31  ;;  %v2700_v25 = vmul.f32 %v2698_v47, %v2694_v0  ;;  %3768 = vrot.lane.b32.xlu0 %v9181_v58, %s6995_s13  ;;  %v2717_v56 = vrot.slane %v2709_v28, 1  ;;  %v11757_v47 = vld [vmem:[#allocation48_spill] sm:$0xff]  ;;  %v11766_v50 = vld [vmem:[#allocation39_spill] sm:$0xff]  ;;  %v11767_v57 = vld [vmem:[#allocation98_spill] sm:$0xff] }
 0x49e   :  { %3772 = vrot.lane.b32.xlu1 %v9138_v45, %s6995_s13  ;;  %v2718_v43 = vrot.slane %v2710_v11, 1  ;;  %vm11758_vm11 = vcmask 261120   ;;  %v2756_v0 = vsel %vm2755_vm3, %v11764_v54, %v11763_v55  ;;  %v2800_v46 = vsel %vm2755_vm3, %v11766_v50, %v11765_v49  ;;  %v11782_v54 = vld [vmem:[#allocation58_spill] sm:$0xff]  ;;  %v11783_v50 = vld [vmem:[#allocation101_spill] sm:$0xff] }
 0x49f   :  { %v2810_v61 = vadd.f32 %v2802_v26, %v2766_v15  ;;  %v2811_v44 = vadd.f32 %v2803_v7, %v2767_v18  ;;  %v9619_v5 = vpop.permute.xlu2 %3188  ;;  %v2704_v23 = vadd.f32 %v2700_v25, %v2669_v22  ;;  %v2725_v40 = vadd.f32 %v2717_v56, %v2703_v12  ;;  %vm11759_vm2 = vmmov %vm11758_vm11  ;;  %v11768_v22 = vld [vmem:[#allocation107_spill] sm:$0xff]  ;;  %v11769_v18 = vld [vmem:[#allocation60_spill] sm:$0xff] }
 0x4a0   :  { %v9621_v14 = vpop.permute.xlu0 %3231  ;;  %v2879_v9 = vpop.permute.xlu1 %2878  ;;  %v2840_v35 = vsel %vm11758_vm11, %v11757_v47, %v9449_v4  ;;  %v2841_v60 = vsel %vm11759_vm2, %v9449_v4, %v9196_v33  ;;  %vm11761_vm12 = vmmov %vm11759_vm2  ;;  %v9641_v4 = vstv %s5822_s28  ;;  %v2757_v31 = vsel %vm2755_vm3, %v11763_v55, %v11767_v57  ;;  %v11771_v56 = vld [vmem:[#allocation75_spill] sm:$0xff]  ;;  %v11774_v47 = vld [vmem:[#allocation45_spill] sm:$0xff]  ;;  %s6998_s28 = smov 13  }
 0x4a1   :  { %v2884_v36 = vsel %vm11761_vm12, %v11760_v3, %v2879_v9  ;;  %vm11762_vm5 = vmmov %vm11759_vm2  ;;  %v2848_v37 = vadd.f32 %v2840_v35, %v2810_v61  ;;  %v2849_v48 = vadd.f32 %v2841_v60, %v2811_v44  ;;  %v2726_v34 = vadd.f32 %v2718_v43, %v2704_v23  ;;  %v11776_v3 = vld [vmem:[#allocation65_spill] sm:$0xff] }
 0x4a2   :  { %v2885_v30 = vsel %vm11762_vm5, %v2879_v9, %v9390_v20  ;;  %v2764_v33 = vadd.f32 %v2756_v0, %v2725_v40  ;;  %v9643_v20 = vstv %s5823_s20  ;;  %v2801_v13 = vsel %vm2755_vm3, %v11765_v49, %v11768_v22  ;;  %v11773_v9 = vld [vmem:[#allocation109_spill] sm:$0xff]  ;;  %vm11775_vm6 = vmmov %vm11759_vm2  ;;  %s9845_s20 = sld [smem:[#allocation7 + $0x33]] }
 0x4a3   :  { %v2892_v16 = vadd.f32 %v2884_v36, %v2848_v37  ;;  %v2893_v28 = vadd.f32 %v2885_v30, %v2849_v48  ;;  %v2980_v7 = vmul.f32 %v9138_v45, %v9641_v4  ;;  %v2990_v11 = vmul.f32 %v9138_v45, %v9643_v20  ;;  %v11779_v30 = vld [vmem:[#allocation117_spill] sm:$0xff]  ;;  %v11780_v37 = vld [vmem:[#allocation51_spill] sm:$0xff]  ;;  %vm11781_vm3 = vmmov %vm11759_vm2 }
 0x4a4   :  { %3596 = vrot.lane.b32.xlu2 %v9333_v53, %s6993_s21  ;;  %v2765_v12 = vadd.f32 %v2757_v31, %v2726_v34  ;;  %v2808_v15 = vadd.f32 %v2800_v46, %v2764_v33  ;;  %vm11770_vm15 = vcmask 130048   ;;  %v2981_v43 = vmul.f32 %v9239_v19, %v9641_v4  ;;  %vm11784_vm13 = vmmov %vm11759_vm2  ;;  %v9687_v33 = vld [vmem:[#allocation2 + $0x30] sm:$0x3]  ;;  %v11785_v57 = vld [vmem:[#allocation61_spill] sm:$0xff] }
 0x4a5   :  { %4077 = vrot.lane.b32.xlu0 %v9239_v19, %s6997_s5  ;;  %v2922_v25 = vsel %vm11770_vm15, %v11769_v18, %v9498_v62  ;;  %vm11772_vm1 = vmmov %vm11770_vm15  ;;  %v2991_v45 = vmul.f32 %v9239_v19, %v9643_v20  ;;  %v2838_v35 = vsel %vm11775_vm6, %v11774_v47, %v11773_v9  ;;  %v2882_v48 = vsel %vm11781_vm3, %v11780_v37, %v11779_v30 }
 0x4a6   :  { %6529 = vrot.lane.b32.xlu1 %v9163_v2, %s6995_s13  ;;  %v2923_v61 = vsel %vm11772_vm1, %v9498_v62, %v11771_v56  ;;  %v2930_v2 = vadd.f32 %v2922_v25, %v2892_v16  ;;  %v2809_v60 = vadd.f32 %v2801_v13, %v2765_v12  ;;  %vm11777_vm9 = vmmov %vm11772_vm1  ;;  %v6371_v0 = vunpack.i.l.bf16 %v11782_v54  ;;  %v11786_v13 = vld [vmem:[#allocation110_spill] sm:$0xff]  ;;  %v11788_v25 = vld [vmem:[#allocation13_spill] sm:$0xff] }
 0x4a7   :  { %v9655_v26 = vpop.permute.xlu2 %3259  ;;  %v2931_v23 = vadd.f32 %v2923_v61, %v2893_v28  ;;  %vm11778_vm4 = vmmov %vm11772_vm1  ;;  %v2846_v19 = vadd.f32 %v2838_v35, %v2808_v15  ;;  %v2998_v49 = vrot.slane %v2990_v11, 1  ;;  %v2839_v46 = vsel %vm11784_vm13, %v11773_v9, %v11783_v50  ;;  %v11790_v61 = vld [vmem:[#allocation46_spill] sm:$0xff] }
 0x4a8   :  { %v9667_v44 = vpop.permute.xlu0 %3543  ;;  %v2961_v40 = vpop.permute.xlu1 %2960  ;;  %v6376_v31 = vunpack.i.l.bf16 %v11785_v57  ;;  %v2847_v22 = vadd.f32 %v2839_v46, %v2809_v60  ;;  %vm11787_vm11 = vmmov %vm11759_vm2  ;;  %vm3267_vm2 = vcmask 384000   ;;  %vm3198_vm12 = vcmask 654336   ;;  %v11851_v57 = vld [vmem:[#allocation108_spill] sm:$0xff] }
 0x4a9   :  { %v2966_v36 = vsel %vm11777_vm9, %v11776_v3, %v2961_v40  ;;  %v2967_v62 = vsel %vm11778_vm4, %v2961_v40, %v9438_v1  ;;  %v2999_v1 = vrot.slane %v2991_v45, 1  ;;  %v2883_v12 = vsel %vm11787_vm11, %v11779_v30, %v11786_v13  ;;  %v11793_v45 = vld [vmem:[#allocation64_spill] sm:$0xff]  ;;  %v9723_v30 = vld [vmem:[#allocation2 + $0x18] sm:$0x3]  ;;  %vm11801_vm4 = vmmov %vm11772_vm1 }
 0x4aa   :  { %v2974_v34 = vadd.f32 %v2966_v36, %v2930_v2  ;;  %v2975_v55 = vadd.f32 %v2967_v62, %v2931_v23  ;;  %v2890_v11 = vadd.f32 %v2882_v48, %v2846_v19  ;;  %vm11789_vm5 = vcmask 916480   ;;  %v11794_v36 = vld [vmem:[#allocation112_spill] sm:$0xff]  ;;  %v11795_v62 = vld [vmem:[#allocation57_spill] sm:$0xff] }
 0x4ab   :  { %v3036_v56 = vsel %vm11789_vm5, %v11788_v25, %v9541_v17  ;;  %vm11791_vm15 = vmmov %vm11789_vm5  ;;  %v6366_v9 = vunpack.i.l.bf16 %v11793_v45  ;;  %v2891_v47 = vadd.f32 %v2883_v12, %v2847_v22  ;;  %v11798_v48 = vld [vmem:[#allocation52_spill] sm:$0xff]  ;;  %vm3324_vm3 = vcmask 252928   ;;  %v11804_v22 = vld [vmem:[#allocation30_spill] sm:$0xff] }
 0x4ac   :  { %v2984_v16 = vadd.f32 %v2980_v7, %v2974_v34  ;;  %v2985_v28 = vadd.f32 %v2981_v43, %v2975_v55  ;;  %3885 = vrot.lane.b32.xlu2 %v9687_v33, %s6994_s22  ;;  %v3037_v2 = vsel %vm11791_vm15, %v9541_v17, %v11790_v61  ;;  %v2920_v17 = vsel %vm11772_vm1, %v11795_v62, %v11794_v36  ;;  %vm11797_vm6 = vmmov %vm11789_vm5  ;;  %v11800_v55 = vld [vmem:[#allocation104_spill] sm:$0xff]  ;;  %v11806_v12 = vld [vmem:[#allocation127_spill] sm:$0xff] }
 0x4ad   :  { %3821 = vrot.lane.b32.xlu0 %v9284_v59, %s11700_s26  ;;  %vm11799_vm9 = vmmov %vm11789_vm5  ;;  %v2921_v19 = vsel %vm11801_vm4, %v11794_v36, %v11800_v55  ;;  %vm11805_vm13 = vcmask 785408   ;;  %v11809_v25 = vld [vmem:[#allocation63_spill] sm:$0xff]  ;;  %vm11811_vm15 = vcmp.lt.s32.totalorder %v7265_v41, 15  ;;  %v11816_v36 = vld [vmem:[#allocation113_spill] sm:$0xff]  ;;  %vm11991_vm7 = vcmask 138240  }
 0x4ae   :  { %6534 = vrot.lane.b32.xlu1 %v9456_v21, %s11700_s26  ;;  %v3006_v15 = vadd.f32 %v2998_v49, %v2984_v16  ;;  %v3007_v18 = vadd.f32 %v2999_v1, %v2985_v28  ;;  %v11802_v49 = vld [vmem:[#allocation128_spill] sm:$0xff]  ;;  %v2928_v28 = vadd.f32 %v2920_v17, %v2890_v11  ;;  %vm11807_vm11 = vmmov %vm11805_vm13  ;;  %v9754_v11 = vstv %s9695_s25  ;;  %v11819_v55 = vld [vmem:[#allocation118_spill] sm:$0xff]  ;;  %s9900_s25 = sld [smem:[#allocation7 + $0x40]] }
 0x4af   :  { %v3234_v7 = vpop.permute.xlu2 %3233  ;;  %v3270_v50 = vsel %vm3267_vm2, %v6366_v9, %v11802_v49  ;;  %v11803_v1 = vld [vmem:[#allocation56_spill] sm:$0xff]  ;;  %vm11810_vm5 = vmmov %vm11772_vm1 }
 0x4b0   :  { %v9711_v23 = vsel %vm3198_vm12, %v9621_v14, %v3234_v7  ;;  %v9715_v43 = vsel %vm3198_vm12, %v3234_v7, %v9599_v10  ;;  %v9717_v40 = vpop.permute.xlu0 %3371  ;;  %v3044_v35 = vadd.f32 %v3036_v56, %v3006_v15  ;;  %v3045_v60 = vadd.f32 %v3037_v2, %v3007_v18  ;;  %v3075_v3 = vpop.permute.xlu1 %3074  ;;  %v11796_v10 = vld [vmem:[#allocation41_spill] sm:$0xff]  ;;  %v11808_v18 = vld [vmem:[#allocation120_spill] sm:$0xff]  ;;  %vm11814_vm1 = vmmov %vm11807_vm11 }
 0x4b1   :  { %11792 = vst [vmem:[#allocation121_spill] sm:$0xff] %v9717_v40  ;;  %v9727_v14 = vmul.f32 %v9723_v30, %v9643_v20  ;;  %v3080_v37 = vsel %vm11797_vm6, %v11796_v10, %v3075_v3  ;;  %v3081_v34 = vsel %vm11799_vm9, %v3075_v3, %v11798_v48  ;;  %v3119_v13 = vsel %vm11805_vm13, %v11804_v22, %v11803_v1  ;;  %vm11815_vm6 = vmmov %vm11814_vm1  ;;  %v11818_v62 = vld [vmem:[#allocation76_spill] sm:$0xff] }
 0x4b2   :  { %v3088_v46 = vadd.f32 %v3080_v37, %v3044_v35  ;;  %v3089_v16 = vadd.f32 %v3081_v34, %v3045_v60  ;;  %v3118_v7 = vsel %vm11807_vm11, %v11806_v12, %v11804_v22  ;;  %v2929_v15 = vadd.f32 %v2921_v19, %v2891_v47  ;;  %v11812_v35 = vld [vmem:[#allocation59_spill] sm:$0xff]  ;;  %v11813_v60 = vld [vmem:[#allocation122_spill] sm:$0xff]  ;;  %vm11817_vm9 = vmmov %vm11801_vm4 }
 0x4b3   :  { %v2964_v56 = vsel %vm11810_vm5, %v11809_v25, %v11808_v18  ;;  %v3278_v9 = vsel %vm11811_vm15, %v3270_v50, 0.0  ;;  %v3163_v3 = vsel %vm11814_vm1, %v11813_v60, %v11812_v35  ;;  %v3162_v47 = vsel %vm11815_vm6, %v9488_v32, %v11813_v60  ;;  %v11820_v19 = vld [vmem:[#allocation79_spill] sm:$0xff]  ;;  %vm11823_vm4 = vmmov %vm11811_vm15 }
 0x4b4   :  { %v3126_v61 = vadd.f32 %v3118_v7, %v3088_v46  ;;  %v3127_v2 = vadd.f32 %v3119_v13, %v3089_v16  ;;  %3655 = vrot.lane.b32.xlu2 %v9181_v58, %s6992_s4  ;;  %v2965_v58 = vsel %vm11817_vm9, %v11808_v18, %v11816_v36  ;;  %v3327_v17 = vsel %vm3324_vm3, %v6371_v0, %v11818_v62  ;;  %vm11830_vm15 = vmmov %vm11823_vm4 }
 0x4b5   :  { %3879 = vrot.lane.b32.xlu0 %v9333_v53, %s6994_s22  ;;  %v2972_v34 = vadd.f32 %v2964_v56, %v2928_v28  ;;  %v9776_v32 = vstv %s9701_s29  ;;  %v3271_v53 = vsel %vm3267_vm2, %v11802_v49, %v11819_v55  ;;  %v3201_v50 = vsel %vm3198_vm12, %v9579_v27, %v11820_v19  ;;  %v9807_v56 = vld [vmem:[#allocation2 + $0x8] sm:$0x3]  ;;  %s9909_s29 = sld [smem:[#allocation7 + $0x41]] }
 0x4b6   :  { %v3170_v10 = vadd.f32 %v3162_v47, %v3126_v61  ;;  %v3171_v37 = vadd.f32 %v3163_v3, %v3127_v2  ;;  %3594 = vrot.lane.b32.xlu1 %v9284_v59, %s6993_s21  ;;  %v3294_v0 = vmul.f32 %v9754_v11, %v3278_v9  ;;  %v11822_v59 = vld [vmem:[#allocation62_spill] sm:$0xff]  ;;  %v9795_v22 = vstv %s9729_s3  ;;  %s9805_s21 = sld [smem:[#allocation7 + $0x24]]  ;;  %s6999_s3 = smov 125  }
 0x4b7   :  { %v9773_v48 = vpop.permute.xlu2 %6509  ;;  %v3202_v16 = vsel %vm3198_vm12, %v11820_v19, %v11822_v59  ;;  %v3335_v49 = vsel %vm11823_vm4, %v3327_v17, 0.0  ;;  %v3245_v27 = vsel %vm3198_vm12, %v9569_v63, %v9529_v51  ;;  %v2978_v12 = vmul.f32 %v9723_v30, %v9641_v4 }
 0x4b8   :  { %v9784_v46 = vpop.permute.xlu0 %3659  ;;  %v3209_v28 = vadd.f32 %v3201_v50, %v3170_v10  ;;  %v9792_v1 = vpop.permute.xlu1 %3152  ;;  %v3210_v13 = vadd.f32 %v3202_v16, %v3171_v37  ;;  %v2973_v7 = vadd.f32 %v2965_v58, %v2929_v15  ;;  %v3284_v18 = vmul.f32 %v9776_v32, %v3278_v9  ;;  %v11825_v9 = vld [vmem:[#allocation67_spill] sm:$0xff]  ;;  %v9825_v58 = vld [vmem:[#allocation2 + $0x10] sm:$0x3] }
 0x4b9   :  { %11821 = vst [vmem:[#allocation38_spill] sm:$0xff] %v9784_v46  ;;  %v2979_v61 = vmul.f32 %v9807_v56, %v9641_v4  ;;  %v2989_v2 = vmul.f32 %v9807_v56, %v9643_v20  ;;  %vm11824_vm13 = vcmp.lt.s32.totalorder %v7155_v29, 15  ;;  %v9816_v35 = vstv %s9740_s0  ;;  %v11827_v37 = vld [vmem:[#allocation28_spill] sm:$0xff]  ;;  %s10037_s0 = sld [smem:[#allocation7 + $0xb]] }
 0x4ba   :  { %v3253_v25 = vadd.f32 %v3245_v27, %v3209_v28  ;;  %v3279_v63 = vsel %vm11824_vm13, %v3271_v53, 0.0  ;;  %v3302_v60 = vrot.slane %v3294_v0, 1  ;;  %v3351_v15 = vmul.f32 %v9795_v22, %v3335_v49  ;;  %v11831_v27 = vld [vmem:[#allocation72_spill] sm:$0xff]  ;;  %vm11833_vm1 = vmmov %vm11824_vm13 }
 0x4bb   :  { %v3246_v3 = vsel %vm3198_vm12, %v9529_v51, %v11825_v9  ;;  %v2982_v4 = vadd.f32 %v2978_v12, %v2972_v34  ;;  %v2996_v36 = vrot.slane %v9727_v14, 1  ;;  %v2983_v17 = vadd.f32 %v2979_v61, %v2973_v7  ;;  %v6898_v7 = vld [vmem:[#allocation2 + $0x38] sm:$0x3] }
 0x4bc   :  { %v3288_v47 = vadd.f32 %v3284_v18, %v3253_v25  ;;  %6544 = vrot.lane.b32.xlu2 %v9456_v21, %s11826_s17  ;;  %v3254_v20 = vadd.f32 %v3246_v3, %v3210_v13  ;;  %v3341_v10 = vmul.f32 %v9816_v35, %v3335_v49  ;;  %vm11828_vm11 = vcmask 121856   ;;  %v6899_v18 = vld [vmem:[#allocation2 + $0x28] sm:$0x3] }
 0x4bd   :  { %4189 = vrot.lane.b32.xlu0 %v9825_v58, %s6998_s28  ;;  %v3383_v51 = vsel %vm11828_vm11, %v6376_v31, %v11827_v37  ;;  %v2997_v34 = vrot.slane %v2989_v2, 1  ;;  %v3285_v53 = vmul.f32 %v9776_v32, %v3279_v63  ;;  %v3295_v19 = vmul.f32 %v9754_v11, %v3279_v63 }
 0x4be   :  { %v3310_v55 = vadd.f32 %v3302_v60, %v3288_v47  ;;  %3653 = vrot.lane.b32.xlu1 %v9723_v30, %s6992_s4  ;;  %vm3663_vm5 = vcmask 375808   ;;  %v3359_v0 = vrot.slane %v3351_v15, 1  ;;  %v9843_v59 = vstv %s9787_s1  ;;  %s9858_s4 = sld [smem:[#allocation7 + $0x32]]  ;;  %v9867_v47 = vld [vmem:[#allocation2 + $0x10] sm:$0x3] }
 0x4bf   :  { %v9836_v14 = vpop.permute.xlu2 %3316  ;;  %v3391_v49 = vsel %vm11830_vm15, %v3383_v51, 0.0  ;;  %v3328_v13 = vsel %vm3324_vm3, %v11818_v62, %v11831_v27  ;;  %v3289_v12 = vadd.f32 %v3285_v53, %v3254_v20  ;;  %v9853_v25 = vpack.i.bf16 %v6899_v18, %v6898_v7  ;;  %v11843_v27 = vld [vmem:[#allocation73_spill] sm:$0xff]  ;;  %s10041_s1 = sld [smem:[#allocation7 + $0x5c]] }
 0x4c0   :  { %v9840_v50 = vpop.permute.xlu0 %6519  ;;  %v3345_v31 = vadd.f32 %v3341_v10, %v3310_v55  ;;  %v3149_v28 = vpop.permute.xlu1 %3148  ;;  %v3004_v61 = vadd.f32 %v2996_v36, %v2982_v4  ;;  %v3005_v2 = vadd.f32 %v2997_v34, %v2983_v17  ;;  %v9856_v63 = vstv %s9805_s21  ;;  %v11834_v4 = vld [vmem:[#allocation114_spill] sm:$0xff]  ;;  %v11835_v36 = vld [vmem:[#allocation105_spill] sm:$0xff]  ;;  %v11837_v17 = vld [vmem:[#allocation43_spill] sm:$0xff]  ;;  %s10048_s21 = sld [smem:[#allocation7 + $0x5d]] }
 0x4c1   :  { %11829 = vst [vmem:[#allocation132_spill] sm:$0xff] %v9840_v50  ;;  %v6521_v16 = vunpack.i.l.bf16 %v9840_v50  ;;  %v3303_v15 = vrot.slane %v3295_v19, 1  ;;  %v3407_v3 = vmul.f32 %v9843_v59, %v3391_v49  ;;  %v3336_v62 = vsel %vm11833_vm1, %v3328_v13, 0.0  ;;  %v11839_v19 = vld [vmem:[#allocation35_spill] sm:$0xff] }
 0x4c2   :  { %v3367_v9 = vadd.f32 %v3359_v0, %v3345_v31  ;;  %vm11836_vm6 = vcmask 916480   ;;  %v3397_v51 = vmul.f32 %v9856_v63, %v3391_v49  ;;  %v11840_v0 = vld [vmem:[#allocation111_spill] sm:$0xff]  ;;  %vm11844_vm13 = vcmask 1039360   ;;  %v11845_v49 = vld [vmem:[#allocation49_spill] sm:$0xff] }
 0x4c3   :  { %v9862_v60 = vsel %vm3663_vm5, %v6521_v16, %v9784_v46  ;;  %v3034_v20 = vsel %vm11836_vm6, %v11835_v36, %v11834_v4  ;;  %vm11838_vm9 = vmmov %vm11836_vm6  ;;  %v3311_v55 = vadd.f32 %v3303_v15, %v3289_v12  ;;  %v11842_v16 = vld [vmem:[#allocation119_spill] sm:$0xff]  ;;  %v3342_v18 = vmul.f32 %v9816_v35, %v3336_v62 }
 0x4c4   :  { %11832 = vst [vmem:[#allocation78_spill] sm:$0xff] %v9862_v60  ;;  %3940 = vrot.lane.b32.xlu2 %v9867_v47, %s11826_s17  ;;  %v3035_v10 = vsel %vm11838_vm9, %v11834_v4, %v11837_v17  ;;  %v3042_v34 = vadd.f32 %v3034_v20, %v3004_v61  ;;  %vm11841_vm4 = vmmov %vm11836_vm6  ;;  %v3439_v13 = vsel %vm11844_vm13, %v11843_v27, %v11842_v16  ;;  %v3415_v4 = vrot.slane %v3407_v3, 1  ;;  %v11849_v3 = vld [vmem:[#allocation66_spill] sm:$0xff]  ;;  %v11850_v46 = vld [vmem:[#allocation115_spill] sm:$0xff] }
 0x4c5   :  { %6564 = vrot.lane.b32.xlu0 %v9853_v25, %s6998_s28  ;;  %v3043_v53 = vadd.f32 %v3035_v10, %v3005_v2  ;;  %v3078_v31 = vsel %vm11841_vm4, %v11840_v0, %v11839_v19  ;;  %vm11846_vm11 = vmmov %vm11841_vm4  ;;  %v3352_v61 = vmul.f32 %v9795_v22, %v3336_v62  ;;  %v3401_v15 = vadd.f32 %v3397_v51, %v3367_v9  ;;  %v11847_v10 = vld [vmem:[#allocation129_spill] sm:$0xff] }
 0x4c6   :  { %3942 = vrot.lane.b32.xlu1 %v9687_v33, %s11826_s17  ;;  %v3079_v12 = vsel %vm11846_vm11, %v11839_v19, %v11845_v49  ;;  %v9898_v36 = vstv %s9845_s20  ;;  %v3447_v17 = vsel %vm11830_vm15, %v3439_v13, 0.0  ;;  %vm11848_vm1 = vcmask 121856   ;;  %v11853_v13 = vld [vmem:[#allocation55_spill] sm:$0xff]  ;;  %s7000_s20 = smov 29  }
 0x4c7   :  { %v9888_v7 = vpop.permute.xlu2 %6514  ;;  %v3384_v19 = vsel %vm11848_vm1, %v11827_v37, %v11847_v10  ;;  %v3346_v62 = vadd.f32 %v3342_v18, %v3311_v55  ;;  %v3086_v0 = vadd.f32 %v3078_v31, %v3042_v34  ;;  %v3087_v27 = vadd.f32 %v3079_v12, %v3043_v53 }
 0x4c8   :  { %v9895_v2 = vpop.permute.xlu0 %3718  ;;  %v9902_v20 = vpop.permute.xlu1 %3257  ;;  %v9912_v9 = vstv %s9858_s4  ;;  %v6381_v51 = vunpack.i.l.bf16 %v11849_v3  ;;  %v3360_v49 = vrot.slane %v3352_v61, 1  ;;  %v3423_v50 = vadd.f32 %v3415_v4, %v3401_v15  ;;  %s7001_s4 = smov 93  }
 0x4c9   :  { %vm11852_vm6 = vcmask 785408   ;;  %v3463_v37 = vmul.f32 %v9898_v36, %v3447_v17  ;;  %vm11855_vm4 = vcmp.lt.s32.totalorder %v7155_v29, 15  ;;  %v3453_v53 = vmul.f32 %v9912_v9, %v3447_v17 }
 0x4ca   :  { %v3116_v40 = vsel %vm11852_vm6, %v11851_v57, %v11850_v46  ;;  %vm11854_vm9 = vmmov %vm11852_vm6  ;;  %v3392_v55 = vsel %vm11855_vm4, %v3384_v19, 0.0  ;;  %v3440_v34 = vsel %vm11844_vm13, %v11842_v16, %v6381_v51  ;;  %vm11857_vm15 = vcmask 908288  }
 0x4cb   :  { %v3117_v60 = vsel %vm11854_vm9, %v11850_v46, %v11853_v13  ;;  %vm11856_vm11 = vmmov %vm11852_vm6  ;;  %v3368_v46 = vadd.f32 %v3360_v49, %v3346_v62  ;;  %v3124_v12 = vadd.f32 %v3116_v40, %v3086_v0  ;;  %v3398_v16 = vmul.f32 %v9856_v63, %v3392_v55 }
 0x4cc   :  { %3766 = vrot.lane.b32.xlu2 %v9723_v30, %s6995_s13  ;;  %v3160_v57 = vsel %vm11856_vm11, %v3149_v28, %v9442_v24  ;;  %v3125_v31 = vadd.f32 %v3117_v60, %v3087_v27  ;;  %v3408_v61 = vmul.f32 %v9843_v59, %v3392_v55  ;;  %v3495_v28 = vsel %vm11857_vm15, %v9577_v6, %v9595_v8  ;;  %s9944_s13 = sld [smem:[#allocation7 + $0x4e]]  ;;  %vm11858_vm1 = vmmov %vm11855_vm4 }
 0x4cd   :  { %6569 = vrot.lane.b32.xlu0 %v9456_v21, %s6999_s3  ;;  %v3457_v60 = vadd.f32 %v3453_v53, %v3423_v50  ;;  %v3448_v40 = vsel %vm11858_vm1, %v3440_v34, 0.0  ;;  %v3471_v4 = vrot.slane %v3463_v37, 1  ;;  %v9949_v17 = vstv %s9900_s25  ;;  %vm11860_vm13 = vmmov %vm11857_vm15  ;;  %s10066_s25 = sld [smem:[#allocation7 + $0xa]] }
 0x4ce   :  { %3712 = vrot.lane.b32.xlu1 %v9807_v56, %s11668_s24  ;;  %v3168_v10 = vadd.f32 %v3160_v57, %v3124_v12  ;;  %s9951_s24 = sld [smem:[#allocation7 + $0x4f]]  ;;  %v9954_v62 = vstv %s9909_s29  ;;  %v3161_v6 = vsel %vm11852_vm6, %v9442_v24, %v9792_v1  ;;  %v3402_v50 = vadd.f32 %v3398_v16, %v3368_v46  ;;  %v9975_v12 = vld [vmem:[#allocation2 + $0x18] sm:$0x3]  ;;  %vm11864_vm15 = vmmov %vm11858_vm1 }
 0x4cf   :  { %v9935_v18 = vpop.permute.xlu2 %3600  ;;  %v6506_v27 = vunpack.i.l.bf16 %v9496_v42  ;;  %vm11859_vm9 = vcmp.lt.s32.totalorder %v7265_v41, 15  ;;  %v6367_v13 = vunpack.i.h.bf16 %v11793_v45  ;;  %v3454_v37 = vmul.f32 %v9912_v9, %v3448_v40  ;;  %vm11866_vm6 = vmmov %vm11864_vm15  ;;  %s10084_s29 = sld [smem:[#allocation7 + $0x19]] }
 0x4d0   :  { %v9942_v15 = vpop.permute.xlu0 %3481  ;;  %v3187_v19 = vpop.permute.xlu1 %3186  ;;  %v3503_v51 = vsel %vm11859_vm9, %v3495_v28, 0.0  ;;  %v3416_v55 = vrot.slane %v3408_v61, 1  ;;  %v3479_v34 = vadd.f32 %v3471_v4, %v3457_v60  ;;  %v6512_v53 = vunpack.i.h.bf16 %v9773_v48 }
 0x4d1   :  { %v3199_v0 = vsel %vm3198_vm12, %v3187_v19, %v9619_v5  ;;  %v3169_v57 = vadd.f32 %v3161_v6, %v3125_v31  ;;  %v3269_v24 = vsel %vm3267_vm2, %v9902_v20, %v9655_v26  ;;  %v3509_v46 = vmul.f32 %v9949_v17, %v3503_v51 }
 0x4d2   :  { %v3207_v49 = vadd.f32 %v3199_v0, %v3168_v10  ;;  %v3519_v45 = vmul.f32 %v9954_v62, %v3503_v51  ;;  %vm3549_vm4 = vcmask 777216   ;;  %v3424_v31 = vadd.f32 %v3416_v55, %v3402_v50 }
 0x4d3   :  { %v3464_v26 = vmul.f32 %v9898_v36, %v3448_v40  ;;  %v6511_v16 = vunpack.i.l.bf16 %v9773_v48  ;;  %v3268_v61 = vsel %vm3267_vm2, %v6367_v13, %v9902_v20  ;;  %v3200_v60 = vsel %vm3198_vm12, %v9619_v5, %v9535_v38  ;;  %vm11863_vm12 = vmmov %vm11859_vm9 }
 0x4d4   :  { %v3251_v1 = vadd.f32 %v9711_v23, %v3207_v49  ;;  %4075 = vrot.lane.b32.xlu2 %v9825_v58, %s6997_s5  ;;  %v3496_v23 = vsel %vm11860_vm13, %v9595_v8, %v6506_v27  ;;  %vm11861_vm11 = vcmp.lt.s32.totalorder %v7263_v39, 15  ;;  %v9995_v4 = vstv %s9944_s13  ;;  %s7003_s13 = smov 109  }
 0x4d5   :  { %3990 = vrot.lane.b32.xlu0 %v9975_v12, %s6996_s23  ;;  %v3277_v40 = vsel %vm11861_vm11, %v3269_v24, 0.0  ;;  %v3513_v48 = vadd.f32 %v3509_v46, %v3479_v34  ;;  %v3208_v10 = vadd.f32 %v3200_v60, %v3169_v57  ;;  %v10000_v19 = vstv %s9951_s24  ;;  %vm11868_vm13 = vmmov %vm11861_vm11  ;;  %s5848_s24 = sld [smem:[#allocation7 + $0x26]] }
 0x4d6   :  { %6549 = vrot.lane.b32.xlu1 %v9456_v21, %s6996_s23  ;;  %v3527_v6 = vrot.slane %v3519_v45, 1  ;;  %vm11862_vm2 = vcmp.lt.s32.totalorder %v11548_v52, 15  ;;  %v3458_v5 = vadd.f32 %v3454_v37, %v3424_v31  ;;  %v3283_v50 = vmul.f32 %v9776_v32, %v3277_v40 }
 0x4d7   :  { %v9987_v28 = vpop.permute.xlu2 %3427  ;;  %v3276_v38 = vsel %vm11862_vm2, %v3268_v61, 0.0  ;;  %v3293_v27 = vmul.f32 %v9754_v11, %v3277_v40  ;;  %v3504_v37 = vsel %vm11864_vm15, %v3496_v23, 0.0  ;;  %vm11865_vm1 = vcmask 244736   ;;  %vm11867_vm9 = vmmov %vm11862_vm2 }
 0x4d8   :  { %v9997_v8 = vpop.permute.xlu0 %3539  ;;  %v3546_v20 = vpop.permute.xlu1 %3545  ;;  %v3535_v13 = vadd.f32 %v3527_v6, %v3513_v48  ;;  %v3282_v57 = vmul.f32 %v9776_v32, %v3276_v38  ;;  %v3292_v24 = vmul.f32 %v9754_v11, %v3276_v38  ;;  %v3510_v40 = vmul.f32 %v9949_v17, %v3504_v37 }
 0x4d9   :  { %v10004_v21 = vsel %vm3549_vm4, %v9997_v8, %v6512_v53  ;;  %v3552_v0 = vsel %vm3549_vm4, %v9667_v44, %v3546_v20  ;;  %v3553_v51 = vsel %vm3549_vm4, %v3546_v20, %v6511_v16  ;;  %v3472_v53 = vrot.slane %v3464_v26, 1 }
 0x4da   :  { %v3560_v49 = vsel %vm11863_vm12, %v3552_v0, 0.0  ;;  %v3252_v44 = vadd.f32 %v9715_v43, %v3208_v10  ;;  %v3301_v16 = vrot.slane %v3293_v27, 1  ;;  %v6372_v43 = vunpack.i.h.bf16 %v11782_v54  ;;  %vm11872_vm12 = vmmov %vm11865_vm1 }
 0x4db   :  { %v3566_v55 = vmul.f32 %v9995_v4, %v3560_v49  ;;  %v3576_v34 = vmul.f32 %v10000_v19, %v3560_v49  ;;  %v3480_v26 = vadd.f32 %v3472_v53, %v3458_v5  ;;  %v3286_v61 = vadd.f32 %v3282_v57, %v3251_v1  ;;  %v10060_v53 = vld [vmem:[#allocation2 + $0x30] sm:$0x3] }
 0x4dc   :  { %6554 = vrot.lane.b32.xlu2 %v9853_v25, %s6997_s5  ;;  %v3287_v31 = vadd.f32 %v3283_v50, %v3252_v44  ;;  %v3520_v48 = vmul.f32 %v9954_v62, %v3504_v37  ;;  %v3300_v20 = vrot.slane %v3292_v24, 1  ;;  %v3561_v54 = vsel %vm11866_vm6, %v3553_v51, 0.0 }
 0x4dd   :  { %v3570_v46 = vadd.f32 %v3566_v55, %v3535_v13  ;;  %v3584_v45 = vrot.slane %v3576_v34, 1  ;;  %4069 = vrot.lane.b32.xlu0 %v9723_v30, %s6997_s5  ;;  %v3514_v6 = vadd.f32 %v3510_v40, %v3480_v26  ;;  %v3577_v55 = vmul.f32 %v10000_v19, %v3561_v54 }
 0x4de   :  { %3996 = vrot.lane.b32.xlu1 %v9867_v47, %s6996_s23  ;;  %v3309_v38 = vadd.f32 %v3301_v16, %v3287_v31  ;;  %v3308_v50 = vadd.f32 %v3300_v20, %v3286_v61  ;;  %v3528_v13 = vrot.slane %v3520_v48, 1  ;;  %vm11870_vm11 = vcmp.lt.s32.totalorder %v7265_v41, 14 }
 0x4df   :  { %v3717_v23 = vpop.permute.xlu2 %3716  ;;  %v10029_v60 = vadd.f32 %v3584_v45, %v3570_v46  ;;  %v10069_v46 = vld [vmem:[#allocation2 + $0x8] sm:$0x3]  ;;  %v10082_v40 = vstv %s10037_s0  ;;  %vm11871_vm2 = vcmask 1031168   ;;  %vm11873_vm15 = vcmp.lt.s32.totalorder %v7265_v41, 15  ;;  %s5849_s0 = sld [smem:[#allocation7 + $0x27]] }
 0x4e0   :  { %v10033_v11 = vsel %vm11865_vm1, %v3717_v23, %v9895_v2  ;;  %v10035_v32 = vpop.permute.xlu0 %3829  ;;  %v3315_v10 = vpop.permute.xlu1 %3314  ;;  %v3536_v24 = vadd.f32 %v3528_v13, %v3514_v6  ;;  %v10092_v6 = vstv %s10041_s1  ;;  %vm11874_vm1 = vmmov %vm11866_vm6  ;;  %vm11875_vm6 = vcmask 1039360   ;;  %s5853_s1 = sld [smem:[#allocation7 + $0x43]] }
 0x4e1   :  { %v3325_v1 = vsel %vm3324_vm3, %v6372_v43, %v3315_v10  ;;  %v3326_v2 = vsel %vm3324_vm3, %v3315_v10, %v9836_v14  ;;  %v3567_v14 = vmul.f32 %v9995_v4, %v3561_v54  ;;  %vm3606_vm3 = vcmask 646144   ;;  %v11869_v43 = vld [vmem:[#allocation78_spill] sm:$0xff] }
 0x4e2   :  { %v3333_v5 = vsel %vm11867_vm9, %v3325_v1, 0.0  ;;  %v3334_v0 = vsel %vm11868_vm13, %v3326_v2, 0.0  ;;  %v3674_v61 = vsel %vm11870_vm11, %v11869_v43, 0.0  ;;  %v3585_v10 = vrot.slane %v3577_v55, 1  ;;  %vm11876_vm9 = vmmov %vm11870_vm11 }
 0x4e3   :  { %v3339_v27 = vmul.f32 %v9816_v35, %v3333_v5  ;;  %v3340_v51 = vmul.f32 %v9816_v35, %v3334_v0  ;;  %v3349_v49 = vmul.f32 %v9795_v22, %v3333_v5  ;;  %v3350_v34 = vmul.f32 %v9795_v22, %v3334_v0 }
 0x4e4   :  { %4134 = vrot.lane.b32.xlu2 %v10060_v53, %s7000_s20  ;;  %v6516_v35 = vunpack.i.l.bf16 %v9888_v7  ;;  %v3571_v48 = vadd.f32 %v3567_v14, %v3536_v24  ;;  %v10117_v55 = vstv %s10066_s25  ;;  %vm11878_vm11 = vcmask 121856   ;;  %s5858_s25 = sld [smem:[#allocation7 + $0xc]] }
 0x4e5   :  { %v3343_v37 = vadd.f32 %v3339_v27, %v3308_v50  ;;  %v3344_v44 = vadd.f32 %v3340_v51, %v3309_v38  ;;  %v3357_v57 = vrot.slane %v3349_v49, 1  ;;  %4360 = vrot.lane.b32.xlu0 %v9687_v33, %s7001_s4  ;;  %v3358_v22 = vrot.slane %v3350_v34, 1 }
 0x4e6   :  { %3823 = vrot.lane.b32.xlu1 %v10069_v46, %s11700_s26  ;;  %v10095_v38 = vstv %s10048_s21  ;;  %v6382_v50 = vunpack.i.h.bf16 %v11849_v3  ;;  %s10101_s26 = sld [smem:[#allocation7 + $0x18]]  ;;  %v3690_v51 = vmul.f32 %v10082_v40, %v3674_v61  ;;  %v3593_v49 = vadd.f32 %v3585_v10, %v3571_v48 }
 0x4e7   :  { %v10073_v45 = vpop.permute.xlu2 %6524  ;;  %v10075_v31 = vadd.f32 %v3357_v57, %v3343_v37  ;;  %v3366_v20 = vadd.f32 %v3358_v22, %v3344_v44  ;;  %s5852_s21 = sld [smem:[#allocation7 + $0x42]] }
 0x4e8   :  { %v6526_v16 = vunpack.i.l.bf16 %v10073_v45  ;;  %v3828_v26 = vpop.permute.xlu0 %3827  ;;  %v3603_v1 = vpop.permute.xlu1 %3602  ;;  %v3438_v34 = vsel %vm11875_vm6, %v9987_v28, %v6382_v50  ;;  %v3698_v10 = vrot.slane %v3690_v51, 1  ;;  %v6904_v50 = vld [vmem:[#allocation2 + $0x20] sm:$0x3] }
 0x4e9   :  { %v10088_v54 = vsel %vm11871_vm2, %v3828_v26, %v10035_v32  ;;  %v3609_v5 = vsel %vm3606_vm3, %v9935_v18, %v3603_v1  ;;  %v3610_v0 = vsel %vm3606_vm3, %v3603_v1, %v6516_v35  ;;  %v10131_v26 = vstv %s10084_s29  ;;  %vm11879_vm2 = vmmov %vm11868_vm13  ;;  %s5863_s29 = sld [smem:[#allocation7 + $0x29]] }
 0x4ea   :  { %v3722_v2 = vsel %vm11872_vm12, %v6526_v16, %v3717_v23  ;;  %v3617_v27 = vsel %vm11873_vm15, %v3609_v5, 0.0  ;;  %v3618_v23 = vsel %vm11874_vm1, %v3610_v0, 0.0  ;;  %v3446_v1 = vsel %vm11868_vm13, %v3438_v34, 0.0  ;;  %v11877_v5 = vld [vmem:[#allocation121_spill] sm:$0xff]  ;;  %vm11881_vm12 = vmmov %vm11878_vm11 }
 0x4eb   :  { %v3623_v13 = vmul.f32 %v10092_v6, %v3617_v27  ;;  %v3624_v18 = vmul.f32 %v10092_v6, %v3618_v23  ;;  %v3633_v14 = vmul.f32 %v10095_v38, %v3617_v27  ;;  %v3634_v3 = vmul.f32 %v10095_v38, %v3618_v23 }
 0x4ec   :  { %3877 = vrot.lane.b32.xlu2 %v9975_v12, %s6994_s22  ;;  %v3730_v24 = vsel %vm11876_vm9, %v3722_v2, 0.0  ;;  %v6905_v2 = vld [vmem:[#allocation2] sm:$0x3]  ;;  %v3462_v34 = vmul.f32 %v9898_v36, %v3446_v1  ;;  %s7002_s22 = smov 77   ;;  %vm11883_vm15 = vcmp.lt.s32.totalorder %v7155_v29, 14  ;;  %vm3889_vm13 = vcmask 900096  }
 0x4ed   :  { %4128 = vrot.lane.b32.xlu0 %v9807_v56, %s7000_s20  ;;  %v3627_v37 = vadd.f32 %v3623_v13, %v10029_v60  ;;  %v3628_v44 = vadd.f32 %v3624_v18, %v3593_v49  ;;  %v3641_v57 = vrot.slane %v3633_v14, 1  ;;  %v3642_v22 = vrot.slane %v3634_v3, 1  ;;  %vm11884_vm1 = vmmov %vm11883_vm15 }
 0x4ee   :  { %4132 = vrot.lane.b32.xlu1 %v9825_v58, %s7000_s20  ;;  %v3680_v60 = vmul.f32 %v10117_v55, %v3674_v61  ;;  %v10138_v27 = vpack.i.bf16 %v6905_v2, %v6904_v50  ;;  %v3746_v23 = vmul.f32 %v10131_v26, %v3730_v24  ;;  %v10144_v18 = vstv %s10101_s26  ;;  %s5860_s26 = sld [smem:[#allocation7 + $0x1a]] }
 0x4ef   :  { %v10124_v35 = vpop.permute.xlu2 %3774  ;;  %v3649_v43 = vadd.f32 %v3641_v57, %v3627_v37  ;;  %v3650_v58 = vadd.f32 %v3642_v22, %v3628_v44  ;;  %v3736_v14 = vmul.f32 %v10144_v18, %v3730_v24  ;;  %v11880_v57 = vld [vmem:[#allocation61_spill] sm:$0xff] }
 0x4f0   :  { %v10128_v16 = vpop.permute.xlu0 %6539  ;;  %v3374_v48 = vpop.permute.xlu1 %3373  ;;  %v6377_v22 = vunpack.i.h.bf16 %v11880_v57 }
 0x4f1   :  { %v3382_v0 = vsel %vm11878_vm11, %v11877_v5, %v3374_v48  ;;  %v3684_v13 = vadd.f32 %v3680_v60, %v3649_v43  ;;  %v3754_v43 = vrot.slane %v3746_v23, 1  ;;  %v3452_v60 = vmul.f32 %v9912_v9, %v3446_v1  ;;  %vm11887_vm11 = vmmov %vm11879_vm2 }
 0x4f2   :  { %v3390_v49 = vsel %vm11879_vm2, %v3382_v0, 0.0  ;;  %v3381_v50 = vsel %vm11881_vm12, %v6377_v22, %v11877_v5  ;;  %v3731_v1 = vsel %vm11883_vm15, %v10033_v11, 0.0  ;;  %vm11889_vm12 = vcmask 908288  }
 0x4f3   :  { %v3396_v61 = vmul.f32 %v9856_v63, %v3390_v49  ;;  %v3406_v51 = vmul.f32 %v9843_v59, %v3390_v49  ;;  %v3706_v3 = vadd.f32 %v3698_v10, %v3684_v13  ;;  %v3470_v13 = vrot.slane %v3462_v34, 1  ;;  %vm11890_vm15 = vmmov %vm11889_vm12 }
 0x4f4   :  { %3936 = vrot.lane.b32.xlu2 %v10069_v46, %s11826_s17  ;;  %v6517_v34 = vunpack.i.h.bf16 %v9888_v7 }
 0x4f5   :  { %v3400_v37 = vadd.f32 %v3396_v61, %v3366_v20  ;;  %v3414_v44 = vrot.slane %v3406_v51, 1  ;;  %6584 = vrot.lane.b32.xlu0 %v10138_v27, %s7002_s22  ;;  %v3740_v24 = vadd.f32 %v3736_v14, %v3706_v3  ;;  %v11882_v61 = vld [vmem:[#allocation38_spill] sm:$0xff] }
 0x4f6   :  { %6559 = vrot.lane.b32.xlu1 %v9853_v25, %s7000_s20 }
 0x4f7   :  { %v3538_v48 = vpop.permute.xlu2 %3537  ;;  %v3422_v0 = vadd.f32 %v3414_v44, %v3400_v37  ;;  %v10162_v49 = vadd.f32 %v3754_v43, %v3740_v24  ;;  %v3747_v37 = vmul.f32 %v10131_v26, %v3731_v1 }
 0x4f8   :  { %v3550_v10 = vsel %vm3549_vm4, %v3538_v48, %v9997_v8  ;;  %v3884_v20 = vpop.permute.xlu0 %3883  ;;  %v3662_v2 = vpop.permute.xlu1 %3661  ;;  %vm11885_vm4 = vcmp.lt.s32.totalorder %v11548_v52, 15  ;;  %v3737_v48 = vmul.f32 %v10144_v18, %v3731_v1 }
 0x4f9   :  { %v3456_v23 = vadd.f32 %v3452_v60, %v3422_v0  ;;  %v3667_v25 = vsel %vm3663_vm5, %v11882_v61, %v3662_v2  ;;  %v3389_v8 = vsel %vm11885_vm4, %v3381_v50, 0.0  ;;  %v3755_v50 = vrot.slane %v3747_v37, 1  ;;  %vm11886_vm9 = vmmov %vm11885_vm4 }
 0x4fa   :  { %v3675_v51 = vsel %vm11884_vm1, %v3667_v25, 0.0  ;;  %v3395_v57 = vmul.f32 %v9856_v63, %v3389_v8  ;;  %v3405_v22 = vmul.f32 %v9843_v59, %v3389_v8  ;;  %v3559_v37 = vsel %vm11887_vm11, %v10004_v21, 0.0  ;;  %vm11888_vm2 = vmmov %vm11885_vm4 }
 0x4fb   :  { %v3681_v5 = vmul.f32 %v10117_v55, %v3675_v51  ;;  %v3691_v14 = vmul.f32 %v10082_v40, %v3675_v51  ;;  %v3478_v3 = vadd.f32 %v3470_v13, %v3456_v23  ;;  %vm11891_vm1 = vmmov %vm11888_vm2 }
 0x4fc   :  { %4246 = vrot.lane.b32.xlu2 %v9687_v33, %s6999_s3  ;;  %v3399_v60 = vadd.f32 %v3395_v57, %v10075_v31  ;;  %v3413_v2 = vrot.slane %v3405_v22, 1  ;;  %vm11892_vm4 = vmmov %vm11887_vm11  ;;  %vm11894_vm11 = vcmp.lt.s32.totalorder %v7155_v29, 14 }
 0x4fd   :  { %v3685_v44 = vadd.f32 %v3681_v5, %v3650_v58  ;;  %v3699_v11 = vrot.slane %v3691_v14, 1  ;;  %4415 = vrot.lane.b32.xlu0 %v9867_v47, %s7002_s22  ;;  %v6507_v5 = vunpack.i.h.bf16 %v9496_v42 }
 0x4fe   :  { %4191 = vrot.lane.b32.xlu1 %v10060_v53, %s6998_s28  ;;  %v6541_v53 = vunpack.i.l.bf16 %v10128_v16  ;;  %v3421_v61 = vadd.f32 %v3413_v2, %v3399_v60 }
 0x4ff   :  { %v10185_v43 = vpop.permute.xlu2 %3596  ;;  %v3707_v24 = vadd.f32 %v3699_v11, %v3685_v44  ;;  %v3558_v44 = vsel %vm11888_vm2, %v3550_v10, 0.0  ;;  %vm11895_vm2 = vcmp.lt.s32.totalorder %v7265_v41, 14 }
 0x500   :  { %v3608_v7 = vsel %vm3606_vm3, %v10185_v43, %v6517_v34  ;;  %v10190_v58 = vpop.permute.xlu0 %3710  ;;  %v3426_v0 = vpop.permute.xlu1 %3425  ;;  %v3574_v10 = vmul.f32 %v10000_v19, %v3558_v44 }
 0x501   :  { %v3741_v63 = vadd.f32 %v3737_v48, %v3707_v24  ;;  %v3437_v59 = vsel %vm11875_vm6, %v3426_v0, %v9987_v28  ;;  %vm3776_vm6 = vcmask 113664  }
 0x502   :  { %v3445_v13 = vsel %vm11886_vm9, %v3437_v59, 0.0  ;;  %vm11893_vm9 = vmmov %vm11892_vm4 }
 0x503   :  { %v10198_v23 = vadd.f32 %v3755_v50, %v3741_v63  ;;  %v3451_v25 = vmul.f32 %v9912_v9, %v3445_v13  ;;  %v3461_v1 = vmul.f32 %v9898_v36, %v3445_v13  ;;  %v3616_v2 = vsel %vm11893_vm9, %v3608_v7, 0.0 }
 0x504   :  { %4244 = vrot.lane.b32.xlu2 %v9867_v47, %s6999_s3 }
 0x505   :  { %4297 = vrot.lane.b32.xlu0 %v10069_v46, %s7003_s13  ;;  %v3455_v28 = vadd.f32 %v3451_v25, %v3421_v61  ;;  %v3469_v31 = vrot.slane %v3461_v1, 1  ;;  %v10251_v61 = vstv %s5849_s0  ;;  %s5864_s0 = sld [smem:[#allocation7 + $0x36]] }
 0x506   :  { %3934 = vrot.lane.b32.xlu1 %v9975_v12, %s11826_s17  ;;  %s5850_s17 = sld [smem:[#allocation7 + $0x34]] }
 0x507   :  { %v3886_v51 = vpop.permute.xlu2 %3885  ;;  %v3477_v14 = vadd.f32 %v3469_v31, %v3455_v28  ;;  %v3582_v28 = vrot.slane %v3574_v10, 1 }
 0x508   :  { %v10209_v8 = vsel %vm3889_vm13, %v3884_v20, %v3886_v51  ;;  %v10212_v9 = vsel %vm3889_vm13, %v3886_v51, %v6541_v53  ;;  %v10214_v36 = vpop.permute.xlu0 %3998  ;;  %v3484_v34 = vpop.permute.xlu1 %3483  ;;  %v3564_v53 = vmul.f32 %v9995_v4, %v3558_v44  ;;  %v3632_v51 = vmul.f32 %v10095_v38, %v3616_v2 }
 0x509   :  { %v3493_v20 = vsel %vm11889_vm12, %v9942_v15, %v3484_v34  ;;  %v3494_v11 = vsel %vm11890_vm15, %v3484_v34, %v6507_v5  ;;  %v3575_v15 = vmul.f32 %v10000_v19, %v3559_v37  ;;  %v10248_v19 = vstv %s5848_s24  ;;  %vm11896_vm12 = vmmov %vm11895_vm2  ;;  %s5865_s24 = sld [smem:[#allocation7 + $0x37]] }
 0x50a   :  { %v3501_v57 = vsel %vm11891_vm1, %v3493_v20, 0.0  ;;  %v3502_v42 = vsel %vm11892_vm4, %v3494_v11, 0.0  ;;  %vm11897_vm15 = vmmov %vm11895_vm2  ;;  %vm11898_vm1 = vcmask 1031168  }
 0x50b   :  { %v3507_v22 = vmul.f32 %v9949_v17, %v3501_v57  ;;  %v3508_v48 = vmul.f32 %v9949_v17, %v3502_v42  ;;  %v3517_v21 = vmul.f32 %v9954_v62, %v3501_v57  ;;  %v3518_v24 = vmul.f32 %v9954_v62, %v3502_v42  ;;  %v10266_v57 = vld [vmem:[#allocation2 + $0x38] sm:$0xff]  ;;  %vm11899_vm4 = vmmov %vm11894_vm11 }
 0x50c   :  { %6574 = vrot.lane.b32.xlu2 %v10138_v27, %s7003_s13  ;;  %v3565_v62 = vmul.f32 %v9995_v4, %v3559_v37  ;;  %v3583_v1 = vrot.slane %v3575_v15, 1  ;;  %v3622_v37 = vmul.f32 %v10092_v6, %v3616_v2  ;;  %v3640_v42 = vrot.slane %v3632_v51, 1  ;;  %vm11900_vm9 = vmmov %vm11899_vm4 }
 0x50d   :  { %4352 = vrot.lane.b32.xlu0 %v9975_v12, %s7001_s4  ;;  %v3511_v60 = vadd.f32 %v3507_v22, %v3477_v14  ;;  %v3512_v0 = vadd.f32 %v3508_v48, %v3478_v3  ;;  %v3525_v50 = vrot.slane %v3517_v21, 1  ;;  %v3526_v63 = vrot.slane %v3518_v24, 1 }
 0x50e   :  { %3992 = vrot.lane.b32.xlu1 %v10069_v46, %s6996_s23  ;;  %s5851_s23 = sld [smem:[#allocation7 + $0x35]]  ;;  %v3900_v51 = vsel %vm11897_vm15, %v10209_v8, 0.0 }
 0x50f   :  { %v10241_v17 = vpop.permute.xlu2 %3655  ;;  %v3533_v13 = vadd.f32 %v3525_v50, %v3511_v60  ;;  %v3534_v3 = vadd.f32 %v3526_v63, %v3512_v0  ;;  %v3843_v50 = vsel %vm11895_vm2, %v10088_v54, 0.0 }
 0x510   :  { %v10246_v59 = vpop.permute.xlu0 %3768  ;;  %v3773_v25 = vpop.permute.xlu1 %3772 }
 0x511   :  { %v3780_v31 = vsel %vm3776_vm6, %v3773_v25, %v10124_v35  ;;  %v3568_v5 = vadd.f32 %v3564_v53, %v3533_v13  ;;  %v3569_v7 = vadd.f32 %v3565_v62, %v3534_v3  ;;  %v10288_v62 = vstv %s5850_s17  ;;  %s5867_s17 = sld [smem:[#allocation7 + $0x45]] }
 0x512   :  { %v3788_v14 = vsel %vm11894_vm11, %v3780_v31, 0.0  ;;  %v10303_v31 = vstv %s5853_s1  ;;  %vm11902_vm11 = vcmask 244736   ;;  %s5871_s1 = sld [smem:[#allocation7 + $0x61]] }
 0x513   :  { %v3794_v34 = vmul.f32 %v10248_v19, %v3788_v14  ;;  %v3804_v4 = vmul.f32 %v10251_v61, %v3788_v14  ;;  %v3591_v44 = vadd.f32 %v3583_v1, %v3569_v7  ;;  %v10263_v20 = vadd.f32 %v3582_v28, %v3568_v5 }
 0x514   :  { %4301 = vrot.lane.b32.xlu2 %v9867_v47, %s7003_s13  ;;  %v10279_v0 = vstv %s5851_s23  ;;  %s5866_s23 = sld [smem:[#allocation7 + $0x44]] }
 0x515   :  { %v3798_v35 = vadd.f32 %v3794_v34, %v10198_v23  ;;  %v3812_v11 = vrot.slane %v3804_v4, 1  ;;  %4520 = vrot.lane.b32.xlu0 %v10266_v57, %s11501_s2  ;;  %v3626_v48 = vadd.f32 %v3622_v37, %v3591_v44  ;;  %v3859_v3 = vmul.f32 %v10279_v0, %v3843_v50 }
 0x516   :  { %4303 = vrot.lane.b32.xlu1 %v9687_v33, %s7003_s13  ;;  %v10309_v34 = vstv %s5852_s21  ;;  %v6542_v37 = vunpack.i.h.bf16 %v10128_v16  ;;  %v3901_v44 = vsel %vm11899_vm4, %v10212_v9, 0.0  ;;  %s10620_s21 = sld [smem:[#allocation7 + $0x52]] }
 0x517   :  { %v10272_v22 = vpop.permute.xlu2 %6544  ;;  %v3820_v21 = vadd.f32 %v3812_v11, %v3798_v35  ;;  %v10276_v10 = vadd.f32 %v3640_v42, %v3626_v48  ;;  %v3867_v14 = vrot.slane %v3859_v3, 1  ;;  %v3916_v35 = vmul.f32 %v10303_v31, %v3900_v51 }
 0x518   :  { %v10274_v24 = vpop.permute.xlu0 %4077  ;;  %v6530_v15 = vpop.permute.xlu1 %6529  ;;  %v3906_v16 = vmul.f32 %v10309_v34, %v3900_v51 }
 0x519   :  { %v6531_v23 = vunpack.i.l.bf16 %v6530_v15  ;;  %v6532_v11 = vunpack.i.h.bf16 %v6530_v15  ;;  %v3917_v15 = vmul.f32 %v10303_v31, %v3901_v44 }
 0x51b   :  { %v3779_v60 = vsel %vm3776_vm6, %v6531_v23, %v3773_v25 }
 0x51c   :  { %v3787_v63 = vsel %vm11896_vm12, %v3779_v60, 0.0  ;;  %4126 = vrot.lane.b32.xlu2 %v9723_v30, %s7000_s20  ;;  %v3849_v30 = vmul.f32 %v10288_v62, %v3843_v50  ;;  %s5855_s20 = sld [smem:[#allocation7 + $0x51]]  ;;  %vm11906_vm12 = vcmp.lt.s32.totalorder %v7263_v39, 14 }
 0x51d   :  { %v3793_v2 = vmul.f32 %v10248_v19, %v3787_v63  ;;  %v3803_v53 = vmul.f32 %v10251_v61, %v3787_v63 }
 0x51e   :  { %4071 = vrot.lane.b32.xlu1 %v9807_v56, %s6997_s5  ;;  %s5854_s5 = sld [smem:[#allocation7 + $0x50]] }
 0x51f   :  { %v10294_v13 = vpop.permute.xlu2 %3940  ;;  %v3797_v54 = vadd.f32 %v3793_v2, %v10162_v49  ;;  %v3811_v25 = vrot.slane %v3803_v53, 1  ;;  %v3924_v2 = vrot.slane %v3916_v35, 1  ;;  %v11903_v35 = vld [vmem:[#allocation132_spill] sm:$0xff] }
 0x520   :  { %v10298_v1 = vpop.permute.xlu0 %3821  ;;  %v10301_v28 = vpop.permute.xlu1 %6534 }
 0x521   :  { %v3819_v5 = vadd.f32 %v3811_v25, %v3797_v54  ;;  %v6536_v7 = vunpack.i.l.bf16 %v10301_v28  ;;  %v3907_v25 = vmul.f32 %v10309_v34, %v3901_v44 }
 0x523   :  { %v3853_v49 = vadd.f32 %v3849_v30, %v3819_v5  ;;  %v3836_v4 = vsel %vm11898_vm1, %v10035_v32, %v6536_v7  ;;  %v3925_v5 = vrot.slane %v3917_v15, 1  ;;  %vm11908_vm1 = vcmask 769024  }
 0x524   :  { %v3844_v8 = vsel %vm11900_vm9, %v3836_v4, 0.0  ;;  %4417 = vrot.lane.b32.xlu2 %v9687_v33, %s7002_s22  ;;  %vm11909_vm4 = vmmov %vm11908_vm1  ;;  %vm11910_vm9 = vcmp.lt.s32.totalorder %v7265_v41, 14 }
 0x525   :  { %v3850_v42 = vmul.f32 %v10288_v62, %v3844_v8  ;;  %v3860_v48 = vmul.f32 %v10279_v0, %v3844_v8  ;;  %v3875_v32 = vadd.f32 %v3867_v14, %v3853_v49 }
 0x526   :  { %6579 = vrot.lane.b32.xlu1 %v10138_v27, %s7001_s4 }
 0x527   :  { %v3767_v9 = vpop.permute.xlu2 %3766  ;;  %v3854_v23 = vadd.f32 %v3850_v42, %v3820_v21  ;;  %v3868_v60 = vrot.slane %v3860_v48, 1  ;;  %v3910_v27 = vadd.f32 %v3906_v16, %v3875_v32  ;;  %v6527_v21 = vunpack.i.h.bf16 %v10073_v45 }
 0x528   :  { %v3777_v50 = vsel %vm3776_vm6, %v6532_v11, %v3767_v9  ;;  %v10330_v63 = vsel %vm3776_vm6, %v3767_v9, %v10246_v59  ;;  %v10332_v33 = vpop.permute.xlu0 %3879  ;;  %v3595_v3 = vpop.permute.xlu1 %3594  ;;  %vm11901_vm6 = vcmp.lt.s32.totalorder %v11548_v52, 15 }
 0x529   :  { %v10337_v53 = vsel %vm3889_vm13, %v10332_v33, %v6542_v37  ;;  %v3876_v54 = vadd.f32 %v3868_v60, %v3854_v23  ;;  %v3607_v59 = vsel %vm3606_vm3, %v3595_v3, %v10185_v43  ;;  %v3932_v30 = vadd.f32 %v3924_v2, %v3910_v27 }
 0x52a   :  { %v3615_v51 = vsel %vm11901_vm6, %v3607_v59, 0.0  ;;  %v3720_v45 = vsel %vm11902_vm11, %v6527_v21, %v10190_v58  ;;  %vm11904_vm3 = vcmp.lt.s32.totalorder %v11548_v52, 14  ;;  %v6907_v21 = vld [vmem:[#allocation2 + $0x18] sm:$0x3]  ;;  %vm11911_vm6 = vcmp.lt.s32.totalorder %v7155_v29, 14 }
 0x52b   :  { %v3621_v7 = vmul.f32 %v10092_v6, %v3615_v51  ;;  %v3631_v14 = vmul.f32 %v10095_v38, %v3615_v51  ;;  %v3911_v49 = vadd.f32 %v3907_v25, %v3876_v54  ;;  %v6522_v6 = vunpack.i.h.bf16 %v11903_v35  ;;  %vm11905_vm2 = vmmov %vm11904_vm3 }
 0x52c   :  { %4185 = vrot.lane.b32.xlu2 %v9807_v56, %s6998_s28  ;;  %v3728_v38 = vsel %vm11904_vm3, %v3720_v45, 0.0  ;;  %vm11907_vm15 = vmmov %vm11905_vm2 }
 0x52d   :  { %v3625_v4 = vadd.f32 %v3621_v7, %v10263_v20  ;;  %v3639_v37 = vrot.slane %v3631_v14, 1  ;;  %v3933_v44 = vadd.f32 %v3925_v5, %v3911_v49  ;;  %v3744_v48 = vmul.f32 %v10131_v26, %v3728_v38  ;;  %vm11912_vm3 = vmmov %vm11906_vm12 }
 0x52e   :  { %4358 = vrot.lane.b32.xlu1 %v9867_v47, %s7001_s4  ;;  %v3734_v3 = vmul.f32 %v10144_v18, %v3728_v38  ;;  %v3785_v59 = vsel %vm11907_vm15, %v3777_v50, 0.0  ;;  %v10382_v5 = vstv %s5854_s5  ;;  %vm4002_vm15 = vcmask 637952   ;;  %s5869_s5 = sld [smem:[#allocation7 + $0x53]] }
 0x52f   :  { %v10354_v43 = vpop.permute.xlu2 %4075  ;;  %v3647_v56 = vadd.f32 %v3639_v37, %v3625_v4  ;;  %v3752_v54 = vrot.slane %v3744_v48, 1  ;;  %v3801_v35 = vmul.f32 %v10251_v61, %v3785_v59 }
 0x530   :  { %v3654_v8 = vpop.permute.xlu1 %3653 }
 0x531   :  { %v3664_v11 = vsel %vm3663_vm5, %v6522_v6, %v3654_v8  ;;  %v3665_v20 = vsel %vm3663_vm5, %v3654_v8, %v10241_v17  ;;  %v6546_v17 = vunpack.i.l.bf16 %v10272_v22  ;;  %vm4079_vm5 = vcmask 367616  }
 0x532   :  { %v3672_v47 = vsel %vm11905_vm2, %v3664_v11, 0.0  ;;  %v3673_v42 = vsel %vm11906_vm12, %v3665_v20, 0.0  ;;  %vm11913_vm2 = vmmov %vm11912_vm3  ;;  %vm4053_vm12 = vcmp.lt.s32.totalorder %v7265_v41, 13 }
 0x533   :  { %v3678_v32 = vmul.f32 %v10117_v55, %v3672_v47  ;;  %v3679_v16 = vmul.f32 %v10117_v55, %v3673_v42  ;;  %v3688_v9 = vmul.f32 %v10082_v40, %v3672_v47  ;;  %v3689_v23 = vmul.f32 %v10082_v40, %v3673_v42 }
 0x534   :  { %4238 = vrot.lane.b32.xlu2 %v9975_v12, %s6999_s3 }
 0x535   :  { %v3682_v60 = vadd.f32 %v3678_v32, %v3647_v56  ;;  %v3683_v15 = vadd.f32 %v3679_v16, %v10276_v10  ;;  %v3696_v2 = vrot.slane %v3688_v9, 1  ;;  %v3697_v27 = vrot.slane %v3689_v23, 1 }
 0x536   :  { %4183 = vrot.lane.b32.xlu1 %v6907_v21, %s6998_s28  ;;  %v10384_v10 = vstv %s5855_s20  ;;  %v3791_v56 = vmul.f32 %v10248_v19, %v3785_v59  ;;  %v3809_v9 = vrot.slane %v3801_v35, 1  ;;  %s5856_s28 = sld [smem:[#allocation7 + $0x5e]] }
 0x537   :  { %v10377_v55 = vpop.permute.xlu2 %6554  ;;  %v3704_v40 = vadd.f32 %v3696_v2, %v3682_v60  ;;  %v3705_v51 = vadd.f32 %v3697_v27, %v3683_v15  ;;  %s5870_s20 = sld [smem:[#allocation7 + $0x60]] }
 0x538   :  { %v6556_v25 = vunpack.i.l.bf16 %v10377_v55  ;;  %v3943_v7 = vpop.permute.xlu1 %3942 }
 0x539   :  { %v3738_v14 = vadd.f32 %v3734_v3, %v3704_v40  ;;  %v3948_v45 = vsel %vm11908_vm1, %v10294_v13, %v3943_v7  ;;  %v3949_v4 = vsel %vm11909_vm4, %v3943_v7, %v6546_v17  ;;  %vm11914_vm1 = vmmov %vm11910_vm9  ;;  %vm11915_vm4 = vcmask 1031168  }
 0x53a   :  { %v4082_v49 = vsel %vm4079_vm5, %v6556_v25, %v10354_v43  ;;  %v3956_v37 = vsel %vm11910_vm9, %v3948_v45, 0.0  ;;  %v3957_v50 = vsel %vm11911_vm6, %v3949_v4, 0.0  ;;  %vm11916_vm9 = vmmov %vm11913_vm2 }
 0x53b   :  { %v3760_v6 = vadd.f32 %v3752_v54, %v3738_v14  ;;  %v3962_v38 = vmul.f32 %v10382_v5, %v3956_v37  ;;  %v3963_v8 = vmul.f32 %v10382_v5, %v3957_v50  ;;  %v3972_v11 = vmul.f32 %v10384_v10, %v3956_v37  ;;  %v10428_v14 = vpop.permute.xlu0 %4189  ;;  %vm11917_vm6 = vmmov %vm11915_vm4 }
 0x53c   :  { %v3973_v13 = vmul.f32 %v10384_v10, %v3957_v50  ;;  %4354 = vrot.lane.b32.xlu2 %v10069_v46, %s7001_s4  ;;  %s5859_s4 = sld [smem:[#allocation7 + $0xd]]  ;;  %v10439_v45 = vstv %s5856_s28 }
 0x53d   :  { %v3966_v20 = vadd.f32 %v3962_v38, %v3932_v30  ;;  %v3967_v47 = vadd.f32 %v3963_v8, %v3933_v44  ;;  %v3980_v42 = vrot.slane %v3972_v11, 1  ;;  %v3795_v16 = vadd.f32 %v3791_v56, %v3760_v6 }
 0x53e   :  { %v3981_v48 = vrot.slane %v3973_v13, 1  ;;  %4240 = vrot.lane.b32.xlu1 %v10069_v46, %s6999_s3  ;;  %v3786_v30 = vsel %vm11912_vm3, %v10330_v63, 0.0  ;;  %s5857_s3 = sld [smem:[#allocation7 + $0x5f]]  ;;  %v10450_v8 = vstv %s5858_s25  ;;  %vm11920_vm3 = vmmov %vm11913_vm2 }
 0x53f   :  { %v10405_v32 = vpop.permute.xlu2 %4134  ;;  %v3988_v23 = vadd.f32 %v3980_v42, %v3966_v20  ;;  %v10411_v2 = vadd.f32 %v3809_v9, %v3795_v16  ;;  %v3802_v21 = vmul.f32 %v10251_v61, %v3786_v30  ;;  %v3792_v63 = vmul.f32 %v10248_v19, %v3786_v30 }
 0x540   :  { %v10407_v17 = vadd.f32 %v3981_v48, %v3967_v47  ;;  %v3713_v60 = vpop.permute.xlu1 %3712  ;;  %v6537_v20 = vunpack.i.h.bf16 %v10301_v28 }
 0x541   :  { %v3721_v15 = vsel %vm11902_vm11, %v10190_v58, %v3713_v60  ;;  %v3810_v7 = vrot.slane %v3802_v21, 1  ;;  %v6547_v60 = vunpack.i.h.bf16 %v10272_v22  ;;  %vm11918_vm11 = vcmp.lt.s32.totalorder %v11548_v52, 14 }
 0x542   :  { %v3729_v44 = vsel %vm11913_vm2, %v3721_v15, 0.0  ;;  %v10447_v35 = vstv %s5859_s4  ;;  %v3899_v15 = vsel %vm11916_vm9, %v10337_v53, 0.0  ;;  %vm11921_vm2 = vcmask 769024  }
 0x543   :  { %v3735_v3 = vmul.f32 %v10144_v18, %v3729_v44  ;;  %v3745_v27 = vmul.f32 %v10131_v26, %v3729_v44  ;;  %v10455_v11 = vpop.permute.xlu0 %6564  ;;  %vm4136_vm9 = vcmask 236544  }
 0x544   :  { %4409 = vrot.lane.b32.xlu2 %v9975_v12, %s7002_s22  ;;  %v10441_v4 = vstv %s5857_s3 }
 0x545   :  { %v3739_v54 = vadd.f32 %v3735_v3, %v3705_v51  ;;  %v3753_v58 = vrot.slane %v3745_v27, 1  ;;  %v4090_v51 = vsel %vm4053_vm12, %v4082_v49, 0.0 }
 0x546   :  { %4295 = vrot.lane.b32.xlu1 %v9975_v12, %s7003_s13  ;;  %v4106_v6 = vmul.f32 %v10447_v35, %v4090_v51  ;;  %v4096_v49 = vmul.f32 %v10450_v8, %v4090_v51  ;;  %s5862_s13 = sld [smem:[#allocation7 + $0x28]] }
 0x547   :  { %v3878_v40 = vpop.permute.xlu2 %3877  ;;  %v3761_v25 = vadd.f32 %v3753_v58, %v3739_v54  ;;  %v3915_v54 = vmul.f32 %v10303_v31, %v3899_v15 }
 0x548   :  { %v10426_v59 = vpop.permute.xlu1 %6549  ;;  %v3890_v47 = vsel %vm3889_vm13, %v3878_v40, %v10332_v33  ;;  %v4114_v16 = vrot.slane %v4106_v6, 1  ;;  %vm11919_vm13 = vmmov %vm11918_vm11 }
 0x549   :  { %v3796_v18 = vadd.f32 %v3792_v63, %v3761_v25  ;;  %v3898_v33 = vsel %vm11919_vm13, %v3890_v47, 0.0  ;;  %v6551_v47 = vunpack.i.l.bf16 %v10426_v59  ;;  %vm11924_vm13 = vmmov %vm11921_vm2 }
 0x54a   :  { %v3914_v40 = vmul.f32 %v10303_v31, %v3898_v33 }
 0x54b   :  { %v3818_v26 = vadd.f32 %v3810_v7, %v3796_v18 }
 0x54e   :  { %4411 = vrot.lane.b32.xlu1 %v10069_v46, %s7002_s22  ;;  %s5861_s22 = sld [smem:[#allocation7 + $0x1b]] }
 0x54f   :  { %v10432_v61 = vpop.permute.xlu2 %3936 }
 0x550   :  { %v3997_v12 = vpop.permute.xlu1 %3996  ;;  %v3947_v22 = vsel %vm11921_vm2, %v10432_v61, %v6547_v60  ;;  %vm4051_vm2 = vcmp.lt.s32.totalorder %v11548_v52, 13 }
 0x551   :  { %v4005_v19 = vsel %vm4002_vm15, %v3997_v12, %v10214_v36  ;;  %v3905_v12 = vmul.f32 %v10309_v34, %v3899_v15 }
 0x552   :  { %v4013_v37 = vsel %vm11914_vm1, %v4005_v19, 0.0  ;;  %vm11922_vm1 = vmmov %vm11920_vm3 }
 0x553   :  { %v4019_v46 = vmul.f32 %v10439_v45, %v4013_v37  ;;  %v4029_v50 = vmul.f32 %v10441_v4, %v4013_v37  ;;  %v3955_v18 = vsel %vm11922_vm1, %v3947_v22, 0.0 }
 0x555   :  { %v4023_v38 = vadd.f32 %v4019_v46, %v3988_v23  ;;  %v4037_v56 = vrot.slane %v4029_v50, 1  ;;  %v10488_v46 = vpop.permute.xlu0 %6569  ;;  %v3922_v50 = vrot.slane %v3914_v40, 1 }
 0x556   :  { %4676 = vrot.lane.b32.xlu1 %v10266_v57, %s6951_s30 }
 0x557   :  { %v4045_v13 = vadd.f32 %v4037_v56, %v4023_v38  ;;  %v10460_v42 = vpop.permute.xlu2 %4246  ;;  %v6566_v38 = vunpack.i.l.bf16 %v10455_v11  ;;  %v3961_v56 = vmul.f32 %v10382_v5, %v3955_v18 }
 0x558   :  { %v3824_v48 = vpop.permute.xlu1 %3823 }
 0x559   :  { %v4100_v9 = vadd.f32 %v4096_v49, %v4045_v13  ;;  %v3833_v23 = vsel %vm11915_vm4, %v10298_v1, %v3824_v48  ;;  %v3834_v30 = vsel %vm11917_vm6, %v3824_v48, %v6537_v20  ;;  %vm4193_vm4 = vcmask 105472  }
 0x55a   :  { %v3841_v28 = vsel %vm11918_vm11, %v3833_v23, 0.0  ;;  %v3842_v3 = vsel %vm11920_vm3, %v3834_v30, 0.0  ;;  %vm11923_vm6 = vcmp.lt.s32.totalorder %v7155_v29, 14  ;;  %vm4054_vm11 = vcmp.lt.s32.totalorder %v7155_v29, 13 }
 0x55b   :  { %v4122_v44 = vadd.f32 %v4114_v16, %v4100_v9  ;;  %v3847_v1 = vmul.f32 %v10288_v62, %v3841_v28  ;;  %v3848_v27 = vmul.f32 %v10288_v62, %v3842_v3  ;;  %v3857_v53 = vmul.f32 %v10279_v0, %v3841_v28 }
 0x55c   :  { %v3858_v21 = vmul.f32 %v10279_v0, %v3842_v3  ;;  %v3904_v62 = vmul.f32 %v10309_v34, %v3898_v33  ;;  %v3923_v0 = vrot.slane %v3915_v54, 1  ;;  %v4196_v16 = vsel %vm4193_vm4, %v6566_v38, %v10428_v14 }
 0x55d   :  { %v3851_v58 = vadd.f32 %v3847_v1, %v10411_v2  ;;  %v3852_v63 = vadd.f32 %v3848_v27, %v3818_v26  ;;  %v3865_v25 = vrot.slane %v3857_v53, 1  ;;  %v3971_v2 = vmul.f32 %v10384_v10, %v3955_v18  ;;  %v3991_v60 = vpop.permute.xlu0 %3990 }
 0x55e   :  { %v3866_v7 = vrot.slane %v3858_v21, 1  ;;  %v4204_v30 = vsel %vm4053_vm12, %v4196_v16, 0.0  ;;  %v10506_v28 = vstv %s5863_s29  ;;  %v4006_v33 = vsel %vm4002_vm15, %v10214_v36, %v6551_v47 }
 0x55f   :  { %v3873_v19 = vadd.f32 %v3865_v25, %v3851_v58  ;;  %v10491_v6 = vpop.permute.xlu2 %4244  ;;  %v3979_v13 = vrot.slane %v3971_v2, 1  ;;  %v10510_v3 = vstv %s5860_s26  ;;  %v10512_v1 = vstv %s5861_s22 }
 0x560   :  { %v3874_v51 = vadd.f32 %v3866_v7, %v3852_v63  ;;  %v4133_v37 = vpop.permute.xlu1 %4132  ;;  %v10520_v54 = vstv %s5862_s13  ;;  %v4014_v58 = vsel %vm11923_vm6, %v4006_v33, 0.0  ;;  %v4220_v63 = vmul.f32 %v10506_v28, %v4204_v30 }
 0x561   :  { %v3908_v31 = vadd.f32 %v3904_v62, %v3873_v19  ;;  %v4210_v18 = vmul.f32 %v10520_v54, %v4204_v30  ;;  %v4030_v62 = vmul.f32 %v10441_v4, %v4014_v58  ;;  %v4140_v47 = vsel %vm4136_vm9, %v4133_v37, %v10405_v32 }
 0x562   :  { %v3909_v26 = vadd.f32 %v3905_v12, %v3874_v51  ;;  %v4020_v12 = vmul.f32 %v10439_v45, %v4014_v58  ;;  %v4228_v19 = vrot.slane %v4220_v63, 1  ;;  %vm11925_vm3 = vcmp.lt.s32.totalorder %v11548_v52, 14 }
 0x563   :  { %v3930_v49 = vadd.f32 %v3922_v50, %v3908_v31  ;;  %v4038_v2 = vrot.slane %v4030_v62, 1  ;;  %v4148_v32 = vsel %vm4054_vm11, %v4140_v47, 0.0  ;;  %vm11926_vm1 = vmmov %vm11925_vm3  ;;  %vm11927_vm6 = vcmp.lt.s32.totalorder %v7263_v39, 14 }
 0x564   :  { %v3931_v34 = vadd.f32 %v3923_v0, %v3909_v26  ;;  %v4024_v31 = vadd.f32 %v4020_v12, %v10407_v17  ;;  %v4154_v58 = vmul.f32 %v10510_v3, %v4148_v32 }
 0x565   :  { %v10528_v0 = vpop.permute.xlu0 %4069 }
 0x566   :  { %v3965_v20 = vadd.f32 %v3961_v56, %v3931_v34  ;;  %v6557_v34 = vunpack.i.h.bf16 %v10377_v55 }
 0x567   :  { %v10514_v22 = vpop.permute.xlu2 %6574 }
 0x568   :  { %v10496_v48 = vpop.permute.xlu1 %6559  ;;  %v10500_v9 = vadd.f32 %v3979_v13, %v3965_v20  ;;  %v4046_v13 = vadd.f32 %v4038_v2, %v4024_v31  ;;  %v4080_v55 = vsel %vm4079_vm5, %v6557_v34, %v10528_v0 }
 0x569   :  { %v6561_v23 = vunpack.i.l.bf16 %v10496_v48 }
 0x56b   :  { %v4139_v15 = vsel %vm4136_vm9, %v6561_v23, %v4133_v37 }
 0x56c   :  { %v4147_v27 = vsel %vm4053_vm12, %v4139_v15, 0.0 }
 0x56d   :  { %v4153_v53 = vmul.f32 %v10510_v3, %v4147_v27  ;;  %v4163_v21 = vmul.f32 %v10512_v1, %v4147_v27  ;;  %v10557_v37 = vpop.permute.xlu0 %4360  ;;  %v6571_v27 = vunpack.i.l.bf16 %v10488_v46 }
 0x56f   :  { %v4157_v40 = vadd.f32 %v4153_v53, %v4122_v44  ;;  %v4171_v36 = vrot.slane %v4163_v21, 1  ;;  %v4083_v44 = vsel %vm4079_vm5, %v10354_v43, %v10274_v24  ;;  %v10537_v26 = vpop.permute.xlu2 %4301  ;;  %v4088_v21 = vsel %vm4051_vm2, %v4080_v55, 0.0 }
 0x570   :  { %v4192_v25 = vpop.permute.xlu1 %4191  ;;  %v4091_v56 = vsel %vm4054_vm11, %v4083_v44, 0.0 }
 0x571   :  { %v4179_v7 = vadd.f32 %v4171_v36, %v4157_v40  ;;  %v4097_v43 = vmul.f32 %v10450_v8, %v4091_v56  ;;  %v4107_v17 = vmul.f32 %v10447_v35, %v4091_v56  ;;  %v4164_v40 = vmul.f32 %v10512_v1, %v4148_v32 }
 0x572   :  { %v6562_v36 = vunpack.i.h.bf16 %v10496_v48 }
 0x573   :  { %v4214_v51 = vadd.f32 %v4210_v18, %v4179_v7  ;;  %v4115_v33 = vrot.slane %v4107_v17, 1  ;;  %v4172_v2 = vrot.slane %v4164_v40, 1 }
 0x575   :  { %v10530_v50 = vadd.f32 %v4228_v19, %v4214_v51 }
 0x577   :  { %v10561_v53 = vpop.permute.xlu2 %4126 }
 0x578   :  { %v3935_v38 = vpop.permute.xlu1 %3934  ;;  %v4137_v18 = vsel %vm4136_vm9, %v6562_v36, %v10561_v53  ;;  %v10604_v36 = vstv %s5864_s0 }
 0x579   :  { %v3946_v20 = vsel %vm11924_vm13, %v3935_v38, %v10432_v61  ;;  %v4101_v61 = vadd.f32 %v4097_v43, %v4046_v13  ;;  %vm4307_vm13 = vcmask 891904  }
 0x57a   :  { %v3954_v24 = vsel %vm11925_vm3, %v3946_v20, 0.0  ;;  %v4094_v20 = vmul.f32 %v10450_v8, %v4088_v21  ;;  %vm4421_vm3 = vcmask 629760  }
 0x57b   :  { %v3960_v16 = vmul.f32 %v10382_v5, %v3954_v24  ;;  %v3970_v23 = vmul.f32 %v10384_v10, %v3954_v24  ;;  %v6552_v5 = vunpack.i.h.bf16 %v10426_v59  ;;  %v4123_v63 = vadd.f32 %v4115_v33, %v4101_v61 }
 0x57d   :  { %v3964_v15 = vadd.f32 %v3960_v16, %v3930_v49  ;;  %v3978_v30 = vrot.slane %v3970_v23, 1  ;;  %v4197_v49 = vsel %vm4193_vm4, %v10428_v14, %v4192_v25  ;;  %v4104_v25 = vmul.f32 %v10447_v35, %v4088_v21  ;;  %v10595_v23 = vpop.permute.xlu0 %4128 }
 0x57e   :  { %v4158_v44 = vadd.f32 %v4154_v58, %v4123_v63  ;;  %v4205_v31 = vsel %vm4054_vm11, %v4197_v49, 0.0  ;;  %v10600_v21 = vstv %s5865_s24 }
 0x57f   :  { %v3986_v12 = vadd.f32 %v3978_v30, %v3964_v15  ;;  %v4221_v47 = vmul.f32 %v10506_v28, %v4205_v31  ;;  %v4112_v16 = vrot.slane %v4104_v25, 1  ;;  %v6576_v15 = vunpack.i.l.bf16 %v10514_v22 }
 0x580   :  { %v3993_v10 = vpop.permute.xlu1 %3992  ;;  %v4180_v55 = vadd.f32 %v4172_v2, %v4158_v44  ;;  %v10623_v44 = vstv %s5866_s23 }
 0x581   :  { %v4003_v7 = vsel %vm4002_vm15, %v3991_v60, %v3993_v10  ;;  %v4004_v59 = vsel %vm4002_vm15, %v3993_v10, %v6552_v5  ;;  %vm4250_vm15 = vcmask 1022976   ;;  %v4229_v33 = vrot.slane %v4221_v47, 1 }
 0x582   :  { %v4011_v62 = vsel %vm11926_vm1, %v4003_v7, 0.0  ;;  %v4012_v19 = vsel %vm11927_vm6, %v4004_v59, 0.0  ;;  %vm4052_vm1 = vcmp.lt.s32.totalorder %v7263_v39, 13  ;;  %vm11937_vm6 = vcmask 1039360  }
 0x583   :  { %v4017_v48 = vmul.f32 %v10439_v45, %v4011_v62  ;;  %v4018_v51 = vmul.f32 %v10439_v45, %v4012_v19  ;;  %v4027_v14 = vmul.f32 %v10441_v4, %v4011_v62  ;;  %v4028_v60 = vmul.f32 %v10441_v4, %v4012_v19 }
 0x584   :  { %v4145_v45 = vsel %vm4051_vm2, %v4137_v18, 0.0  ;;  %v4211_v4 = vmul.f32 %v10520_v54, %v4205_v31 }
 0x585   :  { %v4021_v38 = vadd.f32 %v4017_v48, %v3986_v12  ;;  %v4022_v56 = vadd.f32 %v4018_v51, %v10500_v9  ;;  %v4035_v34 = vrot.slane %v4027_v14, 1  ;;  %v4036_v13 = vrot.slane %v4028_v60, 1  ;;  %v10618_v14 = vpop.permute.xlu0 %6584 }
 0x586   :  { %v4254_v9 = vsel %vm4250_vm15, %v10460_v42, %v6571_v27  ;;  %v4161_v61 = vmul.f32 %v10512_v1, %v4145_v45  ;;  %v4215_v30 = vadd.f32 %v4211_v4, %v4180_v55  ;;  %v4151_v5 = vmul.f32 %v10510_v3, %v4145_v45 }
 0x587   :  { %v4043_v24 = vadd.f32 %v4035_v34, %v4021_v38  ;;  %v10591_v43 = vadd.f32 %v4036_v13, %v4022_v56  ;;  %v4262_v58 = vsel %vm4054_vm11, %v4254_v9, 0.0  ;;  %v4253_v12 = vsel %vm4250_vm15, %v10491_v6, %v10460_v42  ;;  %v4418_v6 = vpop.permute.xlu2 %4417 }
 0x588   :  { %v4304_v17 = vpop.permute.xlu1 %4303  ;;  %v4169_v27 = vrot.slane %v4161_v61, 1  ;;  %v4278_v63 = vmul.f32 %v10600_v21, %v4262_v58  ;;  %v4237_v49 = vadd.f32 %v4229_v33, %v4215_v30  ;;  %v4268_v62 = vmul.f32 %v10604_v36, %v4262_v58 }
 0x589   :  { %v4098_v32 = vadd.f32 %v4094_v20, %v4043_v24  ;;  %v4311_v7 = vsel %vm4307_vm13, %v4304_v17, %v6576_v15  ;;  %v4261_v51 = vsel %vm4053_vm12, %v4253_v12, 0.0  ;;  %v6586_v25 = vunpack.i.l.bf16 %v10618_v14 }
 0x58a   :  { %v4319_v19 = vsel %vm4054_vm11, %v4311_v7, 0.0  ;;  %v4286_v48 = vrot.slane %v4278_v63, 1  ;;  %v4272_v60 = vadd.f32 %v4268_v62, %v4237_v49  ;;  %v10625_v42 = vstv %s5867_s17 }
 0x58b   :  { %v4120_v10 = vadd.f32 %v4112_v16, %v4098_v32  ;;  %v4310_v2 = vsel %vm4307_vm13, %v10537_v26, %v4304_v17  ;;  %v4325_v31 = vmul.f32 %v10623_v44, %v4319_v19  ;;  %v4335_v38 = vmul.f32 %v10625_v42, %v4319_v19 }
 0x58c   :  { %v4267_v34 = vmul.f32 %v10604_v36, %v4261_v51  ;;  %v4277_v13 = vmul.f32 %v10600_v21, %v4261_v51  ;;  %v4294_v20 = vadd.f32 %v4286_v48, %v4272_v60  ;;  %v4318_v26 = vsel %vm4053_vm12, %v4310_v2, 0.0 }
 0x58d   :  { %v4155_v40 = vadd.f32 %v4151_v5, %v4120_v10  ;;  %v4425_v4 = vsel %vm4421_vm3, %v4418_v6, %v6586_v25  ;;  %v10644_v24 = vstv %s5871_s1  ;;  %v4343_v16 = vrot.slane %v4335_v38, 1  ;;  %v4416_v19 = vpop.permute.xlu0 %4415 }
 0x58e   :  { %v4271_v47 = vadd.f32 %v4267_v34, %v10530_v50  ;;  %v4329_v17 = vadd.f32 %v4325_v31, %v4294_v20  ;;  %v4285_v55 = vrot.slane %v4277_v13, 1  ;;  %v4324_v61 = vmul.f32 %v10623_v44, %v4318_v26 }
 0x58f   :  { %v10608_v18 = vadd.f32 %v4169_v27, %v4155_v40  ;;  %v4334_v32 = vmul.f32 %v10625_v42, %v4318_v26  ;;  %v4433_v15 = vsel %vm4054_vm11, %v4425_v4, 0.0  ;;  %v10656_v10 = vstv %s10620_s21 }
 0x590   :  { %v4072_v59 = vpop.permute.xlu1 %4071  ;;  %v4293_v5 = vadd.f32 %v4285_v55, %v4271_v47  ;;  %v10658_v58 = vstv %s5869_s5  ;;  %v10662_v40 = vstv %s5870_s20  ;;  %v4351_v63 = vadd.f32 %v4343_v16, %v4329_v17 }
 0x591   :  { %v4081_v56 = vsel %vm4079_vm5, %v10528_v0, %v4072_v59  ;;  %vm4364_vm5 = vcmask 760832   ;;  %v4449_v7 = vmul.f32 %v10644_v24, %v4433_v15  ;;  %v4186_v59 = vpop.permute.xlu2 %4185  ;;  %v4342_v62 = vrot.slane %v4334_v32, 1 }
 0x592   :  { %v4089_v0 = vsel %vm4052_vm1, %v4081_v56, 0.0  ;;  %v4328_v12 = vadd.f32 %v4324_v61, %v4293_v5  ;;  %v4424_v31 = vsel %vm4421_vm3, %v4416_v19, %v4418_v6  ;;  %v4439_v56 = vmul.f32 %v10662_v40, %v4433_v15 }
 0x593   :  { %v4095_v50 = vmul.f32 %v10450_v8, %v4089_v0  ;;  %v4105_v30 = vmul.f32 %v10447_v35, %v4089_v0  ;;  %v4138_v35 = vsel %vm4136_vm9, %v10561_v53, %v10595_v23  ;;  %v4432_v6 = vsel %vm4053_vm12, %v4424_v31, 0.0 }
 0x594   :  { %v4146_v34 = vsel %vm4052_vm1, %v4138_v35, 0.0  ;;  %v4350_v13 = vadd.f32 %v4342_v62, %v4328_v12  ;;  %v4457_v26 = vrot.slane %v4449_v7, 1  ;;  %v6567_v55 = vunpack.i.h.bf16 %v10455_v11 }
 0x595   :  { %v4099_v48 = vadd.f32 %v4095_v50, %v10591_v43  ;;  %v4113_v51 = vrot.slane %v4105_v30, 1  ;;  %v4152_v17 = vmul.f32 %v10510_v3, %v4146_v34  ;;  %v4162_v16 = vmul.f32 %v10512_v1, %v4146_v34  ;;  %v4298_v7 = vpop.permute.xlu0 %4297 }
 0x596   :  { %v4438_v61 = vmul.f32 %v10662_v40, %v4432_v6  ;;  %v4448_v32 = vmul.f32 %v10644_v24, %v4432_v6  ;;  %v6577_v5 = vunpack.i.h.bf16 %v10514_v22  ;;  %vm11934_vm9 = vcmask 1043456  }
 0x597   :  { %v4121_v4 = vadd.f32 %v4113_v51, %v4099_v48  ;;  %v4170_v1 = vrot.slane %v4162_v16, 1 }
 0x598   :  { %v10638_v45 = vpop.permute.xlu1 %6579  ;;  %v4456_v12 = vrot.slane %v4448_v32, 1 }
 0x599   :  { %v6581_v9 = vunpack.i.l.bf16 %v10638_v45  ;;  %v4156_v50 = vadd.f32 %v4152_v17, %v4121_v4 }
 0x59b   :  { %v4368_v33 = vsel %vm4364_vm5, %v10557_v37, %v6581_v9  ;;  %v4178_v48 = vadd.f32 %v4170_v1, %v4156_v50 }
 0x59c   :  { %v4376_v27 = vsel %vm4054_vm11, %v4368_v33, 0.0  ;;  %vm11935_vm11 = vcmask 916480  }
 0x59d   :  { %v4382_v49 = vmul.f32 %v10656_v10, %v4376_v27  ;;  %v4392_v8 = vmul.f32 %v10658_v58, %v4376_v27  ;;  %v4239_v27 = vpop.permute.xlu2 %4238  ;;  %v4353_v16 = vpop.permute.xlu0 %4352 }
 0x59f   :  { %v4386_v60 = vadd.f32 %v4382_v49, %v4351_v63  ;;  %v4400_v25 = vrot.slane %v4392_v8, 1 }
 0x5a0   :  { %v4359_v2 = vpop.permute.xlu1 %4358 }
 0x5a1   :  { %v4367_v38 = vsel %vm4364_vm5, %v4359_v2, %v10557_v37  ;;  %v4408_v53 = vadd.f32 %v4400_v25, %v4386_v60  ;;  %v4309_v2 = vsel %vm4307_vm13, %v4298_v7, %v6577_v5 }
 0x5a2   :  { %v4375_v23 = vsel %vm4053_vm12, %v4367_v38, 0.0  ;;  %vm11932_vm12 = vcmask 908288  }
 0x5a3   :  { %v4381_v43 = vmul.f32 %v10656_v10, %v4375_v23  ;;  %v4391_v20 = vmul.f32 %v10658_v58, %v4375_v23  ;;  %v4443_v37 = vadd.f32 %v4439_v56, %v4408_v53  ;;  %v6572_v56 = vunpack.i.h.bf16 %v10488_v46 }
 0x5a5   :  { %v4385_v47 = vadd.f32 %v4381_v43, %v4350_v13  ;;  %v4399_v0 = vrot.slane %v4391_v20, 1  ;;  %v4465_v9 = vadd.f32 %v4457_v26, %v4443_v37  ;;  %v4355_v26 = vpop.permute.xlu2 %4354 }
 0x5a7   :  { %v4407_v15 = vadd.f32 %v4399_v0, %v4385_v47  ;;  %v4469_v30 = vsub.f32 0.0, %v4465_v9 }
 0x5a8   :  { %v4184_v33 = vpop.permute.xlu1 %4183 }
 0x5a9   :  { %v4442_v63 = vadd.f32 %v4438_v61, %v4407_v15  ;;  %v4194_v49 = vsel %vm4193_vm4, %v6567_v55, %v4184_v33  ;;  %v4195_v3 = vsel %vm4193_vm4, %v4184_v33, %v4186_v59  ;;  %v4476_v8 = vmul.f32 1.442695, %v4469_v30 }
 0x5aa   :  { %v4202_v11 = vsel %vm4051_vm2, %v4194_v49, 0.0  ;;  %v4203_v35 = vsel %vm4052_vm1, %v4195_v3, 0.0  ;;  %v4365_v61 = vsel %vm4364_vm5, %v4353_v16, %v4355_v26  ;;  %vm11933_vm4 = vcmp.lt.s32.totalorder %v7155_v29, 15 }
 0x5ab   :  { %v4208_v62 = vmul.f32 %v10520_v54, %v4202_v11  ;;  %v4209_v22 = vmul.f32 %v10520_v54, %v4203_v35  ;;  %v4218_v19 = vmul.f32 %v10506_v28, %v4202_v11  ;;  %6832 = vpow2.f32 %v4476_v8 }
 0x5ac   :  { %v4219_v59 = vmul.f32 %v10506_v28, %v4203_v35  ;;  %v4464_v51 = vadd.f32 %v4456_v12, %v4442_v63  ;;  %v4317_v54 = vsel %vm4052_vm1, %v4309_v2, 0.0 }
 0x5ad   :  { %v4212_v60 = vadd.f32 %v4208_v62, %v10608_v18  ;;  %v4226_v25 = vrot.slane %v4218_v19, 1  ;;  %v4213_v31 = vadd.f32 %v4209_v22, %v4178_v48  ;;  %v6582_v18 = vunpack.i.h.bf16 %v10638_v45 }
 0x5ae   :  { %v4227_v38 = vrot.slane %v4219_v59, 1  ;;  %v4468_v34 = vsub.f32 0.0, %v4464_v51  ;;  %v4333_v55 = vmul.f32 %v10625_v42, %v4317_v54  ;;  %v4323_v33 = vmul.f32 %v10623_v44, %v4317_v54 }
 0x5af   :  { %v4234_v53 = vadd.f32 %v4226_v25, %v4212_v60  ;;  %v4366_v15 = vsel %vm4364_vm5, %v4355_v26, %v6582_v18  ;;  %v11928_v60 = vld [vmem:[#allocation71_spill] sm:$0xff]  ;;  %vm11944_vm5 = vcmask 7168  }
 0x5b0   :  { %v4241_v23 = vpop.permute.xlu1 %4240  ;;  %v4235_v20 = vadd.f32 %v4227_v38, %v4213_v31  ;;  %v4474_v45 = vmul.f32 1.442695, %v4468_v34  ;;  %v4341_v63 = vrot.slane %v4333_v55, 1  ;;  %v4374_v49 = vsel %vm4052_vm1, %v4366_v15, 0.0  ;;  %v11929_v15 = vld [vmem:[#allocation70_spill] sm:$0xff] }
 0x5b1   :  { %v4251_v13 = vsel %vm4250_vm15, %v4239_v27, %v4241_v23  ;;  %v4252_v28 = vsel %vm4250_vm15, %v4241_v23, %v6572_v56  ;;  %v6833_v43 = vpop.eup %6832  ;;  %v4390_v48 = vmul.f32 %v10658_v58, %v4374_v49  ;;  %v6587_v31 = vunpack.i.h.bf16 %v10618_v14  ;;  %vm11940_vm15 = vmmov %vm11932_vm12 }
 0x5b2   :  { %v4259_v6 = vsel %vm4051_vm2, %v4251_v13, 0.0  ;;  %v4260_v46 = vsel %vm4052_vm1, %v4252_v28, 0.0  ;;  %v4481_v4 = vadd.f32 1.0, %v6833_v43 }
 0x5b3   :  { %v4265_v37 = vmul.f32 %v10604_v36, %v4259_v6  ;;  %v4266_v47 = vmul.f32 %v10604_v36, %v4260_v46  ;;  %v4275_v0 = vmul.f32 %v10600_v21, %v4259_v6  ;;  %v4276_v17 = vmul.f32 %v10600_v21, %v4260_v46 }
 0x5b4   :  { %6834 = vrcp.f32 %v4481_v4  ;;  %v4373_v21 = vsel %vm4051_vm2, %v4365_v61, 0.0  ;;  %v4398_v34 = vrot.slane %v4390_v48, 1  ;;  %v10798_v48 = vpop.permute.xlu0 %4520 }
 0x5b5   :  { %v4270_v9 = vadd.f32 %v4266_v47, %v4235_v20  ;;  %v4284_v32 = vrot.slane %v4276_v17, 1  ;;  %v4269_v50 = vadd.f32 %v4265_v37, %v4234_v53  ;;  %v4283_v30 = vrot.slane %v4275_v0, 1  ;;  %v4410_v53 = vpop.permute.xlu2 %4409 }
 0x5b6   :  { %6836 = vpow2.f32 %v4474_v45  ;;  %v4389_v62 = vmul.f32 %v10658_v58, %v4373_v21 }
 0x5b7   :  { %v4292_v36 = vadd.f32 %v4284_v32, %v4270_v9  ;;  %v4291_v11 = vadd.f32 %v4283_v30, %v4269_v50 }
 0x5b8   :  { %v4296_v5 = vpop.permute.xlu1 %4295  ;;  %v4397_v56 = vrot.slane %v4389_v62, 1 }
 0x5b9   :  { %v4308_v27 = vsel %vm4307_vm13, %v4296_v5, %v4298_v7  ;;  %v4327_v3 = vadd.f32 %v4323_v33, %v4292_v36  ;;  %v4380_v7 = vmul.f32 %v10656_v10, %v4374_v49  ;;  %v11930_v49 = vld [vmem:[#allocation68_spill] sm:$0xff]  ;;  %vm11941_vm13 = vmmov %vm11932_vm12 }
 0x5ba   :  { %v4316_v1 = vsel %vm4051_vm2, %v4308_v27, 0.0  ;;  %v6835_v8 = vpop.eup %6834 }
 0x5bb   :  { %v4322_v35 = vmul.f32 %v10623_v44, %v4316_v1  ;;  %v4332_v12 = vmul.f32 %v10625_v42, %v4316_v1  ;;  %v4489_v22 = vperm.slane %v6835_v8, 0  ;;  %v4349_v19 = vadd.f32 %v4341_v63, %v4327_v3  ;;  %v10761_v8 = vld [vmem:[#allocation2 + $0x38] sm:$0xff] }
 0x5bc   :  { %v6837_v2 = vpop.eup %6836  ;;  %v4379_v44 = vmul.f32 %v10656_v10, %v4373_v21 }
 0x5bd   :  { %v4326_v59 = vadd.f32 %v4322_v35, %v4291_v11  ;;  %v4340_v51 = vrot.slane %v4332_v12, 1  ;;  %v10732_v25 = vmul.f32 %v4489_v22, %v11928_v60  ;;  %v4384_v42 = vadd.f32 %v4380_v7, %v4349_v19  ;;  %v11931_v35 = vld [vmem:[#allocation69_spill] sm:$0xff]  ;;  %v4971_v7 = vld [vmem:[%s11105_s7] sm:$0xf] }
 0x5be   :  { %v4480_v43 = vadd.f32 1.0, %v6837_v2 }
 0x5bf   :  { %v4348_v38 = vadd.f32 %v4340_v51, %v4326_v59  ;;  %v6603_v54 = vpack.i.bf16 %v10266_v57, %v10732_v25  ;;  %v4406_v20 = vadd.f32 %v4398_v34, %v4384_v42 }
 0x5c0   :  { %v4412_v23 = vpop.permute.xlu1 %4411  ;;  %6838 = vrcp.f32 %v4480_v43 }
 0x5c1   :  { %v4383_v58 = vadd.f32 %v4379_v44, %v4348_v38  ;;  %v4422_v13 = vsel %vm4421_vm3, %v4410_v53, %v4412_v23  ;;  %v4423_v28 = vsel %vm4421_vm3, %v4412_v23, %v6587_v31  ;;  %6604 = vrot.lane.b32.xlu0 %v6603_v54, %s11569_s19  ;;  %vm11942_vm3 = vmmov %vm11932_vm12 }
 0x5c2   :  { %v4430_v14 = vsel %vm4051_vm2, %v4422_v13, 0.0  ;;  %v4431_v10 = vsel %vm4052_vm1, %v4423_v28, 0.0  ;;  %vm11936_vm2 = vcmask 924672   ;;  %vm11943_vm1 = vcmask 121856  }
 0x5c3   :  { %v4405_v18 = vadd.f32 %v4397_v56, %v4383_v58  ;;  %v4436_v6 = vmul.f32 %v10662_v40, %v4430_v14  ;;  %v4437_v57 = vmul.f32 %v10662_v40, %v4431_v10  ;;  %v4446_v46 = vmul.f32 %v10644_v24, %v4430_v14 }
 0x5c4   :  { %v4447_v26 = vmul.f32 %v10644_v24, %v4431_v10 }
 0x5c5   :  { %v4440_v4 = vadd.f32 %v4436_v6, %v4405_v18  ;;  %v4441_v37 = vadd.f32 %v4437_v57, %v4406_v20  ;;  %v4454_v47 = vrot.slane %v4446_v46, 1 }
 0x5c6   :  { %v4455_v0 = vrot.slane %v4447_v26, 1  ;;  %v6839_v32 = vpop.eup %6838 }
 0x5c7   :  { %v4462_v17 = vadd.f32 %v4454_v47, %v4440_v4  ;;  %v4488_v40 = vperm.slane %v6839_v32, 0 }
 0x5c8   :  { %v4463_v16 = vadd.f32 %v4455_v0, %v4441_v37 }
 0x5c9   :  { %v4466_v45 = vsub.f32 0.0, %v4462_v17  ;;  %6619 = vrot.lane.b32.xlu0 %v6603_v54, %s6957_s15  ;;  %v10752_v50 = vmul.f32 %v4488_v40, %v11929_v15 }
 0x5ca   :  { %v4467_v9 = vsub.f32 0.0, %v4463_v16 }
 0x5cb   :  { %v4470_v55 = vmul.f32 1.442695, %v4466_v45  ;;  %v6653_v5 = vpack.i.bf16 %v10732_v25, %v10752_v50 }
 0x5cc   :  { %v4472_v61 = vmul.f32 1.442695, %v4467_v9 }
 0x5cd   :  { %6840 = vpow2.f32 %v4470_v55 }
 0x5ce   :  { %6842 = vpow2.f32 %v4472_v61 }
 0x5d1   :  { %6634 = vrot.lane.b32.xlu0 %v6603_v54, %s11519_s27 }
 0x5d3   :  { %v6841_v24 = vpop.eup %6840 }
 0x5d4   :  { %v6843_v30 = vpop.eup %6842  ;;  %v4478_v33 = vadd.f32 1.0, %v6841_v24 }
 0x5d5   :  { %v4479_v36 = vadd.f32 1.0, %v6843_v30 }
 0x5d6   :  { %6844 = vrcp.f32 %v4478_v33 }
 0x5d7   :  { %6846 = vrcp.f32 %v4479_v36 }
 0x5d9   :  { %6654 = vrot.lane.b32.xlu0 %v6653_v5, %s11517_s18 }
 0x5dc   :  { %v6845_v21 = vpop.eup %6844 }
 0x5dd   :  { %v4486_v27 = vperm.slane %v6845_v21, 0  ;;  %v6847_v63 = vpop.eup %6846 }
 0x5de   :  { %v4487_v1 = vperm.slane %v6847_v63, 0 }
 0x5df   :  { %v10758_v3 = vmul.f32 %v4486_v27, %v11930_v49 }
 0x5e0   :  { %v10768_v12 = vmul.f32 %v4487_v1, %v11931_v35 }
 0x5e1   :  { %6659 = vrot.lane.b32.xlu0 %v6653_v5, %s11501_s2  ;;  %v6593_v11 = vpack.i.bf16 %v10758_v3, %v10761_v8 }
 0x5e2   :  { %v6608_v62 = vpack.i.bf16 %v10768_v12, %v10752_v50  ;;  %v6683_v22 = vpack.i.bf16 %v10761_v8, %v10768_v12  ;;  %v6688_v19 = vpack.i.bf16 %v10768_v12, %v10758_v3 }
 0x5e3   :  { %6594 = vrot.lane.b32.xlu2 %v6593_v11, %s11517_s18  ;;  %6589 = vrot.lane.b32.xlu1 %v6593_v11, %s11464_s16 }
 0x5e9   :  { %6664 = vrot.lane.b32.xlu0 %v6593_v11, %s6957_s15 }
 0x5eb   :  { %6599 = vrot.lane.b32.xlu2 %v6593_v11, %s11569_s19  ;;  %6609 = vrot.lane.b32.xlu1 %v6608_v62, %s11569_s19 }
 0x5f1   :  { %6684 = vrot.lane.b32.xlu0 %v6683_v22, %s11517_s18 }
 0x5f3   :  { %6614 = vrot.lane.b32.xlu2 %v6603_v54, %s11465_s14  ;;  %6624 = vrot.lane.b32.xlu1 %v6608_v62, %s11465_s14  ;;  %v10810_v54 = vpop.permute.xlu1 %4676 }
 0x5f9   :  { %4512 = vrot.lane.b32.xlu0 %v10761_v8, %s11501_s2 }
 0x5fb   :  { %6629 = vrot.lane.b32.xlu2 %v6608_v62, %s6957_s15  ;;  %6639 = vrot.lane.b32.xlu1 %v6608_v62, %s11519_s27 }
 0x603   :  { %6669 = vrot.lane.b32.xlu1 %v6653_v5, %s6951_s30  ;;  %6644 = vrot.lane.b32.xlu2 %v6653_v5, %s11464_s16 }
 0x60b   :  { %6674 = vrot.lane.b32.xlu1 %v6593_v11, %s11519_s27  ;;  %6649 = vrot.lane.b32.xlu2 %v6593_v11, %s11465_s14 }
 0x613   :  { %6689 = vrot.lane.b32.xlu1 %v6688_v19, %s11501_s2  ;;  %6679 = vrot.lane.b32.xlu2 %v6683_v22, %s11464_s16 }
 0x61b   :  { %4668 = vrot.lane.b32.xlu1 %v10761_v8, %s6951_s30  ;;  %6694 = vrot.lane.b32.xlu2 %v6688_v19, %s6951_s30 }
 0x623   :  { %4974 = vperm.xlu2 %6257, %v4971_v7  }
 0x633   :  { %v6605_v59 = vpop.permute.xlu0 %6604 }
 0x634   :  { %v6607_v51 = vunpack.i.h.bf16 %v6605_v59  ;;  %v6606_v60 = vunpack.i.l.bf16 %v6605_v59 }
 0x636   :  { %v4895_v2 = vsel %vm11932_vm12, %v6606_v60, %v6607_v51  ;;  %vm11945_vm12 = vcmp.lt.s32.totalorder %v11548_v52, 15 }
 0x637   :  { %v4907_v31 = vsel %vm11933_vm4, %v4895_v2, 0.0  ;;  %vm11946_vm4 = vcmp.lt.s32.totalorder %v7263_v39, 15 }
 0x638   :  { %v4969_v44 = vpack.c.bf16 %v4907_v31, %v4907_v31 }
 0x63a   :  { %v4990_v38 = vsel %vm11934_vm9, %v4969_v44, 0  ;;  %vm11947_vm9 = vcmp.lt.s32.totalorder %v7265_v41, 15 }
 0x63b   :  { %5034 = vmatpush.bf16.msra.mxu3 %v4990_v38  ;;  %v10804_v42 = vpop.permute.xlu0 %6619 }
 0x63c   :  { %v6622_v34 = vunpack.i.h.bf16 %v10804_v42  ;;  %v6621_v58 = vunpack.i.l.bf16 %v10804_v42 }
 0x63d   :  { %v10806_v56 = vpop.permute.xlu2 %6594 }
 0x63e   :  { %v4745_v20 = vsel %vm11935_vm11, %v6621_v58, %v6622_v34  ;;  %vm11949_vm11 = vcmask 1043456  }
 0x643   :  { %v10808_v53 = vpop.permute.xlu0 %6634 }
 0x644   :  { %v6637_v43 = vunpack.i.h.bf16 %v10808_v53  ;;  %v6636_v14 = vunpack.i.l.bf16 %v10808_v53 }
 0x645   :  { %v6600_v23 = vpop.permute.xlu2 %6599 }
 0x646   :  { %v4843_v46 = vsel %vm11937_vm6, %v6636_v14, %v6637_v43  ;;  %v6602_v61 = vunpack.i.h.bf16 %v6600_v23  ;;  %v6601_v32 = vunpack.i.l.bf16 %v6600_v23 }
 0x647   :  { %v6025_v4 = vpack.c.bf16 %v4843_v46, %v10732_v25 }
 0x64b   :  { %v10814_v13 = vpop.permute.xlu0 %6654 }
 0x64c   :  { %v6657_v16 = vunpack.i.h.bf16 %v10814_v13  ;;  %v6656_v45 = vunpack.i.l.bf16 %v10814_v13 }
 0x64d   :  { %v6615_v28 = vpop.permute.xlu2 %6614 }
 0x64e   :  { %v6617_v10 = vunpack.i.h.bf16 %v6615_v28  ;;  %v6616_v18 = vunpack.i.l.bf16 %v6615_v28  ;;  %v4791_v5 = vsel %vm11943_vm1, %v6656_v45, %v6657_v16 }
 0x650   :  { %v4635_v6 = vsel %vm11936_vm2, %v6616_v18, %v6617_v10  ;;  %vm11950_vm2 = vmmov %vm11949_vm11 }
 0x651   :  { %v6022_v57 = vpack.c.bf16 %v4745_v20, %v4635_v6  ;;  %vm11951_vm6 = vmmov %vm11950_vm2 }
 0x653   :  { %6023 = vmatpush.bf16.msk.msra.mxu3 %vm7199_vm8, %v6022_v57  ;;  %v10828_v0 = vpop.permute.xlu0 %6659 }
 0x655   :  { %v10826_v37 = vpop.permute.xlu1 %6589  ;;  %v6630_v47 = vpop.permute.xlu2 %6629 }
 0x656   :  { %v6631_v22 = vunpack.i.l.bf16 %v6630_v47  ;;  %v6632_v38 = vunpack.i.h.bf16 %v6630_v47 }
 0x657   :  { %6026 = vmatpush.bf16.msk.msra.mxu3 %vm7220_vm10, %v6025_v4 }
 0x65b   :  { %v6665_v21 = vpop.permute.xlu0 %6664 }
 0x65c   :  { %v6667_v19 = vunpack.i.h.bf16 %v6665_v21 }
 0x65d   :  { %v6610_v9 = vpop.permute.xlu1 %6609  ;;  %v6645_v55 = vpop.permute.xlu2 %6644 }
 0x65e   :  { %v6612_v40 = vunpack.i.h.bf16 %v6610_v9  ;;  %v6611_v24 = vunpack.i.l.bf16 %v6610_v9  ;;  %v6647_v15 = vunpack.i.h.bf16 %v6645_v55  ;;  %v6646_v25 = vunpack.i.l.bf16 %v6645_v55  ;;  %v11959_v55 = vld [vmem:[#allocation16_spill] sm:$0xff] }
 0x660   :  { %v4890_v30 = vsel %vm11940_vm15, %v6602_v61, %v6612_v40  ;;  %v4891_v33 = vsel %vm11941_vm13, %v6612_v40, %v6601_v32  ;;  %v4894_v36 = vsel %vm11942_vm3, %v6611_v24, %v6606_v60  ;;  %v4583_v27 = vsel %vm11944_vm5, %v6646_v25, %v6647_v15 }
 0x661   :  { %v4902_v63 = vsel %vm11945_vm12, %v4890_v30, 0.0  ;;  %v4903_v49 = vsel %vm11946_vm4, %v4891_v33, 0.0  ;;  %v6028_v1 = vpack.c.bf16 %v4583_v27, %v4791_v5  ;;  %v4906_v62 = vsel %vm11947_vm9, %v4894_v36, 0.0  ;;  %v11965_v33 = vld [vmem:[#allocation18_spill] sm:$0xff] }
 0x662   :  { %v4966_v11 = vpack.c.bf16 %v4902_v63, %v4902_v63  ;;  %v4967_v35 = vpack.c.bf16 %v4903_v49, %v4903_v49  ;;  %v6666_v60 = vunpack.i.l.bf16 %v6665_v21  ;;  %v4968_v2 = vpack.c.bf16 %v4906_v62, %v4906_v62  ;;  %v4970_v62 = vld [vmem:[%s11104_s6] sm:$0x3] }
 0x663   :  { %6029 = vmatpush.bf16.msk.msra.mxu3 %vm7248_vm14, %v6028_v1  ;;  %vm11952_vm15 = vcmask 916480   ;;  %vm11954_vm3 = vcmask 924672   ;;  %vm11960_vm4 = vnez %v11959_v55  ;;  %v6591_v32 = vunpack.i.l.bf16 %v10826_v37  ;;  %v11968_v1 = vld [vmem:[#allocation21_spill] sm:$0xff] }
 0x664   :  { %v4981_v59 = vsel %vm11949_vm11, %v4966_v11, 0  ;;  %v4984_v51 = vsel %vm11950_vm2, %v4967_v35, 0  ;;  %v4987_v34 = vsel %vm11951_vm6, %v4968_v2, 0  ;;  %v4744_v43 = vsel %vm11952_vm15, %v6631_v22, %v6621_v58  ;;  %vm11953_vm13 = vmmov %vm11952_vm15  ;;  %v11961_v58 = vld [vmem:[#allocation15_spill] sm:$0xff] }
 0x665   :  { %4995 = vmatpush.bf16.msra.mxu0 %v4981_v59  ;;  %5008 = vmatpush.bf16.msra.mxu1 %v4984_v51  ;;  %v6625_v31 = vpop.permute.xlu1 %6624  ;;  %v6650_v44 = vpop.permute.xlu2 %6649  ;;  %v4740_v10 = vsel %vm11953_vm13, %v6667_v19, %v6632_v38  ;;  %vm11955_vm1 = vmmov %vm11953_vm13  ;;  %vm11962_vm9 = vnez %v11961_v58  ;;  %vm11963_vm11 = vcmask 1039360   ;;  %v6596_v15 = vunpack.i.l.bf16 %v10806_v56 }
 0x666   :  { %v6627_v42 = vunpack.i.h.bf16 %v6625_v31  ;;  %v6626_v23 = vunpack.i.l.bf16 %v6625_v31  ;;  %v6652_v13 = vunpack.i.h.bf16 %v6650_v44  ;;  %v6651_v28 = vunpack.i.l.bf16 %v6650_v44  ;;  %5021 = vmatpush.bf16.msra.mxu2 %v4987_v34  ;;  %vm11956_vm5 = vmmov %vm11954_vm3 }
 0x667   :  { %v4741_v6 = vsel %vm11955_vm1, %v6632_v38, %v6666_v60  ;;  %vm11957_vm12 = vmmov %vm11954_vm3  ;;  %vm11964_vm2 = vcmask 7168   ;;  %vm11966_vm6 = vnez %v11965_v33  ;;  %vm11967_vm15 = vcmask 121856  }
 0x668   :  { %v4634_v20 = vsel %vm11954_vm3, %v6626_v23, %v6616_v18  ;;  %v4630_v46 = vsel %vm11956_vm5, %v6652_v13, %v6627_v42  ;;  %v4631_v4 = vsel %vm11957_vm12, %v6627_v42, %v6651_v28  ;;  %v4582_v30 = vsel %vm11964_vm2, %v6591_v32, %v6646_v25 }
 0x669   :  { %v6010_v57 = vpack.c.bf16 %v4744_v43, %v4634_v20  ;;  %v5986_v47 = vpack.c.bf16 %v4740_v10, %v4630_v46  ;;  %v5998_v16 = vpack.c.bf16 %v4741_v6, %v4631_v4  ;;  %v4790_v36 = vsel %vm11967_vm15, %v6596_v15, %v6656_v45  ;;  %v11980_v20 = vld [vmem:[#allocation17_spill] sm:$0xff] }
 0x66a   :  { %v6662_v5 = vunpack.i.h.bf16 %v10828_v0  ;;  %v6661_v21 = vunpack.i.l.bf16 %v10828_v0  ;;  %v6016_v27 = vpack.c.bf16 %v4582_v30, %v4790_v36  ;;  %vm11969_vm13 = vnez %v11968_v1 }
 0x66b   :  { %5987 = vmatpush.bf16.msk.msra.mxu0 %vm7333_vm0, %v5986_v47  ;;  %5999 = vmatpush.bf16.msk.msra.mxu1 %vm11960_vm4, %v5998_v16  ;;  %vm11970_vm3 = vcmask 138240   ;;  %vm11972_vm5 = vcmask 130048   ;;  %v6592_v2 = vunpack.i.h.bf16 %v10826_v37  ;;  %vm11976_vm15 = vcmask 1039360   ;;  %v11982_v37 = vld [vmem:[#allocation19_spill] sm:$0xff] }
 0x66c   :  { %6011 = vmatpush.bf16.msk.msra.mxu2 %vm11962_vm9, %v6010_v57  ;;  %vm11971_vm1 = vmmov %vm11970_vm3  ;;  %v6597_v28 = vunpack.i.h.bf16 %v10806_v56 }
 0x66d   :  { %v6640_v61 = vpop.permute.xlu1 %6639  ;;  %v4531_v25 = vsel %vm11971_vm1, %v6661_v21, %v6662_v5  ;;  %vm11973_vm12 = vmmov %vm11972_vm5  ;;  %vm11978_vm1 = vcmask 7168  }
 0x66e   :  { %v6641_v18 = vunpack.i.l.bf16 %v6640_v61  ;;  %v6642_v22 = vunpack.i.h.bf16 %v6640_v61  ;;  %v11986_v61 = vld [vmem:[#allocation20_spill] sm:$0xff] }
 0x670   :  { %v4842_v40 = vsel %vm11963_vm11, %v6641_v18, %v6636_v14  ;;  %v6680_v14 = vpop.permute.xlu2 %6679  ;;  %vm11974_vm11 = vcmask 588800   ;;  %v11988_v18 = vld [vmem:[#allocation22_spill] sm:$0xff] }
 0x671   :  { %v6013_v24 = vpack.c.bf16 %v4842_v40, %v10752_v50  ;;  %v4530_v50 = vsel %vm11970_vm3, %v10798_v48, %v6661_v21  ;;  %v6685_v48 = vpop.permute.xlu0 %6684  ;;  %v6682_v59 = vunpack.i.h.bf16 %v6680_v14  ;;  %v6681_v51 = vunpack.i.l.bf16 %v6680_v14  ;;  %vm11975_vm2 = vmmov %vm11974_vm11 }
 0x672   :  { %v6687_v31 = vunpack.i.h.bf16 %v6685_v48  ;;  %v6686_v44 = vunpack.i.l.bf16 %v6685_v48  ;;  %vm11977_vm3 = vmmov %vm11976_vm15 }
 0x673   :  { %6014 = vmatpush.bf16.msk.msra.mxu2 %vm11966_vm6, %v6013_v24  ;;  %v4578_v43 = vsel %vm11978_vm1, %v6682_v59, %v6592_v2 }
 0x675   :  { %v6670_v63 = vpop.permute.xlu1 %6669 }
 0x676   :  { %v6672_v53 = vunpack.i.h.bf16 %v6670_v63  ;;  %v6671_v49 = vunpack.i.l.bf16 %v6670_v63 }
 0x677   :  { %6017 = vmatpush.bf16.msk.msra.mxu2 %vm11969_vm13, %v6016_v27 }
 0x678   :  { %v4686_v45 = vsel %vm11972_vm5, %v10810_v54, %v6671_v49  ;;  %v4687_v11 = vsel %vm11973_vm12, %v6671_v49, %v6672_v53  ;;  %v6695_v23 = vpop.permute.xlu2 %6694  ;;  %vm11979_vm5 = vmmov %vm11978_vm1  ;;  %vm11981_vm12 = vnez %v11980_v20  ;;  %vm11989_vm1 = vnez %v11988_v18 }
 0x679   :  { %v6019_v35 = vpack.c.bf16 %v4686_v45, %v4530_v50  ;;  %v6031_v0 = vpack.c.bf16 %v4687_v11, %v4531_v25  ;;  %v4579_v10 = vsel %vm11979_vm5, %v6592_v2, %v6681_v51  ;;  %v6697_v46 = vunpack.i.h.bf16 %v6695_v23  ;;  %v4513_v15 = vpop.permute.xlu0 %4512 }
 0x67a   :  { %vm11990_vm5 = vcmask 130048  }
 0x67b   :  { %6020 = vmatpush.bf16.msk.msra.mxu2 %vm11962_vm9, %v6019_v35  ;;  %6032 = vmatpush.bf16.msk.msra.mxu3 %vm7199_vm8, %v6031_v0 }
 0x67d   :  { %v6675_v19 = vpop.permute.xlu1 %6674 }
 0x67e   :  { %v6677_v54 = vunpack.i.h.bf16 %v6675_v19  ;;  %v6676_v60 = vunpack.i.l.bf16 %v6675_v19  ;;  %5874 = vmatmul.msk.bf16.vlgmr.msra.gmra.mxu2 %vm11974_vm11, %v4970_v62  ;;  %5875 = vmatmul.msk.bf16.vlgmr.msra.gmra.mxu3 %vm11975_vm2, %v4970_v62  ;;  %vm11983_vm11 = vnez %v11982_v37  ;;  %vm11984_vm2 = vcmask 121856  }
 0x67f   :  { %v4786_v6 = vsel %vm11984_vm2, %v6687_v31, %v6597_v28 }
 0x680   :  { %v4838_v38 = vsel %vm11976_vm15, %v6677_v54, %v6642_v22  ;;  %v4839_v42 = vsel %vm11977_vm3, %v6642_v22, %v6676_v60  ;;  %vm11985_vm15 = vmmov %vm11984_vm2  ;;  %v5992_v4 = vpack.c.bf16 %v4578_v43, %v4786_v6  ;;  %vm11987_vm3 = vnez %v11986_v61  ;;  %v4975_v27 = vpop.permute.xlu2 %4974 }
 0x681   :  { %v5989_v34 = vpack.c.bf16 %v4838_v38, %v10758_v3  ;;  %v6001_v13 = vpack.c.bf16 %v4839_v42, %v10768_v12  ;;  %v4787_v57 = vsel %vm11985_vm15, %v6597_v28, %v6686_v44  ;;  %v6696_v3 = vunpack.i.l.bf16 %v6695_v23  ;;  %vm11992_vm2 = vmmov %vm11991_vm7 }
 0x682   :  { %v6004_v12 = vpack.c.bf16 %v4579_v10, %v4787_v57  ;;  %vm11993_vm15 = vmmov %vm11990_vm5 }
 0x683   :  { %5990 = vmatpush.bf16.msk.msra.mxu0 %vm11981_vm12, %v5989_v34  ;;  %6002 = vmatpush.bf16.msk.msra.mxu1 %vm11983_vm11, %v6001_v13  ;;  %v4683_v32 = vsel %vm11990_vm5, %v6696_v3, %v6697_v46  ;;  %vm11994_vm11 = vcmask 588800   ;;  %vm12007_vm12 = vcmp.lt.s32.totalorder %v7265_v41, 15 }
 0x685   :  { %v6690_v47 = vpop.permute.xlu1 %6689 }
 0x686   :  { %v6692_v56 = vunpack.i.h.bf16 %v6690_v47  ;;  %v6691_v16 = vunpack.i.l.bf16 %v6690_v47 }
 0x687   :  { %5993 = vmatpush.bf16.msk.msra.mxu0 %vm11987_vm3, %v5992_v4  ;;  %6005 = vmatpush.bf16.msk.msra.mxu1 %vm11989_vm1, %v6004_v12  ;;  %vm11995_vm1 = vmmov %vm11994_vm11  ;;  %vm12006_vm3 = vcmp.lt.s32.totalorder %v7263_v39, 15 }
 0x688   :  { %v4527_v40 = vsel %vm11991_vm7, %v6691_v16, %v6692_v56  ;;  %v4526_v36 = vsel %vm11992_vm2, %v4513_v15, %v6691_v16  ;;  %vm11996_vm7 = vcmask 1043456   ;;  %vm12000_vm2 = vcmask 908288  }
 0x689   :  { %v6007_v24 = vpack.c.bf16 %v4683_v32, %v4527_v40 }
 0x68b   :  { %6008 = vmatpush.bf16.msk.msra.mxu1 %vm11960_vm4, %v6007_v24 }
 0x68d   :  { %v4669_v30 = vpop.permute.xlu1 %4668 }
 0x68e   :  { %v4682_v5 = vsel %vm11993_vm15, %v4669_v30, %v6696_v3  ;;  %5873 = vmatmul.msk.bf16.vlgmr.msra.gmra.mxu1 %vm11994_vm11, %v4970_v62  ;;  %vm11997_vm11 = vmmov %vm11996_vm7 }
 0x68f   :  { %v5995_v21 = vpack.c.bf16 %v4682_v5, %v4526_v36  ;;  %vm12001_vm15 = vmmov %vm12000_vm2 }
 0x691   :  { %5996 = vmatpush.bf16.msk.msra.mxu0 %vm7333_vm0, %v5995_v21 }
 0x694   :  { %5872 = vmatmul.msk.bf16.vlgmr.msra.gmra.mxu0 %vm11995_vm1, %v4970_v62  ;;  %vm11998_vm1 = vmmov %vm11996_vm7 }
 0x695   :  { %vm11999_vm5 = vmmov %vm11998_vm1 }
 0x701   :  { %v5027_v63 = vpop.f32.mrf.mxu2  ;;  %v5040_v53 = vpop.f32.mrf.mxu3 }
 0x702   :  { %v5028_v49 = vadd.f32 %v5027_v63, %v4975_v27  ;;  %v5041_v14 = vadd.f32 %v5040_v53, %v4975_v27 }
 0x704   :  { %v5046_v50 = vsub.f32 0.0, %v5028_v49  ;;  %v5047_v25 = vsub.f32 0.0, %v5041_v14 }
 0x706   :  { %v5052_v45 = vmul.f32 1.442695, %v5046_v50  ;;  %v5054_v11 = vmul.f32 1.442695, %v5047_v25 }
 0x708   :  { %6848 = vpow2.f32 %v5052_v45 }
 0x709   :  { %6850 = vpow2.f32 %v5054_v11  ;;  %v5042_v35 = vpop.f32.mrf.mxu3  ;;  %v5029_v0 = vpop.f32.mrf.mxu2 }
 0x70b   :  { %v5014_v48 = vpop.f32.mrf.mxu1 }
 0x70c   :  { %v5015_v22 = vadd.f32 %v5014_v48, %v4975_v27 }
 0x70e   :  { %v6849_v19 = vpop.eup %6848  ;;  %v5045_v59 = vsub.f32 0.0, %v5015_v22 }
 0x70f   :  { %v6851_v51 = vpop.eup %6850  ;;  %v5058_v54 = vadd.f32 1.0, %v6849_v19 }
 0x710   :  { %v5059_v62 = vadd.f32 1.0, %v6851_v51  ;;  %v5050_v60 = vmul.f32 1.442695, %v5045_v59 }
 0x711   :  { %6852 = vrcp.f32 %v5058_v54  ;;  %v5001_v2 = vpop.f32.mrf.mxu0 }
 0x712   :  { %6854 = vrcp.f32 %v5059_v62  ;;  %v5002_v31 = vadd.f32 %v5001_v2, %v4975_v27  ;;  %v5647_v27 = vld [vmem:[%s11109_s11] sm:$0x7] }
 0x713   :  { %6856 = vpow2.f32 %v5050_v60  ;;  %v5016_v44 = vpop.f32.mrf.mxu1 }
 0x714   :  { %v5044_v38 = vsub.f32 0.0, %v5002_v31 }
 0x716   :  { %v5048_v42 = vmul.f32 1.442695, %v5044_v38 }
 0x717   :  { %v6853_v23 = vpop.eup %6852 }
 0x718   :  { %v6855_v34 = vpop.eup %6854  ;;  %v5066_v13 = vmul.f32 %v6853_v23, %v5028_v49  ;;  %6858 = vpow2.f32 %v5048_v42 }
 0x719   :  { %v6857_v28 = vpop.eup %6856  ;;  %v5067_v43 = vmul.f32 %v6855_v34, %v5041_v14  ;;  %v5003_v10 = vpop.f32.mrf.mxu0 }
 0x71a   :  { %v10920_v6 = vsel %vm11996_vm7, %v5066_v13, 0.0  ;;  %v5057_v57 = vadd.f32 1.0, %v6857_v28  ;;  %vm12002_vm7 = vmmov %vm12000_vm2 }
 0x71b   :  { %5074 = vst [vmem:[#allocation2 + $0x10] sm:$0xff] %v10920_v6  ;;  %v10924_v46 = vsel %vm11997_vm11, %v5067_v43, 0.0  ;;  %vm12003_vm11 = vmmov %vm12000_vm2 }
 0x71c   :  { %5075 = vst [vmem:[#allocation2 + $0x30] sm:$0xff] %v10924_v46  ;;  %6860 = vrcp.f32 %v5057_v57  ;;  %v6723_v15 = vpack.i.bf16 %v10761_v8, %v10924_v46  ;;  %v6773_v36 = vpack.i.bf16 %v10924_v46, %v10920_v6 }
 0x71e   :  { %v6859_v3 = vpop.eup %6858 }
 0x71f   :  { %v5056_v4 = vadd.f32 1.0, %v6859_v3 }
 0x721   :  { %6862 = vrcp.f32 %v5056_v4 }
 0x722   :  { %v6861_v12 = vpop.eup %6860 }
 0x723   :  { %v5065_v47 = vmul.f32 %v6861_v12, %v5015_v22 }
 0x725   :  { %v10928_v56 = vsel %vm11998_vm1, %v5065_v47, 0.0  ;;  %vm12004_vm1 = vcmp.lt.s32.totalorder %v7155_v29, 15 }
 0x726   :  { %5073 = vst [vmem:[#allocation2 + $0x8] sm:$0xff] %v10928_v56  ;;  %v6728_v30 = vpack.i.bf16 %v10928_v56, %v10920_v6  ;;  %v6788_v5 = vpack.i.bf16 %v10761_v8, %v10928_v56 }
 0x727   :  { %v6863_v16 = vpop.eup %6862 }
 0x728   :  { %v5064_v32 = vmul.f32 %v6863_v16, %v5002_v31 }
 0x72a   :  { %v10932_v40 = vsel %vm11999_vm5, %v5064_v32, 0.0  ;;  %vm12005_vm5 = vcmp.lt.s32.totalorder %v11548_v52, 15 }
 0x72b   :  { %5072 = vst [vmem:[#allocation2 + $0x18] sm:$0xff] %v10932_v40  ;;  %v6698_v24 = vpack.i.bf16 %v10932_v40, %v10761_v8  ;;  %v6808_v21 = vpack.i.bf16 %v10928_v56, %v10932_v40 }
 0x72d   :  { %6699 = vrot.lane.b32.xlu2 %v6698_v24, %s11569_s19  ;;  %6709 = vrot.lane.b32.xlu0 %v6698_v24, %s11517_s18 }
 0x72e   :  { %6719 = vrot.lane.b32.xlu1 %v6698_v24, %s6957_s15 }
 0x735   :  { %6704 = vrot.lane.b32.xlu2 %v6698_v24, %s11464_s16  ;;  %6724 = vrot.lane.b32.xlu0 %v6723_v15, %s11569_s19 }
 0x736   :  { %6729 = vrot.lane.b32.xlu1 %v6728_v30, %s11569_s19 }
 0x73d   :  { %6714 = vrot.lane.b32.xlu2 %v6698_v24, %s11465_s14  ;;  %6739 = vrot.lane.b32.xlu0 %v6723_v15, %s6957_s15 }
 0x73e   :  { %6744 = vrot.lane.b32.xlu1 %v6728_v30, %s11465_s14 }
 0x745   :  { %5254 = vrot.lane.b32.xlu0 %v10761_v8, %s6951_s30  ;;  %6734 = vrot.lane.b32.xlu2 %v6723_v15, %s11465_s14 }
 0x746   :  { %6764 = vrot.lane.b32.xlu1 %v6728_v30, %s11519_s27 }
 0x74d   :  { %6759 = vrot.lane.b32.xlu0 %v6723_v15, %s11519_s27  ;;  %6749 = vrot.lane.b32.xlu2 %v6728_v30, %s6957_s15 }
 0x74e   :  { %6774 = vrot.lane.b32.xlu1 %v6773_v36, %s11517_s18 }
 0x755   :  { %6754 = vrot.lane.b32.xlu2 %v6698_v24, %s11501_s2  ;;  %6769 = vrot.lane.b32.xlu0 %v6773_v36, %s11464_s16 }
 0x756   :  { %6779 = vrot.lane.b32.xlu1 %v6773_v36, %s11501_s2 }
 0x75d   :  { %6789 = vrot.lane.b32.xlu2 %v6788_v5, %s11464_s16  ;;  %6794 = vrot.lane.b32.xlu0 %v6773_v36, %s6951_s30 }
 0x75e   :  { %6784 = vrot.lane.b32.xlu1 %v6698_v24, %s11519_s27 }
 0x765   :  { %6809 = vrot.lane.b32.xlu2 %v6808_v21, %s6951_s30  ;;  %6799 = vrot.lane.b32.xlu0 %v6788_v5, %s11517_s18 }
 0x766   :  { %6804 = vrot.lane.b32.xlu1 %v6788_v5, %s11501_s2 }
 0x76d   :  { %5650 = vperm.xlu2 %6257, %v5647_v27   ;;  %5246 = vrot.lane.b32.xlu0 %v10761_v8, %s6951_s30 }
 0x787   :  { %v6700_v63 = vpop.permute.xlu2 %6699 }
 0x788   :  { %v6702_v48 = vunpack.i.h.bf16 %v6700_v63  ;;  %v6701_v22 = vunpack.i.l.bf16 %v6700_v63 }
 0x78f   :  { %v10977_v53 = vpop.permute.xlu2 %6704 }
 0x797   :  { %v6715_v49 = vpop.permute.xlu2 %6714 }
 0x798   :  { %v6717_v10 = vunpack.i.h.bf16 %v6715_v49  ;;  %v6716_v15 = vunpack.i.l.bf16 %v6715_v49 }
 0x79f   :  { %v10979_v14 = vpop.permute.xlu0 %6709  ;;  %v6735_v25 = vpop.permute.xlu2 %6734 }
 0x7a0   :  { %v6720_v50 = vpop.permute.xlu1 %6719  ;;  %v6737_v51 = vunpack.i.h.bf16 %v6735_v25  ;;  %v6736_v34 = vunpack.i.l.bf16 %v6735_v25  ;;  %v6712_v58 = vunpack.i.h.bf16 %v10979_v14 }
 0x7a1   :  { %v6722_v29 = vunpack.i.h.bf16 %v6720_v50  ;;  %v6721_v47 = vunpack.i.l.bf16 %v6720_v50 }
 0x7a7   :  { %v6725_v45 = vpop.permute.xlu0 %6724  ;;  %v6750_v2 = vpop.permute.xlu2 %6749 }
 0x7a8   :  { %v6727_v11 = vunpack.i.h.bf16 %v6725_v45  ;;  %v6726_v35 = vunpack.i.l.bf16 %v6725_v45  ;;  %v6730_v0 = vpop.permute.xlu1 %6729  ;;  %v6752_v57 = vunpack.i.h.bf16 %v6750_v2  ;;  %v6751_v41 = vunpack.i.l.bf16 %v6750_v2 }
 0x7a9   :  { %v6732_v19 = vunpack.i.h.bf16 %v6730_v0  ;;  %v6731_v59 = vunpack.i.l.bf16 %v6730_v0 }
 0x7aa   :  { %v5473_v54 = vsel %vm12000_vm2, %v6726_v35, %v6727_v11  ;;  %vm12008_vm2 = vcmask 1043456  }
 0x7ab   :  { %v5468_v8 = vsel %vm12001_vm15, %v6702_v48, %v6732_v19  ;;  %v5469_v62 = vsel %vm12002_vm7, %v6732_v19, %v6701_v22  ;;  %v5472_v60 = vsel %vm12003_vm11, %v6731_v59, %v6726_v35  ;;  %v5485_v31 = vsel %vm12004_vm1, %v5473_v54, 0.0  ;;  %vm12009_vm15 = vmmov %vm12008_vm2 }
 0x7ac   :  { %v5547_v44 = vpack.c.bf16 %v5485_v31, %v5485_v31  ;;  %v5480_v38 = vsel %vm12005_vm5, %v5468_v8, 0.0  ;;  %v5481_v42 = vsel %vm12006_vm3, %v5469_v62, 0.0  ;;  %v5484_v23 = vsel %vm12007_vm12, %v5472_v60, 0.0  ;;  %vm12010_vm7 = vmmov %vm12008_vm2 }
 0x7ad   :  { %v5544_v13 = vpack.c.bf16 %v5480_v38, %v5480_v38  ;;  %v5545_v28 = vpack.c.bf16 %v5481_v42, %v5481_v42  ;;  %v5546_v43 = vpack.c.bf16 %v5484_v23, %v5484_v23  ;;  %vm12011_vm11 = vmmov %vm12008_vm2  ;;  %vm12012_vm12 = vcmask 924672  }
 0x7ae   :  { %v5568_v3 = vsel %vm12008_vm2, %v5547_v44, 0  ;;  %v5213_v30 = vsel %vm12012_vm12, %v6736_v34, %v6737_v51  ;;  %vm12013_vm3 = vcmask 916480  }
 0x7af   :  { %5612 = vmatpush.bf16.msrb.mxu3 %v5568_v3  ;;  %v6740_v4 = vpop.permute.xlu0 %6739  ;;  %v5559_v52 = vsel %vm12009_vm15, %v5544_v13, 0  ;;  %v5562_v12 = vsel %vm12010_vm7, %v5545_v28, 0  ;;  %v5565_v39 = vsel %vm12011_vm11, %v5546_v43, 0  ;;  %v5318_v21 = vsel %vm12013_vm3, %v6722_v29, %v6752_v57  ;;  %vm12014_vm1 = vmmov %vm12013_vm3  ;;  %v11015_v31 = vpop.permute.xlu2 %6754 }
 0x7b0   :  { %v6742_v16 = vunpack.i.h.bf16 %v6740_v4  ;;  %v6741_v32 = vunpack.i.l.bf16 %v6740_v4  ;;  %5573 = vmatpush.bf16.msrb.mxu0 %v5559_v52  ;;  %5586 = vmatpush.bf16.msrb.mxu1 %v5562_v12  ;;  %v6745_v24 = vpop.permute.xlu1 %6744  ;;  %v5319_v27 = vsel %vm12014_vm1, %v6752_v57, %v6721_v47  ;;  %vm12015_vm5 = vmmov %vm12014_vm1  ;;  %v6706_v28 = vunpack.i.l.bf16 %v10977_v53 }
 0x7b1   :  { %5599 = vmatpush.bf16.msrb.mxu2 %v5565_v39  ;;  %v6747_v36 = vunpack.i.h.bf16 %v6745_v24  ;;  %v6746_v5 = vunpack.i.l.bf16 %v6745_v24  ;;  %vm12016_vm2 = vmmov %vm12014_vm1  ;;  %vm12022_vm1 = vcmask 121856  }
 0x7b2   :  { %v5322_v63 = vsel %vm12015_vm5, %v6751_v41, %v6741_v32  ;;  %v5323_v50 = vsel %vm12016_vm2, %v6741_v32, %v6742_v16  ;;  %vm12017_vm15 = vmmov %vm12012_vm12  ;;  %v6756_v41 = vunpack.i.l.bf16 %v11015_v31  ;;  %vm12026_vm2 = vcmask 138240  }
 0x7b3   :  { %v6070_v25 = vpack.c.bf16 %v5323_v50, %v5213_v30  ;;  %v5208_v45 = vsel %vm12017_vm15, %v6717_v10, %v6747_v36  ;;  %vm12018_vm7 = vmmov %vm12012_vm12  ;;  %vm12020_vm12 = vcmask 1039360  }
 0x7b4   :  { %v5209_v11 = vsel %vm12018_vm7, %v6747_v36, %v6716_v15  ;;  %vm12019_vm11 = vmmov %vm12018_vm7  ;;  %v6034_v35 = vpack.c.bf16 %v5318_v21, %v5208_v45  ;;  %vm12028_vm7 = vcmask 130048  }
 0x7b5   :  { %v5212_v49 = vsel %vm12019_vm11, %v6746_v5, %v6736_v34  ;;  %v6046_v0 = vpack.c.bf16 %v5319_v27, %v5209_v11  ;;  %6071 = vmatpush.bf16.msk.msrb.mxu3 %vm7199_vm8, %v6070_v25  ;;  %vm12021_vm3 = vmmov %vm12020_vm12  ;;  %v5549_v34 = vld [vmem:[%s11107_s9] sm:$0x3] }
 0x7b6   :  { %v6058_v48 = vpack.c.bf16 %v5322_v63, %v5212_v49  ;;  %6035 = vmatpush.bf16.msk.msrb.mxu0 %vm7333_vm0, %v6034_v35  ;;  %5552 = vperm.xlu1 %6813, %v5549_v34   ;;  %vm12027_vm15 = vmmov %vm12026_vm2 }
 0x7b7   :  { %6047 = vmatpush.bf16.msk.msrb.mxu1 %vm11960_vm4, %v6046_v0  ;;  %v5255_v22 = vpop.permute.xlu0 %5254  ;;  %v6790_v52 = vpop.permute.xlu2 %6789  ;;  %vm12031_vm11 = vmmov %vm12021_vm3  ;;  %v5548_v0 = vld [vmem:[%s11106_s8] sm:$0x1] }
 0x7b8   :  { %6059 = vmatpush.bf16.msk.msrb.mxu2 %vm11962_vm9, %v6058_v48  ;;  %v6765_v19 = vpop.permute.xlu1 %6764  ;;  %v6792_v49 = vunpack.i.h.bf16 %v6790_v52  ;;  %v6791_v35 = vunpack.i.l.bf16 %v6790_v52 }
 0x7b9   :  { %v6766_v51 = vunpack.i.l.bf16 %v6765_v19  ;;  %v6767_v15 = vunpack.i.h.bf16 %v6765_v19 }
 0x7bf   :  { %v6760_v59 = vpop.permute.xlu0 %6759 }
 0x7c0   :  { %v6762_v54 = vunpack.i.h.bf16 %v6760_v59  ;;  %v6761_v8 = vunpack.i.l.bf16 %v6760_v59  ;;  %v6775_v62 = vpop.permute.xlu1 %6774  ;;  %v6757_v59 = vunpack.i.h.bf16 %v11015_v31 }
 0x7c1   :  { %v6777_v42 = vunpack.i.h.bf16 %v6775_v62  ;;  %v6776_v23 = vunpack.i.l.bf16 %v6775_v62 }
 0x7c2   :  { %v5420_v60 = vsel %vm12020_vm12, %v6766_v51, %v6761_v8  ;;  %v5421_v2 = vsel %vm12021_vm3, %v6761_v8, %v6762_v54  ;;  %vm12032_vm12 = vnez %v11980_v20 }
 0x7c3   :  { %v6061_v44 = vpack.c.bf16 %v5420_v60, %v10920_v6  ;;  %v6073_v38 = vpack.c.bf16 %v5421_v2, %v10924_v46  ;;  %v6711_v6 = vunpack.i.l.bf16 %v10979_v14 }
 0x7c5   :  { %6062 = vmatpush.bf16.msk.msrb.mxu2 %vm11966_vm6, %v6061_v44  ;;  %6074 = vmatpush.bf16.msk.msrb.mxu3 %vm7220_vm10, %v6073_v38  ;;  %v5368_v33 = vsel %vm12022_vm1, %v6711_v6, %v6776_v23  ;;  %vm12023_vm6 = vmmov %vm12022_vm1  ;;  %vm12024_vm10 = vcmask 7168  }
 0x7c6   :  { %v5369_v17 = vsel %vm12023_vm6, %v6776_v23, %v6777_v42  ;;  %vm12025_vm5 = vmmov %vm12024_vm10 }
 0x7c7   :  { %v6770_v13 = vpop.permute.xlu0 %6769  ;;  %vm12036_vm1 = vmmov %vm12025_vm5 }
 0x7c8   :  { %v6772_v43 = vunpack.i.h.bf16 %v6770_v13  ;;  %v6771_v46 = vunpack.i.l.bf16 %v6770_v13  ;;  %v6780_v10 = vpop.permute.xlu1 %6779  ;;  %vm12037_vm6 = vmmov %vm12036_vm1 }
 0x7c9   :  { %v6782_v12 = vunpack.i.h.bf16 %v6780_v10  ;;  %v6781_v39 = vunpack.i.l.bf16 %v6780_v10 }
 0x7ca   :  { %v5160_v57 = vsel %vm12024_vm10, %v6706_v28, %v6771_v46  ;;  %v5161_v3 = vsel %vm12025_vm5, %v6771_v46, %v6772_v43  ;;  %vm12038_vm10 = vcmask 121856  }
 0x7cb   :  { %v6064_v29 = vpack.c.bf16 %v5160_v57, %v5368_v33  ;;  %v6076_v4 = vpack.c.bf16 %v5161_v3, %v5369_v17  ;;  %v5108_v5 = vsel %vm12026_vm2, %v6756_v41, %v6781_v39  ;;  %v5109_v21 = vsel %vm12027_vm15, %v6781_v39, %v6782_v12  ;;  %vm12039_vm5 = vmmov %vm12038_vm10 }
 0x7cc   :  { %vm12040_vm15 = vnez %v11986_v61 }
 0x7cd   :  { %6065 = vmatpush.bf16.msk.msrb.mxu2 %vm11969_vm13, %v6064_v29  ;;  %6077 = vmatpush.bf16.msk.msrb.mxu3 %vm7248_vm14, %v6076_v4  ;;  %vm12029_vm13 = vmmov %vm12028_vm7 }
 0x7ce   :  { %vm12030_vm14 = vmmov %vm12021_vm3  ;;  %vm12033_vm3 = vnez %v11982_v37 }
 0x7cf   :  { %v6795_v47 = vpop.permute.xlu0 %6794 }
 0x7d0   :  { %v6797_v16 = vunpack.i.h.bf16 %v6795_v47  ;;  %v6796_v32 = vunpack.i.l.bf16 %v6795_v47  ;;  %v6785_v24 = vpop.permute.xlu1 %6784 }
 0x7d1   :  { %v6787_v30 = vunpack.i.h.bf16 %v6785_v24  ;;  %v6786_v36 = vunpack.i.l.bf16 %v6785_v24 }
 0x7d2   :  { %v5264_v1 = vsel %vm12028_vm7, %v5255_v22, %v6796_v32  ;;  %v5265_v7 = vsel %vm12029_vm13, %v6796_v32, %v6797_v16  ;;  %vm12041_vm7 = vnez %v11988_v18 }
 0x7d3   :  { %v6067_v27 = vpack.c.bf16 %v5264_v1, %v5108_v5  ;;  %v6079_v63 = vpack.c.bf16 %v5265_v7, %v5109_v21  ;;  %v5416_v50 = vsel %vm12030_vm14, %v6787_v30, %v6767_v15  ;;  %v5417_v25 = vsel %vm12031_vm11, %v6767_v15, %v6786_v36  ;;  %vm12042_vm14 = vmmov %vm12026_vm2 }
 0x7d4   :  { %v6037_v45 = vpack.c.bf16 %v5416_v50, %v10932_v40  ;;  %v6049_v11 = vpack.c.bf16 %v5417_v25, %v10928_v56  ;;  %v6707_v56 = vunpack.i.h.bf16 %v10977_v53  ;;  %v6810_v40 = vpop.permute.xlu2 %6809  ;;  %vm12043_vm11 = vmmov %vm12029_vm13  ;;  %v5646_v50 = vld [vmem:[%s11108_s10] sm:$0x7] }
 0x7d5   :  { %6068 = vmatpush.bf16.msk.msrb.mxu2 %vm11962_vm9, %v6067_v27  ;;  %6080 = vmatpush.bf16.msk.msrb.mxu3 %vm7199_vm8, %v6079_v63  ;;  %vm12034_vm8 = vcmask 588800   ;;  %v6812_v54 = vunpack.i.h.bf16 %v6810_v40  ;;  %v6811_v53 = vunpack.i.l.bf16 %v6810_v40 }
 0x7d6   :  { %6038 = vmatpush.bf16.msk.msrb.mxu0 %vm12032_vm12, %v6037_v45  ;;  %6050 = vmatpush.bf16.msk.msrb.mxu1 %vm12033_vm3, %v6049_v11  ;;  %vm12035_vm9 = vmmov %vm12034_vm8  ;;  %v5156_v20 = vsel %vm12036_vm1, %v6792_v49, %v6707_v56  ;;  %v5157_v37 = vsel %vm12037_vm6, %v6707_v56, %v6791_v35 }
 0x7d7   :  { %v6800_v48 = vpop.permute.xlu0 %6799  ;;  %v5261_v31 = vsel %vm12029_vm13, %v6811_v53, %v6812_v54  ;;  %vm12044_vm12 = vmmov %vm12034_vm8 }
 0x7d8   :  { %v6802_v22 = vunpack.i.h.bf16 %v6800_v48  ;;  %v6801_v19 = vunpack.i.l.bf16 %v6800_v48  ;;  %v6805_v26 = vpop.permute.xlu1 %6804  ;;  %5878 = vmatmul.msk.bf16.vlgmr.msrb.gmra.mxu2 %vm12034_vm8, %v5548_v0  ;;  %5879 = vmatmul.msk.bf16.vlgmr.msrb.gmra.mxu3 %vm12035_vm9, %v5548_v0  ;;  %vm12045_vm3 = vmmov %vm12034_vm8  ;;  %vm12048_vm8 = vcmask 15360  }
 0x7d9   :  { %v6806_v51 = vunpack.i.l.bf16 %v6805_v26  ;;  %v6807_v2 = vunpack.i.h.bf16 %v6805_v26  ;;  %vm12049_vm9 = vmmov %vm12048_vm8 }
 0x7da   :  { %v5364_v8 = vsel %vm12038_vm10, %v6802_v22, %v6712_v58  ;;  %v5365_v14 = vsel %vm12039_vm5, %v6712_v58, %v6801_v19  ;;  %vm12051_vm6 = vmmov %vm12048_vm8 }
 0x7db   :  { %v6040_v62 = vpack.c.bf16 %v5156_v20, %v5364_v8  ;;  %v6052_v60 = vpack.c.bf16 %v5157_v37, %v5365_v14  ;;  %v5105_v44 = vsel %vm12026_vm2, %v6757_v59, %v6806_v51  ;;  %v5104_v23 = vsel %vm12042_vm14, %v6807_v2, %v6757_v59  ;;  %vm12053_vm5 = vmmov %vm12051_vm6 }
 0x7dc   :  { %v6055_v38 = vpack.c.bf16 %v5261_v31, %v5105_v44  ;;  %vm12054_vm2 = vcmask 1043456  }
 0x7dd   :  { %6041 = vmatpush.bf16.msk.msrb.mxu0 %vm12040_vm15, %v6040_v62  ;;  %6053 = vmatpush.bf16.msk.msrb.mxu1 %vm12041_vm7, %v6052_v60  ;;  %vm12055_vm15 = vmmov %vm12054_vm2 }
 0x7df   :  { %v5247_v42 = vpop.permute.xlu0 %5246 }
 0x7e0   :  { %v5260_v34 = vsel %vm12043_vm11, %v5247_v42, %v6811_v53 }
 0x7e1   :  { %v6043_v13 = vpack.c.bf16 %v5260_v34, %v5104_v23  ;;  %6056 = vmatpush.bf16.msk.msrb.mxu1 %vm11960_vm4, %v6055_v38 }
 0x7e3   :  { %6044 = vmatpush.bf16.msk.msrb.mxu0 %vm7333_vm0, %v6043_v13  ;;  %vm12046_vm0 = vcmask 1041408  }
 0x7e4   :  { %5877 = vmatmul.msk.bf16.vlgmr.msrb.gmra.mxu1 %vm12044_vm12, %v5548_v0  ;;  %vm12047_vm4 = vmmov %vm12046_vm0 }
 0x7e5   :  { %vm12050_vm1 = vmmov %vm12046_vm0 }
 0x7e6   :  { %5876 = vmatmul.msk.bf16.vlgmr.msrb.gmra.mxu0 %vm12045_vm3, %v5548_v0  ;;  %vm12052_vm10 = vmmov %vm12046_vm0  ;;  %v5651_v0 = vpop.permute.xlu2 %5650 }
 0x828   :  { %v5553_v61 = vpop.permute.xlu1 %5552 }
 0x85b   :  { %v5605_v18 = vpop.f32.mrf.mxu2  ;;  %v5618_v28 = vpop.f32.mrf.mxu3 }
 0x85c   :  { %v5606_v6 = vadd.f32 %v5605_v18, %v5553_v61  ;;  %v5619_v43 = vadd.f32 %v5618_v28, %v5553_v61 }
 0x85e   :  { %v5624_v46 = vsub.f32 0.0, %v5606_v6  ;;  %v5625_v10 = vsub.f32 0.0, %v5619_v43 }
 0x860   :  { %v5630_v33 = vmul.f32 1.442695, %v5624_v46  ;;  %v5632_v17 = vmul.f32 1.442695, %v5625_v10 }
 0x861   :  { %v5592_v57 = vpop.f32.mrf.mxu1 }
 0x862   :  { %6864 = vpow2.f32 %v5630_v33  ;;  %v5593_v55 = vadd.f32 %v5592_v57, %v5553_v61 }
 0x863   :  { %6866 = vpow2.f32 %v5632_v17  ;;  %v5579_v3 = vpop.f32.mrf.mxu0  ;;  %v5607_v9 = vpop.f32.mrf.mxu2 }
 0x864   :  { %v5623_v29 = vsub.f32 0.0, %v5593_v55  ;;  %v5580_v4 = vadd.f32 %v5579_v3, %v5553_v61  ;;  %v5620_v52 = vpop.f32.mrf.mxu3 }
 0x866   :  { %v5628_v12 = vmul.f32 1.442695, %v5623_v29  ;;  %v5622_v39 = vsub.f32 0.0, %v5580_v4 }
 0x868   :  { %v6865_v47 = vpop.eup %6864  ;;  %6868 = vpow2.f32 %v5628_v12  ;;  %v5626_v41 = vmul.f32 1.442695, %v5622_v39 }
 0x869   :  { %v6867_v16 = vpop.eup %6866  ;;  %v5636_v32 = vadd.f32 1.0, %v6865_v47  ;;  %v5594_v24 = vpop.f32.mrf.mxu1 }
 0x86a   :  { %v5637_v15 = vadd.f32 1.0, %v6867_v16  ;;  %6870 = vpow2.f32 %v5626_v41 }
 0x86b   :  { %6872 = vrcp.f32 %v5636_v32  ;;  %v5581_v30 = vpop.f32.mrf.mxu0 }
 0x86c   :  { %6874 = vrcp.f32 %v5637_v15 }
 0x86e   :  { %v6869_v36 = vpop.eup %6868 }
 0x86f   :  { %v5635_v5 = vadd.f32 1.0, %v6869_v36 }
 0x870   :  { %v6871_v21 = vpop.eup %6870 }
 0x871   :  { %v6873_v1 = vpop.eup %6872  ;;  %6876 = vrcp.f32 %v5635_v5  ;;  %v5634_v7 = vadd.f32 1.0, %v6871_v21 }
 0x872   :  { %v6875_v27 = vpop.eup %6874  ;;  %v5644_v63 = vmul.f32 %v6873_v1, %v5606_v6 }
 0x873   :  { %v5645_v25 = vmul.f32 %v6875_v27, %v5619_v43  ;;  %6878 = vrcp.f32 %v5634_v7 }
 0x874   :  { %5884 = vmatpush.msk.msra.mxu2 %vm12046_vm0, %v5644_v63 }
 0x875   :  { %5886 = vmatpush.msk.msra.mxu3 %vm12047_vm4, %v5645_v25  ;;  %5885 = vmatmul.msk.f32.vlgmr.msra.gmra.mxu2 %vm12048_vm8, %v5646_v50 }
 0x876   :  { %5887 = vmatmul.msk.f32.vlgmr.msra.gmra.mxu3 %vm12049_vm9, %v5646_v50 }
 0x877   :  { %v6877_v45 = vpop.eup %6876 }
 0x878   :  { %v5643_v11 = vmul.f32 %v6877_v45, %v5593_v55 }
 0x879   :  { %v6879_v49 = vpop.eup %6878 }
 0x87a   :  { %v5642_v35 = vmul.f32 %v6879_v49, %v5580_v4  ;;  %5882 = vmatpush.msk.msra.mxu1 %vm12050_vm1, %v5643_v11 }
 0x87b   :  { %5883 = vmatmul.msk.f32.vlgmr.msra.gmra.mxu1 %vm12051_vm6, %v5646_v50 }
 0x87c   :  { %5880 = vmatpush.msk.msra.mxu0 %vm12052_vm10, %v5642_v35 }
 0x87d   :  { %5881 = vmatmul.msk.f32.vlgmr.msra.gmra.mxu0 %vm12053_vm5, %v5646_v50 }
 0x8f8   :  { %v5705_v56 = vpop.f32.mrf.mxu1  ;;  %v5725_v48 = vpop.f32.mrf.mxu2 }
 0x8f9   :  { %v5706_v40 = vadd.f32 %v5705_v56, %v5651_v0  ;;  %v5745_v58 = vpop.f32.mrf.mxu3  ;;  %v5726_v20 = vadd.f32 %v5725_v48, %v5651_v0 }
 0x8fa   :  { %v5746_v22 = vadd.f32 %v5745_v58, %v5651_v0  ;;  %v5685_v19 = vpop.f32.mrf.mxu0 }
 0x8fb   :  { %v5750_v26 = vrot.slane %v5706_v40, 4  ;;  %v5686_v59 = vadd.f32 %v5685_v19, %v5651_v0 }
 0x8fc   :  { %v5756_v37 = vrot.slane %v5746_v22, 4 }
 0x8fd   :  { %v5751_v51 = vsel %vm12054_vm2, %v5686_v59, %v5750_v26 }
 0x8fe   :  { %v5757_v54 = vsel %vm12055_vm15, %v5726_v20, %v5756_v37  ;;  %5753 = vst [vmem:[%s11110_s12] sm:$0x77] %v5751_v51 }
 0x8ff   :  { %5888 = vst [vmem:[%s11110_s12 + $0x8] sm:$0x77] %v5757_v54 }
 0x900   :  { %5765 = vsyncpa [#allocation5], 1 }
 0x901   :  { %5766 = vsyncpa [#allocation6], 1 }

</bundles_post_ra>
